<compile_context>
chip_gen: v7x
topology: tpu7x:2x2x1
jax: 0.10.0
libtpu: 0.0.40
codegen_flags: <defaults>
</compile_context>

<pallas_src>
import functools

import jax
import jax.numpy as jnp
from jax.experimental import pallas as pl
from jax.experimental.pallas import tpu as pltpu


def _softplus(x):
    # Numerically-stable softplus using only exp/log/max (EUP/VPU friendly).
    return jnp.maximum(x, 0.0) + jnp.log(1.0 + jnp.exp(-jnp.abs(x)))


def _temporal_attention_kernel(x_ref, ste_ref, wqkv_x_ref, wqkv_s_ref, bqkv_ref,
                               wo_ref, bo_ref, out_ref, *, n_heads, use_mask):
    _, tile_n, L, Dh = x_ref.shape
    d_head = Dh // n_heads

    x = x_ref[0]                                   # (tile_n, L, Dh)  activation dtype
    ste = ste_ref[0]                               # (tile_n, L, Dp)

    rows = tile_n * L
    x2 = x.reshape(rows, Dh)
    s2 = ste.reshape(rows, ste_ref.shape[3])

    # Fused Q|K|V projection; BN already folded into the weights. concat(x, ste)
    # along features is expressed as two matmuls summed (identical math).
    qkv = jnp.dot(x2, wqkv_x_ref[...], preferred_element_type=jnp.float32)
    qkv = qkv + jnp.dot(s2, wqkv_s_ref[...], preferred_element_type=jnp.float32)
    qkv = _softplus(qkv + bqkv_ref[...])           # (rows, 3*Dh) f32

    q = qkv[:, 0 * Dh:1 * Dh].reshape(tile_n, L, Dh)
    k = qkv[:, 1 * Dh:2 * Dh].reshape(tile_n, L, Dh)
    v = qkv[:, 2 * Dh:3 * Dh].reshape(tile_n, L, Dh)
    q = q * (1.0 / (d_head ** 0.5))                # fold 1/sqrt(d_head) into Q once

    if use_mask:
        row_id = jax.lax.broadcasted_iota(jnp.int32, (L, L), 0)   # query index
        col_id = jax.lax.broadcasted_iota(jnp.int32, (L, L), 1)   # key index
        causal = col_id <= row_id
    neg = jnp.float32(-2.0 ** 15 + 1.0)            # matches torch: -2**15 + 1

    head_outs = []
    for h in range(n_heads):                       # static unroll, heads are small
        sl = slice(h * d_head, (h + 1) * d_head)
        qh, kh, vh = q[:, :, sl], k[:, :, sl], v[:, :, sl]        # (tile_n, L, d_head)
        scores = jnp.einsum('nld,nmd->nlm', qh, kh,
                            preferred_element_type=jnp.float32)   # (tile_n, L, L)
        if use_mask:
            scores = jnp.where(causal, scores, neg)
        m = jnp.max(scores, axis=-1, keepdims=True)
        e = jnp.exp(scores - m)
        p = e / jnp.sum(e, axis=-1, keepdims=True)
        head_outs.append(jnp.einsum('nlm,nmd->nld', p, vh,
                                    preferred_element_type=jnp.float32))
    att = jnp.concatenate(head_outs, axis=-1)      # (tile_n, L, Dh) f32

    # Output projection (+ folded BN) + softplus.
    o = jnp.dot(att.reshape(rows, Dh).astype(wo_ref.dtype), wo_ref[...],
                preferred_element_type=jnp.float32)
    o = _softplus(o + bo_ref[...])
    out_ref[0] = o.reshape(tile_n, L, Dh).astype(out_ref.dtype)


def _fold_bn(w, b, bn, eps):
    """Fold an eval-mode BatchNorm (gamma, beta, mean, var) into (w, b)."""
    gamma, beta, mean, var = bn
    s = gamma / jnp.sqrt(var + eps)
    return w * s[None, :], (b - mean) * s + beta


def temporal_attention(x, ste, params, *, n_heads, use_mask=True, tile_n=None,
                       bn_eps=1e-5, vmem_limit_bytes=48 * 1024 * 1024):
    """x: (B, L, N, d_hidden); ste: (B, L, N, d_hidden_pos). Returns (B, L, N, d_hidden)."""
    B, L, N, Dh = x.shape
    Dp = ste.shape[-1]
    assert Dh % n_heads == 0, "hidden size not divisible by number of heads"

    # ---- parameter prep (O(D^2), runs once in XLA): fold BN, fuse Q/K/V --------
    wq, bq = _fold_bn(*params['q'], eps=bn_eps)
    wk, bk = _fold_bn(*params['k'], eps=bn_eps)
    wv, bv = _fold_bn(*params['v'], eps=bn_eps)
    wo, bo = _fold_bn(*params['out'], eps=bn_eps)

    w_qkv = jnp.concatenate([wq, wk, wv], axis=1)        # (Dh + Dp, 3*Dh)
    w_qkv_x = w_qkv[:Dh].astype(x.dtype)                 # x-part of concat(x, ste)
    w_qkv_s = w_qkv[Dh:].astype(x.dtype)                 # ste-part
    b_qkv = jnp.concatenate([bq, bk, bv]).reshape(1, 3 * Dh).astype(jnp.float32)
    wo = wo.astype(x.dtype)
    bo = bo.reshape(1, Dh).astype(jnp.float32)

    # ---- node-major layout: each grid step owns (tile_n nodes, full L, full D) --
    xp = jnp.transpose(x, (0, 2, 1, 3))                  # (B, N, L, Dh)
    sp = jnp.transpose(ste, (0, 2, 1, 3))                # (B, N, L, Dp)

    # ---- tile_n: as large as the VMEM budget allows ----------------------------
    if tile_n is None:
        itemsize = jnp.dtype(x.dtype).itemsize
        bytes_per_node = ((2 * L * (Dh + Dp) + 2 * L * Dh) * itemsize   # dbl-buffered I/O
                          + L * (10 * Dh + 4 * L) * 4)                  # f32 intermediates
        budget = 8 * 1024 * 1024                         # activation slabs; v7x-safe
        cap = max(8, (budget // max(bytes_per_node, 1)) // 8 * 8)
        tile_n = N if N <= cap else cap                  # multiple of 8, or the full N

    grid = (B, pl.cdiv(N, tile_n))                       # masked node tail, no assert

    kernel = functools.partial(_temporal_attention_kernel,
                               n_heads=n_heads, use_mask=use_mask)

    out = pl.pallas_call(
        kernel,
        out_shape=jax.ShapeDtypeStruct((B, N, L, Dh), x.dtype),
        grid_spec=pltpu.PrefetchScalarGridSpec(
            num_scalar_prefetch=0,
            grid=grid,
            in_specs=[
                pl.BlockSpec((1, tile_n, L, Dh), lambda b, n: (b, n, 0, 0)),
                pl.BlockSpec((1, tile_n, L, Dp), lambda b, n: (b, n, 0, 0)),
                # constant-index weight/bias operands (DMA'd once across the grid)
                pl.BlockSpec((Dh, 3 * Dh), lambda b, n: (0, 0)),
                pl.BlockSpec((Dp, 3 * Dh), lambda b, n: (0, 0)),
                pl.BlockSpec((1, 3 * Dh), lambda b, n: (0, 0)),
                pl.BlockSpec((Dh, Dh), lambda b, n: (0, 0)),
                pl.BlockSpec((1, Dh), lambda b, n: (0, 0)),
            ],
            out_specs=pl.BlockSpec((1, tile_n, L, Dh), lambda b, n: (b, n, 0, 0)),
        ),
        compiler_params=pltpu.CompilerParams(
            dimension_semantics=("parallel", "parallel"),  # v7x: 2 TCs split the grid
            vmem_limit_bytes=vmem_limit_bytes,
        ),
    )(xp, sp, w_qkv_x, w_qkv_s, b_qkv, wo, bo)

    return jnp.transpose(out, (0, 2, 1, 3))              # back to (B, L, N, Dh)


def temporal_attention_reference(x, ste, params, *, n_heads, use_mask=True, bn_eps=1e-5):
    """Pure-JAX mirror of the PyTorch module (eval-mode BN), for validation."""
    B, L, N, Dh = x.shape
    d_head = Dh // n_heads
    xc = jnp.concatenate([x, ste], axis=-1)

    def fc(inp, layer):
        w, b, (gamma, beta, mean, var) = layer
        y = jnp.einsum('blnf,fo->blno', inp, w) + b
        y = (y - mean) / jnp.sqrt(var + bn_eps) * gamma + beta
        return _softplus(y)

    q, k, v = fc(xc, params['q']), fc(xc, params['k']), fc(xc, params['v'])

    def split_heads(t):                                   # (B,L,N,Dh) -> (H,B,N,L,dh)
        t = t.reshape(B, L, N, n_heads, d_head)
        return jnp.transpose(t, (3, 0, 2, 1, 4))

    qh, kh, vh = split_heads(q), split_heads(k), split_heads(v)
    scores = jnp.einsum('hbnld,hbnmd->hbnlm', qh, kh) / (d_head ** 0.5)
    if use_mask:
        mask = jnp.tril(jnp.ones((L, L), dtype=bool))
        scores = jnp.where(mask, scores, jnp.float32(-2.0 ** 15 + 1.0))
    p = jax.nn.softmax(scores, axis=-1)
    att = jnp.einsum('hbnlm,hbnmd->hbnld', p, vh)         # (H,B,N,L,dh)
    att = jnp.transpose(att, (1, 3, 2, 0, 4)).reshape(B, L, N, Dh)
    return fc(att, params['out'])


def make_params(key, d_in, d_hidden, dtype=jnp.float32):
    """Mirror the PyTorch init: xavier_uniform conv weights, zero bias, fresh BN."""
    def layer(k, fan_in, fan_out):
        bound = (6.0 / (fan_in + fan_out)) ** 0.5
        w = jax.random.uniform(k, (fan_in, fan_out), dtype, -bound, bound)  # (in, out)
        b = jnp.zeros((fan_out,), dtype)
        bn = (jnp.ones((fan_out,), dtype),    # gamma
              jnp.zeros((fan_out,), dtype),   # beta
              jnp.zeros((fan_out,), dtype),   # running_mean
              jnp.ones((fan_out,), dtype))    # running_var
        return (w, b, bn)

    kq, kk, kv, ko = jax.random.split(key, 4)
    return {'q': layer(kq, d_in, d_hidden),
            'k': layer(kk, d_in, d_hidden),
            'v': layer(kv, d_in, d_hidden),
            'out': layer(ko, d_hidden, d_hidden)}


if __name__ == "__main__":
    B, L, N = 2, 8, 16                      # batch, seq_len, n_nodes
    d_hidden, n_heads, d_hidden_pos = 64, 8, 64
    key = jax.random.PRNGKey(0)
    kx, ks, kp = jax.random.split(key, 3)

    x = jax.random.normal(kx, (B, L, N, d_hidden), dtype=jnp.float32)
    ste = jax.random.normal(ks, (B, L, N, d_hidden_pos), dtype=jnp.float32)
    params = make_params(kp, d_hidden + d_hidden_pos, d_hidden)

    fn = jax.jit(functools.partial(temporal_attention, n_heads=n_heads))
    out = jax.block_until_ready(fn(x, ste, params))
    assert out.shape == (B, L, N, d_hidden)

    # Loose sanity check vs a pure-JAX reference (loose tolerance because the
    # default XLA matmul precision on TPU differs from the in-kernel MXU path).
    ref = jax.block_until_ready(
        temporal_attention_reference(x, ste, params, n_heads=n_heads))
    max_err = float(jnp.max(jnp.abs(out - ref)))
    assert jnp.allclose(out, ref, atol=5e-2, rtol=5e-2), f"max |diff| = {max_err}"

    print("KERNEL_OK")
</pallas_src>

<mosaic_0001>
module attributes {stable_mosaic.version = 11 : i64} {
  func.func @_temporal_attention_kernel(%arg0: i32, %arg1: i32, %arg2: memref<1x16x8x64xf32, #tpu.memory_space<vmem>>, %arg3: memref<1x16x8x64xf32, #tpu.memory_space<vmem>>, %arg4: memref<64x192xf32, #tpu.memory_space<vmem>>, %arg5: memref<64x192xf32, #tpu.memory_space<vmem>>, %arg6: memref<1x192xf32, #tpu.memory_space<vmem>>, %arg7: memref<64x64xf32, #tpu.memory_space<vmem>>, %arg8: memref<1x64xf32, #tpu.memory_space<vmem>>, %arg9: memref<1x16x8x64xf32, #tpu.memory_space<vmem>>) attributes {dimension_semantics = [#tpu.dimension_semantics<parallel>, #tpu.dimension_semantics<parallel>], iteration_bounds = array<i64: 2, 1>, scalar_prefetch = 0 : i64, scratch_operands = 0 : i64, tpu.core_type = #tpu.core_type<tc>, window_params = [{transform_indices = @transform_0, window_bounds = array<i64: 1, 16, 8, 64>}, {transform_indices = @transform_1, window_bounds = array<i64: 1, 16, 8, 64>}, {pipeline_mode = #tpu.pipeline_mode<synchronous>, transform_indices = @transform_2, window_bounds = array<i64: 64, 192>}, {pipeline_mode = #tpu.pipeline_mode<synchronous>, transform_indices = @transform_3, window_bounds = array<i64: 64, 192>}, {pipeline_mode = #tpu.pipeline_mode<synchronous>, transform_indices = @transform_4, window_bounds = array<i64: 1, 192>}, {pipeline_mode = #tpu.pipeline_mode<synchronous>, transform_indices = @transform_5, window_bounds = array<i64: 64, 64>}, {pipeline_mode = #tpu.pipeline_mode<synchronous>, transform_indices = @transform_6, window_bounds = array<i64: 1, 64>}, {transform_indices = @transform_7, window_bounds = array<i64: 1, 16, 8, 64>}]} {
    %c0 = arith.constant 0 : index
    %c0_0 = arith.constant 0 : index
    %c0_1 = arith.constant 0 : index
    %c0_2 = arith.constant 0 : index
    %0 = vector.load %arg2[%c0, %c0_0, %c0_1, %c0_2] : memref<1x16x8x64xf32, #tpu.memory_space<vmem>>, vector<1x16x8x64xf32>
    %1 = vector.shape_cast %0 : vector<1x16x8x64xf32> to vector<16x8x64xf32>
    %c0_3 = arith.constant 0 : index
    %c0_4 = arith.constant 0 : index
    %c0_5 = arith.constant 0 : index
    %c0_6 = arith.constant 0 : index
    %2 = vector.load %arg3[%c0_3, %c0_4, %c0_5, %c0_6] : memref<1x16x8x64xf32, #tpu.memory_space<vmem>>, vector<1x16x8x64xf32>
    %3 = vector.shape_cast %2 : vector<1x16x8x64xf32> to vector<16x8x64xf32>
    %4 = vector.shape_cast %1 : vector<16x8x64xf32> to vector<128x64xf32>
    %5 = vector.shape_cast %3 : vector<16x8x64xf32> to vector<128x64xf32>
    %c0_7 = arith.constant 0 : index
    %c0_8 = arith.constant 0 : index
    %6 = vector.load %arg4[%c0_7, %c0_8] : memref<64x192xf32, #tpu.memory_space<vmem>>, vector<64x192xf32>
    %cst = arith.constant dense<0.000000e+00> : vector<128x192xf32>
    %7 = tpu.matmul %4, %6, %cst {dimension_numbers = #tpu.dot_dimension_numbers<[1], [0], [0], [1], [0, 0, 1, 1], [], []>} : vector<128x64xf32>, vector<64x192xf32>, vector<128x192xf32> -> vector<128x192xf32>
    %c0_9 = arith.constant 0 : index
    %c0_10 = arith.constant 0 : index
    %8 = vector.load %arg5[%c0_9, %c0_10] : memref<64x192xf32, #tpu.memory_space<vmem>>, vector<64x192xf32>
    %cst_11 = arith.constant dense<0.000000e+00> : vector<128x192xf32>
    %9 = tpu.matmul %5, %8, %cst_11 {dimension_numbers = #tpu.dot_dimension_numbers<[1], [0], [0], [1], [0, 0, 1, 1], [], []>} : vector<128x64xf32>, vector<64x192xf32>, vector<128x192xf32> -> vector<128x192xf32>
    %10 = arith.addf %7, %9 : vector<128x192xf32>
    %c0_12 = arith.constant 0 : index
    %c0_13 = arith.constant 0 : index
    %11 = vector.load %arg6[%c0_12, %c0_13] : memref<1x192xf32, #tpu.memory_space<vmem>>, vector<1x192xf32>
    %12 = vector.broadcast %11 : vector<1x192xf32> to vector<128x192xf32>
    %13 = arith.addf %10, %12 : vector<128x192xf32>
    %cst_14 = arith.constant 0.000000e+00 : f32
    %14 = vector.broadcast %cst_14 : f32 to vector<128x192xf32>
    %15 = arith.maximumf %13, %14 : vector<128x192xf32>
    %16 = math.absf %13 : vector<128x192xf32>
    %cst_15 = arith.constant 0.000000e+00 : f32
    %17 = vector.broadcast %cst_15 : f32 to vector<128x192xf32>
    %18 = arith.subf %17, %16 : vector<128x192xf32>
    %19 = math.exp %18 : vector<128x192xf32>
    %cst_16 = arith.constant 1.000000e+00 : f32
    %20 = vector.broadcast %cst_16 : f32 to vector<128x192xf32>
    %21 = arith.addf %20, %19 : vector<128x192xf32>
    %22 = math.log %21 : vector<128x192xf32>
    %23 = arith.addf %15, %22 : vector<128x192xf32>
    %24 = vector.extract_strided_slice %23 {offsets = [0, 0], sizes = [128, 64], strides = [1, 1]} : vector<128x192xf32> to vector<128x64xf32>
    %25 = vector.shape_cast %24 : vector<128x64xf32> to vector<16x8x64xf32>
    %26 = vector.extract_strided_slice %23 {offsets = [0, 64], sizes = [128, 64], strides = [1, 1]} : vector<128x192xf32> to vector<128x64xf32>
    %27 = vector.shape_cast %26 : vector<128x64xf32> to vector<16x8x64xf32>
    %28 = vector.extract_strided_slice %23 {offsets = [0, 128], sizes = [128, 64], strides = [1, 1]} : vector<128x192xf32> to vector<128x64xf32>
    %29 = vector.shape_cast %28 : vector<128x64xf32> to vector<16x8x64xf32>
    %cst_17 = arith.constant 0.353553385 : f32
    %30 = vector.broadcast %cst_17 : f32 to vector<16x8x64xf32>
    %31 = arith.mulf %25, %30 : vector<16x8x64xf32>
    %32 = tpu.iota {dimensions = array<i32: 0>} : vector<8x8xi32>
    %33 = tpu.iota {dimensions = array<i32: 1>} : vector<8x8xi32>
    %34 = arith.cmpi sle, %33, %32 : vector<8x8xi32>
    %35 = vector.extract_strided_slice %31 {offsets = [0, 0, 0], sizes = [16, 8, 8], strides = [1, 1, 1]} : vector<16x8x64xf32> to vector<16x8x8xf32>
    %36 = vector.extract_strided_slice %27 {offsets = [0, 0, 0], sizes = [16, 8, 8], strides = [1, 1, 1]} : vector<16x8x64xf32> to vector<16x8x8xf32>
    %37 = vector.extract_strided_slice %29 {offsets = [0, 0, 0], sizes = [16, 8, 8], strides = [1, 1, 1]} : vector<16x8x64xf32> to vector<16x8x8xf32>
    "tpu.trace_start"() <{level = 10 : i32, message = "nld,nmd->nlm"}> : () -> ()
    %cst_18 = arith.constant dense<0.000000e+00> : vector<16x8x8xf32>
    %38 = tpu.matmul %35, %36, %cst_18 {dimension_numbers = #tpu.dot_dimension_numbers<[2], [2], [1], [1], [0, 0, 0, 1, 1, 1], [0], [0]>} : vector<16x8x8xf32>, vector<16x8x8xf32>, vector<16x8x8xf32> -> vector<16x8x8xf32>
    %cst_19 = arith.constant -3.276700e+04 : f32
    "tpu.trace_stop"() : () -> ()
    %39 = vector.shape_cast %34 : vector<8x8xi1> to vector<1x8x8xi1>
    %40 = vector.broadcast %39 : vector<1x8x8xi1> to vector<16x8x8xi1>
    %41 = vector.broadcast %cst_19 : f32 to vector<16x8x8xf32>
    %42 = arith.select %40, %38, %41 : vector<16x8x8xi1>, vector<16x8x8xf32>
    %cst_20 = arith.constant dense<0xFF800000> : vector<16x8xf32>
    %43 = vector.multi_reduction <maximumf>, %42, %cst_20 [2] : vector<16x8x8xf32> to vector<16x8xf32>
    %44 = vector.shape_cast %43 : vector<16x8xf32> to vector<16x8x1xf32>
    %45 = vector.broadcast %44 : vector<16x8x1xf32> to vector<16x8x8xf32>
    %46 = arith.subf %42, %45 : vector<16x8x8xf32>
    %47 = math.exp %46 : vector<16x8x8xf32>
    %cst_21 = arith.constant dense<0.000000e+00> : vector<16x8xf32>
    %48 = vector.multi_reduction <add>, %47, %cst_21 [2] : vector<16x8x8xf32> to vector<16x8xf32>
    %49 = vector.shape_cast %48 : vector<16x8xf32> to vector<16x8x1xf32>
    %50 = vector.broadcast %49 : vector<16x8x1xf32> to vector<16x8x8xf32>
    %51 = arith.divf %47, %50 : vector<16x8x8xf32>
    "tpu.trace_start"() <{level = 10 : i32, message = "nlm,nmd->nld"}> : () -> ()
    %cst_22 = arith.constant dense<0.000000e+00> : vector<16x8x8xf32>
    %52 = tpu.matmul %51, %37, %cst_22 {dimension_numbers = #tpu.dot_dimension_numbers<[2], [1], [1], [2], [0, 0, 0, 1, 1, 2], [0], [0]>} : vector<16x8x8xf32>, vector<16x8x8xf32>, vector<16x8x8xf32> -> vector<16x8x8xf32>
    "tpu.trace_stop"() : () -> ()
    %53 = vector.extract_strided_slice %31 {offsets = [0, 0, 8], sizes = [16, 8, 8], strides = [1, 1, 1]} : vector<16x8x64xf32> to vector<16x8x8xf32>
    %54 = vector.extract_strided_slice %27 {offsets = [0, 0, 8], sizes = [16, 8, 8], strides = [1, 1, 1]} : vector<16x8x64xf32> to vector<16x8x8xf32>
    %55 = vector.extract_strided_slice %29 {offsets = [0, 0, 8], sizes = [16, 8, 8], strides = [1, 1, 1]} : vector<16x8x64xf32> to vector<16x8x8xf32>
    "tpu.trace_start"() <{level = 10 : i32, message = "nld,nmd->nlm"}> : () -> ()
    %cst_23 = arith.constant dense<0.000000e+00> : vector<16x8x8xf32>
    %56 = tpu.matmul %53, %54, %cst_23 {dimension_numbers = #tpu.dot_dimension_numbers<[2], [2], [1], [1], [0, 0, 0, 1, 1, 1], [0], [0]>} : vector<16x8x8xf32>, vector<16x8x8xf32>, vector<16x8x8xf32> -> vector<16x8x8xf32>
    %cst_24 = arith.constant -3.276700e+04 : f32
    "tpu.trace_stop"() : () -> ()
    %57 = vector.shape_cast %34 : vector<8x8xi1> to vector<1x8x8xi1>
    %58 = vector.broadcast %57 : vector<1x8x8xi1> to vector<16x8x8xi1>
    %59 = vector.broadcast %cst_24 : f32 to vector<16x8x8xf32>
    %60 = arith.select %58, %56, %59 : vector<16x8x8xi1>, vector<16x8x8xf32>
    %cst_25 = arith.constant dense<0xFF800000> : vector<16x8xf32>
    %61 = vector.multi_reduction <maximumf>, %60, %cst_25 [2] : vector<16x8x8xf32> to vector<16x8xf32>
    %62 = vector.shape_cast %61 : vector<16x8xf32> to vector<16x8x1xf32>
    %63 = vector.broadcast %62 : vector<16x8x1xf32> to vector<16x8x8xf32>
    %64 = arith.subf %60, %63 : vector<16x8x8xf32>
    %65 = math.exp %64 : vector<16x8x8xf32>
    %cst_26 = arith.constant dense<0.000000e+00> : vector<16x8xf32>
    %66 = vector.multi_reduction <add>, %65, %cst_26 [2] : vector<16x8x8xf32> to vector<16x8xf32>
    %67 = vector.shape_cast %66 : vector<16x8xf32> to vector<16x8x1xf32>
    %68 = vector.broadcast %67 : vector<16x8x1xf32> to vector<16x8x8xf32>
    %69 = arith.divf %65, %68 : vector<16x8x8xf32>
    "tpu.trace_start"() <{level = 10 : i32, message = "nlm,nmd->nld"}> : () -> ()
    %cst_27 = arith.constant dense<0.000000e+00> : vector<16x8x8xf32>
    %70 = tpu.matmul %69, %55, %cst_27 {dimension_numbers = #tpu.dot_dimension_numbers<[2], [1], [1], [2], [0, 0, 0, 1, 1, 2], [0], [0]>} : vector<16x8x8xf32>, vector<16x8x8xf32>, vector<16x8x8xf32> -> vector<16x8x8xf32>
    "tpu.trace_stop"() : () -> ()
    %71 = vector.extract_strided_slice %31 {offsets = [0, 0, 16], sizes = [16, 8, 8], strides = [1, 1, 1]} : vector<16x8x64xf32> to vector<16x8x8xf32>
    %72 = vector.extract_strided_slice %27 {offsets = [0, 0, 16], sizes = [16, 8, 8], strides = [1, 1, 1]} : vector<16x8x64xf32> to vector<16x8x8xf32>
    %73 = vector.extract_strided_slice %29 {offsets = [0, 0, 16], sizes = [16, 8, 8], strides = [1, 1, 1]} : vector<16x8x64xf32> to vector<16x8x8xf32>
    "tpu.trace_start"() <{level = 10 : i32, message = "nld,nmd->nlm"}> : () -> ()
    %cst_28 = arith.constant dense<0.000000e+00> : vector<16x8x8xf32>
    %74 = tpu.matmul %71, %72, %cst_28 {dimension_numbers = #tpu.dot_dimension_numbers<[2], [2], [1], [1], [0, 0, 0, 1, 1, 1], [0], [0]>} : vector<16x8x8xf32>, vector<16x8x8xf32>, vector<16x8x8xf32> -> vector<16x8x8xf32>
    %cst_29 = arith.constant -3.276700e+04 : f32
    "tpu.trace_stop"() : () -> ()
    %75 = vector.shape_cast %34 : vector<8x8xi1> to vector<1x8x8xi1>
    %76 = vector.broadcast %75 : vector<1x8x8xi1> to vector<16x8x8xi1>
    %77 = vector.broadcast %cst_29 : f32 to vector<16x8x8xf32>
    %78 = arith.select %76, %74, %77 : vector<16x8x8xi1>, vector<16x8x8xf32>
    %cst_30 = arith.constant dense<0xFF800000> : vector<16x8xf32>
    %79 = vector.multi_reduction <maximumf>, %78, %cst_30 [2] : vector<16x8x8xf32> to vector<16x8xf32>
    %80 = vector.shape_cast %79 : vector<16x8xf32> to vector<16x8x1xf32>
    %81 = vector.broadcast %80 : vector<16x8x1xf32> to vector<16x8x8xf32>
    %82 = arith.subf %78, %81 : vector<16x8x8xf32>
    %83 = math.exp %82 : vector<16x8x8xf32>
    %cst_31 = arith.constant dense<0.000000e+00> : vector<16x8xf32>
    %84 = vector.multi_reduction <add>, %83, %cst_31 [2] : vector<16x8x8xf32> to vector<16x8xf32>
    %85 = vector.shape_cast %84 : vector<16x8xf32> to vector<16x8x1xf32>
    %86 = vector.broadcast %85 : vector<16x8x1xf32> to vector<16x8x8xf32>
    %87 = arith.divf %83, %86 : vector<16x8x8xf32>
    "tpu.trace_start"() <{level = 10 : i32, message = "nlm,nmd->nld"}> : () -> ()
    %cst_32 = arith.constant dense<0.000000e+00> : vector<16x8x8xf32>
    %88 = tpu.matmul %87, %73, %cst_32 {dimension_numbers = #tpu.dot_dimension_numbers<[2], [1], [1], [2], [0, 0, 0, 1, 1, 2], [0], [0]>} : vector<16x8x8xf32>, vector<16x8x8xf32>, vector<16x8x8xf32> -> vector<16x8x8xf32>
    "tpu.trace_stop"() : () -> ()
    %89 = vector.extract_strided_slice %31 {offsets = [0, 0, 24], sizes = [16, 8, 8], strides = [1, 1, 1]} : vector<16x8x64xf32> to vector<16x8x8xf32>
    %90 = vector.extract_strided_slice %27 {offsets = [0, 0, 24], sizes = [16, 8, 8], strides = [1, 1, 1]} : vector<16x8x64xf32> to vector<16x8x8xf32>
    %91 = vector.extract_strided_slice %29 {offsets = [0, 0, 24], sizes = [16, 8, 8], strides = [1, 1, 1]} : vector<16x8x64xf32> to vector<16x8x8xf32>
    "tpu.trace_start"() <{level = 10 : i32, message = "nld,nmd->nlm"}> : () -> ()
    %cst_33 = arith.constant dense<0.000000e+00> : vector<16x8x8xf32>
    %92 = tpu.matmul %89, %90, %cst_33 {dimension_numbers = #tpu.dot_dimension_numbers<[2], [2], [1], [1], [0, 0, 0, 1, 1, 1], [0], [0]>} : vector<16x8x8xf32>, vector<16x8x8xf32>, vector<16x8x8xf32> -> vector<16x8x8xf32>
    %cst_34 = arith.constant -3.276700e+04 : f32
    "tpu.trace_stop"() : () -> ()
    %93 = vector.shape_cast %34 : vector<8x8xi1> to vector<1x8x8xi1>
    %94 = vector.broadcast %93 : vector<1x8x8xi1> to vector<16x8x8xi1>
    %95 = vector.broadcast %cst_34 : f32 to vector<16x8x8xf32>
    %96 = arith.select %94, %92, %95 : vector<16x8x8xi1>, vector<16x8x8xf32>
    %cst_35 = arith.constant dense<0xFF800000> : vector<16x8xf32>
    %97 = vector.multi_reduction <maximumf>, %96, %cst_35 [2] : vector<16x8x8xf32> to vector<16x8xf32>
    %98 = vector.shape_cast %97 : vector<16x8xf32> to vector<16x8x1xf32>
    %99 = vector.broadcast %98 : vector<16x8x1xf32> to vector<16x8x8xf32>
    %100 = arith.subf %96, %99 : vector<16x8x8xf32>
    %101 = math.exp %100 : vector<16x8x8xf32>
    %cst_36 = arith.constant dense<0.000000e+00> : vector<16x8xf32>
    %102 = vector.multi_reduction <add>, %101, %cst_36 [2] : vector<16x8x8xf32> to vector<16x8xf32>
    %103 = vector.shape_cast %102 : vector<16x8xf32> to vector<16x8x1xf32>
    %104 = vector.broadcast %103 : vector<16x8x1xf32> to vector<16x8x8xf32>
    %105 = arith.divf %101, %104 : vector<16x8x8xf32>
    "tpu.trace_start"() <{level = 10 : i32, message = "nlm,nmd->nld"}> : () -> ()
    %cst_37 = arith.constant dense<0.000000e+00> : vector<16x8x8xf32>
    %106 = tpu.matmul %105, %91, %cst_37 {dimension_numbers = #tpu.dot_dimension_numbers<[2], [1], [1], [2], [0, 0, 0, 1, 1, 2], [0], [0]>} : vector<16x8x8xf32>, vector<16x8x8xf32>, vector<16x8x8xf32> -> vector<16x8x8xf32>
    "tpu.trace_stop"() : () -> ()
    %107 = vector.extract_strided_slice %31 {offsets = [0, 0, 32], sizes = [16, 8, 8], strides = [1, 1, 1]} : vector<16x8x64xf32> to vector<16x8x8xf32>
    %108 = vector.extract_strided_slice %27 {offsets = [0, 0, 32], sizes = [16, 8, 8], strides = [1, 1, 1]} : vector<16x8x64xf32> to vector<16x8x8xf32>
    %109 = vector.extract_strided_slice %29 {offsets = [0, 0, 32], sizes = [16, 8, 8], strides = [1, 1, 1]} : vector<16x8x64xf32> to vector<16x8x8xf32>
    "tpu.trace_start"() <{level = 10 : i32, message = "nld,nmd->nlm"}> : () -> ()
    %cst_38 = arith.constant dense<0.000000e+00> : vector<16x8x8xf32>
    %110 = tpu.matmul %107, %108, %cst_38 {dimension_numbers = #tpu.dot_dimension_numbers<[2], [2], [1], [1], [0, 0, 0, 1, 1, 1], [0], [0]>} : vector<16x8x8xf32>, vector<16x8x8xf32>, vector<16x8x8xf32> -> vector<16x8x8xf32>
    %cst_39 = arith.constant -3.276700e+04 : f32
    "tpu.trace_stop"() : () -> ()
    %111 = vector.shape_cast %34 : vector<8x8xi1> to vector<1x8x8xi1>
    %112 = vector.broadcast %111 : vector<1x8x8xi1> to vector<16x8x8xi1>
    %113 = vector.broadcast %cst_39 : f32 to vector<16x8x8xf32>
    %114 = arith.select %112, %110, %113 : vector<16x8x8xi1>, vector<16x8x8xf32>
    %cst_40 = arith.constant dense<0xFF800000> : vector<16x8xf32>
    %115 = vector.multi_reduction <maximumf>, %114, %cst_40 [2] : vector<16x8x8xf32> to vector<16x8xf32>
    %116 = vector.shape_cast %115 : vector<16x8xf32> to vector<16x8x1xf32>
    %117 = vector.broadcast %116 : vector<16x8x1xf32> to vector<16x8x8xf32>
    %118 = arith.subf %114, %117 : vector<16x8x8xf32>
    %119 = math.exp %118 : vector<16x8x8xf32>
    %cst_41 = arith.constant dense<0.000000e+00> : vector<16x8xf32>
    %120 = vector.multi_reduction <add>, %119, %cst_41 [2] : vector<16x8x8xf32> to vector<16x8xf32>
    %121 = vector.shape_cast %120 : vector<16x8xf32> to vector<16x8x1xf32>
    %122 = vector.broadcast %121 : vector<16x8x1xf32> to vector<16x8x8xf32>
    %123 = arith.divf %119, %122 : vector<16x8x8xf32>
    "tpu.trace_start"() <{level = 10 : i32, message = "nlm,nmd->nld"}> : () -> ()
    %cst_42 = arith.constant dense<0.000000e+00> : vector<16x8x8xf32>
    %124 = tpu.matmul %123, %109, %cst_42 {dimension_numbers = #tpu.dot_dimension_numbers<[2], [1], [1], [2], [0, 0, 0, 1, 1, 2], [0], [0]>} : vector<16x8x8xf32>, vector<16x8x8xf32>, vector<16x8x8xf32> -> vector<16x8x8xf32>
    "tpu.trace_stop"() : () -> ()
    %125 = vector.extract_strided_slice %31 {offsets = [0, 0, 40], sizes = [16, 8, 8], strides = [1, 1, 1]} : vector<16x8x64xf32> to vector<16x8x8xf32>
    %126 = vector.extract_strided_slice %27 {offsets = [0, 0, 40], sizes = [16, 8, 8], strides = [1, 1, 1]} : vector<16x8x64xf32> to vector<16x8x8xf32>
    %127 = vector.extract_strided_slice %29 {offsets = [0, 0, 40], sizes = [16, 8, 8], strides = [1, 1, 1]} : vector<16x8x64xf32> to vector<16x8x8xf32>
    "tpu.trace_start"() <{level = 10 : i32, message = "nld,nmd->nlm"}> : () -> ()
    %cst_43 = arith.constant dense<0.000000e+00> : vector<16x8x8xf32>
    %128 = tpu.matmul %125, %126, %cst_43 {dimension_numbers = #tpu.dot_dimension_numbers<[2], [2], [1], [1], [0, 0, 0, 1, 1, 1], [0], [0]>} : vector<16x8x8xf32>, vector<16x8x8xf32>, vector<16x8x8xf32> -> vector<16x8x8xf32>
    %cst_44 = arith.constant -3.276700e+04 : f32
    "tpu.trace_stop"() : () -> ()
    %129 = vector.shape_cast %34 : vector<8x8xi1> to vector<1x8x8xi1>
    %130 = vector.broadcast %129 : vector<1x8x8xi1> to vector<16x8x8xi1>
    %131 = vector.broadcast %cst_44 : f32 to vector<16x8x8xf32>
    %132 = arith.select %130, %128, %131 : vector<16x8x8xi1>, vector<16x8x8xf32>
    %cst_45 = arith.constant dense<0xFF800000> : vector<16x8xf32>
    %133 = vector.multi_reduction <maximumf>, %132, %cst_45 [2] : vector<16x8x8xf32> to vector<16x8xf32>
    %134 = vector.shape_cast %133 : vector<16x8xf32> to vector<16x8x1xf32>
    %135 = vector.broadcast %134 : vector<16x8x1xf32> to vector<16x8x8xf32>
    %136 = arith.subf %132, %135 : vector<16x8x8xf32>
    %137 = math.exp %136 : vector<16x8x8xf32>
    %cst_46 = arith.constant dense<0.000000e+00> : vector<16x8xf32>
    %138 = vector.multi_reduction <add>, %137, %cst_46 [2] : vector<16x8x8xf32> to vector<16x8xf32>
    %139 = vector.shape_cast %138 : vector<16x8xf32> to vector<16x8x1xf32>
    %140 = vector.broadcast %139 : vector<16x8x1xf32> to vector<16x8x8xf32>
    %141 = arith.divf %137, %140 : vector<16x8x8xf32>
    "tpu.trace_start"() <{level = 10 : i32, message = "nlm,nmd->nld"}> : () -> ()
    %cst_47 = arith.constant dense<0.000000e+00> : vector<16x8x8xf32>
    %142 = tpu.matmul %141, %127, %cst_47 {dimension_numbers = #tpu.dot_dimension_numbers<[2], [1], [1], [2], [0, 0, 0, 1, 1, 2], [0], [0]>} : vector<16x8x8xf32>, vector<16x8x8xf32>, vector<16x8x8xf32> -> vector<16x8x8xf32>
    "tpu.trace_stop"() : () -> ()
    %143 = vector.extract_strided_slice %31 {offsets = [0, 0, 48], sizes = [16, 8, 8], strides = [1, 1, 1]} : vector<16x8x64xf32> to vector<16x8x8xf32>
    %144 = vector.extract_strided_slice %27 {offsets = [0, 0, 48], sizes = [16, 8, 8], strides = [1, 1, 1]} : vector<16x8x64xf32> to vector<16x8x8xf32>
    %145 = vector.extract_strided_slice %29 {offsets = [0, 0, 48], sizes = [16, 8, 8], strides = [1, 1, 1]} : vector<16x8x64xf32> to vector<16x8x8xf32>
    "tpu.trace_start"() <{level = 10 : i32, message = "nld,nmd->nlm"}> : () -> ()
    %cst_48 = arith.constant dense<0.000000e+00> : vector<16x8x8xf32>
    %146 = tpu.matmul %143, %144, %cst_48 {dimension_numbers = #tpu.dot_dimension_numbers<[2], [2], [1], [1], [0, 0, 0, 1, 1, 1], [0], [0]>} : vector<16x8x8xf32>, vector<16x8x8xf32>, vector<16x8x8xf32> -> vector<16x8x8xf32>
    %cst_49 = arith.constant -3.276700e+04 : f32
    "tpu.trace_stop"() : () -> ()
    %147 = vector.shape_cast %34 : vector<8x8xi1> to vector<1x8x8xi1>
    %148 = vector.broadcast %147 : vector<1x8x8xi1> to vector<16x8x8xi1>
    %149 = vector.broadcast %cst_49 : f32 to vector<16x8x8xf32>
    %150 = arith.select %148, %146, %149 : vector<16x8x8xi1>, vector<16x8x8xf32>
    %cst_50 = arith.constant dense<0xFF800000> : vector<16x8xf32>
    %151 = vector.multi_reduction <maximumf>, %150, %cst_50 [2] : vector<16x8x8xf32> to vector<16x8xf32>
    %152 = vector.shape_cast %151 : vector<16x8xf32> to vector<16x8x1xf32>
    %153 = vector.broadcast %152 : vector<16x8x1xf32> to vector<16x8x8xf32>
    %154 = arith.subf %150, %153 : vector<16x8x8xf32>
    %155 = math.exp %154 : vector<16x8x8xf32>
    %cst_51 = arith.constant dense<0.000000e+00> : vector<16x8xf32>
    %156 = vector.multi_reduction <add>, %155, %cst_51 [2] : vector<16x8x8xf32> to vector<16x8xf32>
    %157 = vector.shape_cast %156 : vector<16x8xf32> to vector<16x8x1xf32>
    %158 = vector.broadcast %157 : vector<16x8x1xf32> to vector<16x8x8xf32>
    %159 = arith.divf %155, %158 : vector<16x8x8xf32>
    "tpu.trace_start"() <{level = 10 : i32, message = "nlm,nmd->nld"}> : () -> ()
    %cst_52 = arith.constant dense<0.000000e+00> : vector<16x8x8xf32>
    %160 = tpu.matmul %159, %145, %cst_52 {dimension_numbers = #tpu.dot_dimension_numbers<[2], [1], [1], [2], [0, 0, 0, 1, 1, 2], [0], [0]>} : vector<16x8x8xf32>, vector<16x8x8xf32>, vector<16x8x8xf32> -> vector<16x8x8xf32>
    "tpu.trace_stop"() : () -> ()
    %161 = vector.extract_strided_slice %31 {offsets = [0, 0, 56], sizes = [16, 8, 8], strides = [1, 1, 1]} : vector<16x8x64xf32> to vector<16x8x8xf32>
    %162 = vector.extract_strided_slice %27 {offsets = [0, 0, 56], sizes = [16, 8, 8], strides = [1, 1, 1]} : vector<16x8x64xf32> to vector<16x8x8xf32>
    %163 = vector.extract_strided_slice %29 {offsets = [0, 0, 56], sizes = [16, 8, 8], strides = [1, 1, 1]} : vector<16x8x64xf32> to vector<16x8x8xf32>
    "tpu.trace_start"() <{level = 10 : i32, message = "nld,nmd->nlm"}> : () -> ()
    %cst_53 = arith.constant dense<0.000000e+00> : vector<16x8x8xf32>
    %164 = tpu.matmul %161, %162, %cst_53 {dimension_numbers = #tpu.dot_dimension_numbers<[2], [2], [1], [1], [0, 0, 0, 1, 1, 1], [0], [0]>} : vector<16x8x8xf32>, vector<16x8x8xf32>, vector<16x8x8xf32> -> vector<16x8x8xf32>
    %cst_54 = arith.constant -3.276700e+04 : f32
    "tpu.trace_stop"() : () -> ()
    %165 = vector.shape_cast %34 : vector<8x8xi1> to vector<1x8x8xi1>
    %166 = vector.broadcast %165 : vector<1x8x8xi1> to vector<16x8x8xi1>
    %167 = vector.broadcast %cst_54 : f32 to vector<16x8x8xf32>
    %168 = arith.select %166, %164, %167 : vector<16x8x8xi1>, vector<16x8x8xf32>
    %cst_55 = arith.constant dense<0xFF800000> : vector<16x8xf32>
    %169 = vector.multi_reduction <maximumf>, %168, %cst_55 [2] : vector<16x8x8xf32> to vector<16x8xf32>
    %170 = vector.shape_cast %169 : vector<16x8xf32> to vector<16x8x1xf32>
    %171 = vector.broadcast %170 : vector<16x8x1xf32> to vector<16x8x8xf32>
    %172 = arith.subf %168, %171 : vector<16x8x8xf32>
    %173 = math.exp %172 : vector<16x8x8xf32>
    %cst_56 = arith.constant dense<0.000000e+00> : vector<16x8xf32>
    %174 = vector.multi_reduction <add>, %173, %cst_56 [2] : vector<16x8x8xf32> to vector<16x8xf32>
    %175 = vector.shape_cast %174 : vector<16x8xf32> to vector<16x8x1xf32>
    %176 = vector.broadcast %175 : vector<16x8x1xf32> to vector<16x8x8xf32>
    %177 = arith.divf %173, %176 : vector<16x8x8xf32>
    "tpu.trace_start"() <{level = 10 : i32, message = "nlm,nmd->nld"}> : () -> ()
    %cst_57 = arith.constant dense<0.000000e+00> : vector<16x8x8xf32>
    %178 = tpu.matmul %177, %163, %cst_57 {dimension_numbers = #tpu.dot_dimension_numbers<[2], [1], [1], [2], [0, 0, 0, 1, 1, 2], [0], [0]>} : vector<16x8x8xf32>, vector<16x8x8xf32>, vector<16x8x8xf32> -> vector<16x8x8xf32>
    "tpu.trace_stop"() : () -> ()
    %179 = tpu.concatenate %52, %70, %88, %106, %124, %142, %160, %178 in 2 : vector<16x8x8xf32>, vector<16x8x8xf32>, vector<16x8x8xf32>, vector<16x8x8xf32>, vector<16x8x8xf32>, vector<16x8x8xf32>, vector<16x8x8xf32>, vector<16x8x8xf32> -> vector<16x8x64xf32>
    %180 = vector.shape_cast %179 : vector<16x8x64xf32> to vector<128x64xf32>
    %c0_58 = arith.constant 0 : index
    %c0_59 = arith.constant 0 : index
    %181 = vector.load %arg7[%c0_58, %c0_59] : memref<64x64xf32, #tpu.memory_space<vmem>>, vector<64x64xf32>
    %cst_60 = arith.constant dense<0.000000e+00> : vector<128x64xf32>
    %182 = tpu.matmul %180, %181, %cst_60 {dimension_numbers = #tpu.dot_dimension_numbers<[1], [0], [0], [1], [0, 0, 1, 1], [], []>} : vector<128x64xf32>, vector<64x64xf32>, vector<128x64xf32> -> vector<128x64xf32>
    %c0_61 = arith.constant 0 : index
    %c0_62 = arith.constant 0 : index
    %183 = vector.load %arg8[%c0_61, %c0_62] : memref<1x64xf32, #tpu.memory_space<vmem>>, vector<1x64xf32>
    %184 = vector.broadcast %183 : vector<1x64xf32> to vector<128x64xf32>
    %185 = arith.addf %182, %184 : vector<128x64xf32>
    %cst_63 = arith.constant 0.000000e+00 : f32
    %186 = vector.broadcast %cst_63 : f32 to vector<128x64xf32>
    %187 = arith.maximumf %185, %186 : vector<128x64xf32>
    %188 = math.absf %185 : vector<128x64xf32>
    %cst_64 = arith.constant 0.000000e+00 : f32
    %189 = vector.broadcast %cst_64 : f32 to vector<128x64xf32>
    %190 = arith.subf %189, %188 : vector<128x64xf32>
    %191 = math.exp %190 : vector<128x64xf32>
    %cst_65 = arith.constant 1.000000e+00 : f32
    %192 = vector.broadcast %cst_65 : f32 to vector<128x64xf32>
    %193 = arith.addf %192, %191 : vector<128x64xf32>
    %194 = math.log %193 : vector<128x64xf32>
    %195 = arith.addf %187, %194 : vector<128x64xf32>
    %196 = vector.shape_cast %195 : vector<128x64xf32> to vector<16x8x64xf32>
    %c0_66 = arith.constant 0 : index
    %c0_67 = arith.constant 0 : index
    %c0_68 = arith.constant 0 : index
    %c0_69 = arith.constant 0 : index
    %197 = vector.load %arg9[%c0_66, %c0_67, %c0_68, %c0_69] : memref<1x16x8x64xf32, #tpu.memory_space<vmem>>, vector<1x16x8x64xf32>
    %198 = vector.shape_cast %197 : vector<1x16x8x64xf32> to vector<16x8x64xf32>
    %199 = vector.shape_cast %196 : vector<16x8x64xf32> to vector<1x16x8x64xf32>
    tpu.vector_store %arg9[%c0_66, %c0_67, %c0_68, %c0_69], %199 {strides = array<i32>} : memref<1x16x8x64xf32, #tpu.memory_space<vmem>>, vector<1x16x8x64xf32>,
    return
  }
  func.func @transform_0(%arg0: i32, %arg1: i32) -> (i32, i32, i32, i32) {
    %c0_i32 = arith.constant 0 : i32
    %c0_i32_0 = arith.constant 0 : i32
    %c0_i32_1 = arith.constant 0 : i32
    return %arg0, %arg1, %c0_i32, %c0_i32_0 : i32, i32, i32, i32
  }
  func.func @transform_1(%arg0: i32, %arg1: i32) -> (i32, i32, i32, i32) {
    %c0_i32 = arith.constant 0 : i32
    %c0_i32_0 = arith.constant 0 : i32
    %c0_i32_1 = arith.constant 0 : i32
    return %arg0, %arg1, %c0_i32, %c0_i32_0 : i32, i32, i32, i32
  }
  func.func @transform_2(%arg0: i32, %arg1: i32) -> (i32, i32) {
    %c0_i32 = arith.constant 0 : i32
    %c0_i32_0 = arith.constant 0 : i32
    %c0_i32_1 = arith.constant 0 : i32
    return %c0_i32, %c0_i32_0 : i32, i32
  }
  func.func @transform_3(%arg0: i32, %arg1: i32) -> (i32, i32) {
    %c0_i32 = arith.constant 0 : i32
    %c0_i32_0 = arith.constant 0 : i32
    %c0_i32_1 = arith.constant 0 : i32
    return %c0_i32, %c0_i32_0 : i32, i32
  }
  func.func @transform_4(%arg0: i32, %arg1: i32) -> (i32, i32) {
    %c0_i32 = arith.constant 0 : i32
    %c0_i32_0 = arith.constant 0 : i32
    %c0_i32_1 = arith.constant 0 : i32
    return %c0_i32, %c0_i32_0 : i32, i32
  }
  func.func @transform_5(%arg0: i32, %arg1: i32) -> (i32, i32) {
    %c0_i32 = arith.constant 0 : i32
    %c0_i32_0 = arith.constant 0 : i32
    %c0_i32_1 = arith.constant 0 : i32
    return %c0_i32, %c0_i32_0 : i32, i32
  }
  func.func @transform_6(%arg0: i32, %arg1: i32) -> (i32, i32) {
    %c0_i32 = arith.constant 0 : i32
    %c0_i32_0 = arith.constant 0 : i32
    %c0_i32_1 = arith.constant 0 : i32
    return %c0_i32, %c0_i32_0 : i32, i32
  }
  func.func @transform_7(%arg0: i32, %arg1: i32) -> (i32, i32, i32, i32) {
    %c0_i32 = arith.constant 0 : i32
    %c0_i32_0 = arith.constant 0 : i32
    %c0_i32_1 = arith.constant 0 : i32
    return %arg0, %arg1, %c0_i32, %c0_i32_0 : i32, i32, i32, i32
  }
}

</mosaic_0001>

<bundles_post_ra>
// kernel: temporal_attention.1
= control target key start
LH: loop header
LB: loop body
LE: loop exit
PB: predicated region body
PF: predicated region fallthrough
CT: control target
= control target key end

     0   :  { %s26667_s24 = smov 0   ;;  %s26669_s25 = smov 0   ;;  %s32064_s0 = inlined_call_operand.vmem [shape: f32[2,16,8,64], index: 0, kind: input, shape index: {}]   ;;  %s32065_s1 = inlined_call_operand.vmem [shape: f32[2,16,8,64], index: 1, kind: input, shape index: {}]   ;;  %s32066_s2 = inlined_call_operand.vmem [shape: f32[64,192], index: 2, kind: input, shape index: {}]   ;;  %s32067_s3 = inlined_call_operand.vmem [shape: f32[64,192], index: 3, kind: input, shape index: {}]   ;;  %s32068_s4 = inlined_call_operand.vmem [shape: f32[1,192], index: 4, kind: input, shape index: {}]   ;;  %s32069_s5 = inlined_call_operand.vmem [shape: f32[64,64], index: 5, kind: input, shape index: {}]   ;;  %s32070_s6 = inlined_call_operand.vmem [shape: f32[1,64], index: 6, kind: input, shape index: {}]   ;;  %s32071_s7 = inlined_call_operand.vmem [shape: f32[2,16,8,64], index: 7, kind: output, shape index: {}]  }
   0x1   :  { %s26671_s26 = smov 0  }
   0x2 LB: > { %s29_s27 = sadd.s32 1, %s26604_s25  ;;  %p23452_p0 = scmp.ge.s32.totalorder %s26608_s26, 1  ;;  %s26608_s26 = sphi %s26671_s26, %s17_s26   ;;  %s26604_s25 = sphi %s26669_s25, %s32728_s25   ;;  %s26600_s24 = sphi %s26667_s24, %s32727_s24  }
   0x3   : > { %p31_p1 = scmp.ge.s32.totalorder %s29_s27, 2  ;;  %p275_p2 = scmp.lt.s32.totalorder %s26608_s26, 3 }
   0x5   : > { %s32730_s27 = smov (%p31_p1, %s29_s27), 0  ;;  %p276_p3 = pnand %p23452_p0, %p275_p2 }
   0x7   : > { %279 = sbr.rel (%p276_p3) target bundleno = 6164 (0x1814), region = 48 }
   0xe   : > { %v403_v0 = vld [vmem:[%s32067_s3 + $0x8] sm:$0xff]  ;;  %v405_v1 = vld [vmem:[%s32067_s3 + $0x18] sm:$0xff]  ;;  %v402_v2 = vld [vmem:[%s32067_s3] sm:$0xff]  ;;  %v32072_v7 = vmov 0.0   ;;  %p325_p4 = scmp.lt.s32.totalorder %s26600_s24, 1  ;;  %vm418_vm0 = vcmask 523264  }
   0xf   : > { %v25753_v3 = vpack.c.bf16 %v405_v1, %v403_v0  ;;  %v404_v4 = vld [vmem:[%s32067_s3 + $0x10] sm:$0xff]  ;;  %v407_v5 = vld [vmem:[%s32067_s3 + $0x28] sm:$0xff]  ;;  %v409_v6 = vld [vmem:[%s32067_s3 + $0x38] sm:$0xff]  ;;  %531 = vmatprep.mubr.f32.mxu0 %v32072_v7  ;;  %24433 = vmatprep.subr.mxu1 %v32072_v7  ;;  %vm26611_vm2 = vmmov 0   ;;  %s26612_s21 = smov 64   ;;  %s26613_s22 = smov 120  }
  0x10   : > { %v25755_v8 = vpack.c.bf16 %v404_v4, %v402_v2  ;;  %v25757_v9 = vpack.c.bf16 %v409_v6, %v407_v5  ;;  %v406_v10 = vld [vmem:[%s32067_s3 + $0x20] sm:$0xff]  ;;  %v408_v11 = vld [vmem:[%s32067_s3 + $0x30] sm:$0xff]  ;;  %v411_v12 = vld [vmem:[%s32067_s3 + $0x48] sm:$0xff]  ;;  %s32732_s24 = smov (!%p325_p4, %s26600_s24), 1  ;;  %24435 = vmatprep.mubr.msk.f32.mxu1 %vm26611_vm2, %v32072_v7  ;;  %s26614_s23 = smov 56   ;;  %vm1193_vm3 = vcmask 64512  }
  0x11   : > { %25754 = vmatprep.subr.bf16.mxu0 %v25753_v3  ;;  %v413_v13 = vld [vmem:[%s32067_s3 + $0x58] sm:$0xff]  ;;  %v25759_v14 = vpack.c.bf16 %v408_v11, %v406_v10  ;;  %v410_v16 = vld [vmem:[%s32067_s3 + $0x40] sm:$0xff]  ;;  %v412_v17 = vld [vmem:[%s32067_s3 + $0x50] sm:$0xff]  ;;  %s26739_s18 = sshll.u32 %s32732_s24, 7  ;;  %s26615_s28 = smov 48   ;;  %vm22873_vm4 = vcmask 130048  }
  0x12   : > { %25756 = vmatpush1.bf16.msra.mxu0 %v25755_v8  ;;  %v25761_v15 = vpack.c.bf16 %v413_v13, %v411_v12  ;;  %v415_v18 = vld [vmem:[%s32067_s3 + $0x68] sm:$0xff]  ;;  %v417_v19 = vld [vmem:[%s32067_s3 + $0x78] sm:$0xff]  ;;  %v25763_v20 = vpack.c.bf16 %v412_v17, %v410_v16  ;;  %v414_v22 = vld [vmem:[%s32067_s3 + $0x60] sm:$0xff]  ;;  %s26751_s29 = scalar_lea.vmem %s32065_s1, %s26739_s18  ;;  %s26846_s19 = scalar_lea.vmem %s32064_s0, %s26739_s18  ;;  %vm22890_vm5 = vcmask 195584   ;;  %vm22907_vm6 = vcmask 261120  }
  0x13   : > { %25758 = vmatprep.subr.bf16.mxu0 %v25757_v9  ;;  %v25765_v21 = vpack.c.bf16 %v417_v19, %v415_v18  ;;  %v416_v23 = vld [vmem:[%s32067_s3 + $0x70] sm:$0xff]  ;;  %v387_v24 = vld [vmem:[%s32066_s2 + $0x8] sm:$0xff]  ;;  %v389_v25 = vld [vmem:[%s32066_s2 + $0x18] sm:$0xff]  ;;  %v839_v18 = vlaneseq  ;;  %s26616_s24 = smov 112   ;;  %s26617_s30 = smov 40   ;;  %vm22924_vm7 = vcmask 326656  }
  0x14   : > { %v25767_v26 = vpack.c.bf16 %v416_v23, %v414_v22  ;;  %v25769_v27 = vpack.c.bf16 %v389_v25, %v387_v24  ;;  %v386_v28 = vld [vmem:[%s32066_s2] sm:$0xff]  ;;  %v388_v29 = vld [vmem:[%s32066_s2 + $0x10] sm:$0xff]  ;;  %v391_v30 = vld [vmem:[%s32066_s2 + $0x28] sm:$0xff]  ;;  %v32180_v24 = vmov 0  ;;  %s26618_s8 = smov 104   ;;  %s26619_s9 = smov 32  }
  0x15   : > { %v393_v31 = vld [vmem:[%s32066_s2 + $0x38] sm:$0xff]  ;;  %v370_v32 = vld [vmem:[%s26751_s29] sm:$0xff]  ;;  %v25771_v33 = vpack.c.bf16 %v388_v29, %v386_v28  ;;  %v392_v36 = vld [vmem:[%s32066_s2 + $0x30] sm:$0xff]  ;;  %v840_v19 = vshrl.u32 %v839_v18, 7  ;;  %v1188_v23 = vand.u32 127, %v839_v18  ;;  %s26620_s10 = smov 96  }
  0x16   : > { %25760 = vmatpush1.bf16.msra.mxu0 %v25759_v14  ;;  %v25773_v34 = vpack.c.bf16 %v393_v31, %v391_v30  ;;  %v390_v35 = vld [vmem:[%s32066_s2 + $0x20] sm:$0xff]  ;;  %v395_v37 = vld [vmem:[%s32066_s2 + $0x48] sm:$0xff]  ;;  %v397_v38 = vld [vmem:[%s32066_s2 + $0x58] sm:$0xff]  ;;  %s26621_s11 = smov 24   ;;  %s26622_s12 = smov 88   ;;  %vm22941_vm8 = vcmask 392192  }
  0x17   : > { %25762 = vmatprep.subr.bf16.mxu0 %v25761_v15  ;;  %v371_v39 = vld [vmem:[%s26751_s29 + $0x8] sm:$0xff]  ;;  %v25775_v40 = vpack.c.bf16 %v392_v36, %v390_v35  ;;  %v25777_v41 = vpack.c.bf16 %v397_v38, %v395_v37  ;;  %v394_v42 = vld [vmem:[%s32066_s2 + $0x40] sm:$0xff]  ;;  %v396_v43 = vld [vmem:[%s32066_s2 + $0x50] sm:$0xff]  ;;  %vm26902_vm1 = vcmp.le.s32.totalorder %v1188_v23, %v840_v19  ;;  %v841_v25 = vsub.s32 0, %v840_v19  ;;  %s26623_s13 = smov 16   ;;  %s26624_s14 = smov 80  }
  0x18   : > { %v399_v44 = vld [vmem:[%s32066_s2 + $0x68] sm:$0xff]  ;;  %v401_v45 = vld [vmem:[%s32066_s2 + $0x78] sm:$0xff]  ;;  %v372_v46 = vld [vmem:[%s26751_s29 + $0x10] sm:$0xff]  ;;  %v25779_v47 = vpack.c.bf16 %v396_v43, %v394_v42  ;;  %v32181_v24 = vsel %vm26902_vm1, 4294967295, %v32180_v24  ;;  %s26625_s15 = smov 8   ;;  %s26626_s16 = smov 72  }
  0x19   : > { %v25781_v48 = vpack.c.bf16 %v401_v45, %v399_v44  ;;  %v398_v49 = vld [vmem:[%s32066_s2 + $0x60] sm:$0xff]  ;;  %v400_v50 = vld [vmem:[%s32066_s2 + $0x70] sm:$0xff]  ;;  %v373_v51 = vld [vmem:[%s26751_s29 + $0x18] sm:$0xff]  ;;  %32182 = vst [vmem:[#allocation2_spill] sm:$0xff] %v32181_v24  ;;  %vm22958_vm9 = vcmask 457728  }
  0x1a   : > { %25764 = vmatpush1.bf16.msra.mxu0 %v25763_v20  ;;  %v25783_v52 = vpack.c.bf16 %v400_v50, %v398_v49  ;;  %v374_v53 = vld [vmem:[%s26751_s29 + $0x20] sm:$0xff]  ;;  %v375_v54 = vld [vmem:[%s26751_s29 + $0x28] sm:$0xff]  ;;  %v376_v55 = vld [vmem:[%s26751_s29 + $0x30] sm:$0xff] }
  0x1b   : > { %25766 = vmatprep.subr.bf16.mxu0 %v25765_v21  ;;  %v377_v56 = vld [vmem:[%s26751_s29 + $0x38] sm:$0xff]  ;;  %v378_v57 = vld [vmem:[%s26751_s29 + $0x40] sm:$0xff]  ;;  %v379_v58 = vld [vmem:[%s26751_s29 + $0x48] sm:$0xff]  ;;  %v845_v21 = vsub.s32 1, %v840_v19 }
  0x1c   : > { %v380_v59 = vld [vmem:[%s26751_s29 + $0x50] sm:$0xff]  ;;  %v381_v60 = vld [vmem:[%s26751_s29 + $0x58] sm:$0xff]  ;;  %v382_v61 = vld [vmem:[%s26751_s29 + $0x60] sm:$0xff] }
  0x1d   : > { %v383_v62 = vld [vmem:[%s26751_s29 + $0x68] sm:$0xff]  ;;  %v384_v63 = vld [vmem:[%s26751_s29 + $0x70] sm:$0xff]  ;;  %v385_v0 = vld [vmem:[%s26751_s29 + $0x78] sm:$0xff] }
  0x1e   : > { %25768 = vmatpush1.bf16.msra.mxu0 %v25767_v26  ;;  %v354_v1 = vld [vmem:[%s26846_s19] sm:$0xff]  ;;  %v355_v2 = vld [vmem:[%s26846_s19 + $0x8] sm:$0xff]  ;;  %v356_v3 = vld [vmem:[%s26846_s19 + $0x10] sm:$0xff] }
  0x1f   : > { %25770 = vmatprep.subr.bf16.mxu0 %v25769_v27  ;;  %v357_v4 = vld [vmem:[%s26846_s19 + $0x18] sm:$0xff]  ;;  %v358_v5 = vld [vmem:[%s26846_s19 + $0x20] sm:$0xff]  ;;  %v359_v6 = vld [vmem:[%s26846_s19 + $0x28] sm:$0xff] }
  0x20   : > { %v360_v8 = vld [vmem:[%s26846_s19 + $0x30] sm:$0xff]  ;;  %v361_v9 = vld [vmem:[%s26846_s19 + $0x38] sm:$0xff]  ;;  %v362_v10 = vld [vmem:[%s26846_s19 + $0x40] sm:$0xff] }
  0x21   : > { %23459 = vmatmul.mubr.msk.f32.vlgmr.msra.gmra.mrb[0].mxu0 %vm418_vm0, %v370_v32  ;;  %v363_v11 = vld [vmem:[%s26846_s19 + $0x48] sm:$0xff]  ;;  %v364_v12 = vld [vmem:[%s26846_s19 + $0x50] sm:$0xff]  ;;  %v365_v13 = vld [vmem:[%s26846_s19 + $0x58] sm:$0xff] }
  0x22   : > { %25772 = vmatpush1.bf16.msra.mxu0 %v25771_v33  ;;  %537 = vmatprep.mubr.f32.mxu0 %v32072_v7  ;;  %v366_v14 = vld [vmem:[%s26846_s19 + $0x60] sm:$0xff]  ;;  %v367_v15 = vld [vmem:[%s26846_s19 + $0x68] sm:$0xff]  ;;  %v368_v16 = vld [vmem:[%s26846_s19 + $0x70] sm:$0xff] }
  0x23   : > { %25774 = vmatprep.subr.bf16.mxu0 %v25773_v34  ;;  %v369_v17 = vld [vmem:[%s26846_s19 + $0x78] sm:$0xff]  ;;  %v837_v20 = vld [vmem:[%s32068_s4] sm:$0x3]  ;;  %s31981_s19 = scalar_lea.vmem %s32071_s7, %s26739_s18 }
  0x24   : > { %v26900_v22 = vrot.slane %v837_v20, %v845_v21  ;;  %v26906_v26 = vrot.slane %v837_v20, %v841_v25 }
  0x25   : > { %23460 = vmatmul.mubr.msk.f32.gmra.mrb[2].mxu0 %vm418_vm0, %v371_v39 }
  0x26   : > { %543 = vmatprep.mubr.f32.mxu0 %v32072_v7  ;;  %25776 = vmatpush1.bf16.msra.mxu0 %v25775_v40 }
  0x27   : > { %25778 = vmatprep.subr.bf16.mxu0 %v25777_v41 }
  0x29   : > { %23461 = vmatmul.mubr.msk.f32.gmra.mrb[4].mxu0 %vm418_vm0, %v372_v46 }
  0x2a   : > { %549 = vmatprep.mubr.f32.mxu0 %v32072_v7  ;;  %25780 = vmatpush1.bf16.msra.mxu0 %v25779_v47 }
  0x2b   : > { %25782 = vmatprep.subr.bf16.mxu0 %v25781_v48 }
  0x2d   : > { %23462 = vmatmul.mubr.msk.f32.gmra.mrb[6].mxu0 %vm418_vm0, %v373_v51 }
  0x2e   : > { %555 = vmatprep.mubr.f32.mxu0 %v32072_v7  ;;  %25784 = vmatpush1.bf16.msra.mxu0 %v25783_v52 }
  0x2f   : > { %24608 = vmatprep.subr.mxu0 %v32072_v7 }
  0x31   : > { %23463 = vmatmul.mubr.msk.f32.gmra.mrb[8].mxu0 %vm418_vm0, %v374_v53 }
  0x32   : > { %561 = vmatprep.mubr.f32.mxu0 %v32072_v7 }
  0x35   : > { %23464 = vmatmul.mubr.msk.f32.gmra.mrb[10].mxu0 %vm418_vm0, %v375_v54 }
  0x36   : > { %567 = vmatprep.mubr.f32.mxu0 %v32072_v7 }
  0x39   : > { %23465 = vmatmul.mubr.msk.f32.gmra.mrb[12].mxu0 %vm418_vm0, %v376_v55 }
  0x3a   : > { %573 = vmatprep.mubr.f32.mxu0 %v32072_v7 }
  0x3d   : > { %23466 = vmatmul.mubr.msk.f32.gmra.mrb[14].mxu0 %vm418_vm0, %v377_v56 }
  0x3e   : > { %579 = vmatprep.mubr.f32.mxu0 %v32072_v7 }
  0x41   : > { %23467 = vmatmul.mubr.msk.f32.gmra.mrb[16].mxu0 %vm418_vm0, %v378_v57 }
  0x42   : > { %585 = vmatprep.mubr.f32.mxu0 %v32072_v7 }
  0x45   : > { %23468 = vmatmul.mubr.msk.f32.gmra.mrb[18].mxu0 %vm418_vm0, %v379_v58 }
  0x46   : > { %591 = vmatprep.mubr.f32.mxu0 %v32072_v7 }
  0x49   : > { %23469 = vmatmul.mubr.msk.f32.gmra.mrb[20].mxu0 %vm418_vm0, %v380_v59 }
  0x4a   : > { %597 = vmatprep.mubr.f32.mxu0 %v32072_v7 }
  0x4d   : > { %23470 = vmatmul.mubr.msk.f32.gmra.mrb[22].mxu0 %vm418_vm0, %v381_v60 }
  0x4e   : > { %603 = vmatprep.mubr.f32.mxu0 %v32072_v7 }
  0x51   : > { %23471 = vmatmul.mubr.msk.f32.gmra.mrb[24].mxu0 %vm418_vm0, %v382_v61 }
  0x52   : > { %609 = vmatprep.mubr.f32.mxu0 %v32072_v7 }
  0x55   : > { %23472 = vmatmul.mubr.msk.f32.gmra.mrb[26].mxu0 %vm418_vm0, %v383_v62 }
  0x56   : > { %615 = vmatprep.mubr.f32.mxu0 %v32072_v7 }
  0x59   : > { %23473 = vmatmul.mubr.msk.f32.gmra.mrb[28].mxu0 %vm418_vm0, %v384_v63 }
  0x5a   : > { %621 = vmatprep.mubr.f32.mxu0 %v32072_v7 }
  0x5d   : > { %23474 = vmatmul.mubr.msk.f32.gmra.mrb[30].mxu0 %vm418_vm0, %v385_v0 }
  0x5e   : > { %740 = vmatprep.mubr.f32.mxu0 %v32072_v7 }
  0x61   : > { %23475 = vmatmul.mubr.msk.f32.vlgmr.msra.gmra.mrb[0].mxu0 %vm418_vm0, %v354_v1 }
  0x62   : > { %746 = vmatprep.mubr.f32.mxu0 %v32072_v7 }
  0x65   : > { %23476 = vmatmul.mubr.msk.f32.gmra.mrb[2].mxu0 %vm418_vm0, %v355_v2 }
  0x66   : > { %752 = vmatprep.mubr.f32.mxu0 %v32072_v7 }
  0x69   : > { %23477 = vmatmul.mubr.msk.f32.gmra.mrb[4].mxu0 %vm418_vm0, %v356_v3 }
  0x6a   : > { %758 = vmatprep.mubr.f32.mxu0 %v32072_v7 }
  0x6d   : > { %23478 = vmatmul.mubr.msk.f32.gmra.mrb[6].mxu0 %vm418_vm0, %v357_v4 }
  0x6e   : > { %764 = vmatprep.mubr.f32.mxu0 %v32072_v7 }
  0x71   : > { %23479 = vmatmul.mubr.msk.f32.gmra.mrb[8].mxu0 %vm418_vm0, %v358_v5 }
  0x72   : > { %770 = vmatprep.mubr.f32.mxu0 %v32072_v7 }
  0x75   : > { %23480 = vmatmul.mubr.msk.f32.gmra.mrb[10].mxu0 %vm418_vm0, %v359_v6 }
  0x76   : > { %776 = vmatprep.mubr.f32.mxu0 %v32072_v7 }
  0x79   : > { %23481 = vmatmul.mubr.msk.f32.gmra.mrb[12].mxu0 %vm418_vm0, %v360_v8 }
  0x7a   : > { %782 = vmatprep.mubr.f32.mxu0 %v32072_v7 }
  0x7d   : > { %23482 = vmatmul.mubr.msk.f32.gmra.mrb[14].mxu0 %vm418_vm0, %v361_v9 }
  0x7e   : > { %788 = vmatprep.mubr.f32.mxu0 %v32072_v7 }
  0x81   : > { %23483 = vmatmul.mubr.msk.f32.gmra.mrb[16].mxu0 %vm418_vm0, %v362_v10 }
  0x82   : > { %794 = vmatprep.mubr.f32.mxu0 %v32072_v7 }
  0x85   : > { %23484 = vmatmul.mubr.msk.f32.gmra.mrb[18].mxu0 %vm418_vm0, %v363_v11 }
  0x86   : > { %800 = vmatprep.mubr.f32.mxu0 %v32072_v7 }
  0x89   : > { %23485 = vmatmul.mubr.msk.f32.gmra.mrb[20].mxu0 %vm418_vm0, %v364_v12 }
  0x8a   : > { %806 = vmatprep.mubr.f32.mxu0 %v32072_v7 }
  0x8d   : > { %23486 = vmatmul.mubr.msk.f32.gmra.mrb[22].mxu0 %vm418_vm0, %v365_v13 }
  0x8e   : > { %812 = vmatprep.mubr.f32.mxu0 %v32072_v7 }
  0x91   : > { %23487 = vmatmul.mubr.msk.f32.gmra.mrb[24].mxu0 %vm418_vm0, %v366_v14 }
  0x92   : > { %818 = vmatprep.mubr.f32.mxu0 %v32072_v7 }
  0x95   : > { %23488 = vmatmul.mubr.msk.f32.gmra.mrb[26].mxu0 %vm418_vm0, %v367_v15 }
  0x96   : > { %824 = vmatprep.mubr.f32.mxu0 %v32072_v7 }
  0x99   : > { %23489 = vmatmul.mubr.msk.f32.gmra.mrb[28].mxu0 %vm418_vm0, %v368_v16 }
  0x9a   : > { %830 = vmatprep.mubr.f32.mxu0 %v32072_v7 }
  0x9d   : > { %23490 = vmatmul.mubr.msk.f32.gmra.mrb[30].mxu0 %vm418_vm0, %v369_v17 }
  0x9e   : > { %24610 = vmatprep.mubr.msk.f32.mxu0 %vm26611_vm2, %v32072_v7 }
 0x134   : > { %v742_v27 = vpop.f32.mrb[0].mxu0 }
 0x135   : > { %v26909_v28 = vadd.f32 %v26906_v26, %v742_v27  ;;  %v26911_v29 = vpop.f32.mrb[1].mxu0 }
 0x137   : > { %v913_v30 = vand.u32 2147483647, %v26909_v28  ;;  %v881_v16 = vmax.f32 %v26909_v28, 0.0 }
 0x138   : > { %v748_v31 = vpop.f32.mrb[2].mxu0 }
 0x139   : > { %v945_v32 = vsub.f32 0.0, %v913_v30  ;;  %v26915_v33 = vadd.f32 %v26906_v26, %v748_v31  ;;  %v26917_v34 = vpop.f32.mrb[3].mxu0 }
 0x13b   : > { %v977_v35 = vmul.f32 1.442695, %v945_v32  ;;  %v915_v36 = vand.u32 2147483647, %v26915_v33  ;;  %v883_v28 = vmax.f32 %v26915_v33, 0.0 }
 0x13c   : > { %v754_v37 = vpop.f32.mrb[4].mxu0 }
 0x13d   : > { %25882 = vpow2.f32 %v977_v35  ;;  %v947_v38 = vsub.f32 0.0, %v915_v36  ;;  %v26921_v39 = vadd.f32 %v26906_v26, %v754_v37  ;;  %v26923_v40 = vpop.f32.mrb[5].mxu0 }
 0x13f   : > { %v981_v41 = vmul.f32 1.442695, %v947_v38  ;;  %v917_v42 = vand.u32 2147483647, %v26921_v39  ;;  %v885_v33 = vmax.f32 %v26921_v39, 0.0 }
 0x140   : > { %v760_v43 = vpop.f32.mrb[6].mxu0 }
 0x141   : > { %25884 = vpow2.f32 %v981_v41  ;;  %v949_v44 = vsub.f32 0.0, %v917_v42  ;;  %v26927_v45 = vadd.f32 %v26906_v26, %v760_v43  ;;  %v26929_v46 = vpop.f32.mrb[7].mxu0 }
 0x143   : > { %v985_v47 = vmul.f32 1.442695, %v949_v44  ;;  %v919_v48 = vand.u32 2147483647, %v26927_v45 }
 0x144   : > { %v766_v49 = vpop.f32.mrb[8].mxu0 }
 0x145   : > { %25886 = vpow2.f32 %v985_v47  ;;  %v951_v50 = vsub.f32 0.0, %v919_v48  ;;  %v26933_v51 = vadd.f32 %v26906_v26, %v766_v49  ;;  %v26935_v52 = vpop.f32.mrb[9].mxu0 }
 0x147   : > { %v25883_v53 = vpop.eup %25882  ;;  %v989_v54 = vmul.f32 1.442695, %v951_v50  ;;  %v921_v55 = vand.u32 2147483647, %v26933_v51 }
 0x148   : > { %v1041_v56 = vadd.f32 1.0, %v25883_v53  ;;  %v772_v58 = vpop.f32.mrb[10].mxu0 }
 0x149   : > { %25888 = vpow2.f32 %v989_v54  ;;  %v953_v57 = vsub.f32 0.0, %v921_v55  ;;  %v26939_v59 = vadd.f32 %v26906_v26, %v772_v58  ;;  %v26941_v60 = vpop.f32.mrb[11].mxu0 }
 0x14a   : > { %25890 = vlog2.f32 %v1041_v56 }
 0x14b   : > { %v25885_v61 = vpop.eup %25884  ;;  %v993_v62 = vmul.f32 1.442695, %v953_v57  ;;  %v923_v1 = vand.u32 2147483647, %v26939_v59 }
 0x14c   : > { %v1043_v63 = vadd.f32 1.0, %v25885_v61  ;;  %v778_v0 = vpop.f32.mrb[12].mxu0 }
 0x14d   : > { %25892 = vpow2.f32 %v993_v62  ;;  %v26944_v2 = vpop.f32.mrb[13].mxu0  ;;  %v26947_v3 = vadd.f32 %v26906_v26, %v778_v0  ;;  %v955_v5 = vsub.f32 0.0, %v923_v1 }
 0x14e   : > { %25894 = vlog2.f32 %v1043_v63  ;;  %v887_v63 = vmax.f32 %v26927_v45, 0.0 }
 0x14f   : > { %v25887_v4 = vpop.eup %25886  ;;  %v997_v9 = vmul.f32 1.442695, %v955_v5  ;;  %v925_v10 = vand.u32 2147483647, %v26947_v3 }
 0x150   : > { %v1045_v6 = vadd.f32 1.0, %v25887_v4  ;;  %v784_v8 = vpop.f32.mrb[14].mxu0 }
 0x151   : > { %v26955_v11 = vadd.f32 %v26906_v26, %v784_v8  ;;  %v26957_v12 = vpop.f32.mrb[15].mxu0  ;;  %v957_v14 = vsub.f32 0.0, %v925_v10 }
 0x152   : > { %25896 = vlog2.f32 %v1045_v6 }
 0x153   : > { %v25889_v13 = vpop.eup %25888  ;;  %25898 = vpow2.f32 %v997_v9  ;;  %v1001_v20 = vmul.f32 1.442695, %v957_v14  ;;  %v927_v21 = vand.u32 2147483647, %v26955_v11  ;;  %v889_v14 = vmax.f32 %v26933_v51, 0.0 }
 0x154   : > { %v25891_v15 = vpop.eup %25890  ;;  %v1047_v17 = vadd.f32 1.0, %v25889_v13  ;;  %v790_v18 = vpop.f32.mrb[16].mxu0 }
 0x155   : > { %v1074_v19 = vmul.f32 0.6931472, %v25891_v15  ;;  %v26961_v23 = vpop.f32.mrb[17].mxu0  ;;  %v959_v30 = vsub.f32 0.0, %v927_v21  ;;  %v26967_v38 = vadd.f32 %v26906_v26, %v790_v18 }
 0x156   : > { %25900 = vlog2.f32 %v1047_v17 }
 0x157   : > { %v25893_v25 = vpop.eup %25892  ;;  %v26963_v27 = vadd.f32 %v1074_v19, %v881_v16  ;;  %25902 = vpow2.f32 %v1001_v20  ;;  %v1005_v37 = vmul.f32 1.442695, %v959_v30  ;;  %v929_v44 = vand.u32 2147483647, %v26967_v38 }
 0x158   : > { %v25895_v31 = vpop.eup %25894  ;;  %v1049_v32 = vadd.f32 1.0, %v25893_v25  ;;  %v796_v35 = vpop.f32.mrb[18].mxu0 }
 0x159   : > { %32183 = vst [vmem:[#allocation3_spill] sm:$0xff] %v26963_v27  ;;  %v1078_v36 = vmul.f32 0.6931472, %v25895_v31  ;;  %1191 = vrot.lane.b32.xlu0 %v26963_v27, %s26612_s21  ;;  %v26971_v41 = vpop.f32.mrb[19].mxu0  ;;  %v26978_v49 = vadd.f32 %v26906_v26, %v796_v35  ;;  %v961_v54 = vsub.f32 0.0, %v929_v44 }
 0x15a   : > { %25904 = vlog2.f32 %v1049_v32 }
 0x15b   : > { %v26973_v42 = vadd.f32 %v1078_v36, %v883_v28  ;;  %25906 = vpow2.f32 %v1005_v37  ;;  %v1009_v58 = vmul.f32 1.442695, %v961_v54  ;;  %v931_v61 = vand.u32 2147483647, %v26978_v49 }
 0x15c   : > { %v25897_v43 = vpop.eup %25896  ;;  %v802_v47 = vpop.f32.mrb[20].mxu0  ;;  %v891_v28 = vmax.f32 %v26939_v59, 0.0 }
 0x15d   : > { %32184 = vst [vmem:[#allocation4_spill] sm:$0xff] %v26973_v42  ;;  %v1082_v48 = vmul.f32 0.6931472, %v25897_v43  ;;  %1270 = vrot.lane.b32.xlu0 %v26973_v42, %s26612_s21  ;;  %v26982_v50 = vpop.f32.mrb[21].mxu0  ;;  %v25899_v53 = vpop.eup %25898  ;;  %v963_v5 = vsub.f32 0.0, %v931_v61  ;;  %v26995_v8 = vadd.f32 %v26906_v26, %v802_v47 }
 0x15e   : > { %v1051_v56 = vadd.f32 1.0, %v25899_v53 }
 0x15f   : > { %v26984_v55 = vadd.f32 %v1082_v48, %v885_v33  ;;  %v1013_v10 = vmul.f32 1.442695, %v963_v5  ;;  %v933_v16 = vand.u32 2147483647, %v26995_v8 }
 0x160   : > { %v25901_v57 = vpop.eup %25900  ;;  %v808_v62 = vpop.f32.mrb[22].mxu0  ;;  %25908 = vlog2.f32 %v1051_v56 }
 0x161   : > { %32185 = vst [vmem:[#allocation5_spill] sm:$0xff] %v26984_v55  ;;  %v25903_v39 = vpop.eup %25902  ;;  %v1086_v0 = vmul.f32 0.6931472, %v25901_v57  ;;  %1348 = vrot.lane.b32.xlu1 %v26984_v55, %s26612_s21  ;;  %v26990_v1 = vpop.f32.mrb[23].mxu0  ;;  %25910 = vpow2.f32 %v1009_v58  ;;  %v965_v20 = vsub.f32 0.0, %v933_v16  ;;  %v27006_v21 = vadd.f32 %v26906_v26, %v808_v62 }
 0x162   : > { %v1053_v4 = vadd.f32 1.0, %v25903_v39  ;;  %v893_v57 = vmax.f32 %v26947_v3, 0.0  ;;  %v895_v3 = vmax.f32 %v26955_v11, 0.0 }
 0x163   : > { %v26992_v6 = vadd.f32 %v1086_v0, %v887_v63  ;;  %v1017_v30 = vmul.f32 1.442695, %v965_v20  ;;  %v935_v31 = vand.u32 2147483647, %v27006_v21 }
 0x164   : > { %v25905_v9 = vpop.eup %25904  ;;  %25912 = vlog2.f32 %v1053_v4  ;;  %v814_v13 = vpop.f32.mrb[24].mxu0 }
 0x165   : > { %32186 = vst [vmem:[#allocation6_spill] sm:$0xff] %v26992_v6  ;;  %v25907_v45 = vpop.eup %25906  ;;  %v1090_v15 = vmul.f32 0.6931472, %v25905_v9  ;;  %1426 = vrot.lane.b32.xlu1 %v26992_v6, %s26612_s21  ;;  %v27001_v17 = vpop.f32.mrb[25].mxu0  ;;  %25914 = vpow2.f32 %v1013_v10  ;;  %v27014_v35 = vadd.f32 %v26906_v26, %v814_v13  ;;  %v967_v37 = vsub.f32 0.0, %v935_v31 }
 0x166   : > { %v1055_v18 = vadd.f32 1.0, %v25907_v45 }
 0x167   : > { %v27003_v19 = vadd.f32 %v1090_v15, %v889_v14  ;;  %v937_v47 = vand.u32 2147483647, %v27014_v35  ;;  %v1021_v54 = vmul.f32 1.442695, %v967_v37 }
 0x168   : > { %25916 = vlog2.f32 %v1055_v18  ;;  %v820_v25 = vpop.f32.mrb[26].mxu0 }
 0x169   : > { %32187 = vst [vmem:[#allocation7_spill] sm:$0xff] %v27003_v19  ;;  %1504 = vrot.lane.b32.xlu0 %v27003_v19, %s26612_s21  ;;  %v27010_v51 = vpop.f32.mrb[27].mxu0  ;;  %25918 = vpow2.f32 %v1017_v30  ;;  %v969_v61 = vsub.f32 0.0, %v937_v47  ;;  %v27024_v59 = vadd.f32 %v26906_v26, %v820_v25 }
 0x16a   : > { %v25909_v32 = vpop.eup %25908 }
 0x16b   : > { %v1094_v36 = vmul.f32 0.6931472, %v25909_v32  ;;  %v25911_v44 = vpop.eup %25910  ;;  %v1025_v10 = vmul.f32 1.442695, %v969_v61  ;;  %v939_v13 = vand.u32 2147483647, %v27024_v59 }
 0x16c   : > { %v826_v43 = vpop.f32.mrb[28].mxu0  ;;  %v1057_v53 = vadd.f32 1.0, %v25911_v44  ;;  %v897_v32 = vmax.f32 %v26967_v38, 0.0 }
 0x16d   : > { %v27018_v48 = vadd.f32 %v1094_v36, %v891_v28  ;;  %v27020_v56 = vpop.f32.mrb[29].mxu0  ;;  %v27039_v14 = vadd.f32 %v26906_v26, %v826_v43  ;;  %v971_v16 = vsub.f32 0.0, %v939_v13  ;;  %v903_v13 = vmax.f32 %v27006_v21, 0.0 }
 0x16e   : > { %v25913_v33 = vpop.eup %25912  ;;  %32189 = vst [vmem:[#allocation9_spill] sm:$0xff] %v27020_v56  ;;  %25920 = vlog2.f32 %v1057_v53  ;;  %v899_v53 = vmax.f32 %v26978_v49, 0.0  ;;  %v907_v21 = vmax.f32 %v27024_v59, 0.0 }
 0x16f   : > { %32188 = vst [vmem:[#allocation8_spill] sm:$0xff] %v27018_v48  ;;  %v1098_v58 = vmul.f32 0.6931472, %v25913_v33  ;;  %1582 = vrot.lane.b32.xlu1 %v27018_v48, %s26612_s21  ;;  %v25915_v39 = vpop.eup %25914  ;;  %25922 = vpow2.f32 %v1021_v54  ;;  %v1029_v11 = vmul.f32 1.442695, %v971_v16 }
 0x170   : > { %v832_v62 = vpop.f32.mrb[30].mxu0  ;;  %v1059_v5 = vadd.f32 1.0, %v25915_v39  ;;  %v941_v20 = vand.u32 2147483647, %v27039_v14  ;;  %v901_v39 = vmax.f32 %v26995_v8, 0.0 }
 0x171   : > { %v27028_v63 = vadd.f32 %v1098_v58, %v893_v57  ;;  %v27030_v0 = vpop.f32.mrb[31].mxu0  ;;  %v27045_v25 = vadd.f32 %v26906_v26, %v832_v62 }
 0x172   : > { %32191 = vst [vmem:[#allocation11_spill] sm:$0xff] %v27030_v0  ;;  %v25917_v4 = vpop.eup %25916  ;;  %25924 = vlog2.f32 %v1059_v5  ;;  %v973_v31 = vsub.f32 0.0, %v941_v20  ;;  %v905_v20 = vmax.f32 %v27014_v35, 0.0  ;;  %v909_v35 = vmax.f32 %v27039_v14, 0.0 }
 0x173   : > { %32190 = vst [vmem:[#allocation10_spill] sm:$0xff] %v27028_v63  ;;  %v1102_v9 = vmul.f32 0.6931472, %v25917_v4  ;;  %1660 = vrot.lane.b32.xlu0 %v27028_v63, %s26612_s21  ;;  %v25919_v15 = vpop.eup %25918  ;;  %25926 = vpow2.f32 %v1025_v10  ;;  %v943_v47 = vand.u32 2147483647, %v27045_v25  ;;  %v911_v59 = vmax.f32 %v27045_v25, 0.0 }
 0x174   : > { %v1061_v18 = vadd.f32 1.0, %v25919_v15  ;;  %v1033_v37 = vmul.f32 1.442695, %v973_v31  ;;  %v27098_v14 = vmul.f32 0.35355338, %v26984_v55 }
 0x175   : > { %v27036_v45 = vadd.f32 %v1102_v9, %v895_v3  ;;  %v975_v26 = vsub.f32 0.0, %v943_v47  ;;  %v27105_v25 = vmul.f32 0.35355338, %v26973_v42 }
 0x176   : > { %25928 = vlog2.f32 %v1061_v18  ;;  %32201 = vst [vmem:[#allocation21_spill] sm:$0xff] %v27098_v14 }
 0x177   : > { %32192 = vst [vmem:[#allocation12_spill] sm:$0xff] %v27036_v45  ;;  %1738 = vrot.lane.b32.xlu1 %v27036_v45, %s26612_s21  ;;  %25930 = vpow2.f32 %v1029_v11  ;;  %v1037_v58 = vmul.f32 1.442695, %v975_v26  ;;  %v27085_v26 = vmul.f32 0.35355338, %v26963_v27  ;;  %32202 = vst [vmem:[#allocation22_spill] sm:$0xff] %v27105_v25 }
 0x178   : > { %v25921_v30 = vpop.eup %25920 }
 0x179   : > { %v1106_v28 = vmul.f32 0.6931472, %v25921_v30  ;;  %v25923_v36 = vpop.eup %25922  ;;  %32199 = vst [vmem:[#allocation19_spill] sm:$0xff] %v27085_v26 }
 0x17a   : > { %v1063_v44 = vadd.f32 1.0, %v25923_v36 }
 0x17b   : > { %v27048_v43 = vadd.f32 %v1106_v28, %v897_v32 }
 0x17c   : > { %v25925_v33 = vpop.eup %25924  ;;  %25932 = vlog2.f32 %v1063_v44 }
 0x17d   : > { %32193 = vst [vmem:[#allocation13_spill] sm:$0xff] %v27048_v43  ;;  %v1110_v54 = vmul.f32 0.6931472, %v25925_v33  ;;  %1816 = vrot.lane.b32.xlu0 %v27048_v43, %s26612_s21  ;;  %25934 = vpow2.f32 %v1033_v37  ;;  %v25927_v38 = vpop.eup %25926 }
 0x17e   : > { %v1065_v61 = vadd.f32 1.0, %v25927_v38 }
 0x17f   : > { %v27054_v57 = vadd.f32 %v1110_v54, %v899_v53 }
 0x180   : > { %v25929_v62 = vpop.eup %25928  ;;  %25936 = vlog2.f32 %v1065_v61 }
 0x181   : > { %32194 = vst [vmem:[#allocation14_spill] sm:$0xff] %v27054_v57  ;;  %1894 = vrot.lane.b32.xlu1 %v27054_v57, %s26612_s21  ;;  %v1114_v4 = vmul.f32 0.6931472, %v25929_v62  ;;  %v25931_v49 = vpop.eup %25930  ;;  %25938 = vpow2.f32 %v1037_v58  ;;  %v27112_v58 = vmul.f32 0.35355338, %v26992_v6 }
 0x182   : > { %v1067_v3 = vadd.f32 1.0, %v25931_v49 }
 0x183   : > { %v27059_v5 = vadd.f32 %v1114_v4, %v901_v39  ;;  %32203 = vst [vmem:[#allocation23_spill] sm:$0xff] %v27112_v58 }
 0x184   : > { %25940 = vlog2.f32 %v1067_v3  ;;  %v27142_v3 = vmul.f32 0.35355338, %v27003_v19 }
 0x185   : > { %32195 = vst [vmem:[#allocation15_spill] sm:$0xff] %v27059_v5  ;;  %1972 = vrot.lane.b32.xlu0 %v27059_v5, %s26612_s21 }
 0x186   : > { %v25933_v9 = vpop.eup %25932  ;;  %32204 = vst [vmem:[#allocation24_spill] sm:$0xff] %v27142_v3 }
 0x187   : > { %v25935_v10 = vpop.eup %25934  ;;  %v1118_v15 = vmul.f32 0.6931472, %v25933_v9 }
 0x188   : > { %v1069_v16 = vadd.f32 1.0, %v25935_v10  ;;  %v27152_v10 = vadd.f32 %v26900_v22, %v26911_v29 }
 0x189   : > { %v27064_v18 = vadd.f32 %v1118_v15, %v903_v13  ;;  %v27155_v13 = vmul.f32 0.35355338, %v27018_v48 }
 0x18a   : > { %25942 = vlog2.f32 %v1069_v16  ;;  %v25937_v8 = vpop.eup %25936  ;;  %v914_v16 = vand.u32 2147483647, %v27152_v10 }
 0x18b   : > { %32196 = vst [vmem:[#allocation16_spill] sm:$0xff] %v27064_v18  ;;  %2050 = vrot.lane.b32.xlu1 %v27064_v18, %s26612_s21  ;;  %v25939_v11 = vpop.eup %25938  ;;  %v1122_v30 = vmul.f32 0.6931472, %v25937_v8  ;;  %32205 = vst [vmem:[#allocation25_spill] sm:$0xff] %v27155_v13  ;;  %v27165_v8 = vmul.f32 0.35355338, %v27028_v63 }
 0x18c   : > { %v1071_v31 = vadd.f32 1.0, %v25939_v11  ;;  %v946_v11 = vsub.f32 0.0, %v914_v16 }
 0x18d   : > { %v27069_v32 = vadd.f32 %v1122_v30, %v905_v20  ;;  %32206 = vst [vmem:[#allocation26_spill] sm:$0xff] %v27165_v8  ;;  %v27174_v20 = vmul.f32 0.35355338, %v27036_v45 }
 0x18e   : > { %v25941_v28 = vpop.eup %25940  ;;  %25944 = vlog2.f32 %v1071_v31  ;;  %v979_v30 = vmul.f32 1.442695, %v946_v11  ;;  %v882_v11 = vmax.f32 %v27152_v10, 0.0 }
 0x18f   : > { %32197 = vst [vmem:[#allocation17_spill] sm:$0xff] %v27069_v32  ;;  %v1126_v36 = vmul.f32 0.6931472, %v25941_v28  ;;  %2128 = vrot.lane.b32.xlu0 %v27069_v32, %s26612_s21  ;;  %32207 = vst [vmem:[#allocation27_spill] sm:$0xff] %v27174_v20  ;;  %v27183_v28 = vmul.f32 0.35355338, %v27048_v43 }
 0x190   : > { %25946 = vpow2.f32 %v979_v30 }
 0x191   : > { %v27074_v37 = vadd.f32 %v1126_v36, %v907_v21  ;;  %32208 = vst [vmem:[#allocation28_spill] sm:$0xff] %v27183_v28  ;;  %v27192_v36 = vmul.f32 0.35355338, %v27054_v57 }
 0x193   : > { %2206 = vrot.lane.b32.xlu1 %v27074_v37, %s26612_s21  ;;  %32209 = vst [vmem:[#allocation29_spill] sm:$0xff] %v27192_v36 }
 0x194   : > { %v25943_v44 = vpop.eup %25942 }
 0x195   : > { %v1130_v47 = vmul.f32 0.6931472, %v25943_v44 }
 0x197   : > { %v27079_v33 = vadd.f32 %v1130_v47, %v909_v35  ;;  %v27201_v35 = vmul.f32 0.35355338, %v27059_v5 }
 0x198   : > { %v25945_v53 = vpop.eup %25944 }
 0x199   : > { %32198 = vst [vmem:[#allocation18_spill] sm:$0xff] %v27079_v33  ;;  %2284 = vrot.lane.b32.xlu0 %v27079_v33, %s26612_s21  ;;  %v1134_v54 = vmul.f32 0.6931472, %v25945_v53  ;;  %32210 = vst [vmem:[#allocation30_spill] sm:$0xff] %v27201_v35 }
 0x19a   : > { %v25947_v47 = vpop.eup %25946 }
 0x19b   : > { %v27087_v38 = vadd.f32 %v1134_v54, %v911_v59  ;;  %v1042_v59 = vadd.f32 1.0, %v25947_v47  ;;  %v27210_v54 = vmul.f32 0.35355338, %v27064_v18 }
 0x19d   : > { %32200 = vst [vmem:[#allocation20_spill] sm:$0xff] %v27087_v38  ;;  %3801 = vrot.lane.b32.xlu0 %v27085_v26, %s26613_s22  ;;  %2362 = vrot.lane.b32.xlu1 %v27087_v38, %s26612_s21  ;;  %32211 = vst [vmem:[#allocation31_spill] sm:$0xff] %v27210_v54  ;;  %25948 = vlog2.f32 %v1042_v59  ;;  %v27248_v30 = vmul.f32 0.35355338, %v27087_v38 }
 0x19f   : > { %32214 = vst [vmem:[#allocation34_spill] sm:$0xff] %v27248_v30 }
 0x1a1   : > { %3959 = vrot.lane.b32.xlu0 %v26984_v55, %s26614_s23  ;;  %3803 = vrot.lane.b32.xlu1 %v26963_v27, %s26614_s23 }
 0x1a5   : > { %3957 = vrot.lane.b32.xlu0 %v27098_v14, %s26613_s22  ;;  %3881 = vrot.lane.b32.xlu1 %v26973_v42, %s26614_s23 }
 0x1a9   : > { %3879 = vrot.lane.b32.xlu1 %v27105_v25, %s26613_s22 }
 0x1ad   : > { %4037 = vrot.lane.b32.xlu1 %v26992_v6, %s26614_s23 }
 0x1b1   : > { %4035 = vrot.lane.b32.xlu1 %v27112_v58, %s26613_s22 }
 0x1cb   : > { %v1192_v61 = vpop.permute.xlu0 %1191 }
 0x1cc   : > { %24434 = vmatpush3.xpose.msk.msra.mxu1 %vm1193_vm3, %v1192_v61 }
 0x1cd   : > { %24438 = vmatprep.subr.mxu1 %v32072_v7 }
 0x1cf   : > { %24436 = vmatmul.mubr.msk.f32.vlgmr.msra.gmra.mrb[0].mxu1 %vm1193_vm3, %v27085_v26  ;;  %v1271_v62 = vpop.permute.xlu0 %1270 }
 0x1d0   : > { %24439 = vmatpush3.xpose.msk.msra.mxu1 %vm1193_vm3, %v1271_v62  ;;  %24440 = vmatprep.mubr.msk.f32.mxu1 %vm26611_vm2, %v32072_v7  ;;  %v27219_v62 = vmul.f32 0.35355338, %v27069_v32 }
 0x1d1   : > { %24443 = vmatprep.subr.mxu1 %v32072_v7 }
 0x1d2   : > { %32212 = vst [vmem:[#allocation32_spill] sm:$0xff] %v27219_v62 }
 0x1d3   : > { %24441 = vmatmul.mubr.msk.f32.vlgmr.msra.gmra.mrb[2].mxu1 %vm1193_vm3, %v27105_v25  ;;  %v1349_v39 = vpop.permute.xlu1 %1348 }
 0x1d4   : > { %24444 = vmatpush3.xpose.msk.msra.mxu1 %vm1193_vm3, %v1349_v39  ;;  %24445 = vmatprep.mubr.msk.f32.mxu1 %vm26611_vm2, %v32072_v7 }
 0x1d5   : > { %24448 = vmatprep.subr.mxu1 %v32072_v7 }
 0x1d7   : > { %24446 = vmatmul.mubr.msk.f32.vlgmr.msra.gmra.mrb[4].mxu1 %vm1193_vm3, %v27098_v14  ;;  %v1427_v4 = vpop.permute.xlu1 %1426 }
 0x1d8   : > { %24449 = vmatpush3.xpose.msk.msra.mxu1 %vm1193_vm3, %v1427_v4  ;;  %24450 = vmatprep.mubr.msk.f32.mxu1 %vm26611_vm2, %v32072_v7  ;;  %v27228_v4 = vmul.f32 0.35355338, %v27074_v37 }
 0x1d9   : > { %24453 = vmatprep.subr.mxu1 %v32072_v7 }
 0x1db   : > { %24451 = vmatmul.mubr.msk.f32.vlgmr.msra.gmra.mrb[6].mxu1 %vm1193_vm3, %v27112_v58  ;;  %v1505_v49 = vpop.permute.xlu0 %1504 }
 0x1dc   : > { %24454 = vmatpush3.xpose.msk.msra.mxu1 %vm1193_vm3, %v1505_v49  ;;  %24455 = vmatprep.mubr.msk.f32.mxu1 %vm26611_vm2, %v32072_v7 }
 0x1dd   : > { %24458 = vmatprep.subr.mxu1 %v32072_v7 }
 0x1df   : > { %24456 = vmatmul.mubr.msk.f32.vlgmr.msra.gmra.mrb[8].mxu1 %vm1193_vm3, %v27142_v3 }
 0x1e0   : > { %24460 = vmatprep.mubr.msk.f32.mxu1 %vm26611_vm2, %v32072_v7 }
 0x1e1   : > { %v1583_v9 = vpop.permute.xlu1 %1582 }
 0x1e2   : > { %24459 = vmatpush3.xpose.msk.msra.mxu1 %vm1193_vm3, %v1583_v9  ;;  %v25949_v9 = vpop.eup %25948 }
 0x1e3   : > { %24463 = vmatprep.subr.mxu1 %v32072_v7  ;;  %v1076_v16 = vmul.f32 0.6931472, %v25949_v9 }
 0x1e5   : > { %v1661_v15 = vpop.permute.xlu0 %1660  ;;  %24461 = vmatmul.mubr.msk.f32.vlgmr.msra.gmra.mrb[10].mxu1 %vm1193_vm3, %v27155_v13 }
 0x1e6   : > { %24464 = vmatpush3.xpose.msk.msra.mxu1 %vm1193_vm3, %v1661_v15  ;;  %24465 = vmatprep.mubr.msk.f32.mxu1 %vm26611_vm2, %v32072_v7  ;;  %v27238_v15 = vmul.f32 0.35355338, %v27079_v33 }
 0x1e7   : > { %24468 = vmatprep.subr.mxu1 %v32072_v7 }
 0x1e8   : > { %32213 = vst [vmem:[#allocation33_spill] sm:$0xff] %v27238_v15 }
 0x1e9   : > { %v1739_v29 = vpop.permute.xlu1 %1738  ;;  %24466 = vmatmul.mubr.msk.f32.vlgmr.msra.gmra.mrb[12].mxu1 %vm1193_vm3, %v27165_v8 }
 0x1ea   : > { %24469 = vmatpush3.xpose.msk.msra.mxu1 %vm1193_vm3, %v1739_v29  ;;  %24470 = vmatprep.mubr.msk.f32.mxu1 %vm26611_vm2, %v32072_v7 }
 0x1eb   : > { %24473 = vmatprep.subr.mxu1 %v32072_v7 }
 0x1ed   : > { %24471 = vmatmul.mubr.msk.f32.vlgmr.msra.gmra.mrb[14].mxu1 %vm1193_vm3, %v27174_v20 }
 0x1ee   : > { %24475 = vmatprep.mubr.msk.f32.mxu1 %vm26611_vm2, %v32072_v7 }
 0x1ef   : > { %v1817_v31 = vpop.permute.xlu0 %1816 }
 0x1f0   : > { %24474 = vmatpush3.xpose.msk.msra.mxu1 %vm1193_vm3, %v1817_v31  ;;  %v27250_v31 = vadd.f32 %v1076_v16, %v882_v11 }
 0x1f1   : > { %24478 = vmatprep.subr.mxu1 %v32072_v7 }
 0x1f2   : > { %32215 = vst [vmem:[#allocation35_spill] sm:$0xff] %v27250_v31 }
 0x1f3   : > { %24476 = vmatmul.mubr.msk.f32.vlgmr.msra.gmra.mrb[16].mxu1 %vm1193_vm3, %v27183_v28  ;;  %v1895_v21 = vpop.permute.xlu1 %1894 }
 0x1f4   : > { %24479 = vmatpush3.xpose.msk.msra.mxu1 %vm1193_vm3, %v1895_v21  ;;  %24480 = vmatprep.mubr.msk.f32.mxu1 %vm26611_vm2, %v32072_v7 }
 0x1f5   : > { %24483 = vmatprep.subr.mxu1 %v32072_v7 }
 0x1f7   : > { %24481 = vmatmul.mubr.msk.f32.vlgmr.msra.gmra.mrb[18].mxu1 %vm1193_vm3, %v27192_v36  ;;  %v1973_v44 = vpop.permute.xlu0 %1972 }
 0x1f8   : > { %24485 = vmatprep.mubr.msk.f32.mxu1 %vm26611_vm2, %v32072_v7  ;;  %24484 = vmatpush3.xpose.msk.msra.mxu1 %vm1193_vm3, %v1973_v44 }
 0x1f9   : > { %24488 = vmatprep.subr.mxu1 %v32072_v7 }
 0x1fb   : > { %24486 = vmatmul.mubr.msk.f32.vlgmr.msra.gmra.mrb[20].mxu1 %vm1193_vm3, %v27201_v35 }
 0x1fc   : > { %24490 = vmatprep.mubr.msk.f32.mxu1 %vm26611_vm2, %v32072_v7 }
 0x1fd   : > { %v2051_v53 = vpop.permute.xlu1 %2050 }
 0x1fe   : > { %24489 = vmatpush3.xpose.msk.msra.mxu1 %vm1193_vm3, %v2051_v53 }
 0x1ff   : > { %24493 = vmatprep.subr.mxu1 %v32072_v7 }
 0x201   : > { %24491 = vmatmul.mubr.msk.f32.vlgmr.msra.gmra.mrb[22].mxu1 %vm1193_vm3, %v27210_v54  ;;  %v2129_v61 = vpop.permute.xlu0 %2128 }
 0x202   : > { %24495 = vmatprep.mubr.msk.f32.mxu1 %vm26611_vm2, %v32072_v7  ;;  %24494 = vmatpush3.xpose.msk.msra.mxu1 %vm1193_vm3, %v2129_v61 }
 0x203   : > { %24498 = vmatprep.subr.mxu1 %v32072_v7 }
 0x205   : > { %24496 = vmatmul.mubr.msk.f32.vlgmr.msra.gmra.mrb[24].mxu1 %vm1193_vm3, %v27219_v62  ;;  %v2207_v39 = vpop.permute.xlu1 %2206 }
 0x206   : > { %24499 = vmatpush3.xpose.msk.msra.mxu1 %vm1193_vm3, %v2207_v39  ;;  %24500 = vmatprep.mubr.msk.f32.mxu1 %vm26611_vm2, %v32072_v7 }
 0x207   : > { %24503 = vmatprep.subr.mxu1 %v32072_v7 }
 0x209   : > { %24501 = vmatmul.mubr.msk.f32.vlgmr.msra.gmra.mrb[26].mxu1 %vm1193_vm3, %v27228_v4 }
 0x20a   : > { %24505 = vmatprep.mubr.msk.f32.mxu1 %vm26611_vm2, %v32072_v7 }
 0x20b   : > { %v2285_v49 = vpop.permute.xlu0 %2284 }
 0x20c   : > { %24504 = vmatpush3.xpose.msk.msra.mxu1 %vm1193_vm3, %v2285_v49 }
 0x20d   : > { %24508 = vmatprep.subr.mxu1 %v32072_v7 }
 0x20f   : > { %24506 = vmatmul.mubr.msk.f32.vlgmr.msra.gmra.mrb[28].mxu1 %vm1193_vm3, %v27238_v15  ;;  %v2363_v29 = vpop.permute.xlu1 %2362 }
 0x210   : > { %24510 = vmatprep.mubr.msk.f32.mxu1 %vm26611_vm2, %v32072_v7  ;;  %24509 = vmatpush3.xpose.msk.msra.mxu1 %vm1193_vm3, %v2363_v29 }
 0x211   : > { %24513 = vmatprep.subr.mxu1 %v32072_v7 }
 0x213   : > { %v27252_v21 = vpop.permute.xlu1 %3803  ;;  %24511 = vmatmul.mubr.msk.f32.vlgmr.msra.gmra.mrb[30].mxu1 %vm1193_vm3, %v27248_v30 }
 0x214   : > { %32216 = vst [vmem:[#allocation36_spill] sm:$0xff] %v27252_v21  ;;  %24514 = vmatpush3.msra.mxu1 %v27250_v31  ;;  %24515 = vmatprep.mubr.msk.f32.mxu1 %vm26611_vm2, %v32072_v7 }
 0x215   : > { %24518 = vmatprep.subr.mxu1 %v32072_v7 }
 0x217   : > { %v27260_v10 = vpop.permute.xlu1 %3881 }
 0x218   : > { %32217 = vst [vmem:[#allocation37_spill] sm:$0xff] %v27260_v10 }
 0x21b   : > { %v27262_v44 = vpop.permute.xlu1 %3879 }
 0x21c   : > { %32218 = vst [vmem:[#allocation38_spill] sm:$0xff] %v27262_v44 }
 0x21f   : > { %v4038_v47 = vpop.permute.xlu1 %4037 }
 0x220   : > { %24609 = vmatpush3.xpose.msk.msra.mxu0 %vm1193_vm3, %v4038_v47 }
 0x221   : > { %24618 = vmatprep.subr.mxu0 %v32072_v7 }
 0x223   : > { %v4036_v53 = vpop.permute.xlu1 %4035 }
 0x224   : > { %24611 = vmatmul.mubr.msk.f32.vlgmr.msra.gmra.mrb[32].mxu0 %vm1193_vm3, %v4036_v53 }
 0x225   : > { %24620 = vmatprep.mubr.msk.f32.mxu0 %vm26611_vm2, %v32072_v7 }
 0x2a2   : > { %v1265_v59 = vpop.f32.mrb[0].mxu1 }
 0x2a3   : > { %v24437_v61 = vpop.f32.mrb[1].mxu1  ;;  %v27271_v39 = vsel %vm26902_vm1, %v1265_v59, -32767.0 }
 0x2a4   : > { %v2457_v49 = vsel %vm1193_vm3, %v27271_v39, -inf }
 0x2a5   : > { %2458 = vmax.xlane.f32.xlu0 %v2457_v49 }
 0x2a6   : > { %v1343_v9 = vpop.f32.mrb[2].mxu1 }
 0x2a7   : > { %v24442_v16 = vpop.f32.mrb[3].mxu1  ;;  %v27277_v29 = vsel %vm26902_vm1, %v1343_v9, -32767.0 }
 0x2a8   : > { %v2460_v11 = vsel %vm1193_vm3, %v27277_v29, -inf }
 0x2a9   : > { %2461 = vmax.xlane.f32.xlu1 %v2460_v11 }
 0x2aa   : > { %v1421_v47 = vpop.f32.mrb[4].mxu1 }
 0x2ab   : > { %v24447_v53 = vpop.f32.mrb[5].mxu1  ;;  %v27283_v59 = vsel %vm26902_vm1, %v1421_v47, -32767.0 }
 0x2ac   : > { %v2463_v61 = vsel %vm1193_vm3, %v27283_v59, -inf }
 0x2ad   : > { %2464 = vmax.xlane.f32.xlu0 %v2463_v61 }
 0x2ae   : > { %v1499_v49 = vpop.f32.mrb[6].mxu1 }
 0x2af   : > { %v24452_v16 = vpop.f32.mrb[7].mxu1  ;;  %v27289_v9 = vsel %vm26902_vm1, %v1499_v49, -32767.0 }
 0x2b0   : > { %v2466_v7 = vsel %vm1193_vm3, %v27289_v9, -inf }
 0x2b1   : > { %2467 = vmax.xlane.f32.xlu0 %v2466_v7 }
 0x2b2   : > { %v1577_v11 = vpop.f32.mrb[8].mxu1 }
 0x2b3   : > { %v24457_v53 = vpop.f32.mrb[9].mxu1  ;;  %v27295_v47 = vsel %vm26902_vm1, %v1577_v11, -32767.0 }
 0x2b4   : > { %v2469_v58 = vsel %vm1193_vm3, %v27295_v47, -inf }
 0x2b5   : > { %2470 = vmax.xlane.f32.xlu1 %v2469_v58 }
 0x2b8   : > { %v1655_v61 = vpop.f32.mrb[10].mxu1 }
 0x2b9   : > { %v24462_v16 = vpop.f32.mrb[11].mxu1  ;;  %v27301_v49 = vsel %vm26902_vm1, %v1655_v61, -32767.0 }
 0x2ba   : > { %v2472_v6 = vsel %vm1193_vm3, %v27301_v49, -inf }
 0x2bb   : > { %2473 = vmax.xlane.f32.xlu0 %v2472_v6 }
 0x2bc   : > { %v1733_v7 = vpop.f32.mrb[12].mxu1 }
 0x2bd   : > { %v24467_v53 = vpop.f32.mrb[13].mxu1  ;;  %v27307_v11 = vsel %vm26902_vm1, %v1733_v7, -32767.0 }
 0x2be   : > { %v2475_v25 = vsel %vm1193_vm3, %v27307_v11, -inf }
 0x2bf   : > { %2476 = vmax.xlane.f32.xlu1 %v2475_v25 }
 0x2c0   : > { %v1811_v58 = vpop.f32.mrb[14].mxu1 }
 0x2c1   : > { %v24472_v16 = vpop.f32.mrb[15].mxu1  ;;  %v27313_v61 = vsel %vm26902_vm1, %v1811_v58, -32767.0 }
 0x2c2   : > { %v2478_v42 = vsel %vm1193_vm3, %v27313_v61, -inf }
 0x2c3   : > { %2479 = vmax.xlane.f32.xlu0 %v2478_v42 }
 0x2c6   : > { %v1889_v6 = vpop.f32.mrb[16].mxu1 }
 0x2c7   : > { %v24477_v53 = vpop.f32.mrb[17].mxu1  ;;  %v27319_v7 = vsel %vm26902_vm1, %v1889_v6, -32767.0 }
 0x2c8   : > { %v2481_v14 = vsel %vm1193_vm3, %v27319_v7, -inf }
 0x2c9   : > { %2482 = vmax.xlane.f32.xlu1 %v2481_v14 }
 0x2ca   : > { %v1967_v25 = vpop.f32.mrb[18].mxu1 }
 0x2cb   : > { %v24482_v16 = vpop.f32.mrb[19].mxu1  ;;  %v27325_v58 = vsel %vm26902_vm1, %v1967_v25, -32767.0 }
 0x2cc   : > { %v2484_v55 = vsel %vm1193_vm3, %v27325_v58, -inf }
 0x2cd   : > { %2485 = vmax.xlane.f32.xlu0 %v2484_v55 }
 0x2ce   : > { %v2045_v42 = vpop.f32.mrb[20].mxu1 }
 0x2cf   : > { %v24487_v53 = vpop.f32.mrb[21].mxu1  ;;  %v27331_v6 = vsel %vm26902_vm1, %v2045_v42, -32767.0 }
 0x2d0   : > { %v2487_v26 = vsel %vm1193_vm3, %v27331_v6, -inf }
 0x2d1   : > { %2488 = vmax.xlane.f32.xlu1 %v2487_v26 }
 0x2d4   : > { %v2123_v14 = vpop.f32.mrb[22].mxu1 }
 0x2d5   : > { %v24492_v16 = vpop.f32.mrb[23].mxu1  ;;  %v27337_v25 = vsel %vm26902_vm1, %v2123_v14, -32767.0 }
 0x2d6   : > { %v2490_v27 = vsel %vm1193_vm3, %v27337_v25, -inf }
 0x2d7   : > { %2491 = vmax.xlane.f32.xlu0 %v2490_v27 }
 0x2d8   : > { %v2201_v55 = vpop.f32.mrb[24].mxu1 }
 0x2d9   : > { %v24497_v53 = vpop.f32.mrb[25].mxu1  ;;  %v27343_v42 = vsel %vm26902_vm1, %v2201_v55, -32767.0 }
 0x2da   : > { %v2493_v44 = vsel %vm1193_vm3, %v27343_v42, -inf }
 0x2db   : > { %2494 = vmax.xlane.f32.xlu1 %v2493_v44 }
 0x2dc   : > { %v2279_v26 = vpop.f32.mrb[26].mxu1 }
 0x2dd   : > { %v24502_v16 = vpop.f32.mrb[27].mxu1  ;;  %v27349_v14 = vsel %vm26902_vm1, %v2279_v26, -32767.0 }
 0x2de   : > { %v2496_v10 = vsel %vm1193_vm3, %v27349_v14, -inf }
 0x2df   : > { %2497 = vmax.xlane.f32.xlu0 %v2496_v10 }
 0x2e2   : > { %v2357_v27 = vpop.f32.mrb[28].mxu1 }
 0x2e3   : > { %v24507_v53 = vpop.f32.mrb[29].mxu1  ;;  %v27355_v55 = vsel %vm26902_vm1, %v2357_v27, -32767.0 }
 0x2e4   : > { %v2499_v21 = vsel %vm1193_vm3, %v27355_v55, -inf }
 0x2e5   : > { %2500 = vmax.xlane.f32.xlu1 %v2499_v21  ;;  %v27371_v21 = vpop.permute.xlu0 %3801 }
 0x2e6   : > { %v2435_v44 = vpop.f32.mrb[30].mxu1  ;;  %32220 = vst [vmem:[#allocation40_spill] sm:$0xff] %v27371_v21 }
 0x2e7   : > { %v24512_v16 = vpop.f32.mrb[31].mxu1  ;;  %v27361_v26 = vsel %vm26902_vm1, %v2435_v44, -32767.0 }
 0x2e8   : > { %v2502_v0 = vsel %vm1193_vm3, %v27361_v26, -inf }
 0x2e9   : > { %2503 = vmax.xlane.f32.xlu0 %v2502_v0  ;;  %v27373_v53 = vpop.permute.xlu0 %3959 }
 0x2ea   : > { %32221 = vst [vmem:[#allocation41_spill] sm:$0xff] %v27373_v53 }
 0x2ed   : > { %v27375_v16 = vpop.permute.xlu0 %3957 }
 0x2ee   : > { %32222 = vst [vmem:[#allocation42_spill] sm:$0xff] %v27375_v16 }
 0x2f6   : > { %4193 = vrot.lane.b32.xlu1 %v27018_v48, %s26614_s23 }
 0x2f7   : > { %v27367_v10 = vpop.f32.mrb[32].mxu0 }
 0x2f8   : > { %32219 = vst [vmem:[#allocation39_spill] sm:$0xff] %v27367_v10  ;;  %v24612_v27 = vpop.f32.mrb[33].mxu0 }
 0x2ff   : > { %4115 = vrot.lane.b32.xlu0 %v27003_v19, %s26614_s23 }
 0x332   : > { %v2459_v44 = vpop.xlane.xlu0 %2458 }
 0x333   : > { %v2505_v24 = vsub.f32 %v27271_v39, %v2459_v44 }
 0x335   : > { %v2521_v15 = vmul.f32 1.442695, %v2505_v24 }
 0x336   : > { %v2462_v0 = vpop.xlane.xlu1 %2461 }
 0x337   : > { %25950 = vpow2.f32 %v2521_v15  ;;  %v2506_v48 = vsub.f32 %v27277_v29, %v2462_v0 }
 0x339   : > { %v2523_v33 = vmul.f32 1.442695, %v2506_v48 }
 0x33a   : > { %v2465_v10 = vpop.xlane.xlu0 %2464 }
 0x33b   : > { %25952 = vpow2.f32 %v2523_v33  ;;  %v2507_v27 = vsub.f32 %v27283_v59, %v2465_v10 }
 0x33d   : > { %v2525_v19 = vmul.f32 1.442695, %v2507_v27 }
 0x33e   : > { %v2468_v31 = vpop.xlane.xlu0 %2467 }
 0x33f   : > { %25954 = vpow2.f32 %v2525_v19  ;;  %v2508_v53 = vsub.f32 %v27289_v9, %v2468_v31 }
 0x341   : > { %v27381_v21 = vpop.eup %25950  ;;  %v2527_v16 = vmul.f32 1.442695, %v2508_v53 }
 0x342   : > { %v2471_v56 = vpop.xlane.xlu1 %2470  ;;  %v2553_v24 = vsel %vm1193_vm3, %v27381_v21, 0.0 }
 0x343   : > { %25956 = vpow2.f32 %v2527_v16  ;;  %v2509_v15 = vsub.f32 %v27295_v47, %v2471_v56  ;;  %2554 = vadd.xlane.f32.xlu1 %v2553_v24 }
 0x345   : > { %v27386_v48 = vpop.eup %25952  ;;  %v2529_v33 = vmul.f32 1.442695, %v2509_v15 }
 0x346   : > { %v2556_v39 = vsel %vm1193_vm3, %v27386_v48, 0.0 }
 0x347   : > { %25958 = vpow2.f32 %v2529_v33  ;;  %2557 = vadd.xlane.f32.xlu0 %v2556_v39 }
 0x348   : > { %v2474_v31 = vpop.xlane.xlu0 %2473 }
 0x349   : > { %v27390_v19 = vpop.eup %25954  ;;  %v2510_v29 = vsub.f32 %v27301_v49, %v2474_v31 }
 0x34a   : > { %v2559_v59 = vsel %vm1193_vm3, %v27390_v19, 0.0 }
 0x34b   : > { %2560 = vadd.xlane.f32.xlu1 %v2559_v59  ;;  %v2531_v9 = vmul.f32 1.442695, %v2510_v29 }
 0x34c   : > { %v2477_v47 = vpop.xlane.xlu1 %2476 }
 0x34d   : > { %v27395_v56 = vpop.eup %25956  ;;  %25960 = vpow2.f32 %v2531_v9  ;;  %v2511_v10 = vsub.f32 %v27307_v11, %v2477_v47 }
 0x34e   : > { %v2562_v53 = vsel %vm1193_vm3, %v27395_v56, 0.0 }
 0x34f   : > { %2563 = vadd.xlane.f32.xlu0 %v2562_v53  ;;  %v2533_v16 = vmul.f32 1.442695, %v2511_v10 }
 0x350   : > { %v2480_v0 = vpop.xlane.xlu0 %2479 }
 0x351   : > { %v27400_v44 = vpop.eup %25958  ;;  %25962 = vpow2.f32 %v2533_v16  ;;  %v2512_v49 = vsub.f32 %v27313_v61, %v2480_v0 }
 0x352   : > { %v2565_v27 = vsel %vm1193_vm3, %v27400_v44, 0.0 }
 0x353   : > { %2566 = vadd.xlane.f32.xlu1 %v2565_v27  ;;  %v2535_v24 = vmul.f32 1.442695, %v2512_v49 }
 0x355   : > { %25964 = vpow2.f32 %v2535_v24 }
 0x356   : > { %v2483_v11 = vpop.xlane.xlu1 %2482 }
 0x357   : > { %v27405_v15 = vpop.eup %25960  ;;  %v2513_v33 = vsub.f32 %v27319_v7, %v2483_v11 }
 0x358   : > { %v2568_v39 = vsel %vm1193_vm3, %v27405_v15, 0.0 }
 0x359   : > { %2569 = vadd.xlane.f32.xlu0 %v2568_v39  ;;  %v2537_v31 = vmul.f32 1.442695, %v2513_v33 }
 0x35a   : > { %v2486_v59 = vpop.xlane.xlu0 %2485 }
 0x35b   : > { %v27410_v29 = vpop.eup %25962  ;;  %25966 = vpow2.f32 %v2537_v31  ;;  %v2514_v61 = vsub.f32 %v27325_v58, %v2486_v59 }
 0x35c   : > { %v2571_v9 = vsel %vm1193_vm3, %v27410_v29, 0.0 }
 0x35d   : > { %2572 = vadd.xlane.f32.xlu1 %v2571_v9  ;;  %v2539_v47 = vmul.f32 1.442695, %v2514_v61 }
 0x35e   : > { %v2489_v7 = vpop.xlane.xlu1 %2488 }
 0x35f   : > { %v27415_v10 = vpop.eup %25964  ;;  %25968 = vpow2.f32 %v2539_v47  ;;  %v2515_v16 = vsub.f32 %v27331_v6, %v2489_v7 }
 0x360   : > { %v2574_v53 = vsel %vm1193_vm3, %v27415_v10, 0.0 }
 0x361   : > { %2575 = vadd.xlane.f32.xlu0 %v2574_v53  ;;  %v2541_v0 = vmul.f32 1.442695, %v2515_v16 }
 0x363   : > { %25970 = vpow2.f32 %v2541_v0 }
 0x364   : > { %v2492_v58 = vpop.xlane.xlu0 %2491 }
 0x365   : > { %v27420_v49 = vpop.eup %25966  ;;  %v2516_v27 = vsub.f32 %v27337_v25, %v2492_v58 }
 0x366   : > { %v2577_v24 = vsel %vm1193_vm3, %v27420_v49, 0.0 }
 0x367   : > { %2578 = vadd.xlane.f32.xlu1 %v2577_v24  ;;  %v2543_v11 = vmul.f32 1.442695, %v2516_v27  ;;  %v32223_v27 = vmov 0.0  }
 0x368   : > { %v2495_v39 = vpop.xlane.xlu1 %2494 }
 0x369   : > { %v27425_v33 = vpop.eup %25968  ;;  %25972 = vpow2.f32 %v2543_v11  ;;  %v2517_v31 = vsub.f32 %v27343_v42, %v2495_v39 }
 0x36a   : > { %v2580_v6 = vsel %vm1193_vm3, %v27425_v33, 0.0 }
 0x36b   : > { %2581 = vadd.xlane.f32.xlu0 %v2580_v6  ;;  %v2545_v59 = vmul.f32 1.442695, %v2517_v31 }
 0x36c   : > { %v2498_v9 = vpop.xlane.xlu0 %2497 }
 0x36d   : > { %v27430_v61 = vpop.eup %25970  ;;  %25974 = vpow2.f32 %v2545_v59  ;;  %v2518_v25 = vsub.f32 %v27349_v14, %v2498_v9 }
 0x36e   : > { %v2583_v47 = vsel %vm1193_vm3, %v27430_v61, 0.0 }
 0x36f   : > { %2584 = vadd.xlane.f32.xlu1 %v2583_v47  ;;  %v2547_v7 = vmul.f32 1.442695, %v2518_v25  ;;  %v27457_v25 = vadd.f32 %v26900_v22, %v26917_v34  ;;  %v27473_v34 = vadd.f32 %v26900_v22, %v26929_v46  ;;  %v27485_v46 = vadd.f32 %v26900_v22, %v26941_v60 }
 0x370   : > { %v27497_v60 = vadd.f32 %v26900_v22, %v26957_v12 }
 0x371   : > { %25976 = vpow2.f32 %v2547_v7  ;;  %v27463_v7 = vadd.f32 %v26900_v22, %v26923_v40 }
 0x372   : > { %v2501_v53 = vpop.xlane.xlu1 %2500 }
 0x373   : > { %v27435_v16 = vpop.eup %25972  ;;  %v2519_v39 = vsub.f32 %v27355_v55, %v2501_v53 }
 0x374   : > { %v2586_v42 = vsel %vm1193_vm3, %v27435_v16, 0.0 }
 0x375   : > { %2587 = vadd.xlane.f32.xlu0 %v2586_v42  ;;  %v2549_v31 = vmul.f32 1.442695, %v2519_v39  ;;  %v916_v42 = vand.u32 2147483647, %v27457_v25  ;;  %v920_v39 = vand.u32 2147483647, %v27473_v34 }
 0x376   : > { %v4194_v0 = vpop.permute.xlu1 %4193  ;;  %v2504_v6 = vpop.xlane.xlu0 %2503 }
 0x377   : > { %24619 = vmatpush3.xpose.msk.msra.mxu0 %vm1193_vm3, %v4194_v0  ;;  %v27440_v58 = vpop.eup %25974  ;;  %v2520_v59 = vsub.f32 %v27361_v26, %v2504_v6  ;;  %25978 = vpow2.f32 %v2549_v31  ;;  %v918_v26 = vand.u32 2147483647, %v27463_v7  ;;  %v948_v0 = vsub.f32 0.0, %v916_v42 }
 0x378   : > { %24628 = vmatprep.subr.mxu0 %v32223_v27  ;;  %v2589_v14 = vsel %vm1193_vm3, %v27440_v58, 0.0  ;;  %v27480_v6 = vadd.f32 %v26900_v22, %v26935_v52 }
 0x379   : > { %2590 = vadd.xlane.f32.xlu1 %v2589_v14  ;;  %v2551_v9 = vmul.f32 1.442695, %v2520_v59  ;;  %v950_v40 = vsub.f32 0.0, %v918_v26  ;;  %v952_v59 = vsub.f32 0.0, %v920_v39  ;;  %v924_v26 = vand.u32 2147483647, %v27485_v46 }
 0x37b   : > { %v27445_v24 = vpop.eup %25976  ;;  %25980 = vpow2.f32 %v2551_v9  ;;  %v987_v31 = vmul.f32 1.442695, %v950_v40  ;;  %v922_v9 = vand.u32 2147483647, %v27480_v6  ;;  %v991_v42 = vmul.f32 1.442695, %v952_v59 }
 0x37c   : > { %v2592_v11 = vsel %vm1193_vm3, %v27445_v24, 0.0 }
 0x37d   : > { %2593 = vadd.xlane.f32.xlu0 %v2592_v11  ;;  %v983_v11 = vmul.f32 1.442695, %v948_v0  ;;  %v27490_v0 = vadd.f32 %v26900_v22, %v26944_v2 }
 0x37f   : > { %25982 = vpow2.f32 %v983_v11  ;;  %v926_v11 = vand.u32 2147483647, %v27490_v0 }
 0x380   : > { %25984 = vpow2.f32 %v987_v31 }
 0x381   : > { %v27459_v47 = vpop.eup %25978  ;;  %25986 = vpow2.f32 %v991_v42  ;;  %v958_v59 = vsub.f32 0.0, %v926_v11  ;;  %v27504_v42 = vadd.f32 %v26900_v22, %v26961_v23  ;;  %v27517_v11 = vpop.permute.xlu0 %4115 }
 0x382   : > { %v2595_v55 = vsel %vm1193_vm3, %v27459_v47, 0.0 }
 0x385   : > { %v27468_v53 = vpop.eup %25980 }
 0x386   : > { %v2598_v14 = vsel %vm1193_vm3, %v27468_v53, 0.0 }
 0x389   : > { %v25983_v40 = vpop.eup %25982 }
 0x38a   : > { %4191 = vrot.lane.b32.xlu1 %v27155_v13, %s26613_s22  ;;  %v25985_v2 = vpop.eup %25984  ;;  %v1044_v31 = vadd.f32 1.0, %v25983_v40  ;;  %v27515_v40 = vadd.f32 %v26900_v22, %v26971_v41 }
 0x38b   : > { %v25987_v12 = vpop.eup %25986 }
 0x38c   : > { %v1048_v23 = vadd.f32 1.0, %v25987_v12 }
 0x393   : > { %4113 = vrot.lane.b32.xlu0 %v27142_v3, %s26613_s22 }
 0x3ae   : > { %2596 = vadd.xlane.f32.xlu1 %v2595_v55  ;;  %v954_v55 = vsub.f32 0.0, %v922_v9  ;;  %v928_v9 = vand.u32 2147483647, %v27497_v60 }
 0x3b0   : > { %v995_v52 = vmul.f32 1.442695, %v954_v55  ;;  %v1046_v55 = vadd.f32 1.0, %v25985_v2 }
 0x3b2   : > { %2599 = vadd.xlane.f32.xlu0 %v2598_v14  ;;  %v956_v14 = vsub.f32 0.0, %v924_v26  ;;  %25988 = vpow2.f32 %v995_v52  ;;  %v1003_v26 = vmul.f32 1.442695, %v958_v59  ;;  %v960_v52 = vsub.f32 0.0, %v928_v9 }
 0x3b4   : > { %v999_v39 = vmul.f32 1.442695, %v956_v14  ;;  %v930_v14 = vand.u32 2147483647, %v27504_v42 }
 0x3b6   : > { %25990 = vpow2.f32 %v999_v39  ;;  %v962_v59 = vsub.f32 0.0, %v930_v14 }
 0x3b7   : > { %25992 = vlog2.f32 %v1044_v31  ;;  %v1007_v31 = vmul.f32 1.442695, %v960_v52 }
 0x3b8   : > { %25994 = vlog2.f32 %v1046_v55  ;;  %v932_v55 = vand.u32 2147483647, %v27515_v40  ;;  %v1011_v52 = vmul.f32 1.442695, %v962_v59  ;;  %v884_v59 = vmax.f32 %v27457_v25, 0.0 }
 0x3bc   : > { %v25989_v2 = vpop.eup %25988 }
 0x3bd   : > { %v1050_v9 = vadd.f32 1.0, %v25989_v2 }
 0x3bf   : > { %4349 = vrot.lane.b32.xlu1 %v27036_v45, %s26614_s23 }
 0x3c0   : > { %v25991_v12 = vpop.eup %25990 }
 0x3c1   : > { %v1052_v14 = vadd.f32 1.0, %v25991_v12 }
 0x3c3   : > { %4347 = vrot.lane.b32.xlu1 %v27174_v20, %s26613_s22 }
 0x3c7   : > { %4505 = vrot.lane.b32.xlu1 %v27054_v57, %s26614_s23 }
 0x3c8   : > { %4271 = vrot.lane.b32.xlu0 %v27028_v63, %s26614_s23 }
 0x3cb   : > { %4503 = vrot.lane.b32.xlu1 %v27192_v36, %s26613_s22  ;;  %v27528_v36 = vadd.f32 %v26900_v22, %v26982_v50  ;;  %v27537_v50 = vadd.f32 %v26900_v22, %v26990_v1 }
 0x3cc   : > { %4269 = vrot.lane.b32.xlu0 %v27165_v8, %s26613_s22 }
 0x3cd   : > { %v934_v57 = vand.u32 2147483647, %v27528_v36 }
 0x3cf   : > { %4661 = vrot.lane.b32.xlu1 %v27064_v18, %s26614_s23 }
 0x3d0   : > { %v2555_v39 = vpop.xlane.xlu1 %2554  ;;  %4427 = vrot.lane.b32.xlu0 %v27048_v43, %s26614_s23 }
 0x3d1   : > { %25996 = vrcp.f32 %v2555_v39 }
 0x3d2   : > { %25998 = vpow2.f32 %v1003_v26  ;;  %v25993_v26 = vpop.eup %25992 }
 0x3d3   : > { %26000 = vlog2.f32 %v1048_v23  ;;  %4659 = vrot.lane.b32.xlu1 %v27210_v54, %s26613_s22  ;;  %v964_v23 = vsub.f32 0.0, %v932_v55  ;;  %v25995_v2 = vpop.eup %25994  ;;  %v1080_v18 = vmul.f32 0.6931472, %v25993_v26  ;;  %v886_v54 = vmax.f32 %v27463_v7, 0.0 }
 0x3d4   : > { %v2558_v41 = vpop.xlane.xlu0 %2557  ;;  %4425 = vrot.lane.b32.xlu0 %v27183_v28, %s26613_s22  ;;  %v1084_v55 = vmul.f32 0.6931472, %v25995_v2 }
 0x3d5   : > { %26002 = vrcp.f32 %v2558_v41  ;;  %v1015_v41 = vmul.f32 1.442695, %v964_v23  ;;  %v27545_v1 = vadd.f32 %v1080_v18, %v884_v59  ;;  %v27552_v23 = vadd.f32 %v26900_v22, %v27001_v17 }
 0x3d6   : > { %26004 = vpow2.f32 %v1007_v31  ;;  %v27557_v18 = vadd.f32 %v1084_v55, %v886_v54  ;;  %v888_v55 = vmax.f32 %v27473_v34, 0.0 }
 0x3d7   : > { %26006 = vlog2.f32 %v1050_v9  ;;  %4817 = vrot.lane.b32.xlu1 %v27074_v37, %s26614_s23  ;;  %32224 = vst [vmem:[#allocation43_spill] sm:$0xff] %v27545_v1 }
 0x3d8   : > { %v2561_v39 = vpop.xlane.xlu1 %2560  ;;  %4583 = vrot.lane.b32.xlu0 %v27059_v5, %s26614_s23  ;;  %32225 = vst [vmem:[#allocation44_spill] sm:$0xff] %v27557_v18 }
 0x3d9   : > { %26008 = vrcp.f32 %v2561_v39  ;;  %v966_v39 = vsub.f32 0.0, %v934_v57 }
 0x3da   : > { %26010 = vpow2.f32 %v1011_v52  ;;  %v936_v52 = vand.u32 2147483647, %v27537_v50 }
 0x3db   : > { %v25997_v31 = vpop.eup %25996  ;;  %26012 = vlog2.f32 %v1052_v14  ;;  %4815 = vrot.lane.b32.xlu1 %v27228_v4, %s26613_s22 }
 0x3dc   : > { %v25999_v9 = vpop.eup %25998  ;;  %v2564_v12 = vpop.xlane.xlu0 %2563  ;;  %v2602_v26 = vmul.f32 %v25997_v31, %v27381_v21  ;;  %4581 = vrot.lane.b32.xlu0 %v27201_v35, %s26613_s22  ;;  %v1019_v31 = vmul.f32 1.442695, %v966_v39  ;;  %v968_v59 = vsub.f32 0.0, %v936_v52 }
 0x3dd   : > { %26014 = vrcp.f32 %v2564_v12  ;;  %v26001_v25 = vpop.eup %26000  ;;  %v1054_v14 = vadd.f32 1.0, %v25999_v9  ;;  %v938_v12 = vand.u32 2147483647, %v27552_v23 }
 0x3de   : > { %24516 = vmatmul.mubr.msk.f32.vlgmr.msra.gmra.mrb[32].mxu1 %vm1193_vm3, %v2602_v26  ;;  %26016 = vpow2.f32 %v1015_v41  ;;  %v1088_v17 = vmul.f32 0.6931472, %v26001_v25  ;;  %v27573_v26 = vadd.f32 %v26900_v22, %v27010_v51  ;;  %v1023_v25 = vmul.f32 1.442695, %v968_v59  ;;  %v32228_v59 = vld [vmem:[#allocation9_spill] sm:$0xff] }
 0x3df   : > { %v26003_v2 = vpop.eup %26002  ;;  %24519 = vmatpush3.msra.mxu1 %v27545_v1  ;;  %24520 = vmatprep.mubr.msk.f32.mxu1 %vm26611_vm2, %v32223_v27 }
 0x3e0   : > { %v26005_v57 = vpop.eup %26004  ;;  %v2567_v21 = vpop.xlane.xlu1 %2566  ;;  %v2604_v7 = vmul.f32 %v26003_v2, %v27386_v48  ;;  %24523 = vmatprep.subr.mxu1 %v32223_v27  ;;  %4973 = vrot.lane.b32.xlu1 %v27087_v38, %s26614_s23  ;;  %v27580_v39 = vadd.f32 %v1088_v17, %v888_v55 }
 0x3e1   : > { %26018 = vrcp.f32 %v2567_v21  ;;  %v26007_v9 = vpop.eup %26006  ;;  %v1056_v41 = vadd.f32 1.0, %v26005_v57  ;;  %4739 = vrot.lane.b32.xlu0 %v27069_v32, %s26614_s23  ;;  %v970_v21 = vsub.f32 0.0, %v938_v12 }
 0x3e2   : > { %24521 = vmatmul.mubr.msk.f32.vlgmr.msra.gmra.mrb[34].mxu1 %vm1193_vm3, %v2604_v7  ;;  %26020 = vlog2.f32 %v1054_v14  ;;  %32226 = vst [vmem:[#allocation45_spill] sm:$0xff] %v27580_v39  ;;  %v1092_v52 = vmul.f32 0.6931472, %v26007_v9  ;;  %v890_v14 = vmax.f32 %v27480_v6, 0.0  ;;  %v940_v7 = vand.u32 2147483647, %v27573_v26 }
 0x3e3   : > { %v26009_v54 = vpop.eup %26008  ;;  %24524 = vmatpush3.msra.mxu1 %v27557_v18  ;;  %24525 = vmatprep.mubr.msk.f32.mxu1 %vm26611_vm2, %v32223_v27  ;;  %26022 = vpow2.f32 %v1019_v31  ;;  %v27598_v9 = vadd.f32 %v26900_v22, %v32228_v59  ;;  %v1027_v12 = vmul.f32 1.442695, %v970_v21 }
 0x3e4   : > { %v26011_v48 = vpop.eup %26010  ;;  %v2606_v34 = vmul.f32 %v26009_v54, %v27390_v19  ;;  %24528 = vmatprep.subr.mxu1 %v32223_v27  ;;  %26024 = vlog2.f32 %v1056_v41  ;;  %4971 = vrot.lane.b32.xlu1 %v27248_v30, %s26613_s22  ;;  %v27594_v17 = vadd.f32 %v1092_v52, %v890_v14  ;;  %v892_v41 = vmax.f32 %v27485_v46, 0.0  ;;  %v32230_v52 = vld [vmem:[#allocation18_spill] sm:$0xff] }
 0x3e5   : > { %v26013_v2 = vpop.eup %26012  ;;  %v1058_v57 = vadd.f32 1.0, %v26011_v48  ;;  %4737 = vrot.lane.b32.xlu0 %v27219_v62, %s26613_s22 }
 0x3e6   : > { %24526 = vmatmul.mubr.msk.f32.vlgmr.msra.gmra.mrb[36].mxu1 %vm1193_vm3, %v2606_v34  ;;  %v2570_v19 = vpop.xlane.xlu0 %2569  ;;  %32227 = vst [vmem:[#allocation46_spill] sm:$0xff] %v27594_v17  ;;  %v1096_v31 = vmul.f32 0.6931472, %v26013_v2  ;;  %v972_v34 = vsub.f32 0.0, %v940_v7  ;;  %v32232_v7 = vld [vmem:[#allocation33_spill] sm:$0xff] }
 0x3e7   : > { %v26015_v51 = vpop.eup %26014  ;;  %24529 = vmatpush3.msra.mxu1 %v27580_v39  ;;  %26026 = vrcp.f32 %v2570_v19  ;;  %24530 = vmatprep.mubr.msk.f32.mxu1 %vm26611_vm2, %v32223_v27 }
 0x3e8   : > { %v2608_v6 = vmul.f32 %v26015_v51, %v27395_v56  ;;  %26028 = vpow2.f32 %v1023_v25  ;;  %24533 = vmatprep.subr.mxu1 %v32223_v27  ;;  %v26017_v54 = vpop.eup %26016  ;;  %v32229_v56 = vld [vmem:[#allocation35_spill] sm:$0xff]  ;;  %v27611_v46 = vadd.f32 %v1096_v31, %v892_v41  ;;  %v942_v51 = vand.u32 2147483647, %v27598_v9 }
 0x3e9   : > { %26030 = vlog2.f32 %v1058_v57  ;;  %5242 = vrot.lane.b32.xlu1 %v32229_v56, %s26613_s22  ;;  %4895 = vrot.lane.b32.xlu0 %v32230_v52, %s26614_s23  ;;  %v1060_v14 = vadd.f32 1.0, %v26017_v54  ;;  %v894_v54 = vmax.f32 %v27490_v0, 0.0  ;;  %v896_v56 = vmax.f32 %v27497_v60, 0.0 }
 0x3ea   : > { %24531 = vmatmul.mubr.msk.f32.vlgmr.msra.gmra.mrb[38].mxu1 %vm1193_vm3, %v2608_v6  ;;  %v2573_v48 = vpop.xlane.xlu1 %2572  ;;  %32231 = vst [vmem:[#allocation9_spill] sm:$0xff] %v27611_v46  ;;  %v974_v31 = vsub.f32 0.0, %v942_v51 }
 0x3eb   : > { %v26019_v55 = vpop.eup %26018  ;;  %24534 = vmatpush3.msra.mxu1 %v27594_v17  ;;  %26032 = vrcp.f32 %v2573_v48  ;;  %24535 = vmatprep.mubr.msk.f32.mxu1 %vm26611_vm2, %v32223_v27 }
 0x3ec   : > { %v2610_v25 = vmul.f32 %v26019_v55, %v27400_v44  ;;  %v26021_v2 = vpop.eup %26020  ;;  %24538 = vmatprep.subr.mxu1 %v32223_v27  ;;  %26034 = vpow2.f32 %v1027_v12  ;;  %v1031_v44 = vmul.f32 1.442695, %v972_v34 }
 0x3ed   : > { %v26023_v57 = vpop.eup %26022  ;;  %v1100_v19 = vmul.f32 0.6931472, %v26021_v2  ;;  %4893 = vrot.lane.b32.xlu0 %v32232_v7, %s26613_s22  ;;  %v1035_v2 = vmul.f32 1.442695, %v974_v31 }
 0x3ee   : > { %24536 = vmatmul.mubr.msk.f32.vlgmr.msra.gmra.mrb[40].mxu1 %vm1193_vm3, %v2610_v25  ;;  %v2576_v21 = vpop.xlane.xlu0 %2575  ;;  %v26025_v6 = vpop.eup %26024  ;;  %v1062_v55 = vadd.f32 1.0, %v26023_v57 }
 0x3ef   : > { %24539 = vmatpush3.msra.mxu1 %v27611_v46  ;;  %24540 = vmatprep.mubr.msk.f32.mxu1 %vm26611_vm2, %v32223_v27  ;;  %26036 = vrcp.f32 %v2576_v21  ;;  %v27624_v48 = vadd.f32 %v1100_v19, %v894_v54  ;;  %v1104_v25 = vmul.f32 0.6931472, %v26025_v6  ;;  %v898_v19 = vmax.f32 %v27504_v42, 0.0 }
 0x3f0   : > { %24543 = vmatprep.subr.mxu1 %v32223_v27  ;;  %26038 = vlog2.f32 %v1060_v14 }
 0x3f1   : > { %v26027_v59 = vpop.eup %26026  ;;  %32233 = vst [vmem:[#allocation47_spill] sm:$0xff] %v27624_v48  ;;  %26040 = vpow2.f32 %v1031_v44  ;;  %v27633_v0 = vadd.f32 %v1104_v25, %v896_v56 }
 0x3f2   : > { %v26029_v41 = vpop.eup %26028  ;;  %v2612_v12 = vmul.f32 %v26027_v59, %v27405_v15  ;;  %26042 = vlog2.f32 %v1062_v55 }
 0x3f3   : > { %v26031_v34 = vpop.eup %26030  ;;  %v1064_v51 = vadd.f32 1.0, %v26029_v41  ;;  %32234 = vst [vmem:[#allocation48_spill] sm:$0xff] %v27633_v0 }
 0x3f4   : > { %24541 = vmatmul.mubr.msk.f32.vlgmr.msra.gmra.mrb[42].mxu1 %vm1193_vm3, %v2612_v12  ;;  %v2579_v30 = vpop.xlane.xlu1 %2578  ;;  %v1108_v14 = vmul.f32 0.6931472, %v26031_v34 }
 0x3f5   : > { %v26033_v21 = vpop.eup %26032  ;;  %24544 = vmatpush3.msra.mxu1 %v27624_v48  ;;  %24545 = vmatprep.mubr.msk.f32.mxu1 %vm26611_vm2, %v32223_v27  ;;  %26044 = vrcp.f32 %v2579_v30 }
 0x3f6   : > { %24548 = vmatprep.subr.mxu1 %v32223_v27  ;;  %v2614_v15 = vmul.f32 %v26033_v21, %v27410_v29  ;;  %v26035_v57 = vpop.eup %26034  ;;  %26046 = vpow2.f32 %v1035_v2  ;;  %v27642_v56 = vadd.f32 %v1108_v14, %v898_v19  ;;  %v904_v19 = vmax.f32 %v27537_v50, 0.0 }
 0x3f7   : > { %26048 = vlog2.f32 %v1064_v51  ;;  %v1066_v6 = vadd.f32 1.0, %v26035_v57 }
 0x3f8   : > { %24546 = vmatmul.mubr.msk.f32.vlgmr.msra.gmra.mrb[44].mxu1 %vm1193_vm3, %v2614_v15  ;;  %v2582_v44 = vpop.xlane.xlu0 %2581  ;;  %v902_v15 = vmax.f32 %v27528_v36, 0.0 }
 0x3f9   : > { %v26037_v60 = vpop.eup %26036  ;;  %24549 = vmatpush3.msra.mxu1 %v27633_v0  ;;  %24550 = vmatprep.mubr.msk.f32.mxu1 %vm26611_vm2, %v32223_v27  ;;  %26050 = vrcp.f32 %v2582_v44 }
 0x3fa   : > { %24553 = vmatprep.subr.mxu1 %v32223_v27  ;;  %v2616_v30 = vmul.f32 %v26037_v60, %v27415_v10  ;;  %v26039_v29 = vpop.eup %26038  ;;  %v900_v10 = vmax.f32 %v27515_v40, 0.0 }
 0x3fb   : > { %v26041_v31 = vpop.eup %26040  ;;  %v1112_v42 = vmul.f32 0.6931472, %v26039_v29  ;;  %v32236_v29 = vld [vmem:[#allocation39_spill] sm:$0xff] }
 0x3fc   : > { %24551 = vmatmul.mubr.msk.f32.vlgmr.msra.gmra.mrb[46].mxu1 %vm1193_vm3, %v2616_v30  ;;  %v2585_v59 = vpop.xlane.xlu1 %2584  ;;  %v26043_v54 = vpop.eup %26042  ;;  %v1068_v41 = vadd.f32 1.0, %v26041_v31 }
 0x3fd   : > { %24554 = vmatpush3.msra.mxu1 %v27642_v56  ;;  %24555 = vmatprep.mubr.msk.f32.mxu1 %vm26611_vm2, %v32223_v27  ;;  %26052 = vrcp.f32 %v2585_v59  ;;  %v27651_v34 = vadd.f32 %v1112_v42, %v900_v10  ;;  %v1116_v2 = vmul.f32 0.6931472, %v26043_v54 }
 0x3fe   : > { %24558 = vmatprep.subr.mxu1 %v32223_v27  ;;  %26054 = vlog2.f32 %v1066_v6  ;;  %v27671_v6 = vsel %vm26902_vm1, %v32236_v29, -32767.0 }
 0x3ff   : > { %v26045_v55 = vpop.eup %26044  ;;  %26056 = vlog2.f32 %v1068_v41  ;;  %v27660_v57 = vadd.f32 %v1116_v2, %v902_v15  ;;  %v906_v41 = vmax.f32 %v27552_v23, 0.0  ;;  %v908_v23 = vmax.f32 %v27573_v26, 0.0 }
 0x400   : > { %v2618_v12 = vmul.f32 %v26045_v55, %v27420_v49  ;;  %v26047_v25 = vpop.eup %26046  ;;  %v5074_v55 = vsel %vm1193_vm3, %v27671_v6, -inf }
 0x401   : > { %v26049_v21 = vpop.eup %26048  ;;  %v1070_v40 = vadd.f32 1.0, %v26047_v25  ;;  %32235 = vst [vmem:[#allocation49_spill] sm:$0xff] %v27660_v57 }
 0x402   : > { %24556 = vmatmul.mubr.msk.f32.vlgmr.msra.gmra.mrb[48].mxu1 %vm1193_vm3, %v2618_v12  ;;  %v2588_v14 = vpop.xlane.xlu0 %2587  ;;  %v1120_v60 = vmul.f32 0.6931472, %v26049_v21 }
 0x403   : > { %v26051_v51 = vpop.eup %26050  ;;  %24559 = vmatpush3.msra.mxu1 %v27651_v34  ;;  %24560 = vmatprep.mubr.msk.f32.mxu1 %vm26611_vm2, %v32223_v27  ;;  %26058 = vrcp.f32 %v2588_v14 }
 0x404   : > { %24563 = vmatprep.subr.mxu1 %v32223_v27  ;;  %v2620_v49 = vmul.f32 %v26051_v51, %v27425_v33  ;;  %26060 = vlog2.f32 %v1070_v40  ;;  %v27674_v42 = vadd.f32 %v1120_v60, %v904_v19  ;;  %v32241_v60 = vld [vmem:[#allocation11_spill] sm:$0xff] }
 0x405   : > { %v880_v26 = vadd.f32 %v26900_v22, %v32241_v60  ;;  %v32244_v60 = vld [vmem:[#allocation36_spill] sm:$0xff] }
 0x406   : > { %24561 = vmatmul.mubr.msk.f32.vlgmr.msra.gmra.mrb[50].mxu1 %vm1193_vm3, %v2620_v49  ;;  %v2591_v44 = vpop.xlane.xlu1 %2590  ;;  %32238 = vst [vmem:[#allocation39_spill] sm:$0xff] %v27674_v42  ;;  %v910_v49 = vmax.f32 %v27598_v9, 0.0 }
 0x407   : > { %24564 = vmatpush3.msra.mxu1 %v27660_v57  ;;  %24565 = vmatprep.mubr.msk.f32.mxu1 %vm26611_vm2, %v32223_v27  ;;  %v26053_v36 = vpop.eup %26052  ;;  %26062 = vrcp.f32 %v2591_v44  ;;  %v944_v9 = vand.u32 2147483647, %v880_v26 }
 0x408   : > { %24568 = vmatprep.subr.mxu1 %v32223_v27  ;;  %v26055_v30 = vpop.eup %26054  ;;  %v2622_v31 = vmul.f32 %v26053_v36, %v27430_v61 }
 0x409   : > { %v1124_v59 = vmul.f32 0.6931472, %v26055_v30  ;;  %v26057_v10 = vpop.eup %26056  ;;  %v976_v19 = vsub.f32 0.0, %v944_v9  ;;  %v32246_v9 = vld [vmem:[#allocation37_spill] sm:$0xff] }
 0x40a   : > { %24566 = vmatmul.mubr.msk.f32.vlgmr.msra.gmra.mrb[52].mxu1 %vm1193_vm3, %v2622_v31  ;;  %v4192_v54 = vpop.permute.xlu1 %4191  ;;  %v2594_v50 = vpop.xlane.xlu0 %2593  ;;  %v1128_v2 = vmul.f32 0.6931472, %v26057_v10 }
 0x40b   : > { %24569 = vmatpush3.msra.mxu1 %v27674_v42  ;;  %24570 = vmatprep.mubr.msk.f32.mxu1 %vm26611_vm2, %v32223_v27  ;;  %26064 = vrcp.f32 %v2594_v50  ;;  %v27688_v25 = vadd.f32 %v1124_v59, %v906_v41  ;;  %v1039_v44 = vmul.f32 1.442695, %v976_v19  ;;  %v912_v41 = vmax.f32 %v880_v26, 0.0  ;;  %v32245_v26 = vld [vmem:[#allocation40_spill] sm:$0xff] }
 0x40c   : > { %24621 = vmatmul.mubr.msk.f32.vlgmr.msra.gmra.mrb[34].mxu0 %vm1193_vm3, %v4192_v54  ;;  %5075 = vmax.xlane.f32.xlu0 %v5074_v55  ;;  %v27697_v14 = vadd.f32 %v1128_v2, %v908_v23 }
 0x40d   : > { %v26059_v61 = vpop.eup %26058  ;;  %24573 = vmatprep.subr.mxu1 %v32223_v27  ;;  %24630 = vmatprep.mubr.msk.f32.mxu0 %vm26611_vm2, %v32223_v27  ;;  %32239 = vst [vmem:[#allocation50_spill] sm:$0xff] %v27688_v25  ;;  %26066 = vpow2.f32 %v1039_v44  ;;  %v32247_v44 = vld [vmem:[#allocation38_spill] sm:$0xff] }
 0x40e   : > { %v2624_v12 = vmul.f32 %v26059_v61, %v27435_v16  ;;  %v26061_v21 = vpop.eup %26060  ;;  %32240 = vst [vmem:[#allocation51_spill] sm:$0xff] %v27697_v14  ;;  %v27715_v29 = vpop.permute.xlu0 %4113 }
 0x40f   : > { %v1132_v16 = vmul.f32 0.6931472, %v26061_v21 }
 0x410   : > { %24571 = vmatmul.mubr.msk.f32.vlgmr.msra.gmra.mrb[54].mxu1 %vm1193_vm3, %v2624_v12 }
 0x411   : > { %24574 = vmatpush3.msra.mxu1 %v27688_v25  ;;  %24575 = vmatprep.mubr.msk.f32.mxu1 %vm26611_vm2, %v32223_v27  ;;  %v26063_v51 = vpop.eup %26062  ;;  %v27708_v36 = vadd.f32 %v1132_v16, %v910_v49 }
 0x412   : > { %24578 = vmatprep.subr.mxu1 %v32223_v27  ;;  %v2626_v15 = vmul.f32 %v26063_v51, %v27440_v58 }
 0x413   : > { %32242 = vst [vmem:[#allocation11_spill] sm:$0xff] %v27708_v36 }
 0x414   : > { %24576 = vmatmul.mubr.msk.f32.vlgmr.msra.gmra.mrb[56].mxu1 %vm1193_vm3, %v2626_v15 }
 0x415   : > { %v26065_v40 = vpop.eup %26064  ;;  %24579 = vmatpush3.msra.mxu1 %v27697_v14  ;;  %24580 = vmatprep.mubr.msk.f32.mxu1 %vm26611_vm2, %v32223_v27 }
 0x416   : > { %24583 = vmatprep.subr.mxu1 %v32223_v27  ;;  %v2628_v58 = vmul.f32 %v26065_v40, %v27445_v24 }
 0x417   : > { %v26067_v22 = vpop.eup %26066 }
 0x418   : > { %24581 = vmatmul.mubr.msk.f32.vlgmr.msra.gmra.mrb[58].mxu1 %vm1193_vm3, %v2628_v58  ;;  %v1072_v30 = vadd.f32 1.0, %v26067_v22  ;;  %v32248_v22 = vld [vmem:[#allocation41_spill] sm:$0xff] }
 0x419   : > { %24584 = vmatpush3.msra.mxu1 %v27708_v36  ;;  %24585 = vmatprep.mubr.msk.f32.mxu1 %vm26611_vm2, %v32223_v27 }
 0x41a   : > { %24588 = vmatprep.subr.mxu1 %v32223_v27  ;;  %26068 = vlog2.f32 %v1072_v30 }
 0x424   : > { %v26069_v54 = vpop.eup %26068 }
 0x425   : > { %v1136_v10 = vmul.f32 0.6931472, %v26069_v54 }
 0x427   : > { %v27723_v51 = vadd.f32 %v1136_v10, %v912_v41 }
 0x429   : > { %32243 = vst [vmem:[#allocation52_spill] sm:$0xff] %v27723_v51 }
 0x43b   : > { %v2597_v24 = vpop.xlane.xlu1 %2596 }
 0x43c   : > { %26070 = vrcp.f32 %v2597_v24 }
 0x43f   : > { %v4350_v31 = vpop.permute.xlu1 %4349  ;;  %v2600_v59 = vpop.xlane.xlu0 %2599 }
 0x440   : > { %26072 = vrcp.f32 %v2600_v59  ;;  %24629 = vmatpush3.xpose.msk.msra.mxu0 %vm1193_vm3, %v4350_v31  ;;  %v32249_v31 = vld [vmem:[#allocation42_spill] sm:$0xff] }
 0x441   : > { %24638 = vmatprep.subr.mxu0 %v32223_v27 }
 0x443   : > { %v4348_v50 = vpop.permute.xlu1 %4347  ;;  %v4272_v55 = vpop.permute.xlu0 %4271 }
 0x444   : > { %24631 = vmatmul.mubr.msk.f32.vlgmr.msra.gmra.mrb[36].mxu0 %vm1193_vm3, %v4348_v50 }
 0x445   : > { %24640 = vmatprep.mubr.msk.f32.mxu0 %vm26611_vm2, %v32223_v27 }
 0x446   : > { %v26071_v61 = vpop.eup %26070 }
 0x447   : > { %v4506_v12 = vpop.permute.xlu1 %4505  ;;  %v4270_v2 = vpop.permute.xlu0 %4269  ;;  %v2630_v21 = vmul.f32 %v26071_v61, %v27459_v47 }
 0x448   : > { %24639 = vmatpush3.xpose.msk.msra.mxu0 %vm1193_vm3, %v4506_v12 }
 0x449   : > { %24586 = vmatmul.mubr.msk.f32.vlgmr.msra.gmra.mrb[60].mxu1 %vm1193_vm3, %v2630_v21  ;;  %24648 = vmatprep.subr.mxu0 %v32223_v27 }
 0x44a   : > { %v26073_v23 = vpop.eup %26072  ;;  %24589 = vmatpush3.msra.mxu1 %v27723_v51  ;;  %24590 = vmatprep.mubr.msk.f32.mxu1 %vm26611_vm2, %v32223_v27 }
 0x44b   : > { %v4504_v15 = vpop.permute.xlu1 %4503  ;;  %v4428_v16 = vpop.permute.xlu0 %4427  ;;  %v2632_v40 = vmul.f32 %v26073_v23, %v27468_v53  ;;  %24593 = vmatprep.subr.mxu1 %v32223_v27 }
 0x44c   : > { %24641 = vmatmul.mubr.msk.f32.vlgmr.msra.gmra.mrb[38].mxu0 %vm1193_vm3, %v4504_v15 }
 0x44d   : > { %24591 = vmatmul.mubr.msk.f32.vlgmr.msra.gmra.mrb[62].mxu1 %vm1193_vm3, %v2632_v40  ;;  %24650 = vmatprep.mubr.msk.f32.mxu0 %vm26611_vm2, %v32223_v27 }
 0x44e   : > { %24595 = vmatprep.mubr.msk.f32.mxu1 %vm26611_vm2, %v32223_v27 }
 0x44f   : > { %v4662_v47 = vpop.permute.xlu1 %4661  ;;  %v4426_v49 = vpop.permute.xlu0 %4425 }
 0x450   : > { %24649 = vmatpush3.xpose.msk.msra.mxu0 %vm1193_vm3, %v4662_v47 }
 0x451   : > { %24594 = vmatpush3.xpose.msk.msra.mxu1 %vm1193_vm3, %v32244_v60  ;;  %24658 = vmatprep.subr.mxu0 %v32223_v27 }
 0x452   : > { %24598 = vmatprep.subr.mxu1 %v32223_v27 }
 0x453   : > { %v4660_v53 = vpop.permute.xlu1 %4659  ;;  %v4584_v58 = vpop.permute.xlu0 %4583 }
 0x454   : > { %24596 = vmatmul.mubr.msk.f32.vlgmr.msra.gmra.mrb[64].mxu1 %vm1193_vm3, %v32245_v26  ;;  %24651 = vmatmul.mubr.msk.f32.vlgmr.msra.gmra.mrb[40].mxu0 %vm1193_vm3, %v4660_v53 }
 0x455   : > { %24599 = vmatpush3.xpose.msk.msra.mxu1 %vm1193_vm3, %v32246_v9  ;;  %24600 = vmatprep.mubr.msk.f32.mxu1 %vm26611_vm2, %v32223_v27 }
 0x456   : > { %24603 = vmatprep.subr.mxu1 %v32223_v27  ;;  %24660 = vmatprep.mubr.msk.f32.mxu0 %vm26611_vm2, %v32223_v27 }
 0x457   : > { %v4818_v19 = vpop.permute.xlu1 %4817  ;;  %v4582_v30 = vpop.permute.xlu0 %4581 }
 0x458   : > { %24601 = vmatmul.mubr.msk.f32.vlgmr.msra.gmra.mrb[66].mxu1 %vm1193_vm3, %v32247_v44  ;;  %24659 = vmatpush3.xpose.msk.msra.mxu0 %vm1193_vm3, %v4818_v19 }
 0x459   : > { %24604 = vmatpush3.xpose.msk.msra.mxu1 %vm1193_vm3, %v32248_v22  ;;  %24605 = vmatprep.mubr.msk.f32.mxu1 %vm26611_vm2, %v32223_v27 }
 0x45a   : > { %24613 = vmatprep.subr.mxu1 %v32223_v27  ;;  %24668 = vmatprep.subr.mxu0 %v32223_v27 }
 0x45b   : > { %v4816_v24 = vpop.permute.xlu1 %4815  ;;  %v4740_v54 = vpop.permute.xlu0 %4739 }
 0x45c   : > { %24606 = vmatmul.mubr.msk.f32.vlgmr.msra.gmra.mrb[68].mxu1 %vm1193_vm3, %v32249_v31  ;;  %24661 = vmatmul.mubr.msk.f32.vlgmr.msra.gmra.mrb[42].mxu0 %vm1193_vm3, %v4816_v24 }
 0x45d   : > { %24614 = vmatpush3.xpose.msk.msra.mxu1 %vm1193_vm3, %v27517_v11  ;;  %24615 = vmatprep.mubr.msk.f32.mxu1 %vm26611_vm2, %v32223_v27 }
 0x45e   : > { %24623 = vmatprep.subr.mxu1 %v32223_v27  ;;  %24670 = vmatprep.mubr.msk.f32.mxu0 %vm26611_vm2, %v32223_v27 }
 0x45f   : > { %v4974_v59 = vpop.permute.xlu1 %4973 }
 0x460   : > { %24616 = vmatmul.mubr.msk.f32.vlgmr.msra.gmra.mrb[70].mxu1 %vm1193_vm3, %v27715_v29  ;;  %24669 = vmatpush3.xpose.msk.msra.mxu0 %vm1193_vm3, %v4974_v59  ;;  %v4738_v29 = vpop.permute.xlu0 %4737 }
 0x461   : > { %24624 = vmatpush3.xpose.msk.msra.mxu1 %vm1193_vm3, %v4272_v55  ;;  %24625 = vmatprep.mubr.msk.f32.mxu1 %vm26611_vm2, %v32223_v27 }
 0x462   : > { %24633 = vmatprep.subr.mxu1 %v32223_v27  ;;  %24678 = vmatprep.subr.mxu0 %v32223_v27 }
 0x463   : > { %v4972_v11 = vpop.permute.xlu1 %4971 }
 0x464   : > { %24626 = vmatmul.mubr.msk.f32.vlgmr.msra.gmra.mrb[72].mxu1 %vm1193_vm3, %v4270_v2  ;;  %24671 = vmatmul.mubr.msk.f32.vlgmr.msra.gmra.mrb[44].mxu0 %vm1193_vm3, %v4972_v11  ;;  %v4896_v50 = vpop.permute.xlu0 %4895 }
 0x465   : > { %24634 = vmatpush3.xpose.msk.msra.mxu1 %vm1193_vm3, %v4428_v16  ;;  %24635 = vmatprep.mubr.msk.f32.mxu1 %vm26611_vm2, %v32223_v27 }
 0x466   : > { %24643 = vmatprep.subr.mxu1 %v32223_v27  ;;  %24680 = vmatprep.mubr.msk.f32.mxu0 %vm26611_vm2, %v32223_v27 }
 0x467   : > { %v5243_v10 = vpop.permute.xlu1 %5242 }
 0x468   : > { %24636 = vmatmul.mubr.msk.f32.vlgmr.msra.gmra.mrb[74].mxu1 %vm1193_vm3, %v4426_v49  ;;  %v4894_v55 = vpop.permute.xlu0 %4893 }
 0x469   : > { %24644 = vmatpush3.xpose.msk.msra.mxu1 %vm1193_vm3, %v4584_v58  ;;  %24645 = vmatprep.mubr.msk.f32.mxu1 %vm26611_vm2, %v32223_v27 }
 0x46a   : > { %24653 = vmatprep.subr.mxu1 %v32223_v27 }
 0x46c   : > { %24646 = vmatmul.mubr.msk.f32.vlgmr.msra.gmra.mrb[76].mxu1 %vm1193_vm3, %v4582_v30 }
 0x46d   : > { %24654 = vmatpush3.xpose.msk.msra.mxu1 %vm1193_vm3, %v4740_v54  ;;  %24655 = vmatprep.mubr.msk.f32.mxu1 %vm26611_vm2, %v32223_v27 }
 0x46e   : > { %24663 = vmatprep.subr.mxu1 %v32223_v27 }
 0x470   : > { %24656 = vmatmul.mubr.msk.f32.vlgmr.msra.gmra.mrb[78].mxu1 %vm1193_vm3, %v4738_v29 }
 0x471   : > { %24664 = vmatpush3.xpose.msk.msra.mxu1 %vm1193_vm3, %v4896_v50  ;;  %24665 = vmatprep.mubr.msk.f32.mxu1 %vm26611_vm2, %v32223_v27 }
 0x472   : > { %24673 = vmatprep.subr.mxu1 %v32223_v27 }
 0x474   : > { %24666 = vmatmul.mubr.msk.f32.vlgmr.msra.gmra.mrb[80].mxu1 %vm1193_vm3, %v4894_v55 }
 0x475   : > { %24674 = vmatpush3.msra.mxu1 %v5243_v10  ;;  %24675 = vmatprep.mubr.msk.f32.mxu1 %vm26611_vm2, %v32223_v27 }
 0x476   : > { %24683 = vmatprep.subr.mxu1 %v32223_v27 }
 0x4b1   : > { %v27808_v61 = vpop.f32.mrb[32].mxu1 }
 0x4b2   : > { %32250 = vst [vmem:[#allocation36_spill] sm:$0xff] %v27808_v61  ;;  %v24517_v41 = vpop.f32.mrb[33].mxu1 }
 0x4b5   : > { %v27810_v12 = vpop.f32.mrb[34].mxu1 }
 0x4b6   : > { %32251 = vst [vmem:[#allocation40_spill] sm:$0xff] %v27810_v12  ;;  %v24522_v2 = vpop.f32.mrb[35].mxu1 }
 0x4b9   : > { %v27812_v21 = vpop.f32.mrb[36].mxu1 }
 0x4ba   : > { %32252 = vst [vmem:[#allocation37_spill] sm:$0xff] %v27812_v21  ;;  %v24527_v23 = vpop.f32.mrb[37].mxu1 }
 0x4bd   : > { %v27814_v15 = vpop.f32.mrb[38].mxu1 }
 0x4be   : > { %32253 = vst [vmem:[#allocation38_spill] sm:$0xff] %v27814_v15  ;;  %v24532_v16 = vpop.f32.mrb[39].mxu1 }
 0x4c1   : > { %v27816_v40 = vpop.f32.mrb[40].mxu1 }
 0x4c2   : > { %32254 = vst [vmem:[#allocation41_spill] sm:$0xff] %v27816_v40  ;;  %v24537_v47 = vpop.f32.mrb[41].mxu1 }
 0x4c7   : > { %v27818_v49 = vpop.f32.mrb[42].mxu1 }
 0x4c8   : > { %32255 = vst [vmem:[#allocation42_spill] sm:$0xff] %v27818_v49  ;;  %v24542_v60 = vpop.f32.mrb[43].mxu1 }
 0x4cb   : > { %v27820_v53 = vpop.f32.mrb[44].mxu1 }
 0x4cc   : > { %32256 = vst [vmem:[#allocation53_spill] sm:$0xff] %v27820_v53  ;;  %v24547_v26 = vpop.f32.mrb[45].mxu1 }
 0x4cf   : > { %v27822_v58 = vpop.f32.mrb[46].mxu1 }
 0x4d0   : > { %32257 = vst [vmem:[#allocation54_spill] sm:$0xff] %v27822_v58  ;;  %v24552_v9 = vpop.f32.mrb[47].mxu1 }
 0x4d5   : > { %v27824_v19 = vpop.f32.mrb[48].mxu1 }
 0x4d6   : > { %32258 = vst [vmem:[#allocation55_spill] sm:$0xff] %v27824_v19  ;;  %v24557_v44 = vpop.f32.mrb[49].mxu1 }
 0x4d9   : > { %v27826_v22 = vpop.f32.mrb[50].mxu1 }
 0x4da   : > { %32259 = vst [vmem:[#allocation56_spill] sm:$0xff] %v27826_v22  ;;  %v24562_v30 = vpop.f32.mrb[51].mxu1 }
 0x4dd   : > { %v27828_v24 = vpop.f32.mrb[52].mxu1 }
 0x4de   : > { %32260 = vst [vmem:[#allocation57_spill] sm:$0xff] %v27828_v24  ;;  %v24567_v31 = vpop.f32.mrb[53].mxu1 }
 0x4df   : > { %v4265_v59 = vpop.f32.mrb[34].mxu0 }
 0x4e0   : > { %v27832_v54 = vsel %vm26902_vm1, %v4265_v59, -32767.0  ;;  %v24622_v11 = vpop.f32.mrb[35].mxu0 }
 0x4e1   : > { %v5080_v29 = vsel %vm1193_vm3, %v27832_v54, -inf }
 0x4e2   : > { %5081 = vmax.xlane.f32.xlu0 %v5080_v29 }
 0x4e3   : > { %v27836_v50 = vpop.f32.mrb[54].mxu1 }
 0x4e4   : > { %32261 = vst [vmem:[#allocation58_spill] sm:$0xff] %v27836_v50  ;;  %v24572_v55 = vpop.f32.mrb[55].mxu1 }
 0x4e7   : > { %v27838_v10 = vpop.f32.mrb[56].mxu1 }
 0x4e8   : > { %32262 = vst [vmem:[#allocation59_spill] sm:$0xff] %v27838_v10  ;;  %v24577_v41 = vpop.f32.mrb[57].mxu1 }
 0x4e9   : > { %v5076_v41 = vpop.xlane.xlu0 %5075 }
 0x4eb   : > { %v27840_v2 = vpop.f32.mrb[58].mxu1 }
 0x4ec   : > { %32263 = vst [vmem:[#allocation60_spill] sm:$0xff] %v27840_v2  ;;  %v24582_v23 = vpop.f32.mrb[59].mxu1 }
 0x517   : > { %v4421_v16 = vpop.f32.mrb[36].mxu0 }
 0x518   : > { %v27844_v47 = vsel %vm26902_vm1, %v4421_v16, -32767.0  ;;  %v24632_v60 = vpop.f32.mrb[37].mxu0 }
 0x519   : > { %v5086_v26 = vsel %vm1193_vm3, %v27844_v47, -inf  ;;  %v5116_v60 = vsub.f32 %v27671_v6, %v5076_v41 }
 0x51a   : > { %5087 = vmax.xlane.f32.xlu0 %v5086_v26 }
 0x51b   : > { %v5135_v53 = vmul.f32 1.442695, %v5116_v60 }
 0x51c   : > { %v27848_v9 = vpop.f32.mrb[60].mxu1 }
 0x51d   : > { %32264 = vst [vmem:[#allocation61_spill] sm:$0xff] %v27848_v9  ;;  %v24587_v44 = vpop.f32.mrb[61].mxu1  ;;  %26074 = vpow2.f32 %v5135_v53 }
 0x51f   : > { %v4577_v30 = vpop.f32.mrb[38].mxu0 }
 0x520   : > { %v27852_v31 = vsel %vm26902_vm1, %v4577_v30, -32767.0  ;;  %v27854_v59 = vpop.f32.mrb[62].mxu1  ;;  %v24642_v11 = vpop.f32.mrb[39].mxu0 }
 0x521   : > { %32265 = vst [vmem:[#allocation62_spill] sm:$0xff] %v27854_v59  ;;  %v24592_v29 = vpop.f32.mrb[63].mxu1  ;;  %v5092_v55 = vsel %vm1193_vm3, %v27852_v31, -inf }
 0x522   : > { %5093 = vmax.xlane.f32.xlu0 %v5092_v55 }
 0x527   : > { %v27858_v23 = vpop.f32.mrb[64].mxu1  ;;  %v4733_v16 = vpop.f32.mrb[40].mxu0 }
 0x528   : > { %v24597_v26 = vpop.f32.mrb[65].mxu1  ;;  %v27863_v44 = vsel %vm26902_vm1, %v4733_v16, -32767.0  ;;  %v24652_v30 = vpop.f32.mrb[41].mxu0 }
 0x529   : > { %v5098_v11 = vsel %vm1193_vm3, %v27863_v44, -inf }
 0x52a   : > { %5099 = vmax.xlane.f32.xlu0 %v5098_v11 }
 0x52b   : > { %v3953_v29 = vpop.f32.mrb[66].mxu1 }
 0x52c   : > { %v27869_v55 = vsel %vm26902_vm1, %v3953_v29, -32767.0  ;;  %v24602_v49 = vpop.f32.mrb[67].mxu1 }
 0x52d   : > { %v5068_v6 = vsel %vm1193_vm3, %v27869_v55, -inf }
 0x52e   : > { %5069 = vmax.xlane.f32.xlu1 %v5068_v6 }
 0x52f   : > { %v27873_v41 = vpop.f32.mrb[68].mxu1  ;;  %v4889_v16 = vpop.f32.mrb[42].mxu0 }
 0x530   : > { %v24607_v26 = vpop.f32.mrb[69].mxu1  ;;  %v27877_v30 = vsel %vm26902_vm1, %v4889_v16, -32767.0  ;;  %v24662_v11 = vpop.f32.mrb[43].mxu0 }
 0x531   : > { %v5104_v60 = vsel %vm1193_vm3, %v27877_v30, -inf  ;;  %v27887_v16 = vpop.eup %26074 }
 0x532   : > { %5105 = vmax.xlane.f32.xlu0 %v5104_v60  ;;  %v5170_v60 = vsel %vm1193_vm3, %v27887_v16, 0.0 }
 0x533   : > { %v4187_v29 = vpop.f32.mrb[70].mxu1 }
 0x534   : > { %v24617_v49 = vpop.f32.mrb[71].mxu1 }
 0x537   : > { %v4343_v59 = vpop.f32.mrb[72].mxu1  ;;  %v5045_v40 = vpop.f32.mrb[44].mxu0 }
 0x538   : > { %v24627_v9 = vpop.f32.mrb[73].mxu1  ;;  %v27883_v6 = vsel %vm26902_vm1, %v5045_v40, -32767.0  ;;  %v24672_v53 = vpop.f32.mrb[45].mxu0  ;;  %v27920_v50 = vsel %vm26902_vm1, %v4343_v59, -32767.0 }
 0x539   : > { %v5110_v26 = vsel %vm1193_vm3, %v27883_v6, -inf }
 0x53a   : > { %5111 = vmax.xlane.f32.xlu0 %v5110_v26 }
 0x53b   : > { %v4499_v11 = vpop.f32.mrb[74].mxu1 }
 0x53c   : > { %v24637_v15 = vpop.f32.mrb[75].mxu1 }
 0x53e   : > { %5171 = vadd.xlane.f32.xlu0 %v5170_v60 }
 0x53f   : > { %5473 = vrot.lane.b32.xlu1 %v27580_v39, %s26613_s22  ;;  %v4655_v9 = vpop.f32.mrb[76].mxu1 }
 0x540   : > { %v24647_v49 = vpop.f32.mrb[77].mxu1 }
 0x543   : > { %5627 = vrot.lane.b32.xlu1 %v27611_v46, %s26613_s22  ;;  %v4811_v40 = vpop.f32.mrb[78].mxu1 }
 0x544   : > { %v24657_v53 = vpop.f32.mrb[79].mxu1 }
 0x547   : > { %5704 = vrot.lane.b32.xlu1 %v27624_v48, %s26613_s22  ;;  %v4967_v26 = vpop.f32.mrb[80].mxu1 }
 0x548   : > { %v24667_v2 = vpop.f32.mrb[81].mxu1 }
 0x549   : > { %v27910_v2 = vsel %vm26902_vm1, %v4187_v29, -32767.0  ;;  %v27926_v29 = vsel %vm26902_vm1, %v4499_v11, -32767.0  ;;  %v27944_v11 = vsel %vm26902_vm1, %v4967_v26, -32767.0 }
 0x54a   : > { %v5077_v21 = vsel %vm1193_vm3, %v27910_v2, -inf }
 0x54b   : > { %5781 = vrot.lane.b32.xlu1 %v27633_v0, %s26613_s22 }
 0x54f   : > { %5935 = vrot.lane.b32.xlu1 %v27651_v34, %s26613_s22 }
 0x553   : > { %6089 = vrot.lane.b32.xlu1 %v27674_v42, %s26613_s22 }
 0x557   : > { %6243 = vrot.lane.b32.xlu1 %v27697_v14, %s26613_s22 }
 0x55b   : > { %6397 = vrot.lane.b32.xlu1 %v27723_v51, %s26613_s22  ;;  %v32267_v51 = vld [vmem:[#allocation19_spill] sm:$0xff] }
 0x56f   : > { %v5082_v15 = vpop.xlane.xlu0 %5081 }
 0x570   : > { %v5118_v60 = vsub.f32 %v27832_v54, %v5082_v15  ;;  %v5083_v54 = vsel %vm1193_vm3, %v27920_v50, -inf  ;;  %v5089_v15 = vsel %vm1193_vm3, %v27926_v29, -inf }
 0x572   : > { %v5139_v49 = vmul.f32 1.442695, %v5118_v60  ;;  %v27932_v60 = vsel %vm26902_vm1, %v4655_v9, -32767.0  ;;  %v5107_v9 = vsel %vm1193_vm3, %v27944_v11, -inf }
 0x574   : > { %26076 = vpow2.f32 %v5139_v49 }
 0x57e   : > { %v27912_v53 = vpop.eup %26076 }
 0x57f   : > { %v5176_v10 = vsel %vm1193_vm3, %v27912_v53, 0.0  ;;  %5078 = vmax.xlane.f32.xlu1 %v5077_v21  ;;  %v5095_v21 = vsel %vm1193_vm3, %v27932_v60, -inf }
 0x580   : > { %5177 = vadd.xlane.f32.xlu0 %v5176_v10  ;;  %v27938_v10 = vsel %vm26902_vm1, %v4811_v40, -32767.0 }
 0x581   : > { %v5101_v59 = vsel %vm1193_vm3, %v27938_v10, -inf }
 0x583   : > { %5084 = vmax.xlane.f32.xlu1 %v5083_v54 }
 0x587   : > { %5090 = vmax.xlane.f32.xlu1 %v5089_v15 }
 0x58b   : > { %5096 = vmax.xlane.f32.xlu1 %v5095_v21 }
 0x58f   : > { %5102 = vmax.xlane.f32.xlu1 %v5101_v59 }
 0x593   : > { %5108 = vmax.xlane.f32.xlu1 %v5107_v9 }
 0x5a7   : > { %v5088_v49 = vpop.xlane.xlu0 %5087 }
 0x5a8   : > { %v5120_v54 = vsub.f32 %v27844_v47, %v5088_v49 }
 0x5aa   : > { %v5143_v15 = vmul.f32 1.442695, %v5120_v54 }
 0x5ac   : > { %26078 = vpow2.f32 %v5143_v15 }
 0x5af   : > { %v5094_v40 = vpop.xlane.xlu0 %5093 }
 0x5b0   : > { %v5122_v21 = vsub.f32 %v27852_v31, %v5094_v40 }
 0x5b2   : > { %v5147_v12 = vmul.f32 1.442695, %v5122_v21  ;;  %v27977_v21 = vsel %vm26902_vm1, %v27873_v41, -32767.0 }
 0x5b4   : > { %26080 = vpow2.f32 %v5147_v12 }
 0x5b6   : > { %v27950_v24 = vpop.eup %26078 }
 0x5b7   : > { %v5100_v61 = vpop.xlane.xlu0 %5099  ;;  %v5182_v26 = vsel %vm1193_vm3, %v27950_v24, 0.0 }
 0x5b8   : > { %v5124_v59 = vsub.f32 %v27863_v44, %v5100_v61  ;;  %5183 = vadd.xlane.f32.xlu0 %v5182_v26  ;;  %v5071_v26 = vsel %vm1193_vm3, %v27977_v21, -inf }
 0x5ba   : > { %v5151_v9 = vmul.f32 1.442695, %v5124_v59 }
 0x5bc   : > { %26082 = vpow2.f32 %v5151_v9 }
 0x5be   : > { %v27955_v22 = vpop.eup %26080 }
 0x5bf   : > { %v5106_v47 = vpop.xlane.xlu0 %5105  ;;  %v5188_v49 = vsel %vm1193_vm3, %v27955_v22, 0.0 }
 0x5c0   : > { %v5126_v31 = vsub.f32 %v27877_v30, %v5106_v47  ;;  %5189 = vadd.xlane.f32.xlu0 %v5188_v49  ;;  %v5049_v30 = vsel %vm26902_vm1, %v27858_v23, -32767.0 }
 0x5c1   : > { %v5065_v40 = vsel %vm1193_vm3, %v5049_v30, -inf }
 0x5c2   : > { %v5155_v12 = vmul.f32 1.442695, %v5126_v31 }
 0x5c4   : > { %26084 = vpow2.f32 %v5155_v12 }
 0x5c6   : > { %v27960_v54 = vpop.eup %26082 }
 0x5c7   : > { %v5194_v15 = vsel %vm1193_vm3, %v27960_v54, 0.0  ;;  %v5112_v59 = vpop.xlane.xlu0 %5111 }
 0x5c8   : > { %5195 = vadd.xlane.f32.xlu0 %v5194_v15  ;;  %v5128_v9 = vsub.f32 %v27883_v6, %v5112_v59 }
 0x5ca   : > { %v5159_v47 = vmul.f32 1.442695, %v5128_v9 }
 0x5cb   : > { %v27988_v41 = vpop.xlane.xlu0 %5171 }
 0x5cc   : > { %26086 = vpow2.f32 %v5159_v47 }
 0x5ce   : > { %v27964_v61 = vpop.eup %26084 }
 0x5cf   : > { %v5200_v44 = vsel %vm1193_vm3, %v27964_v61, 0.0 }
 0x5d0   : > { %5201 = vadd.xlane.f32.xlu0 %v5200_v44 }
 0x5d6   : > { %v27984_v23 = vpop.eup %26086 }
 0x5d7   : > { %v5206_v49 = vsel %vm1193_vm3, %v27984_v23, 0.0 }
 0x5e6   : > { %5319 = vrot.lane.b32.xlu0 %v27545_v1, %s26613_s22 }
 0x605   : > { %5066 = vmax.xlane.f32.xlu0 %v5065_v40 }
 0x609   : > { %5072 = vmax.xlane.f32.xlu0 %v5071_v26  ;;  %v5070_v26 = vpop.xlane.xlu1 %5069 }
 0x60a   : > { %v5114_v59 = vsub.f32 %v27869_v55, %v5070_v26  ;;  %v32268_v26 = vld [vmem:[#allocation5_spill] sm:$0xff] }
 0x60c   : > { %v5131_v9 = vmul.f32 1.442695, %v5114_v59 }
 0x60d   : > { %v27990_v31 = vpop.xlane.xlu0 %5177 }
 0x60e   : > { %26088 = vpow2.f32 %v5131_v9 }
 0x618   : > { %v28012_v47 = vpop.eup %26088 }
 0x61f   : > { %5396 = vrot.lane.b32.xlu0 %v27557_v18, %s26613_s22 }
 0x63e   : > { %5207 = vadd.xlane.f32.xlu0 %v5206_v49  ;;  %v5164_v49 = vsel %vm1193_vm3, %v28012_v47, 0.0 }
 0x645   : > { %v27992_v12 = vpop.xlane.xlu0 %5183 }
 0x64d   : > { %v27996_v15 = vpop.xlane.xlu0 %5189 }
 0x654   : > { %5550 = vrot.lane.b32.xlu0 %v27594_v17, %s26613_s22 }
 0x655   : > { %v28000_v6 = vpop.xlane.xlu0 %5195 }
 0x658   : > { %5858 = vrot.lane.b32.xlu0 %v27642_v56, %s26613_s22 }
 0x65c   : > { %6012 = vrot.lane.b32.xlu0 %v27660_v57, %s26613_s22 }
 0x65d   : > { %v28004_v44 = vpop.xlane.xlu0 %5201 }
 0x660   : > { %6166 = vrot.lane.b32.xlu0 %v27688_v25, %s26613_s22 }
 0x661   : > { %v5320_v40 = vpop.permute.xlu0 %5319 }
 0x662   : > { %24679 = vmatpush3.msra.mxu0 %v5320_v40  ;;  %v32266_v40 = vld [vmem:[#allocation3_spill] sm:$0xff] }
 0x663   : > { %24688 = vmatprep.subr.mxu0 %v32223_v27 }
 0x664   : > { %6320 = vrot.lane.b32.xlu0 %v27708_v36, %s26613_s22 }
 0x683   : > { %5165 = vadd.xlane.f32.xlu0 %v5164_v49  ;;  %v32272_v49 = vld [vmem:[#allocation4_spill] sm:$0xff] }
 0x692   : > { %v5067_v58 = vpop.xlane.xlu0 %5066 }
 0x693   : > { %v5113_v19 = vsub.f32 %v5049_v30, %v5067_v58  ;;  %v32269_v58 = vld [vmem:[#allocation21_spill] sm:$0xff] }
 0x695   : > { %v5129_v33 = vmul.f32 1.442695, %v5113_v19  ;;  %v32270_v19 = vld [vmem:[#allocation7_spill] sm:$0xff] }
 0x697   : > { %26090 = vpow2.f32 %v5129_v33  ;;  %v28028_v33 = vpop.permute.xlu1 %5473 }
 0x699   : > { %6475 = vrot.lane.b32.xlu0 %v32266_v40, %s26615_s28 }
 0x69b   : > { %v28032_v30 = vpop.permute.xlu1 %5627 }
 0x69d   : > { %6473 = vrot.lane.b32.xlu0 %v32267_v51, %s26616_s24 }
 0x69f   : > { %v28038_v9 = vpop.permute.xlu1 %5704 }
 0x6a0   : > { %32271 = vst [vmem:[#allocation63_spill] sm:$0xff] %v28038_v9  ;;  %v32275_v9 = vld [vmem:[#allocation23_spill] sm:$0xff] }
 0x6a1   : > { %v28020_v55 = vpop.eup %26090  ;;  %6631 = vrot.lane.b32.xlu0 %v32268_v26, %s26615_s28 }
 0x6a2   : > { %v5161_v59 = vsel %vm1193_vm3, %v28020_v55, 0.0 }
 0x6a3   : > { %5162 = vadd.xlane.f32.xlu1 %v5161_v59  ;;  %v32273_v59 = vld [vmem:[#allocation22_spill] sm:$0xff] }
 0x6a5   : > { %6629 = vrot.lane.b32.xlu0 %v32269_v58, %s26616_s24 }
 0x6a9   : > { %6787 = vrot.lane.b32.xlu0 %v32270_v19, %s26615_s28  ;;  %v28046_v19 = vpop.permute.xlu1 %5781 }
 0x6ad   : > { %6785 = vrot.lane.b32.xlu0 %v27142_v3, %s26616_s24  ;;  %v32274_v3 = vld [vmem:[#allocation6_spill] sm:$0xff] }
 0x6b1   : > { %6943 = vrot.lane.b32.xlu0 %v27028_v63, %s26615_s28  ;;  %v28054_v63 = vpop.permute.xlu1 %5935 }
 0x6b4   : > { %6553 = vrot.lane.b32.xlu1 %v32272_v49, %s26615_s28 }
 0x6b5   : > { %6941 = vrot.lane.b32.xlu0 %v27165_v8, %s26616_s24  ;;  %v32276_v8 = vld [vmem:[#allocation8_spill] sm:$0xff] }
 0x6b8   : > { %6551 = vrot.lane.b32.xlu1 %v32273_v59, %s26616_s24  ;;  %v28062_v59 = vpop.permute.xlu1 %6089 }
 0x6b9   : > { %7099 = vrot.lane.b32.xlu0 %v27048_v43, %s26615_s28  ;;  %v5073_v43 = vpop.xlane.xlu0 %5072 }
 0x6bc   : > { %6709 = vrot.lane.b32.xlu1 %v32274_v3, %s26615_s28 }
 0x6bd   : > { %7097 = vrot.lane.b32.xlu0 %v27183_v28, %s26616_s24  ;;  %v28070_v28 = vpop.permute.xlu1 %6243 }
 0x6c0   : > { %6707 = vrot.lane.b32.xlu1 %v32275_v9, %s26616_s24 }
 0x6c1   : > { %7255 = vrot.lane.b32.xlu0 %v27059_v5, %s26615_s28  ;;  %v28078_v5 = vpop.permute.xlu1 %6397 }
 0x6c4   : > { %6865 = vrot.lane.b32.xlu1 %v32276_v8, %s26615_s28 }
 0x6c5   : > { %7253 = vrot.lane.b32.xlu0 %v27201_v35, %s26616_s24  ;;  %v5079_v35 = vpop.xlane.xlu1 %5078 }
 0x6c8   : > { %6863 = vrot.lane.b32.xlu1 %v27155_v13, %s26616_s24 }
 0x6c9   : > { %7411 = vrot.lane.b32.xlu0 %v27069_v32, %s26615_s28  ;;  %v5085_v32 = vpop.xlane.xlu1 %5084 }
 0x6cc   : > { %7021 = vrot.lane.b32.xlu1 %v27036_v45, %s26615_s28 }
 0x6cd   : > { %7409 = vrot.lane.b32.xlu0 %v27219_v62, %s26616_s24  ;;  %v5115_v62 = vsub.f32 %v27977_v21, %v5073_v43 }
 0x6cf   : > { %v5133_v45 = vmul.f32 1.442695, %v5115_v62 }
 0x6d0   : > { %7019 = vrot.lane.b32.xlu1 %v27174_v20, %s26616_s24  ;;  %v5091_v20 = vpop.xlane.xlu1 %5090 }
 0x6d1   : > { %7567 = vrot.lane.b32.xlu0 %v32230_v52, %s26615_s28  ;;  %v5117_v52 = vsub.f32 %v27910_v2, %v5079_v35  ;;  %26092 = vpow2.f32 %v5133_v45  ;;  %v5121_v21 = vsub.f32 %v27926_v29, %v5091_v20 }
 0x6d3   : > { %v5145_v35 = vmul.f32 1.442695, %v5121_v21 }
 0x6d4   : > { %v5097_v13 = vpop.xlane.xlu1 %5096 }
 0x6d5   : > { %7565 = vrot.lane.b32.xlu0 %v32232_v7, %s26616_s24  ;;  %v5137_v7 = vmul.f32 1.442695, %v5117_v52  ;;  %v5123_v62 = vsub.f32 %v27932_v60, %v5097_v13 }
 0x6d7   : > { %26094 = vpow2.f32 %v5137_v7 }
 0x6d9   : > { %7989 = vrot.lane.b32.xlu0 %v27545_v1, %s26616_s24  ;;  %v5119_v1 = vsub.f32 %v27920_v50, %v5085_v32 }
 0x6db   : > { %v5141_v43 = vmul.f32 1.442695, %v5119_v1  ;;  %v28105_v45 = vpop.eup %26092  ;;  %v5149_v1 = vmul.f32 1.442695, %v5123_v62 }
 0x6dc   : > { %v5167_v7 = vsel %vm1193_vm3, %v28105_v45, 0.0 }
 0x6dd   : > { %8065 = vrot.lane.b32.xlu0 %v27557_v18, %s26616_s24  ;;  %v28098_v18 = vpop.permute.xlu0 %5396  ;;  %26096 = vpow2.f32 %v5141_v43 }
 0x6de   : > { %26098 = vpow2.f32 %v5145_v35 }
 0x6df   : > { %26100 = vpow2.f32 %v5149_v1 }
 0x6e1   : > { %8217 = vrot.lane.b32.xlu0 %v27594_v17, %s26616_s24  ;;  %v5103_v17 = vpop.xlane.xlu1 %5102  ;;  %v28103_v32 = vpop.xlane.xlu0 %5207 }
 0x6e2   : > { %v5125_v20 = vsub.f32 %v27938_v10, %v5103_v17  ;;  %v28112_v50 = vpop.eup %26094 }
 0x6e3   : > { %v5173_v17 = vsel %vm1193_vm3, %v28112_v50, 0.0 }
 0x6e4   : > { %v5153_v13 = vmul.f32 1.442695, %v5125_v20 }
 0x6e5   : > { %8521 = vrot.lane.b32.xlu0 %v27642_v56, %s26616_s24  ;;  %v5109_v52 = vpop.xlane.xlu1 %5108  ;;  %v28114_v2 = vpop.permute.xlu0 %5550 }
 0x6e6   : > { %v5127_v29 = vsub.f32 %v27944_v11, %v5109_v52  ;;  %26102 = vpow2.f32 %v5153_v13 }
 0x6e7   : > { %v28121_v60 = vpop.eup %26096 }
 0x6e8   : > { %v5157_v10 = vmul.f32 1.442695, %v5127_v29  ;;  %v5179_v21 = vsel %vm1193_vm3, %v28121_v60, 0.0  ;;  %v28129_v35 = vpop.eup %26098 }
 0x6e9   : > { %8673 = vrot.lane.b32.xlu0 %v27660_v57, %s26616_s24  ;;  %v28125_v43 = vpop.permute.xlu0 %5858  ;;  %v5185_v11 = vsel %vm1193_vm3, %v28129_v35, 0.0  ;;  %v28135_v62 = vpop.eup %26100 }
 0x6ea   : > { %26104 = vpow2.f32 %v5157_v10  ;;  %v5191_v20 = vsel %vm1193_vm3, %v28135_v62, 0.0 }
 0x6ed   : > { %8825 = vrot.lane.b32.xlu0 %v27688_v25, %s26616_s24  ;;  %v28137_v1 = vpop.permute.xlu0 %6012 }
 0x6f0   : > { %v28143_v52 = vpop.eup %26102 }
 0x6f1   : > { %8977 = vrot.lane.b32.xlu0 %v27708_v36, %s26616_s24  ;;  %v5197_v13 = vsel %vm1193_vm3, %v28143_v52, 0.0 }
 0x6f4   : > { %5168 = vadd.xlane.f32.xlu1 %v5167_v7  ;;  %v28145_v7 = vpop.permute.xlu0 %6166  ;;  %v28149_v29 = vpop.eup %26104 }
 0x6f5   : > { %9131 = vrot.lane.b32.xlu0 %v32266_v40, %s26617_s30 }
 0x6f8   : > { %5174 = vadd.xlane.f32.xlu1 %v5173_v17  ;;  %v5203_v17 = vsel %vm1193_vm3, %v28149_v29, 0.0  ;;  %v28153_v10 = vpop.permute.xlu0 %6320 }
 0x6f9   : > { %9129 = vrot.lane.b32.xlu0 %v32267_v51, %s26618_s8 }
 0x6fc   : > { %5180 = vadd.xlane.f32.xlu1 %v5179_v21 }
 0x6fd   : > { %9287 = vrot.lane.b32.xlu0 %v32268_v26, %s26617_s30 }
 0x700   : > { %5186 = vadd.xlane.f32.xlu1 %v5185_v11 }
 0x701   : > { %9285 = vrot.lane.b32.xlu0 %v32269_v58, %s26618_s8 }
 0x704   : > { %5192 = vadd.xlane.f32.xlu1 %v5191_v20 }
 0x708   : > { %5198 = vadd.xlane.f32.xlu1 %v5197_v13  ;;  %v32277_v13 = vld [vmem:[#allocation14_spill] sm:$0xff] }
 0x70c   : > { %5204 = vadd.xlane.f32.xlu1 %v5203_v17 }
 0x710   : > { %v5166_v21 = vpop.xlane.xlu0 %5165 }
 0x711   : > { %26106 = vrcp.f32 %v5166_v21  ;;  %v32282_v21 = vld [vmem:[#allocation35_spill] sm:$0xff] }
 0x712   : > { %26108 = vrcp.f32 %v27988_v41 }
 0x713   : > { %26110 = vrcp.f32 %v27990_v31 }
 0x714   : > { %26112 = vrcp.f32 %v27992_v12  ;;  %v32278_v12 = vld [vmem:[#allocation29_spill] sm:$0xff] }
 0x715   : > { %26114 = vrcp.f32 %v27996_v15 }
 0x716   : > { %26116 = vrcp.f32 %v28000_v6 }
 0x717   : > { %26118 = vrcp.f32 %v28004_v44 }
 0x718   : > { %26120 = vrcp.f32 %v28103_v32  ;;  %v32281_v32 = vld [vmem:[#allocation34_spill] sm:$0xff] }
 0x71b   : > { %v26107_v11 = vpop.eup %26106 }
 0x71c   : > { %v5212_v20 = vmul.f32 %v26107_v11, %v28012_v47  ;;  %v26109_v58 = vpop.eup %26108 }
 0x71d   : > { %7177 = vrot.lane.b32.xlu1 %v32277_v13, %s26615_s28  ;;  %v5216_v41 = vmul.f32 %v26109_v58, %v27887_v16  ;;  %v26111_v31 = vpop.eup %26110  ;;  %v32279_v16 = vld [vmem:[#allocation16_spill] sm:$0xff] }
 0x71e   : > { %24681 = vmatmul.mubr.msk.f32.vlgmr.msra.gmra.mrb[46].mxu0 %vm1193_vm3, %v5212_v20  ;;  %v5220_v15 = vmul.f32 %v26111_v31, %v27912_v53  ;;  %v26113_v47 = vpop.eup %26112  ;;  %v32280_v53 = vld [vmem:[#allocation31_spill] sm:$0xff]  ;;  %v32283_v31 = vld [vmem:[#allocation52_spill] sm:$0xff] }
 0x71f   : > { %24689 = vmatpush3.msra.mxu0 %v28028_v33  ;;  %24690 = vmatprep.mubr.msk.f32.mxu0 %vm26611_vm2, %v32223_v27  ;;  %v5224_v6 = vmul.f32 %v26113_v47, %v27950_v24  ;;  %v26115_v58 = vpop.eup %26114  ;;  %v32284_v47 = vld [vmem:[#allocation22_spill] sm:$0xff] }
 0x720   : > { %24698 = vmatprep.subr.mxu0 %v32223_v27  ;;  %v5228_v44 = vmul.f32 %v26115_v58, %v27955_v22  ;;  %v26117_v33 = vpop.eup %26116 }
 0x721   : > { %7175 = vrot.lane.b32.xlu1 %v32278_v12, %s26616_s24 }
 0x722   : > { %24691 = vmatmul.mubr.msk.f32.vlgmr.msra.gmra.mrb[48].mxu0 %vm1193_vm3, %v5216_v41  ;;  %v28266_v41 = vpop.permute.xlu0 %6475 }
 0x723   : > { %24699 = vmatpush3.msra.mxu0 %v28032_v30  ;;  %24700 = vmatprep.mubr.msk.f32.mxu0 %vm26611_vm2, %v32223_v27 }
 0x724   : > { %24708 = vmatprep.subr.mxu0 %v32223_v27 }
 0x725   : > { %7333 = vrot.lane.b32.xlu1 %v32279_v16, %s26615_s28 }
 0x726   : > { %24701 = vmatmul.mubr.msk.f32.vlgmr.msra.gmra.mrb[50].mxu0 %vm1193_vm3, %v5220_v15  ;;  %v28270_v15 = vpop.permute.xlu0 %6473 }
 0x727   : > { %24709 = vmatpush3.msra.mxu0 %v28046_v19  ;;  %24710 = vmatprep.mubr.msk.f32.mxu0 %vm26611_vm2, %v32223_v27  ;;  %v26119_v19 = vpop.eup %26118 }
 0x728   : > { %24718 = vmatprep.subr.mxu0 %v32223_v27  ;;  %v5236_v30 = vmul.f32 %v26119_v19, %v27964_v61 }
 0x729   : > { %7331 = vrot.lane.b32.xlu1 %v32280_v53, %s26616_s24 }
 0x72a   : > { %24711 = vmatmul.mubr.msk.f32.vlgmr.msra.gmra.mrb[52].mxu0 %vm1193_vm3, %v5224_v6  ;;  %v28276_v6 = vpop.permute.xlu0 %6631 }
 0x72b   : > { %24719 = vmatpush3.msra.mxu0 %v28054_v63  ;;  %24720 = vmatprep.mubr.msk.f32.mxu0 %vm26611_vm2, %v32223_v27  ;;  %v5232_v63 = vmul.f32 %v26117_v33, %v27960_v54 }
 0x72c   : > { %24728 = vmatprep.subr.mxu0 %v32223_v27 }
 0x72d   : > { %7489 = vrot.lane.b32.xlu1 %v27074_v37, %s26615_s28 }
 0x72e   : > { %24721 = vmatmul.mubr.msk.f32.vlgmr.msra.gmra.mrb[54].mxu0 %vm1193_vm3, %v5228_v44  ;;  %v28280_v58 = vpop.permute.xlu0 %6629 }
 0x72f   : > { %24729 = vmatpush3.msra.mxu0 %v28062_v59  ;;  %24730 = vmatprep.mubr.msk.f32.mxu0 %vm26611_vm2, %v32223_v27  ;;  %v26121_v59 = vpop.eup %26120 }
 0x730   : > { %v5163_v24 = vpop.xlane.xlu1 %5162  ;;  %24738 = vmatprep.subr.mxu0 %v32223_v27  ;;  %v5240_v54 = vmul.f32 %v26121_v59, %v27984_v23 }
 0x731   : > { %26122 = vrcp.f32 %v5163_v24  ;;  %7487 = vrot.lane.b32.xlu1 %v27228_v4, %s26616_s24 }
 0x732   : > { %24731 = vmatmul.mubr.msk.f32.vlgmr.msra.gmra.mrb[56].mxu0 %vm1193_vm3, %v5232_v63  ;;  %v28284_v44 = vpop.permute.xlu0 %6787 }
 0x733   : > { %24739 = vmatpush3.msra.mxu0 %v28070_v28  ;;  %24740 = vmatprep.mubr.msk.f32.mxu0 %vm26611_vm2, %v32223_v27 }
 0x734   : > { %v6554_v22 = vpop.permute.xlu1 %6553  ;;  %24748 = vmatprep.subr.mxu0 %v32223_v27 }
 0x735   : > { %7645 = vrot.lane.b32.xlu1 %v27087_v38, %s26615_s28 }
 0x736   : > { %24741 = vmatmul.mubr.msk.f32.vlgmr.msra.gmra.mrb[58].mxu0 %vm1193_vm3, %v5236_v30  ;;  %v28286_v33 = vpop.permute.xlu0 %6785 }
 0x737   : > { %24749 = vmatpush3.msra.mxu0 %v28078_v5  ;;  %24750 = vmatprep.mubr.msk.f32.mxu0 %vm26611_vm2, %v32223_v27 }
 0x738   : > { %v6552_v28 = vpop.permute.xlu1 %6551  ;;  %24758 = vmatprep.subr.mxu0 %v32223_v27 }
 0x739   : > { %7643 = vrot.lane.b32.xlu1 %v32281_v32, %s26616_s24 }
 0x73a   : > { %24751 = vmatmul.mubr.msk.f32.vlgmr.msra.gmra.mrb[60].mxu0 %vm1193_vm3, %v5240_v54  ;;  %v28288_v24 = vpop.permute.xlu0 %6943 }
 0x73b   : > { %v26123_v61 = vpop.eup %26122  ;;  %24760 = vmatprep.mubr.msk.f32.mxu0 %vm26611_vm2, %v32223_v27 }
 0x73c   : > { %v6710_v17 = vpop.permute.xlu1 %6709  ;;  %v5210_v5 = vmul.f32 %v26123_v61, %v28020_v55 }
 0x73d   : > { %7913 = vrot.lane.b32.xlu1 %v32282_v21, %s26616_s24 }
 0x73e   : > { %24759 = vmatpush3.xpose.msk.msra.mxu0 %vm1193_vm3, %v6554_v22  ;;  %24676 = vmatmul.mubr.msk.f32.vlgmr.msra.gmra.mrb[82].mxu1 %vm1193_vm3, %v5210_v5  ;;  %v28290_v19 = vpop.permute.xlu0 %6941 }
 0x73f   : > { %24684 = vmatpush3.msra.mxu1 %v28098_v18  ;;  %24768 = vmatprep.subr.mxu0 %v32223_v27 }
 0x740   : > { %v6708_v23 = vpop.permute.xlu1 %6707  ;;  %24685 = vmatprep.mubr.msk.f32.mxu1 %vm26611_vm2, %v32223_v27  ;;  %24693 = vmatprep.subr.mxu1 %v32223_v27 }
 0x741   : > { %24761 = vmatmul.mubr.msk.f32.vlgmr.msra.gmra.mrb[62].mxu0 %vm1193_vm3, %v6552_v28  ;;  %8141 = vrot.lane.b32.xlu1 %v27580_v39, %s26616_s24 }
 0x742   : > { %24769 = vmatpush3.xpose.msk.msra.mxu0 %vm1193_vm3, %v6710_v17  ;;  %24770 = vmatprep.mubr.msk.f32.mxu0 %vm26611_vm2, %v32223_v27  ;;  %v28292_v59 = vpop.permute.xlu0 %7099 }
 0x743   : > { %24778 = vmatprep.subr.mxu0 %v32223_v27 }
 0x744   : > { %v6866_v18 = vpop.permute.xlu1 %6865 }
 0x745   : > { %24771 = vmatmul.mubr.msk.f32.vlgmr.msra.gmra.mrb[64].mxu0 %vm1193_vm3, %v6708_v23  ;;  %8293 = vrot.lane.b32.xlu1 %v27611_v46, %s26616_s24 }
 0x746   : > { %24779 = vmatpush3.xpose.msk.msra.mxu0 %vm1193_vm3, %v6866_v18  ;;  %24780 = vmatprep.mubr.msk.f32.mxu0 %vm26611_vm2, %v32223_v27  ;;  %v28296_v5 = vpop.permute.xlu0 %7097 }
 0x747   : > { %24788 = vmatprep.subr.mxu0 %v32223_v27 }
 0x748   : > { %v6864_v55 = vpop.permute.xlu1 %6863 }
 0x749   : > { %8369 = vrot.lane.b32.xlu1 %v27624_v48, %s26616_s24  ;;  %24781 = vmatmul.mubr.msk.f32.vlgmr.msra.gmra.mrb[66].mxu0 %vm1193_vm3, %v6864_v55  ;;  %v32285_v55 = vld [vmem:[#allocation63_spill] sm:$0xff] }
 0x74a   : > { %24790 = vmatprep.mubr.msk.f32.mxu0 %vm26611_vm2, %v32223_v27 }
 0x74c   : > { %v7022_v11 = vpop.permute.xlu1 %7021 }
 0x74d   : > { %8445 = vrot.lane.b32.xlu1 %v27633_v0, %s26616_s24  ;;  %24789 = vmatpush3.xpose.msk.msra.mxu0 %vm1193_vm3, %v7022_v11 }
 0x74e   : > { %24798 = vmatprep.subr.mxu0 %v32223_v27 }
 0x750   : > { %v7020_v20 = vpop.permute.xlu1 %7019 }
 0x751   : > { %8597 = vrot.lane.b32.xlu1 %v27651_v34, %s26616_s24  ;;  %24791 = vmatmul.mubr.msk.f32.vlgmr.msra.gmra.mrb[68].mxu0 %vm1193_vm3, %v7020_v20  ;;  %v28309_v20 = vpop.permute.xlu0 %7255 }
 0x752   : > { %24800 = vmatprep.mubr.msk.f32.mxu0 %vm26611_vm2, %v32223_v27 }
 0x755   : > { %8749 = vrot.lane.b32.xlu1 %v27674_v42, %s26616_s24 }
 0x759   : > { %8901 = vrot.lane.b32.xlu1 %v27697_v14, %s26616_s24 }
 0x75d   : > { %9053 = vrot.lane.b32.xlu1 %v32283_v31, %s26616_s24 }
 0x761   : > { %9209 = vrot.lane.b32.xlu1 %v32272_v49, %s26617_s30 }
 0x765   : > { %9207 = vrot.lane.b32.xlu1 %v32284_v47, %s26618_s8 }
 0x769   : > { %9365 = vrot.lane.b32.xlu1 %v32274_v3, %s26617_s30 }
 0x76d   : > { %9363 = vrot.lane.b32.xlu1 %v32275_v9, %s26618_s8 }
 0x781   : > { %v5169_v63 = vpop.xlane.xlu1 %5168 }
 0x782   : > { %26124 = vrcp.f32 %v5169_v63 }
 0x785   : > { %v5175_v22 = vpop.xlane.xlu1 %5174 }
 0x786   : > { %26126 = vrcp.f32 %v5175_v22 }
 0x789   : > { %v5181_v30 = vpop.xlane.xlu1 %5180 }
 0x78a   : > { %26128 = vrcp.f32 %v5181_v30  ;;  %v28318_v30 = vpop.permute.xlu0 %7253 }
 0x78c   : > { %v26125_v28 = vpop.eup %26124 }
 0x78d   : > { %v5187_v54 = vpop.xlane.xlu1 %5186  ;;  %v5214_v61 = vmul.f32 %v26125_v28, %v28105_v45 }
 0x78e   : > { %26130 = vrcp.f32 %v5187_v54 }
 0x78f   : > { %24686 = vmatmul.mubr.msk.f32.vlgmr.msra.gmra.mrb[84].mxu1 %vm1193_vm3, %v5214_v61  ;;  %v7412_v61 = vpop.permute.xlu0 %7411 }
 0x790   : > { %v26127_v17 = vpop.eup %26126  ;;  %24694 = vmatpush3.msra.mxu1 %v28114_v2  ;;  %24695 = vmatprep.mubr.msk.f32.mxu1 %vm26611_vm2, %v32223_v27 }
 0x791   : > { %v5193_v23 = vpop.xlane.xlu1 %5192  ;;  %24703 = vmatprep.subr.mxu1 %v32223_v27  ;;  %v5218_v18 = vmul.f32 %v26127_v17, %v28112_v50 }
 0x792   : > { %26132 = vrcp.f32 %v5193_v23 }
 0x793   : > { %24696 = vmatmul.mubr.msk.f32.vlgmr.msra.gmra.mrb[86].mxu1 %vm1193_vm3, %v5218_v18 }
 0x794   : > { %v26129_v45 = vpop.eup %26128  ;;  %24704 = vmatpush3.msra.mxu1 %v32285_v55  ;;  %24705 = vmatprep.mubr.msk.f32.mxu1 %vm26611_vm2, %v32223_v27 }
 0x795   : > { %v5199_v11 = vpop.xlane.xlu1 %5198  ;;  %24713 = vmatprep.subr.mxu1 %v32223_v27  ;;  %v5222_v2 = vmul.f32 %v26129_v45, %v28121_v60 }
 0x796   : > { %26134 = vrcp.f32 %v5199_v11 }
 0x797   : > { %24706 = vmatmul.mubr.msk.f32.vlgmr.msra.gmra.mrb[88].mxu1 %vm1193_vm3, %v5222_v2 }
 0x798   : > { %v26131_v50 = vpop.eup %26130  ;;  %24714 = vmatpush3.msra.mxu1 %v28125_v43  ;;  %24715 = vmatprep.mubr.msk.f32.mxu1 %vm26611_vm2, %v32223_v27 }
 0x799   : > { %v5205_v63 = vpop.xlane.xlu1 %5204  ;;  %24723 = vmatprep.subr.mxu1 %v32223_v27  ;;  %v5226_v22 = vmul.f32 %v26131_v50, %v28129_v35 }
 0x79a   : > { %26136 = vrcp.f32 %v5205_v63 }
 0x79b   : > { %24716 = vmatmul.mubr.msk.f32.vlgmr.msra.gmra.mrb[90].mxu1 %vm1193_vm3, %v5226_v22 }
 0x79c   : > { %v26133_v60 = vpop.eup %26132  ;;  %24724 = vmatpush3.msra.mxu1 %v28137_v1  ;;  %24725 = vmatprep.mubr.msk.f32.mxu1 %vm26611_vm2, %v32223_v27 }
 0x79d   : > { %v7178_v43 = vpop.permute.xlu1 %7177  ;;  %24733 = vmatprep.subr.mxu1 %v32223_v27  ;;  %v5230_v28 = vmul.f32 %v26133_v60, %v28135_v62 }
 0x79e   : > { %24799 = vmatpush3.xpose.msk.msra.mxu0 %vm1193_vm3, %v7178_v43 }
 0x79f   : > { %24726 = vmatmul.mubr.msk.f32.vlgmr.msra.gmra.mrb[92].mxu1 %vm1193_vm3, %v5230_v28  ;;  %24808 = vmatprep.subr.mxu0 %v32223_v27 }
 0x7a0   : > { %v26135_v35 = vpop.eup %26134  ;;  %24734 = vmatpush3.msra.mxu1 %v28145_v7  ;;  %24735 = vmatprep.mubr.msk.f32.mxu1 %vm26611_vm2, %v32223_v27 }
 0x7a1   : > { %v7176_v1 = vpop.permute.xlu1 %7175  ;;  %24743 = vmatprep.subr.mxu1 %v32223_v27  ;;  %v5234_v54 = vmul.f32 %v26135_v35, %v28143_v52  ;;  %v7410_v52 = vpop.permute.xlu0 %7409 }
 0x7a2   : > { %24801 = vmatmul.mubr.msk.f32.vlgmr.msra.gmra.mrb[70].mxu0 %vm1193_vm3, %v7176_v1 }
 0x7a3   : > { %24736 = vmatmul.mubr.msk.f32.vlgmr.msra.gmra.mrb[94].mxu1 %vm1193_vm3, %v5234_v54  ;;  %24810 = vmatprep.mubr.msk.f32.mxu0 %vm26611_vm2, %v32223_v27 }
 0x7a4   : > { %v26137_v62 = vpop.eup %26136  ;;  %24744 = vmatpush3.msra.mxu1 %v28153_v10  ;;  %24745 = vmatprep.mubr.msk.f32.mxu1 %vm26611_vm2, %v32223_v27 }
 0x7a5   : > { %v7334_v7 = vpop.permute.xlu1 %7333  ;;  %v5238_v17 = vmul.f32 %v26137_v62, %v28149_v29  ;;  %24753 = vmatprep.subr.mxu1 %v32223_v27  ;;  %v7568_v10 = vpop.permute.xlu0 %7567 }
 0x7a6   : > { %24809 = vmatpush3.xpose.msk.msra.mxu0 %vm1193_vm3, %v7334_v7 }
 0x7a7   : > { %24746 = vmatmul.mubr.msk.f32.vlgmr.msra.gmra.mrb[96].mxu1 %vm1193_vm3, %v5238_v17  ;;  %24818 = vmatprep.subr.mxu0 %v32223_v27 }
 0x7a8   : > { %24755 = vmatprep.mubr.msk.f32.mxu1 %vm26611_vm2, %v32223_v27 }
 0x7a9   : > { %v7332_v23 = vpop.permute.xlu1 %7331 }
 0x7aa   : > { %24811 = vmatmul.mubr.msk.f32.vlgmr.msra.gmra.mrb[72].mxu0 %vm1193_vm3, %v7332_v23 }
 0x7ab   : > { %24754 = vmatpush3.xpose.msk.msra.mxu1 %vm1193_vm3, %v28266_v41  ;;  %24820 = vmatprep.mubr.msk.f32.mxu0 %vm26611_vm2, %v32223_v27 }
 0x7ac   : > { %24763 = vmatprep.subr.mxu1 %v32223_v27 }
 0x7ad   : > { %v7490_v29 = vpop.permute.xlu1 %7489 }
 0x7ae   : > { %24756 = vmatmul.mubr.msk.f32.vlgmr.msra.gmra.mrb[98].mxu1 %vm1193_vm3, %v28270_v15  ;;  %24819 = vmatpush3.xpose.msk.msra.mxu0 %vm1193_vm3, %v7490_v29  ;;  %v7566_v15 = vpop.permute.xlu0 %7565 }
 0x7af   : > { %24764 = vmatpush3.xpose.msk.msra.mxu1 %vm1193_vm3, %v28276_v6  ;;  %24765 = vmatprep.mubr.msk.f32.mxu1 %vm26611_vm2, %v32223_v27 }
 0x7b0   : > { %24773 = vmatprep.subr.mxu1 %v32223_v27  ;;  %24828 = vmatprep.subr.mxu0 %v32223_v27 }
 0x7b1   : > { %v7488_v41 = vpop.permute.xlu1 %7487 }
 0x7b2   : > { %24766 = vmatmul.mubr.msk.f32.vlgmr.msra.gmra.mrb[100].mxu1 %vm1193_vm3, %v28280_v58  ;;  %24821 = vmatmul.mubr.msk.f32.vlgmr.msra.gmra.mrb[74].mxu0 %vm1193_vm3, %v7488_v41 }
 0x7b3   : > { %24774 = vmatpush3.xpose.msk.msra.mxu1 %vm1193_vm3, %v28284_v44  ;;  %24775 = vmatprep.mubr.msk.f32.mxu1 %vm26611_vm2, %v32223_v27  ;;  %v7990_v44 = vpop.permute.xlu0 %7989 }
 0x7b4   : > { %24783 = vmatprep.subr.mxu1 %v32223_v27  ;;  %24830 = vmatprep.mubr.msk.f32.mxu0 %vm26611_vm2, %v32223_v27 }
 0x7b5   : > { %v7646_v6 = vpop.permute.xlu1 %7645 }
 0x7b6   : > { %24776 = vmatmul.mubr.msk.f32.vlgmr.msra.gmra.mrb[102].mxu1 %vm1193_vm3, %v28286_v33  ;;  %24829 = vmatpush3.xpose.msk.msra.mxu0 %vm1193_vm3, %v7646_v6 }
 0x7b7   : > { %24784 = vmatpush3.xpose.msk.msra.mxu1 %vm1193_vm3, %v28288_v24  ;;  %24785 = vmatprep.mubr.msk.f32.mxu1 %vm26611_vm2, %v32223_v27 }
 0x7b8   : > { %24793 = vmatprep.subr.mxu1 %v32223_v27  ;;  %24838 = vmatprep.subr.mxu0 %v32223_v27 }
 0x7b9   : > { %v7644_v58 = vpop.permute.xlu1 %7643 }
 0x7ba   : > { %24786 = vmatmul.mubr.msk.f32.vlgmr.msra.gmra.mrb[104].mxu1 %vm1193_vm3, %v28290_v19  ;;  %24831 = vmatmul.mubr.msk.f32.vlgmr.msra.gmra.mrb[76].mxu0 %vm1193_vm3, %v7644_v58 }
 0x7bb   : > { %24794 = vmatpush3.xpose.msk.msra.mxu1 %vm1193_vm3, %v28292_v59  ;;  %24839 = vmatpush3.msra.mxu0 %v7990_v44 }
 0x7bc   : > { %24795 = vmatprep.mubr.msk.f32.mxu1 %vm26611_vm2, %v32223_v27  ;;  %24803 = vmatprep.subr.mxu1 %v32223_v27 }
 0x7bd   : > { %24840 = vmatprep.mubr.msk.f32.mxu0 %vm26611_vm2, %v32223_v27  ;;  %24848 = vmatprep.subr.mxu0 %v32223_v27  ;;  %v7914_v33 = vpop.permute.xlu1 %7913 }
 0x7be   : > { %24796 = vmatmul.mubr.msk.f32.vlgmr.msra.gmra.mrb[106].mxu1 %vm1193_vm3, %v28296_v5 }
 0x7bf   : > { %24804 = vmatpush3.xpose.msk.msra.mxu1 %vm1193_vm3, %v28309_v20  ;;  %24805 = vmatprep.mubr.msk.f32.mxu1 %vm26611_vm2, %v32223_v27 }
 0x7c0   : > { %24813 = vmatprep.subr.mxu1 %v32223_v27 }
 0x7c2   : > { %24806 = vmatmul.mubr.msk.f32.vlgmr.msra.gmra.mrb[108].mxu1 %vm1193_vm3, %v28318_v30 }
 0x7c3   : > { %24814 = vmatpush3.xpose.msk.msra.mxu1 %vm1193_vm3, %v7412_v61  ;;  %24815 = vmatprep.mubr.msk.f32.mxu1 %vm26611_vm2, %v32223_v27 }
 0x7c4   : > { %24823 = vmatprep.subr.mxu1 %v32223_v27 }
 0x7c6   : > { %24816 = vmatmul.mubr.msk.f32.vlgmr.msra.gmra.mrb[110].mxu1 %vm1193_vm3, %v7410_v52 }
 0x7c7   : > { %24824 = vmatpush3.xpose.msk.msra.mxu1 %vm1193_vm3, %v7568_v10  ;;  %24825 = vmatprep.mubr.msk.f32.mxu1 %vm26611_vm2, %v32223_v27 }
 0x7c8   : > { %24833 = vmatprep.subr.mxu1 %v32223_v27 }
 0x7ca   : > { %24826 = vmatmul.mubr.msk.f32.vlgmr.msra.gmra.mrb[112].mxu1 %vm1193_vm3, %v7566_v15 }
 0x7cb   : > { %24834 = vmatpush3.msra.mxu1 %v7914_v33  ;;  %24835 = vmatprep.mubr.msk.f32.mxu1 %vm26611_vm2, %v32223_v27 }
 0x7cc   : > { %24843 = vmatprep.subr.mxu1 %v32223_v27 }
 0x7f1   : > { %v28414_v24 = vpop.f32.mrb[46].mxu0 }
 0x7f2   : > { %32286 = vst [vmem:[#allocation4_spill] sm:$0xff] %v28414_v24  ;;  %v24682_v19 = vpop.f32.mrb[47].mxu0 }
 0x7f5   : > { %v28416_v59 = vpop.f32.mrb[48].mxu0 }
 0x7f6   : > { %32287 = vst [vmem:[#allocation14_spill] sm:$0xff] %v28416_v59  ;;  %v24692_v5 = vpop.f32.mrb[49].mxu0 }
 0x7f9   : > { %v28418_v18 = vpop.f32.mrb[50].mxu0 }
 0x7fa   : > { %32288 = vst [vmem:[#allocation29_spill] sm:$0xff] %v28418_v18  ;;  %v24702_v45 = vpop.f32.mrb[51].mxu0 }
 0x7fd   : > { %v28420_v55 = vpop.f32.mrb[52].mxu0 }
 0x7fe   : > { %32289 = vst [vmem:[#allocation16_spill] sm:$0xff] %v28420_v55  ;;  %v24712_v11 = vpop.f32.mrb[53].mxu0  ;;  %v32310_v55 = vld [vmem:[#allocation12_spill] sm:$0xff] }
 0x801   : > { %v28422_v2 = vpop.f32.mrb[54].mxu0 }
 0x802   : > { %32290 = vst [vmem:[#allocation31_spill] sm:$0xff] %v28422_v2  ;;  %v24722_v20 = vpop.f32.mrb[55].mxu0 }
 0x805   : > { %v28424_v50 = vpop.f32.mrb[56].mxu0 }
 0x806   : > { %32291 = vst [vmem:[#allocation34_spill] sm:$0xff] %v28424_v50  ;;  %v24732_v63 = vpop.f32.mrb[57].mxu0 }
 0x809   : > { %v28426_v22 = vpop.f32.mrb[58].mxu0 }
 0x80a   : > { %32292 = vst [vmem:[#allocation63_spill] sm:$0xff] %v28426_v22  ;;  %v24742_v60 = vpop.f32.mrb[59].mxu0 }
 0x80d   : > { %v28428_v30 = vpop.f32.mrb[60].mxu0 }
 0x80e   : > { %32293 = vst [vmem:[#allocation64_spill] sm:$0xff] %v28428_v30  ;;  %v24752_v43 = vpop.f32.mrb[61].mxu0 }
 0x811   : > { %v28430_v28 = vpop.f32.mrb[82].mxu1 }
 0x812   : > { %32294 = vst [vmem:[#allocation65_spill] sm:$0xff] %v28430_v28  ;;  %v24677_v35 = vpop.f32.mrb[83].mxu1  ;;  %v28560_v28 = vpop.permute.xlu0 %8065 }
 0x814   : > { %v6625_v1 = vpop.f32.mrb[62].mxu0 }
 0x815   : > { %v28434_v61 = vsel %vm26902_vm1, %v6625_v1, -32767.0  ;;  %v24762_v62 = vpop.f32.mrb[63].mxu0 }
 0x816   : > { %v7740_v7 = vsel %vm1193_vm3, %v28434_v61, -inf }
 0x817   : > { %7741 = vmax.xlane.f32.xlu1 %v7740_v7 }
 0x818   : > { %v6781_v17 = vpop.f32.mrb[64].mxu0 }
 0x819   : > { %v24772_v52 = vpop.f32.mrb[65].mxu0 }
 0x81c   : > { %v6937_v23 = vpop.f32.mrb[66].mxu0 }
 0x81d   : > { %v24782_v29 = vpop.f32.mrb[67].mxu0 }
 0x824   : > { %v7093_v10 = vpop.f32.mrb[68].mxu0 }
 0x825   : > { %v24792_v41 = vpop.f32.mrb[69].mxu0 }
 0x862   : > { %v28438_v15 = vpop.f32.mrb[84].mxu1 }
 0x863   : > { %32296 = vst [vmem:[#allocation66_spill] sm:$0xff] %v28438_v15  ;;  %v24687_v6 = vpop.f32.mrb[85].mxu1  ;;  %v32303_v15 = vld [vmem:[#allocation7_spill] sm:$0xff] }
 0x866   : > { %v28440_v58 = vpop.f32.mrb[86].mxu1 }
 0x867   : > { %32297 = vst [vmem:[#allocation67_spill] sm:$0xff] %v28440_v58  ;;  %v24697_v44 = vpop.f32.mrb[87].mxu1 }
 0x86a   : > { %v28442_v33 = vpop.f32.mrb[88].mxu1 }
 0x86b   : > { %32298 = vst [vmem:[#allocation68_spill] sm:$0xff] %v28442_v33  ;;  %v24707_v19 = vpop.f32.mrb[89].mxu1  ;;  %v32308_v33 = vld [vmem:[#allocation25_spill] sm:$0xff] }
 0x86e   : > { %v28444_v5 = vpop.f32.mrb[90].mxu1 }
 0x86f   : > { %32299 = vst [vmem:[#allocation69_spill] sm:$0xff] %v28444_v5  ;;  %v24717_v45 = vpop.f32.mrb[91].mxu1 }
 0x872   : > { %v28446_v11 = vpop.f32.mrb[92].mxu1 }
 0x873   : > { %32300 = vst [vmem:[#allocation70_spill] sm:$0xff] %v28446_v11  ;;  %v24727_v20 = vpop.f32.mrb[93].mxu1 }
 0x875   : > { %v7249_v63 = vpop.f32.mrb[70].mxu0 }
 0x876   : > { %v28448_v60 = vpop.f32.mrb[94].mxu1  ;;  %v24802_v43 = vpop.f32.mrb[71].mxu0 }
 0x877   : > { %32301 = vst [vmem:[#allocation71_spill] sm:$0xff] %v28448_v60  ;;  %v24737_v35 = vpop.f32.mrb[95].mxu1 }
 0x87a   : > { %v28450_v1 = vpop.f32.mrb[96].mxu1 }
 0x87b   : > { %32302 = vst [vmem:[#allocation72_spill] sm:$0xff] %v28450_v1  ;;  %v24747_v62 = vpop.f32.mrb[97].mxu1  ;;  %v28502_v1 = vsel %vm26902_vm1, %v7249_v63, -32767.0 }
 0x87d   : > { %v7405_v7 = vpop.f32.mrb[72].mxu0 }
 0x87e   : > { %v24812_v52 = vpop.f32.mrb[73].mxu0  ;;  %v28514_v59 = vsel %vm26902_vm1, %v7405_v7, -32767.0 }
 0x87f   : > { %v28466_v52 = vsel %vm26902_vm1, %v6781_v17, -32767.0 }
 0x881   : > { %v6547_v29 = vpop.f32.mrb[98].mxu1 }
 0x882   : > { %v28454_v41 = vsel %vm26902_vm1, %v6547_v29, -32767.0  ;;  %v24757_v6 = vpop.f32.mrb[99].mxu1 }
 0x883   : > { %v7737_v44 = vsel %vm1193_vm3, %v28454_v41, -inf }
 0x884   : > { %7738 = vmax.xlane.f32.xlu0 %v7737_v44 }
 0x885   : > { %v6703_v19 = vpop.f32.mrb[100].mxu1  ;;  %v7561_v45 = vpop.f32.mrb[74].mxu0 }
 0x886   : > { %v28460_v20 = vsel %vm26902_vm1, %v6703_v19, -32767.0  ;;  %v24767_v43 = vpop.f32.mrb[101].mxu1  ;;  %v24822_v35 = vpop.f32.mrb[75].mxu0  ;;  %v7746_v19 = vsel %vm1193_vm3, %v28466_v52, -inf }
 0x887   : > { %v7743_v62 = vsel %vm1193_vm3, %v28460_v20, -inf  ;;  %v28478_v35 = vsel %vm26902_vm1, %v6937_v23, -32767.0  ;;  %v28490_v23 = vsel %vm26902_vm1, %v7093_v10, -32767.0 }
 0x888   : > { %7744 = vmax.xlane.f32.xlu0 %v7743_v62  ;;  %v7752_v30 = vsel %vm1193_vm3, %v28478_v35, -inf  ;;  %v28526_v22 = vsel %vm26902_vm1, %v7561_v45, -32767.0 }
 0x889   : > { %v6859_v29 = vpop.f32.mrb[102].mxu1 }
 0x88a   : > { %v28470_v6 = vsel %vm26902_vm1, %v6859_v29, -32767.0  ;;  %v24777_v44 = vpop.f32.mrb[103].mxu1 }
 0x88b   : > { %v7749_v43 = vsel %vm1193_vm3, %v28470_v6, -inf }
 0x88c   : > { %7747 = vmax.xlane.f32.xlu0 %v7746_v19  ;;  %7750 = vmax.xlane.f32.xlu1 %v7749_v43 }
 0x88d   : > { %v7015_v17 = vpop.f32.mrb[104].mxu1  ;;  %v7717_v62 = vpop.f32.mrb[76].mxu0 }
 0x88e   : > { %v28482_v18 = vsel %vm26902_vm1, %v7015_v17, -32767.0  ;;  %v24787_v29 = vpop.f32.mrb[105].mxu1  ;;  %v24832_v44 = vpop.f32.mrb[77].mxu0  ;;  %v28554_v50 = vsel %vm26902_vm1, %v7717_v62, -32767.0 }
 0x88f   : > { %v7755_v58 = vsel %vm1193_vm3, %v28482_v18, -inf  ;;  %v7758_v29 = vsel %vm1193_vm3, %v28490_v23, -inf  ;;  %v7782_v24 = vsel %vm1193_vm3, %v28554_v50, -inf }
 0x890   : > { %7753 = vmax.xlane.f32.xlu0 %v7752_v30  ;;  %7756 = vmax.xlane.f32.xlu1 %v7755_v58 }
 0x891   : > { %v7171_v19 = vpop.f32.mrb[106].mxu1 }
 0x892   : > { %v28494_v43 = vsel %vm26902_vm1, %v7171_v19, -32767.0  ;;  %v24797_v17 = vpop.f32.mrb[107].mxu1  ;;  %v7764_v19 = vsel %vm1193_vm3, %v28502_v1, -inf }
 0x893   : > { %v7761_v44 = vsel %vm1193_vm3, %v28494_v43, -inf }
 0x894   : > { %7759 = vmax.xlane.f32.xlu0 %v7758_v29  ;;  %7762 = vmax.xlane.f32.xlu1 %v7761_v44 }
 0x895   : > { %v7327_v30 = vpop.f32.mrb[108].mxu1 }
 0x896   : > { %v28506_v10 = vsel %vm26902_vm1, %v7327_v30, -32767.0  ;;  %v24807_v58 = vpop.f32.mrb[109].mxu1  ;;  %v7770_v30 = vsel %vm1193_vm3, %v28514_v59, -inf }
 0x897   : > { %v7767_v17 = vsel %vm1193_vm3, %v28506_v10, -inf }
 0x898   : > { %7765 = vmax.xlane.f32.xlu0 %v7764_v19  ;;  %7768 = vmax.xlane.f32.xlu1 %v7767_v17  ;;  %v7776_v17 = vsel %vm1193_vm3, %v28526_v22, -inf }
 0x899   : > { %v7483_v63 = vpop.f32.mrb[110].mxu1 }
 0x89a   : > { %v28518_v29 = vsel %vm26902_vm1, %v7483_v63, -32767.0  ;;  %v24817_v44 = vpop.f32.mrb[111].mxu1  ;;  %v28532_v63 = vpop.permute.xlu1 %8141 }
 0x89b   : > { %v7773_v58 = vsel %vm1193_vm3, %v28518_v29, -inf }
 0x89c   : > { %7771 = vmax.xlane.f32.xlu0 %v7770_v30  ;;  %7774 = vmax.xlane.f32.xlu1 %v7773_v58 }
 0x89d   : > { %v7639_v7 = vpop.f32.mrb[112].mxu1 }
 0x89e   : > { %v24827_v19 = vpop.f32.mrb[113].mxu1  ;;  %v28534_v44 = vpop.permute.xlu1 %8293 }
 0x8a0   : > { %7777 = vmax.xlane.f32.xlu0 %v7776_v17  ;;  %v28548_v17 = vsel %vm26902_vm1, %v7639_v7, -32767.0  ;;  %v28564_v7 = vpop.permute.xlu0 %8217 }
 0x8a1   : > { %v7779_v60 = vsel %vm1193_vm3, %v28548_v17, -inf }
 0x8a2   : > { %v28538_v45 = vpop.permute.xlu1 %8369 }
 0x8a4   : > { %v28570_v62 = vpop.permute.xlu0 %8521 }
 0x8a6   : > { %v28540_v30 = vpop.permute.xlu1 %8445 }
 0x8aa   : > { %v28542_v58 = vpop.permute.xlu1 %8597 }
 0x8ad   : > { %9521 = vrot.lane.b32.xlu1 %v32276_v8, %s26617_s30  ;;  %v32313_v8 = vld [vmem:[#allocation24_spill] sm:$0xff] }
 0x8ae   : > { %v28544_v19 = vpop.permute.xlu1 %8749 }
 0x8af   : > { %32304 = vst [vmem:[#allocation73_spill] sm:$0xff] %v28544_v19 }
 0x8b2   : > { %v28556_v11 = vpop.permute.xlu1 %8901 }
 0x8b3   : > { %32305 = vst [vmem:[#allocation74_spill] sm:$0xff] %v28556_v11 }
 0x8b6   : > { %9443 = vrot.lane.b32.xlu0 %v32303_v15, %s26617_s30  ;;  %v28562_v2 = vpop.permute.xlu1 %9053  ;;  %v28576_v15 = vpop.permute.xlu0 %8673 }
 0x8b7   : > { %32306 = vst [vmem:[#allocation75_spill] sm:$0xff] %v28562_v2  ;;  %32311 = vst [vmem:[#allocation78_spill] sm:$0xff] %v28576_v15 }
 0x8ba   : > { %v28566_v5 = vpop.permute.xlu1 %9209  ;;  %v28582_v54 = vpop.permute.xlu0 %8825 }
 0x8bb   : > { %32307 = vst [vmem:[#allocation76_spill] sm:$0xff] %v28566_v5  ;;  %32314 = vst [vmem:[#allocation80_spill] sm:$0xff] %v28582_v54  ;;  %v32315_v5 = vld [vmem:[#allocation10_spill] sm:$0xff] }
 0x8be   : > { %v28588_v2 = vpop.permute.xlu0 %8977 }
 0x8bf   : > { %32317 = vst [vmem:[#allocation82_spill] sm:$0xff] %v28588_v2 }
 0x8d1   : > { %7780 = vmax.xlane.f32.xlu1 %v7779_v60  ;;  %v28572_v60 = vpop.permute.xlu1 %9207 }
 0x8d2   : > { %32309 = vst [vmem:[#allocation77_spill] sm:$0xff] %v28572_v60 }
 0x8d5   : > { %7783 = vmax.xlane.f32.xlu0 %v7782_v24  ;;  %v28578_v24 = vpop.permute.xlu1 %9365 }
 0x8d6   : > { %32312 = vst [vmem:[#allocation79_spill] sm:$0xff] %v28578_v24 }
 0x8e2   : > { %9519 = vrot.lane.b32.xlu1 %v32308_v33, %s26618_s8  ;;  %v28586_v33 = vpop.permute.xlu1 %9363 }
 0x8e3   : > { %32316 = vst [vmem:[#allocation81_spill] sm:$0xff] %v28586_v33 }
 0x8e6   : > { %9677 = vrot.lane.b32.xlu1 %v32310_v55, %s26617_s30  ;;  %v7742_v60 = vpop.xlane.xlu1 %7741  ;;  %v28591_v55 = vpop.permute.xlu0 %9131 }
 0x8e7   : > { %v7786_v11 = vsub.f32 %v28434_v61, %v7742_v60  ;;  %32318 = vst [vmem:[#allocation83_spill] sm:$0xff] %v28591_v55 }
 0x8e9   : > { %v7803_v9 = vmul.f32 1.442695, %v7786_v11 }
 0x8ea   : > { %v28593_v24 = vpop.permute.xlu0 %9129 }
 0x8eb   : > { %9441 = vrot.lane.b32.xlu0 %v32313_v8, %s26618_s8  ;;  %26138 = vpow2.f32 %v7803_v9  ;;  %32319 = vst [vmem:[#allocation84_spill] sm:$0xff] %v28593_v24 }
 0x8ee   : > { %v28595_v19 = vpop.permute.xlu0 %9287 }
 0x8ef   : > { %9599 = vrot.lane.b32.xlu0 %v32315_v5, %s26617_s30  ;;  %32320 = vst [vmem:[#allocation85_spill] sm:$0xff] %v28595_v19 }
 0x8f2   : > { %v28599_v54 = vpop.permute.xlu0 %9285 }
 0x8f3   : > { %32321 = vst [vmem:[#allocation86_spill] sm:$0xff] %v28599_v54 }
 0x8f5   : > { %v28597_v8 = vpop.eup %26138 }
 0x8f6   : > { %v7836_v5 = vsel %vm1193_vm3, %v28597_v8, 0.0 }
 0x90e   : > { %7837 = vadd.xlane.f32.xlu0 %v7836_v5 }
 0x911   : > { %v7739_v33 = vpop.xlane.xlu0 %7738 }
 0x912   : > { %v7785_v2 = vsub.f32 %v28454_v41, %v7739_v33 }
 0x914   : > { %v7801_v61 = vmul.f32 1.442695, %v7785_v2 }
 0x915   : > { %v7745_v60 = vpop.xlane.xlu0 %7744 }
 0x916   : > { %26140 = vpow2.f32 %v7801_v61  ;;  %v7787_v9 = vsub.f32 %v28460_v20, %v7745_v60 }
 0x918   : > { %v7805_v11 = vmul.f32 1.442695, %v7787_v9 }
 0x919   : > { %v7748_v24 = vpop.xlane.xlu0 %7747  ;;  %v7751_v55 = vpop.xlane.xlu1 %7750 }
 0x91a   : > { %26142 = vpow2.f32 %v7805_v11  ;;  %v7788_v19 = vsub.f32 %v28466_v52, %v7748_v24  ;;  %v7789_v54 = vsub.f32 %v28470_v6, %v7751_v55 }
 0x91c   : > { %v7807_v26 = vmul.f32 1.442695, %v7788_v19  ;;  %v7809_v3 = vmul.f32 1.442695, %v7789_v54 }
 0x91d   : > { %v7754_v15 = vpop.xlane.xlu0 %7753  ;;  %v7757_v5 = vpop.xlane.xlu1 %7756 }
 0x91e   : > { %26144 = vpow2.f32 %v7807_v26  ;;  %v7790_v33 = vsub.f32 %v28478_v35, %v7754_v15  ;;  %v7791_v2 = vsub.f32 %v28482_v18, %v7757_v5 }
 0x91f   : > { %26146 = vpow2.f32 %v7809_v3 }
 0x920   : > { %v28609_v41 = vpop.eup %26140  ;;  %v7811_v20 = vmul.f32 1.442695, %v7790_v33  ;;  %v7813_v61 = vmul.f32 1.442695, %v7791_v2 }
 0x921   : > { %v7760_v60 = vpop.xlane.xlu0 %7759  ;;  %v7763_v9 = vpop.xlane.xlu1 %7762  ;;  %v7833_v52 = vsel %vm1193_vm3, %v28609_v41, 0.0 }
 0x922   : > { %26148 = vpow2.f32 %v7811_v20  ;;  %v7792_v55 = vsub.f32 %v28490_v23, %v7760_v60  ;;  %v7793_v54 = vsub.f32 %v28494_v43, %v7763_v9  ;;  %7834 = vadd.xlane.f32.xlu1 %v7833_v52 }
 0x923   : > { %26150 = vpow2.f32 %v7813_v61 }
 0x924   : > { %v28615_v26 = vpop.eup %26142  ;;  %v7815_v18 = vmul.f32 1.442695, %v7792_v55  ;;  %v7817_v3 = vmul.f32 1.442695, %v7793_v54 }
 0x925   : > { %v7766_v15 = vpop.xlane.xlu0 %7765  ;;  %v7769_v6 = vpop.xlane.xlu1 %7768  ;;  %v7839_v35 = vsel %vm1193_vm3, %v28615_v26, 0.0 }
 0x926   : > { %26152 = vpow2.f32 %v7815_v18  ;;  %v7794_v19 = vsub.f32 %v28502_v1, %v7766_v15  ;;  %v7795_v24 = vsub.f32 %v28506_v10, %v7769_v6  ;;  %7840 = vadd.xlane.f32.xlu1 %v7839_v35 }
 0x927   : > { %26154 = vpow2.f32 %v7817_v3 }
 0x928   : > { %v28621_v23 = vpop.eup %26144  ;;  %v7819_v43 = vmul.f32 1.442695, %v7794_v19  ;;  %v7821_v11 = vmul.f32 1.442695, %v7795_v24 }
 0x929   : > { %v28623_v5 = vpop.eup %26146  ;;  %v7772_v33 = vpop.xlane.xlu0 %7771  ;;  %v7842_v20 = vsel %vm1193_vm3, %v28621_v23, 0.0 }
 0x92a   : > { %v7775_v2 = vpop.xlane.xlu1 %7774  ;;  %26156 = vpow2.f32 %v7819_v43  ;;  %v7796_v61 = vsub.f32 %v28514_v59, %v7772_v33  ;;  %7843 = vadd.xlane.f32.xlu0 %v7842_v20  ;;  %v7845_v10 = vsel %vm1193_vm3, %v28623_v5, 0.0 }
 0x92b   : > { %v7797_v1 = vsub.f32 %v28518_v29, %v7775_v2  ;;  %26158 = vpow2.f32 %v7821_v11  ;;  %7846 = vadd.xlane.f32.xlu1 %v7845_v10 }
 0x92c   : > { %v28631_v60 = vpop.eup %26148  ;;  %v7823_v9 = vmul.f32 1.442695, %v7796_v61 }
 0x92d   : > { %v7825_v52 = vmul.f32 1.442695, %v7797_v1  ;;  %v28633_v55 = vpop.eup %26150  ;;  %v7778_v54 = vpop.xlane.xlu0 %7777  ;;  %v7848_v18 = vsel %vm1193_vm3, %v28631_v60, 0.0 }
 0x92e   : > { %26160 = vpow2.f32 %v7823_v9  ;;  %v7798_v59 = vsub.f32 %v28526_v22, %v7778_v54  ;;  %7849 = vadd.xlane.f32.xlu0 %v7848_v18  ;;  %v7851_v29 = vsel %vm1193_vm3, %v28633_v55, 0.0  ;;  %v28668_v9 = vpop.permute.xlu1 %9521 }
 0x92f   : > { %26162 = vpow2.f32 %v7825_v52  ;;  %7852 = vadd.xlane.f32.xlu1 %v7851_v29 }
 0x930   : > { %v28640_v3 = vpop.eup %26152  ;;  %v7827_v15 = vmul.f32 1.442695, %v7798_v59 }
 0x931   : > { %v28642_v6 = vpop.eup %26154  ;;  %v7854_v35 = vsel %vm1193_vm3, %v28640_v3, 0.0  ;;  %v28670_v52 = vpop.permute.xlu0 %9443 }
 0x932   : > { %26164 = vpow2.f32 %v7827_v15  ;;  %7855 = vadd.xlane.f32.xlu0 %v7854_v35  ;;  %v7857_v19 = vsel %vm1193_vm3, %v28642_v6, 0.0 }
 0x933   : > { %7858 = vadd.xlane.f32.xlu1 %v7857_v19 }
 0x934   : > { %v28648_v22 = vpop.eup %26156 }
 0x935   : > { %v28650_v24 = vpop.eup %26158  ;;  %v7860_v43 = vsel %vm1193_vm3, %v28648_v22, 0.0 }
 0x936   : > { %7861 = vadd.xlane.f32.xlu0 %v7860_v43  ;;  %v7863_v11 = vsel %vm1193_vm3, %v28650_v24, 0.0 }
 0x937   : > { %7864 = vadd.xlane.f32.xlu1 %v7863_v11 }
 0x938   : > { %v28656_v33 = vpop.eup %26160 }
 0x939   : > { %v28658_v2 = vpop.eup %26162  ;;  %v7866_v20 = vsel %vm1193_vm3, %v28656_v33, 0.0 }
 0x93a   : > { %7867 = vadd.xlane.f32.xlu0 %v7866_v20  ;;  %v7869_v61 = vsel %vm1193_vm3, %v28658_v2, 0.0 }
 0x93b   : > { %7870 = vadd.xlane.f32.xlu1 %v7869_v61  ;;  %v32324_v61 = vld [vmem:[#allocation13_spill] sm:$0xff] }
 0x93c   : > { %v28664_v1 = vpop.eup %26164 }
 0x93d   : > { %v7872_v10 = vsel %vm1193_vm3, %v28664_v1, 0.0 }
 0x93e   : > { %7873 = vadd.xlane.f32.xlu0 %v7872_v10 }
 0x95e   : > { %v7781_v54 = vpop.xlane.xlu1 %7780 }
 0x95f   : > { %v7799_v18 = vsub.f32 %v28548_v17, %v7781_v54  ;;  %v32322_v17 = vld [vmem:[#allocation27_spill] sm:$0xff]  ;;  %v32325_v54 = vld [vmem:[#allocation28_spill] sm:$0xff] }
 0x961   : > { %v7829_v59 = vmul.f32 1.442695, %v7799_v18  ;;  %v32326_v18 = vld [vmem:[#allocation15_spill] sm:$0xff] }
 0x962   : > { %v7784_v29 = vpop.xlane.xlu0 %7783 }
 0x963   : > { %26166 = vpow2.f32 %v7829_v59  ;;  %v7800_v15 = vsub.f32 %v28554_v50, %v7784_v29  ;;  %v32323_v50 = vld [vmem:[#allocation26_spill] sm:$0xff] }
 0x964   : > { %v32327_v29 = vld [vmem:[#allocation30_spill] sm:$0xff] }
 0x965   : > { %v7831_v35 = vmul.f32 1.442695, %v7800_v15 }
 0x966   : > { %v28696_v10 = vpop.permute.xlu0 %9441 }
 0x967   : > { %26168 = vpow2.f32 %v7831_v35  ;;  %v32328_v35 = vld [vmem:[#allocation17_spill] sm:$0xff] }
 0x96a   : > { %v28704_v59 = vpop.permute.xlu0 %9599 }
 0x96d   : > { %v28674_v19 = vpop.eup %26166 }
 0x96e   : > { %v7875_v43 = vsel %vm1193_vm3, %v28674_v19, 0.0 }
 0x96f   : > { %7876 = vadd.xlane.f32.xlu1 %v7875_v43  ;;  %v32329_v43 = vld [vmem:[#allocation32_spill] sm:$0xff] }
 0x971   : > { %v28678_v11 = vpop.eup %26168 }
 0x972   : > { %v7878_v20 = vsel %vm1193_vm3, %v28678_v11, 0.0 }
 0x973   : > { %7879 = vadd.xlane.f32.xlu0 %v7878_v20  ;;  %v28720_v20 = vpop.permute.xlu1 %9519 }
 0x980   : > { %9675 = vrot.lane.b32.xlu1 %v32322_v17, %s26618_s8 }
 0x984   : > { %9833 = vrot.lane.b32.xlu1 %v32277_v13, %s26617_s30 }
 0x988   : > { %9831 = vrot.lane.b32.xlu1 %v32278_v12, %s26618_s8 }
 0x989   : > { %9597 = vrot.lane.b32.xlu0 %v32323_v50, %s26618_s8 }
 0x98c   : > { %9989 = vrot.lane.b32.xlu1 %v32279_v16, %s26617_s30 }
 0x98d   : > { %9755 = vrot.lane.b32.xlu0 %v32324_v61, %s26617_s30 }
 0x990   : > { %9987 = vrot.lane.b32.xlu1 %v32280_v53, %s26618_s8 }
 0x991   : > { %9753 = vrot.lane.b32.xlu0 %v32325_v54, %s26618_s8 }
 0x994   : > { %10145 = vrot.lane.b32.xlu1 %v27074_v37, %s26617_s30 }
 0x995   : > { %9911 = vrot.lane.b32.xlu0 %v32326_v18, %s26617_s30 }
 0x998   : > { %10143 = vrot.lane.b32.xlu1 %v27228_v4, %s26618_s8 }
 0x999   : > { %9909 = vrot.lane.b32.xlu0 %v32327_v29, %s26618_s8  ;;  %v32330_v29 = vld [vmem:[#allocation18_spill] sm:$0xff] }
 0x99b   : > { %v7838_v15 = vpop.xlane.xlu0 %7837 }
 0x99c   : > { %26170 = vrcp.f32 %v7838_v15  ;;  %10301 = vrot.lane.b32.xlu1 %v27087_v38, %s26617_s30 }
 0x99d   : > { %10067 = vrot.lane.b32.xlu0 %v32328_v35, %s26617_s30  ;;  %v32331_v35 = vld [vmem:[#allocation33_spill] sm:$0xff] }
 0x9a0   : > { %10299 = vrot.lane.b32.xlu1 %v32281_v32, %s26618_s8 }
 0x9a1   : > { %10065 = vrot.lane.b32.xlu0 %v32329_v43, %s26618_s8 }
 0x9a4   : > { %10569 = vrot.lane.b32.xlu1 %v32282_v21, %s26618_s8  ;;  %v28733_v21 = vpop.permute.xlu1 %9677 }
 0x9a5   : > { %10223 = vrot.lane.b32.xlu0 %v32330_v29, %s26617_s30 }
 0x9a6   : > { %v26171_v15 = vpop.eup %26170 }
 0x9a7   : > { %v7884_v38 = vmul.f32 %v26171_v15, %v28597_v8  ;;  %v32332_v8 = vld [vmem:[#allocation43_spill] sm:$0xff] }
 0x9a8   : > { %10797 = vrot.lane.b32.xlu1 %v27580_v39, %s26618_s8 }
 0x9a9   : > { %10221 = vrot.lane.b32.xlu0 %v32331_v35, %s26618_s8  ;;  %24841 = vmatmul.mubr.msk.f32.vlgmr.msra.gmra.mrb[78].mxu0 %vm1193_vm3, %v7884_v38  ;;  %v32333_v38 = vld [vmem:[#allocation44_spill] sm:$0xff]  ;;  %v32334_v35 = vld [vmem:[#allocation46_spill] sm:$0xff] }
 0x9aa   : > { %24849 = vmatpush3.msra.mxu0 %v28532_v63  ;;  %24850 = vmatprep.mubr.msk.f32.mxu0 %vm26611_vm2, %v32223_v27 }
 0x9ab   : > { %24858 = vmatprep.subr.mxu0 %v32223_v27 }
 0x9ac   : > { %10949 = vrot.lane.b32.xlu1 %v27611_v46, %s26618_s8 }
 0x9ad   : > { %10645 = vrot.lane.b32.xlu0 %v32332_v8, %s26618_s8 }
 0x9af   : > { %v7835_v15 = vpop.xlane.xlu1 %7834 }
 0x9b0   : > { %26172 = vrcp.f32 %v7835_v15  ;;  %11025 = vrot.lane.b32.xlu1 %v27624_v48, %s26618_s8 }
 0x9b1   : > { %10721 = vrot.lane.b32.xlu0 %v32333_v38, %s26618_s8 }
 0x9b3   : > { %v7841_v63 = vpop.xlane.xlu1 %7840 }
 0x9b4   : > { %26174 = vrcp.f32 %v7841_v63  ;;  %11101 = vrot.lane.b32.xlu1 %v27633_v0, %s26618_s8 }
 0x9b5   : > { %10873 = vrot.lane.b32.xlu0 %v32334_v35, %s26618_s8 }
 0x9b7   : > { %v7844_v46 = vpop.xlane.xlu0 %7843 }
 0x9b8   : > { %26176 = vrcp.f32 %v7844_v46  ;;  %v7847_v39 = vpop.xlane.xlu1 %7846  ;;  %11253 = vrot.lane.b32.xlu1 %v27651_v34, %s26618_s8 }
 0x9b9   : > { %26178 = vrcp.f32 %v7847_v39  ;;  %11177 = vrot.lane.b32.xlu0 %v27642_v56, %s26618_s8 }
 0x9ba   : > { %v26173_v15 = vpop.eup %26172 }
 0x9bb   : > { %v7850_v38 = vpop.xlane.xlu0 %7849  ;;  %v7882_v63 = vmul.f32 %v26173_v15, %v28609_v41 }
 0x9bc   : > { %26180 = vrcp.f32 %v7850_v38  ;;  %v7853_v48 = vpop.xlane.xlu1 %7852  ;;  %11405 = vrot.lane.b32.xlu1 %v27674_v42, %s26618_s8 }
 0x9bd   : > { %26182 = vrcp.f32 %v7853_v48  ;;  %11329 = vrot.lane.b32.xlu0 %v27660_v57, %s26618_s8  ;;  %24836 = vmatmul.mubr.msk.f32.vlgmr.msra.gmra.mrb[114].mxu1 %vm1193_vm3, %v7882_v63 }
 0x9be   : > { %v26175_v46 = vpop.eup %26174  ;;  %24844 = vmatpush3.msra.mxu1 %v28560_v28  ;;  %24845 = vmatprep.mubr.msk.f32.mxu1 %vm26611_vm2, %v32223_v27 }
 0x9bf   : > { %v7856_v39 = vpop.xlane.xlu0 %7855  ;;  %24853 = vmatprep.subr.mxu1 %v32223_v27  ;;  %v7886_v41 = vmul.f32 %v26175_v46, %v28615_v26 }
 0x9c0   : > { %26184 = vrcp.f32 %v7856_v39  ;;  %v7859_v38 = vpop.xlane.xlu1 %7858  ;;  %11557 = vrot.lane.b32.xlu1 %v27697_v14, %s26618_s8 }
 0x9c1   : > { %26186 = vrcp.f32 %v7859_v38  ;;  %11481 = vrot.lane.b32.xlu0 %v27688_v25, %s26618_s8  ;;  %24846 = vmatmul.mubr.msk.f32.vlgmr.msra.gmra.mrb[116].mxu1 %vm1193_vm3, %v7886_v41 }
 0x9c2   : > { %v26177_v48 = vpop.eup %26176  ;;  %24854 = vmatpush3.msra.mxu1 %v28564_v7  ;;  %24855 = vmatprep.mubr.msk.f32.mxu1 %vm26611_vm2, %v32223_v27 }
 0x9c3   : > { %v26179_v28 = vpop.eup %26178  ;;  %v7862_v15 = vpop.xlane.xlu0 %7861  ;;  %24863 = vmatprep.subr.mxu1 %v32223_v27  ;;  %v7888_v26 = vmul.f32 %v26177_v48, %v28621_v23 }
 0x9c4   : > { %26188 = vrcp.f32 %v7862_v15  ;;  %v7865_v63 = vpop.xlane.xlu1 %7864  ;;  %11709 = vrot.lane.b32.xlu1 %v32283_v31, %s26618_s8  ;;  %v7890_v46 = vmul.f32 %v26179_v28, %v28623_v5 }
 0x9c5   : > { %26190 = vrcp.f32 %v7865_v63  ;;  %11633 = vrot.lane.b32.xlu0 %v27708_v36, %s26618_s8  ;;  %24851 = vmatmul.mubr.msk.f32.vlgmr.msra.gmra.mrb[80].mxu0 %vm1193_vm3, %v7888_v26  ;;  %v32336_v26 = vld [vmem:[#allocation6_spill] sm:$0xff] }
 0x9c6   : > { %v26181_v7 = vpop.eup %26180  ;;  %24856 = vmatmul.mubr.msk.f32.vlgmr.msra.gmra.mrb[118].mxu1 %vm1193_vm3, %v7890_v46  ;;  %24859 = vmatpush3.msra.mxu0 %v28534_v44 }
 0x9c7   : > { %v26183_v39 = vpop.eup %26182  ;;  %24864 = vmatpush3.msra.mxu1 %v28538_v45  ;;  %v7868_v23 = vpop.xlane.xlu0 %7867  ;;  %24860 = vmatprep.mubr.msk.f32.mxu0 %vm26611_vm2, %v32223_v27  ;;  %v7892_v5 = vmul.f32 %v26181_v7, %v28631_v60  ;;  %v32339_v7 = vld [vmem:[#allocation80_spill] sm:$0xff] }
 0x9c8   : > { %26192 = vrcp.f32 %v7868_v23  ;;  %v7871_v41 = vpop.xlane.xlu1 %7870  ;;  %24868 = vmatprep.subr.mxu0 %v32223_v27  ;;  %11865 = vrot.lane.b32.xlu1 %v32272_v49, %s26619_s9  ;;  %v7894_v38 = vmul.f32 %v26183_v39, %v28633_v55  ;;  %v32340_v23 = vld [vmem:[#allocation23_spill] sm:$0xff] }
 0x9c9   : > { %26194 = vrcp.f32 %v7871_v41  ;;  %24865 = vmatprep.mubr.msk.f32.mxu1 %vm26611_vm2, %v32223_v27  ;;  %24873 = vmatprep.subr.mxu1 %v32223_v27  ;;  %v32343_v41 = vld [vmem:[#allocation82_spill] sm:$0xff] }
 0x9ca   : > { %v26185_v44 = vpop.eup %26184  ;;  %11787 = vrot.lane.b32.xlu0 %v32266_v40, %s26619_s9  ;;  %24861 = vmatmul.mubr.msk.f32.vlgmr.msra.gmra.mrb[82].mxu0 %vm1193_vm3, %v7892_v5 }
 0x9cb   : > { %v26187_v45 = vpop.eup %26186  ;;  %24866 = vmatmul.mubr.msk.f32.vlgmr.msra.gmra.mrb[120].mxu1 %vm1193_vm3, %v7894_v38  ;;  %24869 = vmatpush3.msra.mxu0 %v28540_v30  ;;  %v7874_v60 = vpop.xlane.xlu0 %7873  ;;  %v7896_v55 = vmul.f32 %v26185_v44, %v28640_v3  ;;  %v32335_v3 = vld [vmem:[#allocation78_spill] sm:$0xff]  ;;  %v32344_v38 = vld [vmem:[#allocation75_spill] sm:$0xff] }
 0x9cc   : > { %24874 = vmatpush3.msra.mxu1 %v28570_v62  ;;  %26196 = vrcp.f32 %v7874_v60  ;;  %24870 = vmatprep.mubr.msk.f32.mxu0 %vm26611_vm2, %v32223_v27  ;;  %v7898_v48 = vmul.f32 %v26187_v45, %v28642_v6 }
 0x9cd   : > { %24878 = vmatprep.subr.mxu0 %v32223_v27  ;;  %11863 = vrot.lane.b32.xlu1 %v32284_v47, %s26620_s10 }
 0x9ce   : > { %v26189_v28 = vpop.eup %26188  ;;  %24875 = vmatprep.mubr.msk.f32.mxu1 %vm26611_vm2, %v32223_v27  ;;  %24883 = vmatprep.subr.mxu1 %v32223_v27 }
 0x9cf   : > { %v26191_v30 = vpop.eup %26190  ;;  %11785 = vrot.lane.b32.xlu0 %v32267_v51, %s26620_s10  ;;  %24871 = vmatmul.mubr.msk.f32.vlgmr.msra.gmra.mrb[84].mxu0 %vm1193_vm3, %v7896_v55  ;;  %v7900_v62 = vmul.f32 %v26189_v28, %v28648_v22  ;;  %v32338_v22 = vld [vmem:[#allocation73_spill] sm:$0xff] }
 0x9d0   : > { %24876 = vmatmul.mubr.msk.f32.vlgmr.msra.gmra.mrb[122].mxu1 %vm1193_vm3, %v7898_v48  ;;  %24879 = vmatpush3.msra.mxu0 %v28542_v58  ;;  %v7902_v6 = vmul.f32 %v26191_v30, %v28650_v24  ;;  %v32337_v58 = vld [vmem:[#allocation5_spill] sm:$0xff] }
 0x9d1   : > { %24884 = vmatpush3.msra.mxu1 %v32335_v3  ;;  %24880 = vmatprep.mubr.msk.f32.mxu0 %vm26611_vm2, %v32223_v27 }
 0x9d2   : > { %v26193_v15 = vpop.eup %26192  ;;  %24888 = vmatprep.subr.mxu0 %v32223_v27  ;;  %12021 = vrot.lane.b32.xlu1 %v32336_v26, %s26619_s9 }
 0x9d3   : > { %v26195_v63 = vpop.eup %26194  ;;  %24885 = vmatprep.mubr.msk.f32.mxu1 %vm26611_vm2, %v32223_v27  ;;  %24893 = vmatprep.subr.mxu1 %v32223_v27  ;;  %v7904_v24 = vmul.f32 %v26193_v15, %v28656_v33  ;;  %v32341_v33 = vld [vmem:[#allocation21_spill] sm:$0xff] }
 0x9d4   : > { %11943 = vrot.lane.b32.xlu0 %v32337_v58, %s26619_s9  ;;  %24881 = vmatmul.mubr.msk.f32.vlgmr.msra.gmra.mrb[86].mxu0 %vm1193_vm3, %v7900_v62  ;;  %v7906_v39 = vmul.f32 %v26195_v63, %v28658_v2  ;;  %v32342_v2 = vld [vmem:[#allocation74_spill] sm:$0xff] }
 0x9d5   : > { %24886 = vmatmul.mubr.msk.f32.vlgmr.msra.gmra.mrb[124].mxu1 %vm1193_vm3, %v7902_v6  ;;  %24889 = vmatpush3.msra.mxu0 %v32338_v22  ;;  %v32345_v6 = vld [vmem:[#allocation83_spill] sm:$0xff] }
 0x9d6   : > { %v26197_v46 = vpop.eup %26196  ;;  %24894 = vmatpush3.msra.mxu1 %v32339_v7  ;;  %24890 = vmatprep.mubr.msk.f32.mxu0 %vm26611_vm2, %v32223_v27 }
 0x9d7   : > { %24898 = vmatprep.subr.mxu0 %v32223_v27  ;;  %12019 = vrot.lane.b32.xlu1 %v32340_v23, %s26620_s10  ;;  %v7908_v5 = vmul.f32 %v26197_v46, %v28664_v1  ;;  %v32348_v46 = vld [vmem:[#allocation85_spill] sm:$0xff] }
 0x9d8   : > { %24895 = vmatprep.mubr.msk.f32.mxu1 %vm26611_vm2, %v32223_v27  ;;  %24903 = vmatprep.subr.mxu1 %v32223_v27 }
 0x9d9   : > { %11941 = vrot.lane.b32.xlu0 %v32341_v33, %s26620_s10  ;;  %24891 = vmatmul.mubr.msk.f32.vlgmr.msra.gmra.mrb[88].mxu0 %vm1193_vm3, %v7904_v24  ;;  %v32346_v24 = vld [vmem:[#allocation84_spill] sm:$0xff]  ;;  %v32380_v33 = vld [vmem:[#allocation10_spill] sm:$0xff] }
 0x9da   : > { %24896 = vmatmul.mubr.msk.f32.vlgmr.msra.gmra.mrb[126].mxu1 %vm1193_vm3, %v7906_v39  ;;  %24899 = vmatpush3.msra.mxu0 %v32342_v2  ;;  %v32351_v2 = vld [vmem:[#allocation79_spill] sm:$0xff] }
 0x9db   : > { %24904 = vmatpush3.msra.mxu1 %v32343_v41  ;;  %24900 = vmatprep.mubr.msk.f32.mxu0 %vm26611_vm2, %v32223_v27 }
 0x9dc   : > { %24908 = vmatprep.subr.mxu0 %v32223_v27  ;;  %24905 = vmatprep.mubr.msk.f32.mxu1 %vm26611_vm2, %v32223_v27 }
 0x9dd   : > { %24901 = vmatmul.mubr.msk.f32.vlgmr.msra.gmra.mrb[90].mxu0 %vm1193_vm3, %v7908_v5  ;;  %24913 = vmatprep.subr.mxu1 %v32223_v27  ;;  %v32350_v5 = vld [vmem:[#allocation86_spill] sm:$0xff] }
 0x9de   : > { %24909 = vmatpush3.msra.mxu0 %v32344_v38  ;;  %24910 = vmatprep.mubr.msk.f32.mxu0 %vm26611_vm2, %v32223_v27 }
 0x9df   : > { %24918 = vmatprep.subr.mxu0 %v32223_v27 }
 0x9fc   : > { %v7877_v1 = vpop.xlane.xlu1 %7876 }
 0x9fd   : > { %26198 = vrcp.f32 %v7877_v1  ;;  %v32352_v1 = vld [vmem:[#allocation81_spill] sm:$0xff] }
 0xa00   : > { %v7880_v44 = vpop.xlane.xlu0 %7879  ;;  %v9676_v45 = vpop.permute.xlu1 %9675 }
 0xa01   : > { %26200 = vrcp.f32 %v7880_v44 }
 0xa04   : > { %v9598_v60 = vpop.permute.xlu0 %9597  ;;  %v9834_v55 = vpop.permute.xlu1 %9833 }
 0xa07   : > { %v26199_v48 = vpop.eup %26198 }
 0xa08   : > { %v9756_v28 = vpop.permute.xlu0 %9755  ;;  %v9832_v30 = vpop.permute.xlu1 %9831  ;;  %v7910_v62 = vmul.f32 %v26199_v48, %v28674_v19  ;;  %v32347_v19 = vld [vmem:[#allocation76_spill] sm:$0xff] }
 0xa0a   : > { %24906 = vmatmul.mubr.msk.f32.vlgmr.msra.gmra.mrb[128].mxu1 %vm1193_vm3, %v7910_v62 }
 0xa0b   : > { %v26201_v3 = vpop.eup %26200  ;;  %24914 = vmatpush3.xpose.msk.msra.mxu1 %vm1193_vm3, %v32345_v6  ;;  %24915 = vmatprep.mubr.msk.f32.mxu1 %vm26611_vm2, %v32223_v27 }
 0xa0c   : > { %v9754_v15 = vpop.permute.xlu0 %9753  ;;  %v9990_v63 = vpop.permute.xlu1 %9989  ;;  %24923 = vmatprep.subr.mxu1 %v32223_v27  ;;  %v7912_v22 = vmul.f32 %v26201_v3, %v28678_v11  ;;  %v32349_v11 = vld [vmem:[#allocation77_spill] sm:$0xff] }
 0xa0e   : > { %24911 = vmatmul.mubr.msk.f32.vlgmr.msra.gmra.mrb[92].mxu0 %vm1193_vm3, %v7912_v22  ;;  %24916 = vmatmul.mubr.msk.f32.vlgmr.msra.gmra.mrb[130].mxu1 %vm1193_vm3, %v32346_v24 }
 0xa0f   : > { %24919 = vmatpush3.xpose.msk.msra.mxu0 %vm1193_vm3, %v32347_v19  ;;  %24924 = vmatpush3.xpose.msk.msra.mxu1 %vm1193_vm3, %v32348_v46 }
 0xa10   : > { %v9912_v7 = vpop.permute.xlu0 %9911  ;;  %v9988_v39 = vpop.permute.xlu1 %9987  ;;  %24920 = vmatprep.mubr.msk.f32.mxu0 %vm26611_vm2, %v32223_v27  ;;  %24925 = vmatprep.mubr.msk.f32.mxu1 %vm26611_vm2, %v32223_v27 }
 0xa11   : > { %24928 = vmatprep.subr.mxu0 %v32223_v27  ;;  %24933 = vmatprep.subr.mxu1 %v32223_v27 }
 0xa12   : > { %24921 = vmatmul.mubr.msk.f32.vlgmr.msra.gmra.mrb[94].mxu0 %vm1193_vm3, %v32349_v11  ;;  %24926 = vmatmul.mubr.msk.f32.vlgmr.msra.gmra.mrb[132].mxu1 %vm1193_vm3, %v32350_v5 }
 0xa13   : > { %24929 = vmatpush3.xpose.msk.msra.mxu0 %vm1193_vm3, %v32351_v2  ;;  %24934 = vmatpush3.xpose.msk.msra.mxu1 %vm1193_vm3, %v28670_v52 }
 0xa14   : > { %v9910_v41 = vpop.permute.xlu0 %9909  ;;  %v10146_v38 = vpop.permute.xlu1 %10145  ;;  %24930 = vmatprep.mubr.msk.f32.mxu0 %vm26611_vm2, %v32223_v27  ;;  %24935 = vmatprep.mubr.msk.f32.mxu1 %vm26611_vm2, %v32223_v27 }
 0xa15   : > { %24938 = vmatprep.subr.mxu0 %v32223_v27  ;;  %24943 = vmatprep.subr.mxu1 %v32223_v27 }
 0xa16   : > { %24931 = vmatmul.mubr.msk.f32.vlgmr.msra.gmra.mrb[96].mxu0 %vm1193_vm3, %v32352_v1  ;;  %24936 = vmatmul.mubr.msk.f32.vlgmr.msra.gmra.mrb[134].mxu1 %vm1193_vm3, %v28696_v10 }
 0xa17   : > { %24939 = vmatpush3.xpose.msk.msra.mxu0 %vm1193_vm3, %v28668_v9  ;;  %24944 = vmatpush3.xpose.msk.msra.mxu1 %vm1193_vm3, %v28704_v59 }
 0xa18   : > { %v10068_v52 = vpop.permute.xlu0 %10067  ;;  %v10144_v44 = vpop.permute.xlu1 %10143  ;;  %24940 = vmatprep.mubr.msk.f32.mxu0 %vm26611_vm2, %v32223_v27  ;;  %24945 = vmatprep.mubr.msk.f32.mxu1 %vm26611_vm2, %v32223_v27 }
 0xa19   : > { %24948 = vmatprep.subr.mxu0 %v32223_v27  ;;  %24953 = vmatprep.subr.mxu1 %v32223_v27 }
 0xa1a   : > { %24941 = vmatmul.mubr.msk.f32.vlgmr.msra.gmra.mrb[98].mxu0 %vm1193_vm3, %v28720_v20  ;;  %24946 = vmatmul.mubr.msk.f32.vlgmr.msra.gmra.mrb[136].mxu1 %vm1193_vm3, %v9598_v60 }
 0xa1b   : > { %24949 = vmatpush3.xpose.msk.msra.mxu0 %vm1193_vm3, %v28733_v21  ;;  %24954 = vmatpush3.xpose.msk.msra.mxu1 %vm1193_vm3, %v9756_v28 }
 0xa1c   : > { %v10066_v9 = vpop.permute.xlu0 %10065  ;;  %24950 = vmatprep.mubr.msk.f32.mxu0 %vm26611_vm2, %v32223_v27  ;;  %24955 = vmatprep.mubr.msk.f32.mxu1 %vm26611_vm2, %v32223_v27  ;;  %v10302_v10 = vpop.permute.xlu1 %10301 }
 0xa1d   : > { %24958 = vmatprep.subr.mxu0 %v32223_v27  ;;  %24963 = vmatprep.subr.mxu1 %v32223_v27 }
 0xa1e   : > { %24951 = vmatmul.mubr.msk.f32.vlgmr.msra.gmra.mrb[100].mxu0 %vm1193_vm3, %v9676_v45  ;;  %24956 = vmatmul.mubr.msk.f32.vlgmr.msra.gmra.mrb[138].mxu1 %vm1193_vm3, %v9754_v15 }
 0xa1f   : > { %24959 = vmatpush3.xpose.msk.msra.mxu0 %vm1193_vm3, %v9834_v55  ;;  %24964 = vmatpush3.xpose.msk.msra.mxu1 %vm1193_vm3, %v9912_v7 }
 0xa20   : > { %24960 = vmatprep.mubr.msk.f32.mxu0 %vm26611_vm2, %v32223_v27  ;;  %24965 = vmatprep.mubr.msk.f32.mxu1 %vm26611_vm2, %v32223_v27  ;;  %v10224_v21 = vpop.permute.xlu0 %10223  ;;  %v10300_v59 = vpop.permute.xlu1 %10299 }
 0xa21   : > { %24968 = vmatprep.subr.mxu0 %v32223_v27  ;;  %24973 = vmatprep.subr.mxu1 %v32223_v27 }
 0xa22   : > { %24961 = vmatmul.mubr.msk.f32.vlgmr.msra.gmra.mrb[102].mxu0 %vm1193_vm3, %v9832_v30  ;;  %24966 = vmatmul.mubr.msk.f32.vlgmr.msra.gmra.mrb[140].mxu1 %vm1193_vm3, %v9910_v41 }
 0xa23   : > { %24969 = vmatpush3.xpose.msk.msra.mxu0 %vm1193_vm3, %v9990_v63  ;;  %24974 = vmatpush3.xpose.msk.msra.mxu1 %vm1193_vm3, %v10068_v52 }
 0xa24   : > { %24970 = vmatprep.mubr.msk.f32.mxu0 %vm26611_vm2, %v32223_v27  ;;  %24975 = vmatprep.mubr.msk.f32.mxu1 %vm26611_vm2, %v32223_v27  ;;  %v10222_v20 = vpop.permute.xlu0 %10221  ;;  %v10570_v45 = vpop.permute.xlu1 %10569 }
 0xa25   : > { %24978 = vmatprep.subr.mxu0 %v32223_v27  ;;  %24983 = vmatprep.subr.mxu1 %v32223_v27 }
 0xa26   : > { %24971 = vmatmul.mubr.msk.f32.vlgmr.msra.gmra.mrb[104].mxu0 %vm1193_vm3, %v9988_v39  ;;  %24976 = vmatmul.mubr.msk.f32.vlgmr.msra.gmra.mrb[142].mxu1 %vm1193_vm3, %v10066_v9 }
 0xa27   : > { %24979 = vmatpush3.xpose.msk.msra.mxu0 %vm1193_vm3, %v10146_v38  ;;  %24984 = vmatpush3.xpose.msk.msra.mxu1 %vm1193_vm3, %v10224_v21 }
 0xa28   : > { %24980 = vmatprep.mubr.msk.f32.mxu0 %vm26611_vm2, %v32223_v27  ;;  %24985 = vmatprep.mubr.msk.f32.mxu1 %vm26611_vm2, %v32223_v27  ;;  %v10646_v60 = vpop.permute.xlu0 %10645 }
 0xa29   : > { %24988 = vmatprep.subr.mxu0 %v32223_v27  ;;  %24993 = vmatprep.subr.mxu1 %v32223_v27 }
 0xa2a   : > { %24981 = vmatmul.mubr.msk.f32.vlgmr.msra.gmra.mrb[106].mxu0 %vm1193_vm3, %v10144_v44  ;;  %24986 = vmatmul.mubr.msk.f32.vlgmr.msra.gmra.mrb[144].mxu1 %vm1193_vm3, %v10222_v20 }
 0xa2b   : > { %24989 = vmatpush3.xpose.msk.msra.mxu0 %vm1193_vm3, %v10302_v10  ;;  %24994 = vmatpush3.msra.mxu1 %v10570_v45 }
 0xa2c   : > { %24990 = vmatprep.mubr.msk.f32.mxu0 %vm26611_vm2, %v32223_v27  ;;  %24998 = vmatprep.subr.mxu0 %v32223_v27 }
 0xa2d   : > { %24995 = vmatprep.mubr.msk.f32.mxu1 %vm26611_vm2, %v32223_v27  ;;  %25003 = vmatprep.subr.mxu1 %v32223_v27 }
 0xa2e   : > { %24991 = vmatmul.mubr.msk.f32.vlgmr.msra.gmra.mrb[108].mxu0 %vm1193_vm3, %v10300_v59 }
 0xa2f   : > { %24999 = vmatpush3.msra.mxu0 %v10646_v60  ;;  %25000 = vmatprep.mubr.msk.f32.mxu0 %vm26611_vm2, %v32223_v27 }
 0xa30   : > { %25008 = vmatprep.subr.mxu0 %v32223_v27 }
 0xa7c   : > { %v28962_v55 = vpop.f32.mrb[78].mxu0 }
 0xa7d   : > { %32353 = vst [vmem:[#allocation27_spill] sm:$0xff] %v28962_v55  ;;  %v24842_v48 = vpop.f32.mrb[79].mxu0  ;;  %v32370_v55 = vld [vmem:[#allocation8_spill] sm:$0xff] }
 0xa90   : > { %v28964_v28 = vpop.f32.mrb[114].mxu1 }
 0xa91   : > { %32354 = vst [vmem:[#allocation26_spill] sm:$0xff] %v28964_v28  ;;  %v24837_v30 = vpop.f32.mrb[115].mxu1  ;;  %v29098_v28 = vpop.permute.xlu0 %10721 }
 0xa94   : > { %v28966_v62 = vpop.f32.mrb[116].mxu1 }
 0xa95   : > { %32355 = vst [vmem:[#allocation13_spill] sm:$0xff] %v28966_v62  ;;  %v24847_v3 = vpop.f32.mrb[117].mxu1 }
 0xa98   : > { %v28968_v6 = vpop.f32.mrb[80].mxu0 }
 0xa99   : > { %32356 = vst [vmem:[#allocation28_spill] sm:$0xff] %v28968_v6  ;;  %v28970_v15 = vpop.f32.mrb[118].mxu1  ;;  %v24852_v63 = vpop.f32.mrb[81].mxu0 }
 0xa9a   : > { %32357 = vst [vmem:[#allocation15_spill] sm:$0xff] %v28970_v15  ;;  %v24857_v22 = vpop.f32.mrb[119].mxu1 }
 0xa9d   : > { %v28972_v24 = vpop.f32.mrb[82].mxu0 }
 0xa9e   : > { %32358 = vst [vmem:[#allocation32_spill] sm:$0xff] %v28972_v24  ;;  %v28974_v19 = vpop.f32.mrb[120].mxu1  ;;  %v24862_v46 = vpop.f32.mrb[83].mxu0 }
 0xa9f   : > { %32359 = vst [vmem:[#allocation46_spill] sm:$0xff] %v28974_v19  ;;  %v24867_v7 = vpop.f32.mrb[121].mxu1  ;;  %v32372_v19 = vld [vmem:[#allocation25_spill] sm:$0xff] }
 0xaa2   : > { %v28976_v39 = vpop.f32.mrb[84].mxu0 }
 0xaa3   : > { %32360 = vst [vmem:[#allocation78_spill] sm:$0xff] %v28976_v39  ;;  %v28978_v11 = vpop.f32.mrb[122].mxu1  ;;  %v24872_v5 = vpop.f32.mrb[85].mxu0 }
 0xaa4   : > { %32361 = vst [vmem:[#allocation73_spill] sm:$0xff] %v28978_v11  ;;  %v24877_v2 = vpop.f32.mrb[123].mxu1 }
 0xaa7   : > { %v28980_v41 = vpop.f32.mrb[86].mxu0 }
 0xaa8   : > { %32362 = vst [vmem:[#allocation80_spill] sm:$0xff] %v28980_v41  ;;  %v28982_v38 = vpop.f32.mrb[124].mxu1  ;;  %v24882_v1 = vpop.f32.mrb[87].mxu0 }
 0xaa9   : > { %32363 = vst [vmem:[#allocation74_spill] sm:$0xff] %v28982_v38  ;;  %v24887_v52 = vpop.f32.mrb[125].mxu1  ;;  %v29102_v41 = vpop.permute.xlu0 %10873 }
 0xaac   : > { %v28984_v44 = vpop.f32.mrb[88].mxu0 }
 0xaad   : > { %32364 = vst [vmem:[#allocation82_spill] sm:$0xff] %v28984_v44  ;;  %v28986_v9 = vpop.f32.mrb[126].mxu1  ;;  %v24892_v10 = vpop.f32.mrb[89].mxu0 }
 0xaae   : > { %32365 = vst [vmem:[#allocation75_spill] sm:$0xff] %v28986_v9  ;;  %v24897_v21 = vpop.f32.mrb[127].mxu1 }
 0xab0   : > { %v28988_v59 = vpop.f32.mrb[90].mxu0 }
 0xab1   : > { %32366 = vst [vmem:[#allocation83_spill] sm:$0xff] %v28988_v59  ;;  %v24902_v20 = vpop.f32.mrb[91].mxu0 }
 0xadd   : > { %v28990_v45 = vpop.f32.mrb[128].mxu1 }
 0xade   : > { %32367 = vst [vmem:[#allocation84_spill] sm:$0xff] %v28990_v45  ;;  %v24907_v60 = vpop.f32.mrb[129].mxu1 }
 0xae1   : > { %v28992_v48 = vpop.f32.mrb[92].mxu0  ;;  %v9203_v30 = vpop.f32.mrb[130].mxu1 }
 0xae2   : > { %32368 = vst [vmem:[#allocation76_spill] sm:$0xff] %v28992_v48  ;;  %v28996_v63 = vsel %vm26902_vm1, %v9203_v30, -32767.0  ;;  %v24912_v22 = vpop.f32.mrb[93].mxu0  ;;  %v24917_v46 = vpop.f32.mrb[131].mxu1 }
 0xae3   : > { %v10393_v7 = vsel %vm1193_vm3, %v28996_v63, -inf }
 0xae4   : > { %10394 = vmax.xlane.f32.xlu0 %v10393_v7 }
 0xae5   : > { %v9281_v5 = vpop.f32.mrb[94].mxu0  ;;  %v9359_v2 = vpop.f32.mrb[132].mxu1 }
 0xae6   : > { %v29002_v1 = vsel %vm26902_vm1, %v9281_v5, -32767.0  ;;  %v29006_v52 = vsel %vm26902_vm1, %v9359_v2, -32767.0  ;;  %v24922_v10 = vpop.f32.mrb[95].mxu0  ;;  %v24927_v21 = vpop.f32.mrb[133].mxu1 }
 0xae7   : > { %v10396_v20 = vsel %vm1193_vm3, %v29002_v1, -inf  ;;  %v10399_v60 = vsel %vm1193_vm3, %v29006_v52, -inf }
 0xae8   : > { %10397 = vmax.xlane.f32.xlu1 %v10396_v20  ;;  %10400 = vmax.xlane.f32.xlu0 %v10399_v60 }
 0xae9   : > { %v9437_v30 = vpop.f32.mrb[96].mxu0  ;;  %v9515_v22 = vpop.f32.mrb[134].mxu1 }
 0xaea   : > { %v29014_v46 = vsel %vm26902_vm1, %v9437_v30, -32767.0  ;;  %v29018_v7 = vsel %vm26902_vm1, %v9515_v22, -32767.0  ;;  %v24932_v5 = vpop.f32.mrb[97].mxu0  ;;  %v24937_v2 = vpop.f32.mrb[135].mxu1 }
 0xaeb   : > { %v10402_v10 = vsel %vm1193_vm3, %v29014_v46, -inf  ;;  %v10405_v21 = vsel %vm1193_vm3, %v29018_v7, -inf }
 0xaec   : > { %10403 = vmax.xlane.f32.xlu0 %v10402_v10  ;;  %10406 = vmax.xlane.f32.xlu1 %v10405_v21 }
 0xaed   : > { %v9593_v20 = vpop.f32.mrb[98].mxu0  ;;  %v9671_v60 = vpop.f32.mrb[136].mxu1 }
 0xaee   : > { %v29026_v30 = vsel %vm26902_vm1, %v9593_v20, -32767.0  ;;  %v29030_v22 = vsel %vm26902_vm1, %v9671_v60, -32767.0  ;;  %v24942_v5 = vpop.f32.mrb[99].mxu0  ;;  %v24947_v2 = vpop.f32.mrb[137].mxu1 }
 0xaef   : > { %v10408_v24 = vsel %vm1193_vm3, %v29026_v30, -inf  ;;  %v10411_v48 = vsel %vm1193_vm3, %v29030_v22, -inf }
 0xaf0   : > { %10409 = vmax.xlane.f32.xlu0 %v10408_v24  ;;  %10412 = vmax.xlane.f32.xlu1 %v10411_v48 }
 0xaf1   : > { %v9749_v10 = vpop.f32.mrb[100].mxu0  ;;  %v9827_v21 = vpop.f32.mrb[138].mxu1 }
 0xaf2   : > { %v29038_v20 = vsel %vm26902_vm1, %v9749_v10, -32767.0  ;;  %v29042_v60 = vsel %vm26902_vm1, %v9827_v21, -32767.0  ;;  %v24952_v5 = vpop.f32.mrb[101].mxu0  ;;  %v24957_v2 = vpop.f32.mrb[139].mxu1 }
 0xaf3   : > { %v10414_v15 = vsel %vm1193_vm3, %v29038_v20, -inf  ;;  %v10417_v45 = vsel %vm1193_vm3, %v29042_v60, -inf }
 0xaf4   : > { %10415 = vmax.xlane.f32.xlu0 %v10414_v15  ;;  %10418 = vmax.xlane.f32.xlu1 %v10417_v45 }
 0xaf5   : > { %v9905_v24 = vpop.f32.mrb[102].mxu0  ;;  %v9983_v48 = vpop.f32.mrb[140].mxu1 }
 0xaf6   : > { %v29050_v10 = vsel %vm26902_vm1, %v9905_v24, -32767.0  ;;  %v29054_v21 = vsel %vm26902_vm1, %v9983_v48, -32767.0  ;;  %v24962_v5 = vpop.f32.mrb[103].mxu0  ;;  %v24967_v2 = vpop.f32.mrb[141].mxu1 }
 0xaf7   : > { %v10420_v6 = vsel %vm1193_vm3, %v29050_v10, -inf  ;;  %v10423_v59 = vsel %vm1193_vm3, %v29054_v21, -inf }
 0xaf8   : > { %10421 = vmax.xlane.f32.xlu0 %v10420_v6  ;;  %10424 = vmax.xlane.f32.xlu1 %v10423_v59 }
 0xaf9   : > { %v10061_v15 = vpop.f32.mrb[104].mxu0  ;;  %v10139_v45 = vpop.f32.mrb[142].mxu1 }
 0xafa   : > { %v29062_v24 = vsel %vm26902_vm1, %v10061_v15, -32767.0  ;;  %v29066_v48 = vsel %vm26902_vm1, %v10139_v45, -32767.0  ;;  %v24972_v5 = vpop.f32.mrb[105].mxu0  ;;  %v24977_v2 = vpop.f32.mrb[143].mxu1 }
 0xafb   : > { %v10426_v62 = vsel %vm1193_vm3, %v29062_v24, -inf  ;;  %v10429_v9 = vsel %vm1193_vm3, %v29066_v48, -inf }
 0xafc   : > { %10427 = vmax.xlane.f32.xlu0 %v10426_v62  ;;  %10430 = vmax.xlane.f32.xlu1 %v10429_v9  ;;  %v32371_v62 = vld [vmem:[#allocation7_spill] sm:$0xff] }
 0xafd   : > { %v10217_v6 = vpop.f32.mrb[106].mxu0  ;;  %v10295_v59 = vpop.f32.mrb[144].mxu1 }
 0xafe   : > { %v29074_v15 = vsel %vm26902_vm1, %v10217_v6, -32767.0  ;;  %v24982_v44 = vpop.f32.mrb[107].mxu0  ;;  %v24987_v38 = vpop.f32.mrb[145].mxu1  ;;  %v29084_v9 = vsel %vm26902_vm1, %v10295_v59, -32767.0 }
 0xaff   : > { %v10432_v45 = vsel %vm1193_vm3, %v29074_v15, -inf  ;;  %v29086_v6 = vpop.permute.xlu1 %10797  ;;  %v10435_v38 = vsel %vm1193_vm3, %v29084_v9, -inf }
 0xb00   : > { %10433 = vmax.xlane.f32.xlu0 %v10432_v45 }
 0xb01   : > { %v10373_v5 = vpop.f32.mrb[108].mxu0 }
 0xb02   : > { %v24992_v2 = vpop.f32.mrb[109].mxu0  ;;  %v29092_v44 = vsel %vm26902_vm1, %v10373_v5, -32767.0  ;;  %v29108_v5 = vpop.permute.xlu0 %11177 }
 0xb03   : > { %v10438_v45 = vsel %vm1193_vm3, %v29092_v44, -inf  ;;  %v29096_v2 = vpop.permute.xlu1 %10949  ;;  %32373 = vst [vmem:[#allocation85_spill] sm:$0xff] %v29108_v5 }
 0xb07   : > { %v29100_v59 = vpop.permute.xlu1 %11025 }
 0xb0b   : > { %v29104_v11 = vpop.permute.xlu1 %11101 }
 0xb0d   : > { %12177 = vrot.lane.b32.xlu1 %v32370_v55, %s26619_s9 }
 0xb0f   : > { %v29112_v39 = vpop.permute.xlu1 %11253 }
 0xb10   : > { %32375 = vst [vmem:[#allocation77_spill] sm:$0xff] %v29112_v39 }
 0xb13   : > { %v29118_v55 = vpop.permute.xlu1 %11405 }
 0xb14   : > { %32378 = vst [vmem:[#allocation79_spill] sm:$0xff] %v29118_v55 }
 0xb16   : > { %12099 = vrot.lane.b32.xlu0 %v32371_v62, %s26619_s9  ;;  %v29114_v62 = vpop.permute.xlu0 %11329 }
 0xb17   : > { %32376 = vst [vmem:[#allocation86_spill] sm:$0xff] %v29114_v62 }
 0xb1a   : > { %v29120_v3 = vpop.permute.xlu0 %11481 }
 0xb1b   : > { %32379 = vst [vmem:[#allocation81_spill] sm:$0xff] %v29120_v3 }
 0xb1e   : > { %v29126_v23 = vpop.permute.xlu0 %11633 }
 0xb1f   : > { %32382 = vst [vmem:[#allocation88_spill] sm:$0xff] %v29126_v23 }
 0xb31   : > { %10436 = vmax.xlane.f32.xlu1 %v10435_v38  ;;  %v32374_v38 = vld [vmem:[#allocation12_spill] sm:$0xff] }
 0xb35   : > { %10439 = vmax.xlane.f32.xlu0 %v10438_v45  ;;  %v32377_v45 = vld [vmem:[#allocation24_spill] sm:$0xff] }
 0xb42   : > { %12175 = vrot.lane.b32.xlu1 %v32372_v19, %s26620_s10  ;;  %v29124_v19 = vpop.permute.xlu1 %11557 }
 0xb43   : > { %32381 = vst [vmem:[#allocation87_spill] sm:$0xff] %v29124_v19 }
 0xb46   : > { %12333 = vrot.lane.b32.xlu1 %v32374_v38, %s26619_s9  ;;  %v29128_v58 = vpop.permute.xlu1 %11709  ;;  %v29130_v38 = vpop.permute.xlu0 %11787 }
 0xb47   : > { %32383 = vst [vmem:[#allocation89_spill] sm:$0xff] %v29128_v58  ;;  %32384 = vst [vmem:[#allocation90_spill] sm:$0xff] %v29130_v38 }
 0xb4a   : > { %v29132_v26 = vpop.permute.xlu1 %11865  ;;  %v29134_v62 = vpop.permute.xlu0 %11785 }
 0xb4b   : > { %12097 = vrot.lane.b32.xlu0 %v32377_v45, %s26620_s10  ;;  %32385 = vst [vmem:[#allocation91_spill] sm:$0xff] %v29132_v26  ;;  %32386 = vst [vmem:[#allocation92_spill] sm:$0xff] %v29134_v62 }
 0xb4e   : > { %v29136_v45 = vpop.permute.xlu1 %11863  ;;  %v29138_v55 = vpop.permute.xlu0 %11943 }
 0xb4f   : > { %12255 = vrot.lane.b32.xlu0 %v32380_v33, %s26619_s9  ;;  %32387 = vst [vmem:[#allocation93_spill] sm:$0xff] %v29136_v45  ;;  %32388 = vst [vmem:[#allocation94_spill] sm:$0xff] %v29138_v55 }
 0xb52   : > { %v29140_v3 = vpop.permute.xlu1 %12021  ;;  %v29142_v39 = vpop.permute.xlu0 %11941 }
 0xb53   : > { %32389 = vst [vmem:[#allocation95_spill] sm:$0xff] %v29140_v3  ;;  %32390 = vst [vmem:[#allocation96_spill] sm:$0xff] %v29142_v39 }
 0xb56   : > { %v29144_v33 = vpop.permute.xlu1 %12019 }
 0xb57   : > { %32391 = vst [vmem:[#allocation97_spill] sm:$0xff] %v29144_v33 }
 0xb71   : > { %v10395_v19 = vpop.xlane.xlu0 %10394 }
 0xb72   : > { %v10441_v23 = vsub.f32 %v28996_v63, %v10395_v19 }
 0xb74   : > { %v10457_v58 = vmul.f32 1.442695, %v10441_v23 }
 0xb75   : > { %v10398_v51 = vpop.xlane.xlu1 %10397  ;;  %v10401_v38 = vpop.xlane.xlu0 %10400 }
 0xb76   : > { %26202 = vpow2.f32 %v10457_v58  ;;  %v10442_v26 = vsub.f32 %v29002_v1, %v10398_v51  ;;  %v10443_v62 = vsub.f32 %v29006_v52, %v10401_v38 }
 0xb78   : > { %v10459_v45 = vmul.f32 1.442695, %v10442_v26  ;;  %v10461_v47 = vmul.f32 1.442695, %v10443_v62 }
 0xb79   : > { %v10404_v55 = vpop.xlane.xlu0 %10403  ;;  %v10407_v5 = vpop.xlane.xlu1 %10406 }
 0xb7a   : > { %26204 = vpow2.f32 %v10459_v45  ;;  %v10444_v3 = vsub.f32 %v29014_v46, %v10404_v55  ;;  %v10445_v33 = vsub.f32 %v29018_v7, %v10407_v5 }
 0xb7b   : > { %26206 = vpow2.f32 %v10461_v47 }
 0xb7c   : > { %v10463_v39 = vmul.f32 1.442695, %v10444_v3  ;;  %v10465_v19 = vmul.f32 1.442695, %v10445_v33 }
 0xb7d   : > { %v10410_v23 = vpop.xlane.xlu0 %10409  ;;  %v10413_v63 = vpop.xlane.xlu1 %10412 }
 0xb7e   : > { %26208 = vpow2.f32 %v10463_v39  ;;  %v10446_v58 = vsub.f32 %v29026_v30, %v10410_v23  ;;  %v10447_v51 = vsub.f32 %v29030_v22, %v10413_v63 }
 0xb7f   : > { %26210 = vpow2.f32 %v10465_v19 }
 0xb80   : > { %v29153_v26 = vpop.eup %26202  ;;  %v10467_v1 = vmul.f32 1.442695, %v10446_v58  ;;  %v10469_v52 = vmul.f32 1.442695, %v10447_v51 }
 0xb81   : > { %v10416_v62 = vpop.xlane.xlu0 %10415  ;;  %v10419_v38 = vpop.xlane.xlu1 %10418  ;;  %v10489_v55 = vsel %vm1193_vm3, %v29153_v26, 0.0 }
 0xb82   : > { %26212 = vpow2.f32 %v10467_v1  ;;  %v10448_v47 = vsub.f32 %v29038_v20, %v10416_v62  ;;  %v10449_v33 = vsub.f32 %v29042_v60, %v10419_v38  ;;  %10490 = vadd.xlane.f32.xlu1 %v10489_v55 }
 0xb83   : > { %26214 = vpow2.f32 %v10469_v52 }
 0xb84   : > { %v29159_v39 = vpop.eup %26204  ;;  %v10471_v3 = vmul.f32 1.442695, %v10448_v47  ;;  %v10473_v46 = vmul.f32 1.442695, %v10449_v33 }
 0xb85   : > { %v29161_v7 = vpop.eup %26206  ;;  %v10422_v30 = vpop.xlane.xlu0 %10421  ;;  %v10492_v5 = vsel %vm1193_vm3, %v29159_v39, 0.0 }
 0xb86   : > { %v10425_v22 = vpop.xlane.xlu1 %10424  ;;  %26216 = vpow2.f32 %v10471_v3  ;;  %v10450_v45 = vsub.f32 %v29050_v10, %v10422_v30  ;;  %10493 = vadd.xlane.f32.xlu0 %v10492_v5  ;;  %v10495_v60 = vsel %vm1193_vm3, %v29161_v7, 0.0 }
 0xb87   : > { %v10451_v20 = vsub.f32 %v29054_v21, %v10425_v22  ;;  %26218 = vpow2.f32 %v10473_v46  ;;  %10496 = vadd.xlane.f32.xlu1 %v10495_v60 }
 0xb88   : > { %v29169_v19 = vpop.eup %26208  ;;  %v10475_v23 = vmul.f32 1.442695, %v10450_v45 }
 0xb89   : > { %v10477_v63 = vmul.f32 1.442695, %v10451_v20  ;;  %v29171_v58 = vpop.eup %26210  ;;  %v10428_v51 = vpop.xlane.xlu0 %10427  ;;  %v10498_v52 = vsel %vm1193_vm3, %v29169_v19, 0.0 }
 0xb8a   : > { %v10431_v1 = vpop.xlane.xlu1 %10430  ;;  %26220 = vpow2.f32 %v10475_v23  ;;  %v10452_v10 = vsub.f32 %v29062_v24, %v10428_v51  ;;  %10499 = vadd.xlane.f32.xlu0 %v10498_v52  ;;  %v10501_v62 = vsel %vm1193_vm3, %v29171_v58, 0.0 }
 0xb8b   : > { %v10453_v21 = vsub.f32 %v29066_v48, %v10431_v1  ;;  %26222 = vpow2.f32 %v10477_v63  ;;  %10502 = vadd.xlane.f32.xlu1 %v10501_v62 }
 0xb8c   : > { %v29179_v38 = vpop.eup %26212  ;;  %v10479_v55 = vmul.f32 1.442695, %v10452_v10 }
 0xb8d   : > { %v10481_v47 = vmul.f32 1.442695, %v10453_v21  ;;  %v29181_v33 = vpop.eup %26214  ;;  %v10434_v3 = vpop.xlane.xlu0 %10433  ;;  %v10504_v46 = vsel %vm1193_vm3, %v29179_v38, 0.0 }
 0xb8e   : > { %26224 = vpow2.f32 %v10479_v55  ;;  %v10454_v24 = vsub.f32 %v29074_v15, %v10434_v3  ;;  %10505 = vadd.xlane.f32.xlu0 %v10504_v46  ;;  %v10507_v48 = vsel %vm1193_vm3, %v29181_v33, 0.0  ;;  %v29216_v55 = vpop.permute.xlu1 %12177 }
 0xb8f   : > { %26226 = vpow2.f32 %v10481_v47  ;;  %10508 = vadd.xlane.f32.xlu1 %v10507_v48 }
 0xb90   : > { %v29188_v30 = vpop.eup %26216  ;;  %v10483_v22 = vmul.f32 1.442695, %v10454_v24 }
 0xb91   : > { %v29190_v5 = vpop.eup %26218  ;;  %v10510_v45 = vsel %vm1193_vm3, %v29188_v30, 0.0  ;;  %v29218_v47 = vpop.permute.xlu0 %12099 }
 0xb92   : > { %26228 = vpow2.f32 %v10483_v22  ;;  %10511 = vadd.xlane.f32.xlu0 %v10510_v45  ;;  %v10513_v20 = vsel %vm1193_vm3, %v29190_v5, 0.0 }
 0xb93   : > { %10514 = vadd.xlane.f32.xlu1 %v10513_v20 }
 0xb94   : > { %v29196_v15 = vpop.eup %26220 }
 0xb95   : > { %v29198_v60 = vpop.eup %26222  ;;  %v10516_v23 = vsel %vm1193_vm3, %v29196_v15, 0.0 }
 0xb96   : > { %10517 = vadd.xlane.f32.xlu0 %v10516_v23  ;;  %v10519_v63 = vsel %vm1193_vm3, %v29198_v60, 0.0 }
 0xb97   : > { %10520 = vadd.xlane.f32.xlu1 %v10519_v63 }
 0xb98   : > { %v29204_v51 = vpop.eup %26224 }
 0xb99   : > { %v29206_v1 = vpop.eup %26226  ;;  %v10522_v52 = vsel %vm1193_vm3, %v29204_v51, 0.0 }
 0xb9a   : > { %10523 = vadd.xlane.f32.xlu0 %v10522_v52  ;;  %v10525_v10 = vsel %vm1193_vm3, %v29206_v1, 0.0 }
 0xb9b   : > { %10526 = vadd.xlane.f32.xlu1 %v10525_v10  ;;  %v32394_v10 = vld [vmem:[#allocation17_spill] sm:$0xff] }
 0xb9c   : > { %v29212_v21 = vpop.eup %26228 }
 0xb9d   : > { %v10528_v62 = vsel %vm1193_vm3, %v29212_v21, 0.0 }
 0xb9e   : > { %10529 = vadd.xlane.f32.xlu0 %v10528_v62  ;;  %v32395_v62 = vld [vmem:[#allocation35_spill] sm:$0xff] }
 0xbbe   : > { %v10437_v3 = vpop.xlane.xlu1 %10436 }
 0xbbf   : > { %v10455_v46 = vsub.f32 %v29084_v9, %v10437_v3  ;;  %v32392_v9 = vld [vmem:[#allocation30_spill] sm:$0xff] }
 0xbc1   : > { %v10485_v24 = vmul.f32 1.442695, %v10455_v46  ;;  %v32396_v46 = vld [vmem:[#allocation45_spill] sm:$0xff] }
 0xbc2   : > { %v10440_v48 = vpop.xlane.xlu0 %10439  ;;  %v29264_v3 = vpop.permute.xlu1 %12175 }
 0xbc3   : > { %26230 = vpow2.f32 %v10485_v24  ;;  %v10456_v22 = vsub.f32 %v29092_v44, %v10440_v48  ;;  %v32393_v44 = vld [vmem:[#allocation20_spill] sm:$0xff]  ;;  %v32397_v48 = vld [vmem:[#allocation33_spill] sm:$0xff] }
 0xbc5   : > { %v10487_v45 = vmul.f32 1.442695, %v10456_v22 }
 0xbc6   : > { %v29270_v24 = vpop.permute.xlu0 %12097  ;;  %v29274_v22 = vpop.permute.xlu1 %12333 }
 0xbc7   : > { %26232 = vpow2.f32 %v10487_v45  ;;  %v32398_v45 = vld [vmem:[#allocation9_spill] sm:$0xff] }
 0xbcd   : > { %v29222_v20 = vpop.eup %26230 }
 0xbce   : > { %v10531_v23 = vsel %vm1193_vm3, %v29222_v20, 0.0 }
 0xbcf   : > { %10532 = vadd.xlane.f32.xlu1 %v10531_v23  ;;  %v29280_v23 = vpop.permute.xlu0 %12255 }
 0xbd1   : > { %v29226_v63 = vpop.eup %26232 }
 0xbd2   : > { %v10534_v52 = vsel %vm1193_vm3, %v29226_v63, 0.0 }
 0xbd3   : > { %10535 = vadd.xlane.f32.xlu0 %v10534_v52 }
 0xbe0   : > { %12331 = vrot.lane.b32.xlu1 %v32322_v17, %s26620_s10 }
 0xbe4   : > { %12489 = vrot.lane.b32.xlu1 %v32277_v13, %s26619_s9 }
 0xbe8   : > { %12487 = vrot.lane.b32.xlu1 %v32278_v12, %s26620_s10 }
 0xbe9   : > { %12253 = vrot.lane.b32.xlu0 %v32323_v50, %s26620_s10 }
 0xbec   : > { %12645 = vrot.lane.b32.xlu1 %v32279_v16, %s26619_s9 }
 0xbed   : > { %12411 = vrot.lane.b32.xlu0 %v32324_v61, %s26619_s9 }
 0xbf0   : > { %12643 = vrot.lane.b32.xlu1 %v32280_v53, %s26620_s10 }
 0xbf1   : > { %12409 = vrot.lane.b32.xlu0 %v32325_v54, %s26620_s10 }
 0xbf4   : > { %12801 = vrot.lane.b32.xlu1 %v27074_v37, %s26619_s9 }
 0xbf5   : > { %12567 = vrot.lane.b32.xlu0 %v32326_v18, %s26619_s9 }
 0xbf8   : > { %12799 = vrot.lane.b32.xlu1 %v27228_v4, %s26620_s10 }
 0xbf9   : > { %12565 = vrot.lane.b32.xlu0 %v32392_v9, %s26620_s10 }
 0xbfc   : > { %12957 = vrot.lane.b32.xlu1 %v32393_v44, %s26619_s9 }
 0xbfd   : > { %12723 = vrot.lane.b32.xlu0 %v32394_v10, %s26619_s9 }
 0xc00   : > { %12955 = vrot.lane.b32.xlu1 %v32281_v32, %s26620_s10 }
 0xc01   : > { %12721 = vrot.lane.b32.xlu0 %v32329_v43, %s26620_s10 }
 0xc04   : > { %13225 = vrot.lane.b32.xlu1 %v32395_v62, %s26620_s10 }
 0xc05   : > { %12879 = vrot.lane.b32.xlu0 %v32330_v29, %s26619_s9  ;;  %v32399_v29 = vld [vmem:[#allocation47_spill] sm:$0xff] }
 0xc08   : > { %13453 = vrot.lane.b32.xlu1 %v32396_v46, %s26620_s10  ;;  %v32400_v46 = vld [vmem:[#allocation44_spill] sm:$0xff] }
 0xc09   : > { %12877 = vrot.lane.b32.xlu0 %v32397_v48, %s26620_s10 }
 0xc0c   : > { %13605 = vrot.lane.b32.xlu1 %v32398_v45, %s26620_s10 }
 0xc0d   : > { %13301 = vrot.lane.b32.xlu0 %v32332_v8, %s26620_s10 }
 0xc0f   : > { %v10491_v52 = vpop.xlane.xlu1 %10490 }
 0xc10   : > { %26234 = vrcp.f32 %v10491_v52  ;;  %13681 = vrot.lane.b32.xlu1 %v32399_v29, %s26620_s10 }
 0xc11   : > { %13377 = vrot.lane.b32.xlu0 %v32400_v46, %s26620_s10 }
 0xc13   : > { %v10494_v62 = vpop.xlane.xlu0 %10493 }
 0xc14   : > { %26236 = vrcp.f32 %v10494_v62  ;;  %v10497_v48 = vpop.xlane.xlu1 %10496  ;;  %13757 = vrot.lane.b32.xlu1 %v27633_v0, %s26620_s10 }
 0xc15   : > { %26238 = vrcp.f32 %v10497_v48  ;;  %13529 = vrot.lane.b32.xlu0 %v32334_v35, %s26620_s10 }
 0xc17   : > { %v10500_v8 = vpop.xlane.xlu0 %10499 }
 0xc18   : > { %26240 = vrcp.f32 %v10500_v8  ;;  %v10503_v45 = vpop.xlane.xlu1 %10502  ;;  %13909 = vrot.lane.b32.xlu1 %v27651_v34, %s26620_s10 }
 0xc19   : > { %26242 = vrcp.f32 %v10503_v45  ;;  %13833 = vrot.lane.b32.xlu0 %v27642_v56, %s26620_s10 }
 0xc1a   : > { %v26235_v52 = vpop.eup %26234 }
 0xc1b   : > { %v10506_v62 = vpop.xlane.xlu0 %10505  ;;  %v10538_v46 = vmul.f32 %v26235_v52, %v29153_v26 }
 0xc1c   : > { %26244 = vrcp.f32 %v10506_v62  ;;  %v10509_v0 = vpop.xlane.xlu1 %10508  ;;  %14061 = vrot.lane.b32.xlu1 %v27674_v42, %s26620_s10 }
 0xc1d   : > { %26246 = vrcp.f32 %v10509_v0  ;;  %13985 = vrot.lane.b32.xlu0 %v27660_v57, %s26620_s10  ;;  %24996 = vmatmul.mubr.msk.f32.vlgmr.msra.gmra.mrb[146].mxu1 %vm1193_vm3, %v10538_v46 }
 0xc1e   : > { %v26237_v8 = vpop.eup %26236  ;;  %25004 = vmatpush3.msra.mxu1 %v29098_v28  ;;  %25005 = vmatprep.mubr.msk.f32.mxu1 %vm26611_vm2, %v32223_v27 }
 0xc1f   : > { %v26239_v48 = vpop.eup %26238  ;;  %v10512_v45 = vpop.xlane.xlu0 %10511  ;;  %25013 = vmatprep.subr.mxu1 %v32223_v27  ;;  %v10540_v26 = vmul.f32 %v26237_v8, %v29159_v39 }
 0xc20   : > { %26248 = vrcp.f32 %v10512_v45  ;;  %v10515_v52 = vpop.xlane.xlu1 %10514  ;;  %14213 = vrot.lane.b32.xlu1 %v27697_v14, %s26620_s10  ;;  %v10542_v0 = vmul.f32 %v26239_v48, %v29161_v7 }
 0xc21   : > { %26250 = vrcp.f32 %v10515_v52  ;;  %14137 = vrot.lane.b32.xlu0 %v27688_v25, %s26620_s10  ;;  %25001 = vmatmul.mubr.msk.f32.vlgmr.msra.gmra.mrb[110].mxu0 %vm1193_vm3, %v10540_v26 }
 0xc22   : > { %v26241_v28 = vpop.eup %26240  ;;  %25006 = vmatmul.mubr.msk.f32.vlgmr.msra.gmra.mrb[148].mxu1 %vm1193_vm3, %v10542_v0  ;;  %25009 = vmatpush3.msra.mxu0 %v29086_v6 }
 0xc23   : > { %v26243_v46 = vpop.eup %26242  ;;  %25014 = vmatpush3.msra.mxu1 %v29102_v41  ;;  %v10518_v39 = vpop.xlane.xlu0 %10517  ;;  %25010 = vmatprep.mubr.msk.f32.mxu0 %vm26611_vm2, %v32223_v27  ;;  %v10544_v7 = vmul.f32 %v26241_v28, %v29169_v19  ;;  %v32402_v28 = vld [vmem:[#allocation22_spill] sm:$0xff] }
 0xc24   : > { %26252 = vrcp.f32 %v10518_v39  ;;  %v10521_v62 = vpop.xlane.xlu1 %10520  ;;  %25018 = vmatprep.subr.mxu0 %v32223_v27  ;;  %14365 = vrot.lane.b32.xlu1 %v32283_v31, %s26620_s10  ;;  %v10546_v8 = vmul.f32 %v26243_v46, %v29171_v58  ;;  %v32405_v39 = vld [vmem:[#allocation86_spill] sm:$0xff] }
 0xc25   : > { %26254 = vrcp.f32 %v10521_v62  ;;  %25015 = vmatprep.mubr.msk.f32.mxu1 %vm26611_vm2, %v32223_v27  ;;  %25023 = vmatprep.subr.mxu1 %v32223_v27 }
 0xc26   : > { %v26245_v41 = vpop.eup %26244  ;;  %14289 = vrot.lane.b32.xlu0 %v27708_v36, %s26620_s10  ;;  %25011 = vmatmul.mubr.msk.f32.vlgmr.msra.gmra.mrb[112].mxu0 %vm1193_vm3, %v10544_v7 }
 0xc27   : > { %v26247_v6 = vpop.eup %26246  ;;  %25016 = vmatmul.mubr.msk.f32.vlgmr.msra.gmra.mrb[150].mxu1 %vm1193_vm3, %v10546_v8  ;;  %25019 = vmatpush3.msra.mxu0 %v29096_v2  ;;  %v10524_v19 = vpop.xlane.xlu0 %10523  ;;  %v10548_v58 = vmul.f32 %v26245_v41, %v29179_v38  ;;  %v32406_v8 = vld [vmem:[#allocation6_spill] sm:$0xff] }
 0xc28   : > { %25024 = vmatpush3.msra.mxu1 %v29100_v59  ;;  %v10527_v48 = vpop.xlane.xlu1 %10526  ;;  %25020 = vmatprep.mubr.msk.f32.mxu0 %vm26611_vm2, %v32223_v27  ;;  %v10550_v45 = vmul.f32 %v26247_v6, %v29181_v33  ;;  %26256 = vrcp.f32 %v10524_v19  ;;  %v32401_v33 = vld [vmem:[#allocation85_spill] sm:$0xff] }
 0xc29   : > { %25028 = vmatprep.subr.mxu0 %v32223_v27  ;;  %14521 = vrot.lane.b32.xlu1 %v32272_v49, %s26621_s11  ;;  %26258 = vrcp.f32 %v10527_v48 }
 0xc2a   : > { %v26249_v26 = vpop.eup %26248  ;;  %25025 = vmatprep.mubr.msk.f32.mxu1 %vm26611_vm2, %v32223_v27  ;;  %25033 = vmatprep.subr.mxu1 %v32223_v27 }
 0xc2b   : > { %v26251_v2 = vpop.eup %26250  ;;  %14443 = vrot.lane.b32.xlu0 %v32266_v40, %s26621_s11  ;;  %25021 = vmatmul.mubr.msk.f32.vlgmr.msra.gmra.mrb[114].mxu0 %vm1193_vm3, %v10548_v58  ;;  %v10530_v59 = vpop.xlane.xlu0 %10529  ;;  %v10552_v38 = vmul.f32 %v26249_v26, %v29188_v30  ;;  %v32404_v30 = vld [vmem:[#allocation77_spill] sm:$0xff] }
 0xc2c   : > { %25026 = vmatmul.mubr.msk.f32.vlgmr.msra.gmra.mrb[152].mxu1 %vm1193_vm3, %v10550_v45  ;;  %25029 = vmatpush3.msra.mxu0 %v29104_v11  ;;  %26260 = vrcp.f32 %v10530_v59  ;;  %v10554_v52 = vmul.f32 %v26251_v2, %v29190_v5  ;;  %v32403_v11 = vld [vmem:[#allocation19_spill] sm:$0xff]  ;;  %v32409_v58 = vld [vmem:[#allocation81_spill] sm:$0xff]  ;;  %v32413_v2 = vld [vmem:[#allocation88_spill] sm:$0xff] }
 0xc2d   : > { %25034 = vmatpush3.msra.mxu1 %v32401_v33  ;;  %25030 = vmatprep.mubr.msk.f32.mxu0 %vm26611_vm2, %v32223_v27  ;;  %v32410_v45 = vld [vmem:[#allocation23_spill] sm:$0xff]  ;;  %v32414_v59 = vld [vmem:[#allocation89_spill] sm:$0xff] }
 0xc2e   : > { %v26253_v0 = vpop.eup %26252  ;;  %25038 = vmatprep.subr.mxu0 %v32223_v27  ;;  %14519 = vrot.lane.b32.xlu1 %v32402_v28, %s26622_s12 }
 0xc2f   : > { %v26255_v46 = vpop.eup %26254  ;;  %25035 = vmatprep.mubr.msk.f32.mxu1 %vm26611_vm2, %v32223_v27  ;;  %25043 = vmatprep.subr.mxu1 %v32223_v27  ;;  %v10556_v5 = vmul.f32 %v26253_v0, %v29196_v15  ;;  %v32407_v15 = vld [vmem:[#allocation5_spill] sm:$0xff] }
 0xc30   : > { %14441 = vrot.lane.b32.xlu0 %v32403_v11, %s26622_s12  ;;  %25031 = vmatmul.mubr.msk.f32.vlgmr.msra.gmra.mrb[116].mxu0 %vm1193_vm3, %v10552_v38  ;;  %v10558_v7 = vmul.f32 %v26255_v46, %v29198_v60  ;;  %v32408_v60 = vld [vmem:[#allocation79_spill] sm:$0xff] }
 0xc31   : > { %25036 = vmatmul.mubr.msk.f32.vlgmr.msra.gmra.mrb[154].mxu1 %vm1193_vm3, %v10554_v52  ;;  %25039 = vmatpush3.msra.mxu0 %v32404_v30 }
 0xc32   : > { %25044 = vmatpush3.msra.mxu1 %v32405_v39  ;;  %25040 = vmatprep.mubr.msk.f32.mxu0 %vm26611_vm2, %v32223_v27  ;;  %v26257_v62 = vpop.eup %26256 }
 0xc33   : > { %25048 = vmatprep.subr.mxu0 %v32223_v27  ;;  %14677 = vrot.lane.b32.xlu1 %v32406_v8, %s26621_s11  ;;  %v26259_v41 = vpop.eup %26258  ;;  %v10560_v6 = vmul.f32 %v26257_v62, %v29204_v51  ;;  %v32411_v51 = vld [vmem:[#allocation21_spill] sm:$0xff]  ;;  %v32415_v62 = vld [vmem:[#allocation90_spill] sm:$0xff] }
 0xc34   : > { %25045 = vmatprep.mubr.msk.f32.mxu1 %vm26611_vm2, %v32223_v27  ;;  %25053 = vmatprep.subr.mxu1 %v32223_v27  ;;  %v10562_v48 = vmul.f32 %v26259_v41, %v29206_v1  ;;  %v32412_v1 = vld [vmem:[#allocation87_spill] sm:$0xff] }
 0xc35   : > { %14599 = vrot.lane.b32.xlu0 %v32407_v15, %s26621_s11  ;;  %25041 = vmatmul.mubr.msk.f32.vlgmr.msra.gmra.mrb[118].mxu0 %vm1193_vm3, %v10556_v5 }
 0xc36   : > { %25046 = vmatmul.mubr.msk.f32.vlgmr.msra.gmra.mrb[156].mxu1 %vm1193_vm3, %v10558_v7  ;;  %25049 = vmatpush3.msra.mxu0 %v32408_v60  ;;  %v26261_v19 = vpop.eup %26260 }
 0xc37   : > { %25054 = vmatpush3.msra.mxu1 %v32409_v58  ;;  %25050 = vmatprep.mubr.msk.f32.mxu0 %vm26611_vm2, %v32223_v27  ;;  %v10564_v26 = vmul.f32 %v26261_v19, %v29212_v21  ;;  %v32416_v19 = vld [vmem:[#allocation92_spill] sm:$0xff]  ;;  %v32418_v58 = vld [vmem:[#allocation94_spill] sm:$0xff] }
 0xc38   : > { %25058 = vmatprep.subr.mxu0 %v32223_v27  ;;  %14675 = vrot.lane.b32.xlu1 %v32410_v45, %s26622_s12  ;;  %v32451_v45 = vld [vmem:[#allocation10_spill] sm:$0xff] }
 0xc39   : > { %25055 = vmatprep.mubr.msk.f32.mxu1 %vm26611_vm2, %v32223_v27  ;;  %25063 = vmatprep.subr.mxu1 %v32223_v27 }
 0xc3a   : > { %14597 = vrot.lane.b32.xlu0 %v32411_v51, %s26622_s12  ;;  %25051 = vmatmul.mubr.msk.f32.vlgmr.msra.gmra.mrb[120].mxu0 %vm1193_vm3, %v10560_v6 }
 0xc3b   : > { %25056 = vmatmul.mubr.msk.f32.vlgmr.msra.gmra.mrb[158].mxu1 %vm1193_vm3, %v10562_v48  ;;  %25059 = vmatpush3.msra.mxu0 %v32412_v1  ;;  %v32420_v1 = vld [vmem:[#allocation96_spill] sm:$0xff] }
 0xc3c   : > { %25064 = vmatpush3.msra.mxu1 %v32413_v2  ;;  %25060 = vmatprep.mubr.msk.f32.mxu0 %vm26611_vm2, %v32223_v27  ;;  %v32421_v2 = vld [vmem:[#allocation95_spill] sm:$0xff] }
 0xc3d   : > { %25068 = vmatprep.subr.mxu0 %v32223_v27  ;;  %25065 = vmatprep.mubr.msk.f32.mxu1 %vm26611_vm2, %v32223_v27 }
 0xc3e   : > { %25061 = vmatmul.mubr.msk.f32.vlgmr.msra.gmra.mrb[122].mxu0 %vm1193_vm3, %v10564_v26  ;;  %25073 = vmatprep.subr.mxu1 %v32223_v27 }
 0xc3f   : > { %25069 = vmatpush3.msra.mxu0 %v32414_v59  ;;  %25070 = vmatprep.mubr.msk.f32.mxu0 %vm26611_vm2, %v32223_v27 }
 0xc40   : > { %25078 = vmatprep.subr.mxu0 %v32223_v27 }
 0xc5c   : > { %v10533_v21 = vpop.xlane.xlu1 %10532 }
 0xc5d   : > { %26262 = vrcp.f32 %v10533_v21 }
 0xc60   : > { %v10536_v38 = vpop.xlane.xlu0 %10535  ;;  %v12332_v33 = vpop.permute.xlu1 %12331 }
 0xc61   : > { %26264 = vrcp.f32 %v10536_v38  ;;  %v32422_v38 = vld [vmem:[#allocation97_spill] sm:$0xff] }
 0xc64   : > { %v12254_v52 = vpop.permute.xlu0 %12253  ;;  %v12490_v0 = vpop.permute.xlu1 %12489 }
 0xc67   : > { %v26263_v46 = vpop.eup %26262 }
 0xc68   : > { %v12412_v30 = vpop.permute.xlu0 %12411  ;;  %v12488_v5 = vpop.permute.xlu1 %12487  ;;  %v10566_v39 = vmul.f32 %v26263_v46, %v29222_v20  ;;  %v32417_v20 = vld [vmem:[#allocation91_spill] sm:$0xff] }
 0xc6a   : > { %25066 = vmatmul.mubr.msk.f32.vlgmr.msra.gmra.mrb[160].mxu1 %vm1193_vm3, %v10566_v39 }
 0xc6b   : > { %v26265_v7 = vpop.eup %26264  ;;  %25074 = vmatpush3.xpose.msk.msra.mxu1 %vm1193_vm3, %v32415_v62  ;;  %25075 = vmatprep.mubr.msk.f32.mxu1 %vm26611_vm2, %v32223_v27 }
 0xc6c   : > { %v12410_v41 = vpop.permute.xlu0 %12409  ;;  %v12646_v60 = vpop.permute.xlu1 %12645  ;;  %25083 = vmatprep.subr.mxu1 %v32223_v27  ;;  %v10568_v6 = vmul.f32 %v26265_v7, %v29226_v63  ;;  %v32419_v63 = vld [vmem:[#allocation93_spill] sm:$0xff] }
 0xc6e   : > { %25071 = vmatmul.mubr.msk.f32.vlgmr.msra.gmra.mrb[124].mxu0 %vm1193_vm3, %v10568_v6  ;;  %25076 = vmatmul.mubr.msk.f32.vlgmr.msra.gmra.mrb[162].mxu1 %vm1193_vm3, %v32416_v19 }
 0xc6f   : > { %25079 = vmatpush3.xpose.msk.msra.mxu0 %vm1193_vm3, %v32417_v20  ;;  %25084 = vmatpush3.xpose.msk.msra.mxu1 %vm1193_vm3, %v32418_v58 }
 0xc70   : > { %v12568_v48 = vpop.permute.xlu0 %12567  ;;  %v12644_v26 = vpop.permute.xlu1 %12643  ;;  %25080 = vmatprep.mubr.msk.f32.mxu0 %vm26611_vm2, %v32223_v27  ;;  %25085 = vmatprep.mubr.msk.f32.mxu1 %vm26611_vm2, %v32223_v27 }
 0xc71   : > { %25088 = vmatprep.subr.mxu0 %v32223_v27  ;;  %25093 = vmatprep.subr.mxu1 %v32223_v27 }
 0xc72   : > { %25081 = vmatmul.mubr.msk.f32.vlgmr.msra.gmra.mrb[126].mxu0 %vm1193_vm3, %v32419_v63  ;;  %25086 = vmatmul.mubr.msk.f32.vlgmr.msra.gmra.mrb[164].mxu1 %vm1193_vm3, %v32420_v1 }
 0xc73   : > { %25089 = vmatpush3.xpose.msk.msra.mxu0 %vm1193_vm3, %v32421_v2  ;;  %25094 = vmatpush3.xpose.msk.msra.mxu1 %vm1193_vm3, %v29218_v47 }
 0xc74   : > { %v12566_v59 = vpop.permute.xlu0 %12565  ;;  %v12802_v21 = vpop.permute.xlu1 %12801  ;;  %25090 = vmatprep.mubr.msk.f32.mxu0 %vm26611_vm2, %v32223_v27  ;;  %25095 = vmatprep.mubr.msk.f32.mxu1 %vm26611_vm2, %v32223_v27 }
 0xc75   : > { %25098 = vmatprep.subr.mxu0 %v32223_v27  ;;  %25103 = vmatprep.subr.mxu1 %v32223_v27 }
 0xc76   : > { %25091 = vmatmul.mubr.msk.f32.vlgmr.msra.gmra.mrb[128].mxu0 %vm1193_vm3, %v32422_v38  ;;  %25096 = vmatmul.mubr.msk.f32.vlgmr.msra.gmra.mrb[166].mxu1 %vm1193_vm3, %v29270_v24 }
 0xc77   : > { %25099 = vmatpush3.xpose.msk.msra.mxu0 %vm1193_vm3, %v29216_v55  ;;  %25104 = vmatpush3.xpose.msk.msra.mxu1 %vm1193_vm3, %v29280_v23 }
 0xc78   : > { %v12724_v47 = vpop.permute.xlu0 %12723  ;;  %v12800_v46 = vpop.permute.xlu1 %12799  ;;  %25100 = vmatprep.mubr.msk.f32.mxu0 %vm26611_vm2, %v32223_v27  ;;  %25105 = vmatprep.mubr.msk.f32.mxu1 %vm26611_vm2, %v32223_v27 }
 0xc79   : > { %25108 = vmatprep.subr.mxu0 %v32223_v27  ;;  %25113 = vmatprep.subr.mxu1 %v32223_v27 }
 0xc7a   : > { %25101 = vmatmul.mubr.msk.f32.vlgmr.msra.gmra.mrb[130].mxu0 %vm1193_vm3, %v29264_v3  ;;  %25106 = vmatmul.mubr.msk.f32.vlgmr.msra.gmra.mrb[168].mxu1 %vm1193_vm3, %v12254_v52 }
 0xc7b   : > { %25109 = vmatpush3.xpose.msk.msra.mxu0 %vm1193_vm3, %v29274_v22  ;;  %25114 = vmatpush3.xpose.msk.msra.mxu1 %vm1193_vm3, %v12412_v30 }
 0xc7c   : > { %v12722_v55 = vpop.permute.xlu0 %12721  ;;  %25110 = vmatprep.mubr.msk.f32.mxu0 %vm26611_vm2, %v32223_v27  ;;  %25115 = vmatprep.mubr.msk.f32.mxu1 %vm26611_vm2, %v32223_v27  ;;  %v12958_v24 = vpop.permute.xlu1 %12957 }
 0xc7d   : > { %25118 = vmatprep.subr.mxu0 %v32223_v27  ;;  %25123 = vmatprep.subr.mxu1 %v32223_v27 }
 0xc7e   : > { %25111 = vmatmul.mubr.msk.f32.vlgmr.msra.gmra.mrb[132].mxu0 %vm1193_vm3, %v12332_v33  ;;  %25116 = vmatmul.mubr.msk.f32.vlgmr.msra.gmra.mrb[170].mxu1 %vm1193_vm3, %v12410_v41 }
 0xc7f   : > { %25119 = vmatpush3.xpose.msk.msra.mxu0 %vm1193_vm3, %v12490_v0  ;;  %25124 = vmatpush3.xpose.msk.msra.mxu1 %vm1193_vm3, %v12568_v48 }
 0xc80   : > { %25120 = vmatprep.mubr.msk.f32.mxu0 %vm26611_vm2, %v32223_v27  ;;  %25125 = vmatprep.mubr.msk.f32.mxu1 %vm26611_vm2, %v32223_v27  ;;  %v12880_v3 = vpop.permute.xlu0 %12879  ;;  %v12956_v22 = vpop.permute.xlu1 %12955 }
 0xc81   : > { %25128 = vmatprep.subr.mxu0 %v32223_v27  ;;  %25133 = vmatprep.subr.mxu1 %v32223_v27 }
 0xc82   : > { %25121 = vmatmul.mubr.msk.f32.vlgmr.msra.gmra.mrb[134].mxu0 %vm1193_vm3, %v12488_v5  ;;  %25126 = vmatmul.mubr.msk.f32.vlgmr.msra.gmra.mrb[172].mxu1 %vm1193_vm3, %v12566_v59 }
 0xc83   : > { %25129 = vmatpush3.xpose.msk.msra.mxu0 %vm1193_vm3, %v12646_v60  ;;  %25134 = vmatpush3.xpose.msk.msra.mxu1 %vm1193_vm3, %v12724_v47 }
 0xc84   : > { %25130 = vmatprep.mubr.msk.f32.mxu0 %vm26611_vm2, %v32223_v27  ;;  %25135 = vmatprep.mubr.msk.f32.mxu1 %vm26611_vm2, %v32223_v27  ;;  %v12878_v23 = vpop.permute.xlu0 %12877  ;;  %v13226_v33 = vpop.permute.xlu1 %13225 }
 0xc85   : > { %25138 = vmatprep.subr.mxu0 %v32223_v27  ;;  %25143 = vmatprep.subr.mxu1 %v32223_v27 }
 0xc86   : > { %25131 = vmatmul.mubr.msk.f32.vlgmr.msra.gmra.mrb[136].mxu0 %vm1193_vm3, %v12644_v26  ;;  %25136 = vmatmul.mubr.msk.f32.vlgmr.msra.gmra.mrb[174].mxu1 %vm1193_vm3, %v12722_v55 }
 0xc87   : > { %25139 = vmatpush3.xpose.msk.msra.mxu0 %vm1193_vm3, %v12802_v21  ;;  %25144 = vmatpush3.xpose.msk.msra.mxu1 %vm1193_vm3, %v12880_v3 }
 0xc88   : > { %25140 = vmatprep.mubr.msk.f32.mxu0 %vm26611_vm2, %v32223_v27  ;;  %25145 = vmatprep.mubr.msk.f32.mxu1 %vm26611_vm2, %v32223_v27  ;;  %v13302_v52 = vpop.permute.xlu0 %13301 }
 0xc89   : > { %25148 = vmatprep.subr.mxu0 %v32223_v27  ;;  %25153 = vmatprep.subr.mxu1 %v32223_v27 }
 0xc8a   : > { %25141 = vmatmul.mubr.msk.f32.vlgmr.msra.gmra.mrb[138].mxu0 %vm1193_vm3, %v12800_v46  ;;  %25146 = vmatmul.mubr.msk.f32.vlgmr.msra.gmra.mrb[176].mxu1 %vm1193_vm3, %v12878_v23 }
 0xc8b   : > { %25149 = vmatpush3.xpose.msk.msra.mxu0 %vm1193_vm3, %v12958_v24  ;;  %25154 = vmatpush3.msra.mxu1 %v13226_v33 }
 0xc8c   : > { %25150 = vmatprep.mubr.msk.f32.mxu0 %vm26611_vm2, %v32223_v27  ;;  %25158 = vmatprep.subr.mxu0 %v32223_v27 }
 0xc8d   : > { %25155 = vmatprep.mubr.msk.f32.mxu1 %vm26611_vm2, %v32223_v27  ;;  %25163 = vmatprep.subr.mxu1 %v32223_v27 }
 0xc8e   : > { %25151 = vmatmul.mubr.msk.f32.vlgmr.msra.gmra.mrb[140].mxu0 %vm1193_vm3, %v12956_v22 }
 0xc8f   : > { %25159 = vmatpush3.msra.mxu0 %v13302_v52  ;;  %25160 = vmatprep.mubr.msk.f32.mxu0 %vm26611_vm2, %v32223_v27 }
 0xc90   : > { %25168 = vmatprep.subr.mxu0 %v32223_v27 }
 0xcf0   : > { %v29510_v0 = vpop.f32.mrb[146].mxu1 }
 0xcf1   : > { %32423 = vst [vmem:[#allocation30_spill] sm:$0xff] %v29510_v0  ;;  %v24997_v30 = vpop.f32.mrb[147].mxu1  ;;  %v32440_v0 = vld [vmem:[#allocation8_spill] sm:$0xff] }
 0xcf4   : > { %v29512_v5 = vpop.f32.mrb[110].mxu0 }
 0xcf5   : > { %32424 = vst [vmem:[#allocation20_spill] sm:$0xff] %v29512_v5  ;;  %v29514_v39 = vpop.f32.mrb[148].mxu1  ;;  %v25002_v7 = vpop.f32.mrb[111].mxu0 }
 0xcf6   : > { %32425 = vst [vmem:[#allocation17_spill] sm:$0xff] %v29514_v39  ;;  %v25007_v62 = vpop.f32.mrb[149].mxu1 }
 0xcf9   : > { %v29516_v41 = vpop.f32.mrb[112].mxu0 }
 0xcfa   : > { %32426 = vst [vmem:[#allocation85_spill] sm:$0xff] %v29516_v41  ;;  %v29518_v60 = vpop.f32.mrb[150].mxu1  ;;  %v25012_v6 = vpop.f32.mrb[113].mxu0 }
 0xcfb   : > { %32427 = vst [vmem:[#allocation77_spill] sm:$0xff] %v29518_v60  ;;  %v25017_v19 = vpop.f32.mrb[151].mxu1 }
 0xcfe   : > { %v29520_v20 = vpop.f32.mrb[114].mxu0 }
 0xcff   : > { %32428 = vst [vmem:[#allocation86_spill] sm:$0xff] %v29520_v20  ;;  %v29522_v58 = vpop.f32.mrb[152].mxu1  ;;  %v25022_v48 = vpop.f32.mrb[115].mxu0 }
 0xd00   : > { %32429 = vst [vmem:[#allocation79_spill] sm:$0xff] %v29522_v58  ;;  %v25027_v26 = vpop.f32.mrb[153].mxu1 }
 0xd03   : > { %v29524_v63 = vpop.f32.mrb[116].mxu0 }
 0xd04   : > { %32430 = vst [vmem:[#allocation81_spill] sm:$0xff] %v29524_v63  ;;  %v29526_v1 = vpop.f32.mrb[154].mxu1  ;;  %v25032_v2 = vpop.f32.mrb[117].mxu0  ;;  %v32443_v63 = vld [vmem:[#allocation25_spill] sm:$0xff] }
 0xd05   : > { %32431 = vst [vmem:[#allocation87_spill] sm:$0xff] %v29526_v1  ;;  %v25037_v59 = vpop.f32.mrb[155].mxu1 }
 0xd08   : > { %v29528_v21 = vpop.f32.mrb[118].mxu0 }
 0xd09   : > { %32432 = vst [vmem:[#allocation88_spill] sm:$0xff] %v29528_v21  ;;  %v29530_v38 = vpop.f32.mrb[156].mxu1  ;;  %v25042_v47 = vpop.f32.mrb[119].mxu0 }
 0xd0a   : > { %32433 = vst [vmem:[#allocation89_spill] sm:$0xff] %v29530_v38  ;;  %v25047_v46 = vpop.f32.mrb[157].mxu1  ;;  %v29646_v21 = vpop.permute.xlu0 %13377 }
 0xd0d   : > { %v29532_v55 = vpop.f32.mrb[120].mxu0 }
 0xd0e   : > { %32434 = vst [vmem:[#allocation90_spill] sm:$0xff] %v29532_v55  ;;  %v29534_v24 = vpop.f32.mrb[158].mxu1  ;;  %v25052_v3 = vpop.f32.mrb[121].mxu0 }
 0xd0f   : > { %32435 = vst [vmem:[#allocation92_spill] sm:$0xff] %v29534_v24  ;;  %v25057_v22 = vpop.f32.mrb[159].mxu1  ;;  %v29650_v1 = vpop.permute.xlu0 %13529 }
 0xd11   : > { %v29536_v23 = vpop.f32.mrb[122].mxu0 }
 0xd12   : > { %32436 = vst [vmem:[#allocation91_spill] sm:$0xff] %v29536_v23  ;;  %v25062_v33 = vpop.f32.mrb[123].mxu0 }
 0xd3d   : > { %v29538_v52 = vpop.f32.mrb[160].mxu1 }
 0xd3e   : > { %32437 = vst [vmem:[#allocation94_spill] sm:$0xff] %v29538_v52  ;;  %v25067_v30 = vpop.f32.mrb[161].mxu1 }
 0xd41   : > { %v29540_v7 = vpop.f32.mrb[124].mxu0  ;;  %v11859_v62 = vpop.f32.mrb[162].mxu1 }
 0xd42   : > { %32438 = vst [vmem:[#allocation93_spill] sm:$0xff] %v29540_v7  ;;  %v29544_v19 = vsel %vm26902_vm1, %v11859_v62, -32767.0  ;;  %v25072_v48 = vpop.f32.mrb[125].mxu0  ;;  %v25077_v26 = vpop.f32.mrb[163].mxu1 }
 0xd43   : > { %v13049_v2 = vsel %vm1193_vm3, %v29544_v19, -inf }
 0xd44   : > { %13050 = vmax.xlane.f32.xlu0 %v13049_v2 }
 0xd45   : > { %v11937_v59 = vpop.f32.mrb[126].mxu0  ;;  %v12015_v47 = vpop.f32.mrb[164].mxu1 }
 0xd46   : > { %v29550_v46 = vsel %vm26902_vm1, %v11937_v59, -32767.0  ;;  %v29554_v3 = vsel %vm26902_vm1, %v12015_v47, -32767.0  ;;  %v25082_v22 = vpop.f32.mrb[127].mxu0  ;;  %v25087_v33 = vpop.f32.mrb[165].mxu1 }
 0xd47   : > { %v13052_v30 = vsel %vm1193_vm3, %v29550_v46, -inf  ;;  %v13055_v62 = vsel %vm1193_vm3, %v29554_v3, -inf }
 0xd48   : > { %13053 = vmax.xlane.f32.xlu1 %v13052_v30  ;;  %13056 = vmax.xlane.f32.xlu0 %v13055_v62 }
 0xd49   : > { %v12093_v48 = vpop.f32.mrb[128].mxu0  ;;  %v12171_v26 = vpop.f32.mrb[166].mxu1 }
 0xd4a   : > { %v29562_v2 = vsel %vm26902_vm1, %v12093_v48, -32767.0  ;;  %v29566_v59 = vsel %vm26902_vm1, %v12171_v26, -32767.0  ;;  %v25092_v47 = vpop.f32.mrb[129].mxu0  ;;  %v25097_v22 = vpop.f32.mrb[167].mxu1 }
 0xd4b   : > { %v13058_v33 = vsel %vm1193_vm3, %v29562_v2, -inf  ;;  %v13061_v20 = vsel %vm1193_vm3, %v29566_v59, -inf }
 0xd4c   : > { %13059 = vmax.xlane.f32.xlu0 %v13058_v33  ;;  %13062 = vmax.xlane.f32.xlu1 %v13061_v20 }
 0xd4d   : > { %v12249_v30 = vpop.f32.mrb[130].mxu0  ;;  %v12327_v62 = vpop.f32.mrb[168].mxu1 }
 0xd4e   : > { %v29574_v48 = vsel %vm26902_vm1, %v12249_v30, -32767.0  ;;  %v29578_v26 = vsel %vm26902_vm1, %v12327_v62, -32767.0  ;;  %v25102_v47 = vpop.f32.mrb[131].mxu0  ;;  %v25107_v22 = vpop.f32.mrb[169].mxu1 }
 0xd4f   : > { %v13064_v60 = vsel %vm1193_vm3, %v29574_v48, -inf  ;;  %v13067_v7 = vsel %vm1193_vm3, %v29578_v26, -inf }
 0xd50   : > { %13065 = vmax.xlane.f32.xlu0 %v13064_v60  ;;  %13068 = vmax.xlane.f32.xlu1 %v13067_v7 }
 0xd51   : > { %v12405_v20 = vpop.f32.mrb[132].mxu0  ;;  %v12483_v33 = vpop.f32.mrb[170].mxu1 }
 0xd52   : > { %v29586_v30 = vsel %vm26902_vm1, %v12405_v20, -32767.0  ;;  %v29590_v62 = vsel %vm26902_vm1, %v12483_v33, -32767.0  ;;  %v25112_v47 = vpop.f32.mrb[133].mxu0  ;;  %v25117_v22 = vpop.f32.mrb[171].mxu1 }
 0xd53   : > { %v13070_v52 = vsel %vm1193_vm3, %v29586_v30, -inf  ;;  %v13073_v41 = vsel %vm1193_vm3, %v29590_v62, -inf }
 0xd54   : > { %13071 = vmax.xlane.f32.xlu0 %v13070_v52  ;;  %13074 = vmax.xlane.f32.xlu1 %v13073_v41 }
 0xd55   : > { %v12561_v60 = vpop.f32.mrb[134].mxu0  ;;  %v12639_v7 = vpop.f32.mrb[172].mxu1 }
 0xd56   : > { %v29598_v20 = vsel %vm26902_vm1, %v12561_v60, -32767.0  ;;  %v29602_v33 = vsel %vm26902_vm1, %v12639_v7, -32767.0  ;;  %v25122_v47 = vpop.f32.mrb[135].mxu0  ;;  %v25127_v22 = vpop.f32.mrb[173].mxu1 }
 0xd57   : > { %v13076_v39 = vsel %vm1193_vm3, %v29598_v20, -inf  ;;  %v13079_v23 = vsel %vm1193_vm3, %v29602_v33, -inf }
 0xd58   : > { %13077 = vmax.xlane.f32.xlu0 %v13076_v39  ;;  %13080 = vmax.xlane.f32.xlu1 %v13079_v23 }
 0xd59   : > { %v12717_v41 = vpop.f32.mrb[136].mxu0  ;;  %v12795_v52 = vpop.f32.mrb[174].mxu1 }
 0xd5a   : > { %v29610_v60 = vsel %vm26902_vm1, %v12717_v41, -32767.0  ;;  %v29614_v7 = vsel %vm26902_vm1, %v12795_v52, -32767.0  ;;  %v25132_v47 = vpop.f32.mrb[137].mxu0  ;;  %v25137_v22 = vpop.f32.mrb[175].mxu1 }
 0xd5b   : > { %v13082_v24 = vsel %vm1193_vm3, %v29610_v60, -inf  ;;  %v13085_v55 = vsel %vm1193_vm3, %v29614_v7, -inf }
 0xd5c   : > { %13083 = vmax.xlane.f32.xlu0 %v13082_v24  ;;  %13086 = vmax.xlane.f32.xlu1 %v13085_v55  ;;  %v32441_v24 = vld [vmem:[#allocation7_spill] sm:$0xff] }
 0xd5d   : > { %v12873_v39 = vpop.f32.mrb[138].mxu0  ;;  %v12951_v23 = vpop.f32.mrb[176].mxu1 }
 0xd5e   : > { %v29622_v41 = vsel %vm26902_vm1, %v12873_v39, -32767.0  ;;  %v25142_v38 = vpop.f32.mrb[139].mxu0  ;;  %v25147_v5 = vpop.f32.mrb[177].mxu1  ;;  %v29632_v55 = vsel %vm26902_vm1, %v12951_v23, -32767.0 }
 0xd5f   : > { %v13088_v52 = vsel %vm1193_vm3, %v29622_v41, -inf  ;;  %v29634_v39 = vpop.permute.xlu1 %13453  ;;  %v13091_v5 = vsel %vm1193_vm3, %v29632_v55, -inf }
 0xd60   : > { %13089 = vmax.xlane.f32.xlu0 %v13088_v52 }
 0xd61   : > { %v13029_v47 = vpop.f32.mrb[140].mxu0 }
 0xd62   : > { %v25152_v22 = vpop.f32.mrb[141].mxu0  ;;  %v29640_v38 = vsel %vm26902_vm1, %v13029_v47, -32767.0  ;;  %v29656_v47 = vpop.permute.xlu0 %13833 }
 0xd63   : > { %v13094_v52 = vsel %vm1193_vm3, %v29640_v38, -inf  ;;  %v29644_v22 = vpop.permute.xlu1 %13605  ;;  %32444 = vst [vmem:[#allocation95_spill] sm:$0xff] %v29656_v47 }
 0xd67   : > { %v29648_v23 = vpop.permute.xlu1 %13681 }
 0xd6b   : > { %v29652_v58 = vpop.permute.xlu1 %13757 }
 0xd6c   : > { %32442 = vst [vmem:[#allocation96_spill] sm:$0xff] %v29652_v58 }
 0xd6d   : > { %14833 = vrot.lane.b32.xlu1 %v32440_v0, %s26621_s11  ;;  %v29662_v0 = vpop.permute.xlu0 %13985 }
 0xd6e   : > { %32447 = vst [vmem:[#allocation98_spill] sm:$0xff] %v29662_v0 }
 0xd71   : > { %v29668_v51 = vpop.permute.xlu0 %14137 }
 0xd72   : > { %32450 = vst [vmem:[#allocation100_spill] sm:$0xff] %v29668_v51 }
 0xd75   : > { %v29674_v15 = vpop.permute.xlu0 %14289 }
 0xd76   : > { %14755 = vrot.lane.b32.xlu0 %v32441_v24, %s26621_s11  ;;  %v29660_v24 = vpop.permute.xlu1 %13909  ;;  %32453 = vst [vmem:[#allocation102_spill] sm:$0xff] %v29674_v15 }
 0xd77   : > { %32446 = vst [vmem:[#allocation97_spill] sm:$0xff] %v29660_v24 }
 0xd7a   : > { %v29666_v6 = vpop.permute.xlu1 %14061 }
 0xd7b   : > { %32449 = vst [vmem:[#allocation99_spill] sm:$0xff] %v29666_v6 }
 0xd91   : > { %13092 = vmax.xlane.f32.xlu1 %v13091_v5  ;;  %v32445_v5 = vld [vmem:[#allocation12_spill] sm:$0xff] }
 0xd95   : > { %13095 = vmax.xlane.f32.xlu0 %v13094_v52  ;;  %v32448_v52 = vld [vmem:[#allocation24_spill] sm:$0xff] }
 0xda2   : > { %14831 = vrot.lane.b32.xlu1 %v32443_v63, %s26622_s12  ;;  %v29672_v63 = vpop.permute.xlu1 %14213 }
 0xda3   : > { %32452 = vst [vmem:[#allocation101_spill] sm:$0xff] %v29672_v63 }
 0xda6   : > { %14989 = vrot.lane.b32.xlu1 %v32445_v5, %s26621_s11  ;;  %v29676_v8 = vpop.permute.xlu1 %14365  ;;  %v29678_v5 = vpop.permute.xlu0 %14443 }
 0xda7   : > { %32454 = vst [vmem:[#allocation103_spill] sm:$0xff] %v29676_v8  ;;  %32455 = vst [vmem:[#allocation104_spill] sm:$0xff] %v29678_v5 }
 0xdaa   : > { %v29680_v24 = vpop.permute.xlu1 %14521  ;;  %v29682_v0 = vpop.permute.xlu0 %14441 }
 0xdab   : > { %14753 = vrot.lane.b32.xlu0 %v32448_v52, %s26622_s12  ;;  %32456 = vst [vmem:[#allocation105_spill] sm:$0xff] %v29680_v24  ;;  %32457 = vst [vmem:[#allocation106_spill] sm:$0xff] %v29682_v0 }
 0xdae   : > { %v29684_v52 = vpop.permute.xlu1 %14519  ;;  %v29686_v6 = vpop.permute.xlu0 %14599 }
 0xdaf   : > { %14911 = vrot.lane.b32.xlu0 %v32451_v45, %s26621_s11  ;;  %32458 = vst [vmem:[#allocation107_spill] sm:$0xff] %v29684_v52  ;;  %32459 = vst [vmem:[#allocation108_spill] sm:$0xff] %v29686_v6 }
 0xdb2   : > { %v29688_v51 = vpop.permute.xlu1 %14677  ;;  %v29690_v11 = vpop.permute.xlu0 %14597 }
 0xdb3   : > { %32460 = vst [vmem:[#allocation109_spill] sm:$0xff] %v29688_v51  ;;  %32461 = vst [vmem:[#allocation110_spill] sm:$0xff] %v29690_v11 }
 0xdb6   : > { %v29692_v45 = vpop.permute.xlu1 %14675 }
 0xdb7   : > { %32462 = vst [vmem:[#allocation111_spill] sm:$0xff] %v29692_v45 }
 0xdd1   : > { %v13051_v63 = vpop.xlane.xlu0 %13050 }
 0xdd2   : > { %v13097_v15 = vsub.f32 %v29544_v19, %v13051_v63 }
 0xdd4   : > { %v13113_v8 = vmul.f32 1.442695, %v13097_v15 }
 0xdd5   : > { %v13054_v28 = vpop.xlane.xlu1 %13053  ;;  %v13057_v5 = vpop.xlane.xlu0 %13056 }
 0xdd6   : > { %26266 = vpow2.f32 %v13113_v8  ;;  %v13098_v24 = vsub.f32 %v29550_v46, %v13054_v28  ;;  %v13099_v0 = vsub.f32 %v29554_v3, %v13057_v5 }
 0xdd8   : > { %v13115_v52 = vmul.f32 1.442695, %v13098_v24  ;;  %v13117_v47 = vmul.f32 1.442695, %v13099_v0 }
 0xdd9   : > { %v13060_v6 = vpop.xlane.xlu0 %13059  ;;  %v13063_v58 = vpop.xlane.xlu1 %13062 }
 0xdda   : > { %26268 = vpow2.f32 %v13115_v52  ;;  %v13100_v51 = vsub.f32 %v29562_v2, %v13060_v6  ;;  %v13101_v45 = vsub.f32 %v29566_v59, %v13063_v58 }
 0xddb   : > { %26270 = vpow2.f32 %v13117_v47 }
 0xddc   : > { %v13119_v11 = vmul.f32 1.442695, %v13100_v51  ;;  %v13121_v63 = vmul.f32 1.442695, %v13101_v45 }
 0xddd   : > { %v13066_v15 = vpop.xlane.xlu0 %13065  ;;  %v13069_v19 = vpop.xlane.xlu1 %13068 }
 0xdde   : > { %26272 = vpow2.f32 %v13119_v11  ;;  %v13102_v8 = vsub.f32 %v29574_v48, %v13066_v15  ;;  %v13103_v28 = vsub.f32 %v29578_v26, %v13069_v19 }
 0xddf   : > { %26274 = vpow2.f32 %v13121_v63 }
 0xde0   : > { %v29701_v46 = vpop.eup %26266  ;;  %v13123_v0 = vmul.f32 1.442695, %v13102_v8  ;;  %v13125_v3 = vmul.f32 1.442695, %v13103_v28 }
 0xde1   : > { %v13072_v24 = vpop.xlane.xlu0 %13071  ;;  %v13075_v5 = vpop.xlane.xlu1 %13074  ;;  %v13145_v58 = vsel %vm1193_vm3, %v29701_v46, 0.0 }
 0xde2   : > { %26276 = vpow2.f32 %v13123_v0  ;;  %v13104_v45 = vsub.f32 %v29586_v30, %v13072_v24  ;;  %v13105_v51 = vsub.f32 %v29590_v62, %v13075_v5  ;;  %13146 = vadd.xlane.f32.xlu1 %v13145_v58 }
 0xde3   : > { %26278 = vpow2.f32 %v13125_v3 }
 0xde4   : > { %v29707_v11 = vpop.eup %26268  ;;  %v13127_v6 = vmul.f32 1.442695, %v13104_v45  ;;  %v13129_v2 = vmul.f32 1.442695, %v13105_v51 }
 0xde5   : > { %v29709_v59 = vpop.eup %26270  ;;  %v13078_v48 = vpop.xlane.xlu0 %13077  ;;  %v13148_v47 = vsel %vm1193_vm3, %v29707_v11, 0.0 }
 0xde6   : > { %v13081_v26 = vpop.xlane.xlu1 %13080  ;;  %26280 = vpow2.f32 %v13127_v6  ;;  %v13106_v52 = vsub.f32 %v29598_v20, %v13078_v48  ;;  %13149 = vadd.xlane.f32.xlu0 %v13148_v47  ;;  %v13151_v62 = vsel %vm1193_vm3, %v29709_v59, 0.0 }
 0xde7   : > { %v13107_v30 = vsub.f32 %v29602_v33, %v13081_v26  ;;  %26282 = vpow2.f32 %v13129_v2  ;;  %13152 = vadd.xlane.f32.xlu1 %v13151_v62 }
 0xde8   : > { %v29717_v63 = vpop.eup %26272  ;;  %v13131_v15 = vmul.f32 1.442695, %v13106_v52 }
 0xde9   : > { %v13133_v19 = vmul.f32 1.442695, %v13107_v30  ;;  %v29719_v8 = vpop.eup %26274  ;;  %v13084_v28 = vpop.xlane.xlu0 %13083  ;;  %v13154_v3 = vsel %vm1193_vm3, %v29717_v63, 0.0 }
 0xdea   : > { %v13087_v0 = vpop.xlane.xlu1 %13086  ;;  %26284 = vpow2.f32 %v13131_v15  ;;  %v13108_v20 = vsub.f32 %v29610_v60, %v13084_v28  ;;  %13155 = vadd.xlane.f32.xlu0 %v13154_v3  ;;  %v13157_v24 = vsel %vm1193_vm3, %v29719_v8, 0.0 }
 0xdeb   : > { %v13109_v33 = vsub.f32 %v29614_v7, %v13087_v0  ;;  %26286 = vpow2.f32 %v13133_v19  ;;  %13158 = vadd.xlane.f32.xlu1 %v13157_v24 }
 0xdec   : > { %v29727_v5 = vpop.eup %26276  ;;  %v13135_v58 = vmul.f32 1.442695, %v13108_v20 }
 0xded   : > { %v13137_v45 = vmul.f32 1.442695, %v13109_v33  ;;  %v29729_v51 = vpop.eup %26278  ;;  %v13090_v6 = vpop.xlane.xlu0 %13089  ;;  %v13160_v2 = vsel %vm1193_vm3, %v29727_v5, 0.0 }
 0xdee   : > { %26288 = vpow2.f32 %v13135_v58  ;;  %v13110_v60 = vsub.f32 %v29622_v41, %v13090_v6  ;;  %13161 = vadd.xlane.f32.xlu0 %v13160_v2  ;;  %v13163_v7 = vsel %vm1193_vm3, %v29729_v51, 0.0  ;;  %v29764_v58 = vpop.permute.xlu1 %14833 }
 0xdef   : > { %26290 = vpow2.f32 %v13137_v45  ;;  %13164 = vadd.xlane.f32.xlu1 %v13163_v7 }
 0xdf0   : > { %v29736_v48 = vpop.eup %26280  ;;  %v13139_v26 = vmul.f32 1.442695, %v13110_v60 }
 0xdf1   : > { %v29738_v47 = vpop.eup %26282  ;;  %v13166_v52 = vsel %vm1193_vm3, %v29736_v48, 0.0  ;;  %v29766_v45 = vpop.permute.xlu0 %14755 }
 0xdf2   : > { %26292 = vpow2.f32 %v13139_v26  ;;  %13167 = vadd.xlane.f32.xlu0 %v13166_v52  ;;  %v13169_v30 = vsel %vm1193_vm3, %v29738_v47, 0.0 }
 0xdf3   : > { %13170 = vadd.xlane.f32.xlu1 %v13169_v30 }
 0xdf4   : > { %v29744_v41 = vpop.eup %26284 }
 0xdf5   : > { %v29746_v62 = vpop.eup %26286  ;;  %v13172_v15 = vsel %vm1193_vm3, %v29744_v41, 0.0 }
 0xdf6   : > { %13173 = vadd.xlane.f32.xlu0 %v13172_v15  ;;  %v13175_v19 = vsel %vm1193_vm3, %v29746_v62, 0.0 }
 0xdf7   : > { %13176 = vadd.xlane.f32.xlu1 %v13175_v19 }
 0xdf8   : > { %v29752_v28 = vpop.eup %26288 }
 0xdf9   : > { %v29754_v0 = vpop.eup %26290  ;;  %v13178_v3 = vsel %vm1193_vm3, %v29752_v28, 0.0 }
 0xdfa   : > { %13179 = vadd.xlane.f32.xlu0 %v13178_v3  ;;  %v13181_v20 = vsel %vm1193_vm3, %v29754_v0, 0.0 }
 0xdfb   : > { %13182 = vadd.xlane.f32.xlu1 %v13181_v20  ;;  %v32464_v20 = vld [vmem:[#allocation18_spill] sm:$0xff] }
 0xdfc   : > { %v29760_v33 = vpop.eup %26292 }
 0xdfd   : > { %v13184_v24 = vsel %vm1193_vm3, %v29760_v33, 0.0 }
 0xdfe   : > { %13185 = vadd.xlane.f32.xlu0 %v13184_v24  ;;  %v32465_v24 = vld [vmem:[#allocation45_spill] sm:$0xff] }
 0xe1e   : > { %v13093_v6 = vpop.xlane.xlu1 %13092 }
 0xe1f   : > { %v13111_v2 = vsub.f32 %v29632_v55, %v13093_v6  ;;  %v32463_v55 = vld [vmem:[#allocation35_spill] sm:$0xff] }
 0xe21   : > { %v13141_v60 = vmul.f32 1.442695, %v13111_v2  ;;  %v32466_v2 = vld [vmem:[#allocation33_spill] sm:$0xff] }
 0xe22   : > { %v13096_v7 = vpop.xlane.xlu0 %13095 }
 0xe23   : > { %26294 = vpow2.f32 %v13141_v60  ;;  %v13112_v26 = vsub.f32 %v29640_v38, %v13096_v7  ;;  %v29812_v38 = vpop.permute.xlu1 %14831  ;;  %v32467_v7 = vld [vmem:[#allocation9_spill] sm:$0xff] }
 0xe25   : > { %v13143_v52 = vmul.f32 1.442695, %v13112_v26  ;;  %v32468_v26 = vld [vmem:[#allocation43_spill] sm:$0xff] }
 0xe26   : > { %v29818_v6 = vpop.permute.xlu0 %14753 }
 0xe27   : > { %26296 = vpow2.f32 %v13143_v52  ;;  %v29822_v60 = vpop.permute.xlu1 %14989 }
 0xe2a   : > { %v29828_v52 = vpop.permute.xlu0 %14911 }
 0xe2d   : > { %v29770_v30 = vpop.eup %26294 }
 0xe2e   : > { %v13187_v15 = vsel %vm1193_vm3, %v29770_v30, 0.0 }
 0xe2f   : > { %13188 = vadd.xlane.f32.xlu1 %v13187_v15 }
 0xe31   : > { %v29774_v19 = vpop.eup %26296 }
 0xe32   : > { %v13190_v3 = vsel %vm1193_vm3, %v29774_v19, 0.0 }
 0xe33   : > { %13191 = vadd.xlane.f32.xlu0 %v13190_v3  ;;  %v32469_v3 = vld [vmem:[#allocation44_spill] sm:$0xff] }
 0xe40   : > { %14987 = vrot.lane.b32.xlu1 %v32322_v17, %s26622_s12 }
 0xe44   : > { %15145 = vrot.lane.b32.xlu1 %v32277_v13, %s26621_s11 }
 0xe48   : > { %15143 = vrot.lane.b32.xlu1 %v32278_v12, %s26622_s12 }
 0xe49   : > { %14909 = vrot.lane.b32.xlu0 %v32323_v50, %s26622_s12 }
 0xe4c   : > { %15301 = vrot.lane.b32.xlu1 %v32279_v16, %s26621_s11 }
 0xe4d   : > { %15067 = vrot.lane.b32.xlu0 %v32324_v61, %s26621_s11 }
 0xe50   : > { %15299 = vrot.lane.b32.xlu1 %v32280_v53, %s26622_s12 }
 0xe51   : > { %15065 = vrot.lane.b32.xlu0 %v32325_v54, %s26622_s12 }
 0xe54   : > { %15457 = vrot.lane.b32.xlu1 %v27074_v37, %s26621_s11 }
 0xe55   : > { %15223 = vrot.lane.b32.xlu0 %v32326_v18, %s26621_s11 }
 0xe58   : > { %15455 = vrot.lane.b32.xlu1 %v27228_v4, %s26622_s12 }
 0xe59   : > { %15221 = vrot.lane.b32.xlu0 %v32392_v9, %s26622_s12 }
 0xe5c   : > { %15613 = vrot.lane.b32.xlu1 %v32393_v44, %s26621_s11 }
 0xe5d   : > { %15379 = vrot.lane.b32.xlu0 %v32394_v10, %s26621_s11 }
 0xe60   : > { %15611 = vrot.lane.b32.xlu1 %v32281_v32, %s26622_s12 }
 0xe61   : > { %15377 = vrot.lane.b32.xlu0 %v32329_v43, %s26622_s12 }
 0xe64   : > { %15881 = vrot.lane.b32.xlu1 %v32463_v55, %s26622_s12 }
 0xe65   : > { %15535 = vrot.lane.b32.xlu0 %v32464_v20, %s26621_s11  ;;  %v32470_v20 = vld [vmem:[#allocation48_spill] sm:$0xff] }
 0xe68   : > { %16109 = vrot.lane.b32.xlu1 %v32465_v24, %s26622_s12 }
 0xe69   : > { %15533 = vrot.lane.b32.xlu0 %v32466_v2, %s26622_s12 }
 0xe6c   : > { %16261 = vrot.lane.b32.xlu1 %v32467_v7, %s26622_s12 }
 0xe6d   : > { %15957 = vrot.lane.b32.xlu0 %v32468_v26, %s26622_s12 }
 0xe6f   : > { %v13147_v15 = vpop.xlane.xlu1 %13146 }
 0xe70   : > { %26298 = vrcp.f32 %v13147_v15  ;;  %16337 = vrot.lane.b32.xlu1 %v32399_v29, %s26622_s12 }
 0xe71   : > { %16033 = vrot.lane.b32.xlu0 %v32469_v3, %s26622_s12 }
 0xe73   : > { %v13150_v24 = vpop.xlane.xlu0 %13149 }
 0xe74   : > { %26300 = vrcp.f32 %v13150_v24  ;;  %v13153_v2 = vpop.xlane.xlu1 %13152  ;;  %16413 = vrot.lane.b32.xlu1 %v32470_v20, %s26622_s12 }
 0xe75   : > { %26302 = vrcp.f32 %v13153_v2  ;;  %16185 = vrot.lane.b32.xlu0 %v32334_v35, %s26622_s12 }
 0xe77   : > { %v13156_v26 = vpop.xlane.xlu0 %13155 }
 0xe78   : > { %26304 = vrcp.f32 %v13156_v26  ;;  %v13159_v7 = vpop.xlane.xlu1 %13158  ;;  %16565 = vrot.lane.b32.xlu1 %v27651_v34, %s26622_s12 }
 0xe79   : > { %26306 = vrcp.f32 %v13159_v7  ;;  %16489 = vrot.lane.b32.xlu0 %v27642_v56, %s26622_s12 }
 0xe7a   : > { %v26299_v15 = vpop.eup %26298 }
 0xe7b   : > { %v13162_v24 = vpop.xlane.xlu0 %13161  ;;  %v13194_v3 = vmul.f32 %v26299_v15, %v29701_v46 }
 0xe7c   : > { %26308 = vrcp.f32 %v13162_v24  ;;  %v13165_v20 = vpop.xlane.xlu1 %13164  ;;  %16717 = vrot.lane.b32.xlu1 %v27674_v42, %s26622_s12 }
 0xe7d   : > { %26310 = vrcp.f32 %v13165_v20  ;;  %16641 = vrot.lane.b32.xlu0 %v27660_v57, %s26622_s12  ;;  %25156 = vmatmul.mubr.msk.f32.vlgmr.msra.gmra.mrb[178].mxu1 %vm1193_vm3, %v13194_v3 }
 0xe7e   : > { %v26301_v2 = vpop.eup %26300  ;;  %25164 = vmatpush3.msra.mxu1 %v29646_v21  ;;  %25165 = vmatprep.mubr.msk.f32.mxu1 %vm26611_vm2, %v32223_v27 }
 0xe7f   : > { %v26303_v7 = vpop.eup %26302  ;;  %v13168_v26 = vpop.xlane.xlu0 %13167  ;;  %25173 = vmatprep.subr.mxu1 %v32223_v27  ;;  %v13196_v46 = vmul.f32 %v26301_v2, %v29707_v11 }
 0xe80   : > { %26312 = vrcp.f32 %v13168_v26  ;;  %v13171_v15 = vpop.xlane.xlu1 %13170  ;;  %16869 = vrot.lane.b32.xlu1 %v27697_v14, %s26622_s12  ;;  %v13198_v20 = vmul.f32 %v26303_v7, %v29709_v59 }
 0xe81   : > { %26314 = vrcp.f32 %v13171_v15  ;;  %16793 = vrot.lane.b32.xlu0 %v27688_v25, %s26622_s12  ;;  %25161 = vmatmul.mubr.msk.f32.vlgmr.msra.gmra.mrb[142].mxu0 %vm1193_vm3, %v13196_v46  ;;  %v32472_v15 = vld [vmem:[#allocation95_spill] sm:$0xff] }
 0xe82   : > { %v26305_v21 = vpop.eup %26304  ;;  %25166 = vmatmul.mubr.msk.f32.vlgmr.msra.gmra.mrb[180].mxu1 %vm1193_vm3, %v13198_v20  ;;  %25169 = vmatpush3.msra.mxu0 %v29634_v39 }
 0xe83   : > { %v26307_v3 = vpop.eup %26306  ;;  %25174 = vmatpush3.msra.mxu1 %v29650_v1  ;;  %v13174_v11 = vpop.xlane.xlu0 %13173  ;;  %25170 = vmatprep.mubr.msk.f32.mxu0 %vm26611_vm2, %v32223_v27  ;;  %v13200_v59 = vmul.f32 %v26305_v21, %v29717_v63 }
 0xe84   : > { %26316 = vrcp.f32 %v13174_v11  ;;  %v13177_v24 = vpop.xlane.xlu1 %13176  ;;  %25178 = vmatprep.subr.mxu0 %v32223_v27  ;;  %17021 = vrot.lane.b32.xlu1 %v32283_v31, %s26622_s12  ;;  %v13202_v2 = vmul.f32 %v26307_v3, %v29719_v8  ;;  %v32473_v3 = vld [vmem:[#allocation22_spill] sm:$0xff] }
 0xe85   : > { %26318 = vrcp.f32 %v13177_v24  ;;  %25175 = vmatprep.mubr.msk.f32.mxu1 %vm26611_vm2, %v32223_v27  ;;  %25183 = vmatprep.subr.mxu1 %v32223_v27  ;;  %v32476_v24 = vld [vmem:[#allocation98_spill] sm:$0xff] }
 0xe86   : > { %v26309_v1 = vpop.eup %26308  ;;  %16945 = vrot.lane.b32.xlu0 %v27708_v36, %s26622_s12  ;;  %25171 = vmatmul.mubr.msk.f32.vlgmr.msra.gmra.mrb[144].mxu0 %vm1193_vm3, %v13200_v59 }
 0xe87   : > { %v26311_v39 = vpop.eup %26310  ;;  %25176 = vmatmul.mubr.msk.f32.vlgmr.msra.gmra.mrb[182].mxu1 %vm1193_vm3, %v13202_v2  ;;  %25179 = vmatpush3.msra.mxu0 %v29644_v22  ;;  %v13180_v63 = vpop.xlane.xlu0 %13179  ;;  %v13204_v8 = vmul.f32 %v26309_v1, %v29727_v5  ;;  %v32471_v5 = vld [vmem:[#allocation96_spill] sm:$0xff] }
 0xe88   : > { %25184 = vmatpush3.msra.mxu1 %v29648_v23  ;;  %v13183_v7 = vpop.xlane.xlu1 %13182  ;;  %25180 = vmatprep.mubr.msk.f32.mxu0 %vm26611_vm2, %v32223_v27  ;;  %v13206_v26 = vmul.f32 %v26311_v39, %v29729_v51  ;;  %26320 = vrcp.f32 %v13180_v63  ;;  %v32477_v39 = vld [vmem:[#allocation6_spill] sm:$0xff] }
 0xe89   : > { %25188 = vmatprep.subr.mxu0 %v32223_v27  ;;  %17177 = vrot.lane.b32.xlu1 %v32272_v49, %s26623_s13  ;;  %26322 = vrcp.f32 %v13183_v7 }
 0xe8a   : > { %v26313_v46 = vpop.eup %26312  ;;  %25185 = vmatprep.mubr.msk.f32.mxu1 %vm26611_vm2, %v32223_v27  ;;  %25193 = vmatprep.subr.mxu1 %v32223_v27 }
 0xe8b   : > { %v26315_v22 = vpop.eup %26314  ;;  %17099 = vrot.lane.b32.xlu0 %v32266_v40, %s26623_s13  ;;  %25181 = vmatmul.mubr.msk.f32.vlgmr.msra.gmra.mrb[146].mxu0 %vm1193_vm3, %v13204_v8  ;;  %v13186_v23 = vpop.xlane.xlu0 %13185  ;;  %v13208_v51 = vmul.f32 %v26313_v46, %v29736_v48  ;;  %v32474_v48 = vld [vmem:[#allocation19_spill] sm:$0xff] }
 0xe8c   : > { %25186 = vmatmul.mubr.msk.f32.vlgmr.msra.gmra.mrb[184].mxu1 %vm1193_vm3, %v13206_v26  ;;  %25189 = vmatpush3.msra.mxu0 %v32471_v5  ;;  %26324 = vrcp.f32 %v13186_v23  ;;  %v13210_v20 = vmul.f32 %v26315_v22, %v29738_v47  ;;  %v32475_v47 = vld [vmem:[#allocation97_spill] sm:$0xff]  ;;  %v32480_v26 = vld [vmem:[#allocation100_spill] sm:$0xff]  ;;  %v32481_v22 = vld [vmem:[#allocation23_spill] sm:$0xff] }
 0xe8d   : > { %25194 = vmatpush3.msra.mxu1 %v32472_v15  ;;  %25190 = vmatprep.mubr.msk.f32.mxu0 %vm26611_vm2, %v32223_v27  ;;  %v32484_v5 = vld [vmem:[#allocation102_spill] sm:$0xff] }
 0xe8e   : > { %v26317_v21 = vpop.eup %26316  ;;  %25198 = vmatprep.subr.mxu0 %v32223_v27  ;;  %17175 = vrot.lane.b32.xlu1 %v32473_v3, %s26624_s14 }
 0xe8f   : > { %v26319_v11 = vpop.eup %26318  ;;  %25195 = vmatprep.mubr.msk.f32.mxu1 %vm26611_vm2, %v32223_v27  ;;  %25203 = vmatprep.subr.mxu1 %v32223_v27  ;;  %v13212_v59 = vmul.f32 %v26317_v21, %v29744_v41  ;;  %v32478_v41 = vld [vmem:[#allocation5_spill] sm:$0xff] }
 0xe90   : > { %17097 = vrot.lane.b32.xlu0 %v32474_v48, %s26624_s14  ;;  %25191 = vmatmul.mubr.msk.f32.vlgmr.msra.gmra.mrb[148].mxu0 %vm1193_vm3, %v13208_v51  ;;  %v13214_v2 = vmul.f32 %v26319_v11, %v29746_v62  ;;  %v32479_v62 = vld [vmem:[#allocation99_spill] sm:$0xff] }
 0xe91   : > { %25196 = vmatmul.mubr.msk.f32.vlgmr.msra.gmra.mrb[186].mxu1 %vm1193_vm3, %v13210_v20  ;;  %25199 = vmatpush3.msra.mxu0 %v32475_v47  ;;  %v32485_v51 = vld [vmem:[#allocation103_spill] sm:$0xff] }
 0xe92   : > { %25204 = vmatpush3.msra.mxu1 %v32476_v24  ;;  %25200 = vmatprep.mubr.msk.f32.mxu0 %vm26611_vm2, %v32223_v27  ;;  %v26321_v1 = vpop.eup %26320 }
 0xe93   : > { %25208 = vmatprep.subr.mxu0 %v32223_v27  ;;  %17333 = vrot.lane.b32.xlu1 %v32477_v39, %s26623_s13  ;;  %v26323_v63 = vpop.eup %26322  ;;  %v13216_v8 = vmul.f32 %v26321_v1, %v29752_v28  ;;  %v32482_v28 = vld [vmem:[#allocation21_spill] sm:$0xff] }
 0xe94   : > { %25205 = vmatprep.mubr.msk.f32.mxu1 %vm26611_vm2, %v32223_v27  ;;  %25213 = vmatprep.subr.mxu1 %v32223_v27  ;;  %v13218_v46 = vmul.f32 %v26323_v63, %v29754_v0  ;;  %v32483_v0 = vld [vmem:[#allocation101_spill] sm:$0xff]  ;;  %v32486_v63 = vld [vmem:[#allocation104_spill] sm:$0xff] }
 0xe95   : > { %17255 = vrot.lane.b32.xlu0 %v32478_v41, %s26623_s13  ;;  %25201 = vmatmul.mubr.msk.f32.vlgmr.msra.gmra.mrb[150].mxu0 %vm1193_vm3, %v13212_v59  ;;  %v32522_v41 = vld [vmem:[#allocation10_spill] sm:$0xff] }
 0xe96   : > { %25206 = vmatmul.mubr.msk.f32.vlgmr.msra.gmra.mrb[188].mxu1 %vm1193_vm3, %v13214_v2  ;;  %25209 = vmatpush3.msra.mxu0 %v32479_v62  ;;  %v26325_v7 = vpop.eup %26324 }
 0xe97   : > { %25214 = vmatpush3.msra.mxu1 %v32480_v26  ;;  %25210 = vmatprep.mubr.msk.f32.mxu0 %vm26611_vm2, %v32223_v27  ;;  %v13220_v23 = vmul.f32 %v26325_v7, %v29760_v33  ;;  %v32487_v26 = vld [vmem:[#allocation106_spill] sm:$0xff] }
 0xe98   : > { %25218 = vmatprep.subr.mxu0 %v32223_v27  ;;  %17331 = vrot.lane.b32.xlu1 %v32481_v22, %s26624_s14 }
 0xe99   : > { %25215 = vmatprep.mubr.msk.f32.mxu1 %vm26611_vm2, %v32223_v27  ;;  %25223 = vmatprep.subr.mxu1 %v32223_v27 }
 0xe9a   : > { %17253 = vrot.lane.b32.xlu0 %v32482_v28, %s26624_s14  ;;  %25211 = vmatmul.mubr.msk.f32.vlgmr.msra.gmra.mrb[152].mxu0 %vm1193_vm3, %v13216_v8 }
 0xe9b   : > { %25216 = vmatmul.mubr.msk.f32.vlgmr.msra.gmra.mrb[190].mxu1 %vm1193_vm3, %v13218_v46  ;;  %25219 = vmatpush3.msra.mxu0 %v32483_v0  ;;  %v32489_v46 = vld [vmem:[#allocation108_spill] sm:$0xff] }
 0xe9c   : > { %25224 = vmatpush3.msra.mxu1 %v32484_v5  ;;  %25220 = vmatprep.mubr.msk.f32.mxu0 %vm26611_vm2, %v32223_v27  ;;  %v32491_v5 = vld [vmem:[#allocation110_spill] sm:$0xff] }
 0xe9d   : > { %25228 = vmatprep.subr.mxu0 %v32223_v27  ;;  %25225 = vmatprep.mubr.msk.f32.mxu1 %vm26611_vm2, %v32223_v27 }
 0xe9e   : > { %25221 = vmatmul.mubr.msk.f32.vlgmr.msra.gmra.mrb[154].mxu0 %vm1193_vm3, %v13220_v23  ;;  %25233 = vmatprep.subr.mxu1 %v32223_v27 }
 0xe9f   : > { %25229 = vmatpush3.msra.mxu0 %v32485_v51  ;;  %25230 = vmatprep.mubr.msk.f32.mxu0 %vm26611_vm2, %v32223_v27  ;;  %v32492_v51 = vld [vmem:[#allocation109_spill] sm:$0xff] }
 0xea0   : > { %25238 = vmatprep.subr.mxu0 %v32223_v27 }
 0xebc   : > { %v13189_v33 = vpop.xlane.xlu1 %13188 }
 0xebd   : > { %26326 = vrcp.f32 %v13189_v33 }
 0xec0   : > { %v13192_v15 = vpop.xlane.xlu0 %13191  ;;  %v14988_v20 = vpop.permute.xlu1 %14987 }
 0xec1   : > { %26328 = vrcp.f32 %v13192_v15 }
 0xec4   : > { %v14910_v21 = vpop.permute.xlu0 %14909  ;;  %v15146_v11 = vpop.permute.xlu1 %15145 }
 0xec7   : > { %v26327_v47 = vpop.eup %26326 }
 0xec8   : > { %v15068_v59 = vpop.permute.xlu0 %15067  ;;  %v15144_v24 = vpop.permute.xlu1 %15143  ;;  %v13222_v2 = vmul.f32 %v26327_v47, %v29770_v30  ;;  %v32488_v30 = vld [vmem:[#allocation105_spill] sm:$0xff]  ;;  %v32493_v47 = vld [vmem:[#allocation111_spill] sm:$0xff] }
 0xeca   : > { %25226 = vmatmul.mubr.msk.f32.vlgmr.msra.gmra.mrb[192].mxu1 %vm1193_vm3, %v13222_v2 }
 0xecb   : > { %v26329_v1 = vpop.eup %26328  ;;  %25234 = vmatpush3.xpose.msk.msra.mxu1 %vm1193_vm3, %v32486_v63  ;;  %25235 = vmatprep.mubr.msk.f32.mxu1 %vm26611_vm2, %v32223_v27 }
 0xecc   : > { %v15066_v62 = vpop.permute.xlu0 %15065  ;;  %v15302_v8 = vpop.permute.xlu1 %15301  ;;  %25243 = vmatprep.subr.mxu1 %v32223_v27  ;;  %v13224_v7 = vmul.f32 %v26329_v1, %v29774_v19  ;;  %v32490_v19 = vld [vmem:[#allocation107_spill] sm:$0xff] }
 0xece   : > { %25231 = vmatmul.mubr.msk.f32.vlgmr.msra.gmra.mrb[156].mxu0 %vm1193_vm3, %v13224_v7  ;;  %25236 = vmatmul.mubr.msk.f32.vlgmr.msra.gmra.mrb[194].mxu1 %vm1193_vm3, %v32487_v26 }
 0xecf   : > { %25239 = vmatpush3.xpose.msk.msra.mxu0 %vm1193_vm3, %v32488_v30  ;;  %25244 = vmatpush3.xpose.msk.msra.mxu1 %vm1193_vm3, %v32489_v46 }
 0xed0   : > { %v15224_v23 = vpop.permute.xlu0 %15223  ;;  %v15300_v0 = vpop.permute.xlu1 %15299  ;;  %25240 = vmatprep.mubr.msk.f32.mxu0 %vm26611_vm2, %v32223_v27  ;;  %25245 = vmatprep.mubr.msk.f32.mxu1 %vm26611_vm2, %v32223_v27 }
 0xed1   : > { %25248 = vmatprep.subr.mxu0 %v32223_v27  ;;  %25253 = vmatprep.subr.mxu1 %v32223_v27 }
 0xed2   : > { %25241 = vmatmul.mubr.msk.f32.vlgmr.msra.gmra.mrb[158].mxu0 %vm1193_vm3, %v32490_v19  ;;  %25246 = vmatmul.mubr.msk.f32.vlgmr.msra.gmra.mrb[196].mxu1 %vm1193_vm3, %v32491_v5 }
 0xed3   : > { %25249 = vmatpush3.xpose.msk.msra.mxu0 %vm1193_vm3, %v32492_v51  ;;  %25254 = vmatpush3.xpose.msk.msra.mxu1 %vm1193_vm3, %v29766_v45 }
 0xed4   : > { %v15222_v33 = vpop.permute.xlu0 %15221  ;;  %v15458_v15 = vpop.permute.xlu1 %15457  ;;  %25250 = vmatprep.mubr.msk.f32.mxu0 %vm26611_vm2, %v32223_v27  ;;  %25255 = vmatprep.mubr.msk.f32.mxu1 %vm26611_vm2, %v32223_v27 }
 0xed5   : > { %25258 = vmatprep.subr.mxu0 %v32223_v27  ;;  %25263 = vmatprep.subr.mxu1 %v32223_v27 }
 0xed6   : > { %25251 = vmatmul.mubr.msk.f32.vlgmr.msra.gmra.mrb[160].mxu0 %vm1193_vm3, %v32493_v47  ;;  %25256 = vmatmul.mubr.msk.f32.vlgmr.msra.gmra.mrb[198].mxu1 %vm1193_vm3, %v29818_v6 }
 0xed7   : > { %25259 = vmatpush3.xpose.msk.msra.mxu0 %vm1193_vm3, %v29764_v58  ;;  %25264 = vmatpush3.xpose.msk.msra.mxu1 %vm1193_vm3, %v29828_v52 }
 0xed8   : > { %v15380_v45 = vpop.permute.xlu0 %15379  ;;  %v15456_v2 = vpop.permute.xlu1 %15455  ;;  %25260 = vmatprep.mubr.msk.f32.mxu0 %vm26611_vm2, %v32223_v27  ;;  %25265 = vmatprep.mubr.msk.f32.mxu1 %vm26611_vm2, %v32223_v27 }
 0xed9   : > { %25268 = vmatprep.subr.mxu0 %v32223_v27  ;;  %25273 = vmatprep.subr.mxu1 %v32223_v27 }
 0xeda   : > { %25261 = vmatmul.mubr.msk.f32.vlgmr.msra.gmra.mrb[162].mxu0 %vm1193_vm3, %v29812_v38  ;;  %25266 = vmatmul.mubr.msk.f32.vlgmr.msra.gmra.mrb[200].mxu1 %vm1193_vm3, %v14910_v21 }
 0xedb   : > { %25269 = vmatpush3.xpose.msk.msra.mxu0 %vm1193_vm3, %v29822_v60  ;;  %25274 = vmatpush3.xpose.msk.msra.mxu1 %vm1193_vm3, %v15068_v59 }
 0xedc   : > { %v15378_v58 = vpop.permute.xlu0 %15377  ;;  %25270 = vmatprep.mubr.msk.f32.mxu0 %vm26611_vm2, %v32223_v27  ;;  %25275 = vmatprep.mubr.msk.f32.mxu1 %vm26611_vm2, %v32223_v27  ;;  %v15614_v6 = vpop.permute.xlu1 %15613 }
 0xedd   : > { %25278 = vmatprep.subr.mxu0 %v32223_v27  ;;  %25283 = vmatprep.subr.mxu1 %v32223_v27 }
 0xede   : > { %25271 = vmatmul.mubr.msk.f32.vlgmr.msra.gmra.mrb[164].mxu0 %vm1193_vm3, %v14988_v20  ;;  %25276 = vmatmul.mubr.msk.f32.vlgmr.msra.gmra.mrb[202].mxu1 %vm1193_vm3, %v15066_v62 }
 0xedf   : > { %25279 = vmatpush3.xpose.msk.msra.mxu0 %vm1193_vm3, %v15146_v11  ;;  %25284 = vmatpush3.xpose.msk.msra.mxu1 %vm1193_vm3, %v15224_v23 }
 0xee0   : > { %25280 = vmatprep.mubr.msk.f32.mxu0 %vm26611_vm2, %v32223_v27  ;;  %25285 = vmatprep.mubr.msk.f32.mxu1 %vm26611_vm2, %v32223_v27  ;;  %v15536_v38 = vpop.permute.xlu0 %15535  ;;  %v15612_v60 = vpop.permute.xlu1 %15611 }
 0xee1   : > { %25288 = vmatprep.subr.mxu0 %v32223_v27  ;;  %25293 = vmatprep.subr.mxu1 %v32223_v27 }
 0xee2   : > { %25281 = vmatmul.mubr.msk.f32.vlgmr.msra.gmra.mrb[166].mxu0 %vm1193_vm3, %v15144_v24  ;;  %25286 = vmatmul.mubr.msk.f32.vlgmr.msra.gmra.mrb[204].mxu1 %vm1193_vm3, %v15222_v33 }
 0xee3   : > { %25289 = vmatpush3.xpose.msk.msra.mxu0 %vm1193_vm3, %v15302_v8  ;;  %25294 = vmatpush3.xpose.msk.msra.mxu1 %vm1193_vm3, %v15380_v45 }
 0xee4   : > { %25290 = vmatprep.mubr.msk.f32.mxu0 %vm26611_vm2, %v32223_v27  ;;  %25295 = vmatprep.mubr.msk.f32.mxu1 %vm26611_vm2, %v32223_v27  ;;  %v15534_v52 = vpop.permute.xlu0 %15533  ;;  %v15882_v20 = vpop.permute.xlu1 %15881 }
 0xee5   : > { %25298 = vmatprep.subr.mxu0 %v32223_v27  ;;  %25303 = vmatprep.subr.mxu1 %v32223_v27 }
 0xee6   : > { %25291 = vmatmul.mubr.msk.f32.vlgmr.msra.gmra.mrb[168].mxu0 %vm1193_vm3, %v15300_v0  ;;  %25296 = vmatmul.mubr.msk.f32.vlgmr.msra.gmra.mrb[206].mxu1 %vm1193_vm3, %v15378_v58 }
 0xee7   : > { %25299 = vmatpush3.xpose.msk.msra.mxu0 %vm1193_vm3, %v15458_v15  ;;  %25304 = vmatpush3.xpose.msk.msra.mxu1 %vm1193_vm3, %v15536_v38 }
 0xee8   : > { %25300 = vmatprep.mubr.msk.f32.mxu0 %vm26611_vm2, %v32223_v27  ;;  %25305 = vmatprep.mubr.msk.f32.mxu1 %vm26611_vm2, %v32223_v27  ;;  %v15958_v21 = vpop.permute.xlu0 %15957 }
 0xee9   : > { %25308 = vmatprep.subr.mxu0 %v32223_v27  ;;  %25313 = vmatprep.subr.mxu1 %v32223_v27 }
 0xeea   : > { %25301 = vmatmul.mubr.msk.f32.vlgmr.msra.gmra.mrb[170].mxu0 %vm1193_vm3, %v15456_v2  ;;  %25306 = vmatmul.mubr.msk.f32.vlgmr.msra.gmra.mrb[208].mxu1 %vm1193_vm3, %v15534_v52 }
 0xeeb   : > { %25309 = vmatpush3.xpose.msk.msra.mxu0 %vm1193_vm3, %v15614_v6  ;;  %25314 = vmatpush3.msra.mxu1 %v15882_v20 }
 0xeec   : > { %25310 = vmatprep.mubr.msk.f32.mxu0 %vm26611_vm2, %v32223_v27  ;;  %25318 = vmatprep.subr.mxu0 %v32223_v27 }
 0xeed   : > { %25315 = vmatprep.mubr.msk.f32.mxu1 %vm26611_vm2, %v32223_v27  ;;  %25323 = vmatprep.subr.mxu1 %v32223_v27 }
 0xeee   : > { %25311 = vmatmul.mubr.msk.f32.vlgmr.msra.gmra.mrb[172].mxu0 %vm1193_vm3, %v15612_v60 }
 0xeef   : > { %25319 = vmatpush3.msra.mxu0 %v15958_v21  ;;  %25320 = vmatprep.mubr.msk.f32.mxu0 %vm26611_vm2, %v32223_v27 }
 0xef0   : > { %25328 = vmatprep.subr.mxu0 %v32223_v27 }
 0xf50   : > { %v30058_v11 = vpop.f32.mrb[178].mxu1 }
 0xf51   : > { %32494 = vst [vmem:[#allocation35_spill] sm:$0xff] %v30058_v11  ;;  %v25157_v59 = vpop.f32.mrb[179].mxu1 }
 0xf54   : > { %v30060_v24 = vpop.f32.mrb[142].mxu0 }
 0xf55   : > { %32495 = vst [vmem:[#allocation96_spill] sm:$0xff] %v30060_v24  ;;  %v30062_v1 = vpop.f32.mrb[180].mxu1  ;;  %v25162_v63 = vpop.f32.mrb[143].mxu0 }
 0xf56   : > { %32496 = vst [vmem:[#allocation95_spill] sm:$0xff] %v30062_v1  ;;  %v25167_v62 = vpop.f32.mrb[181].mxu1 }
 0xf59   : > { %v30064_v8 = vpop.f32.mrb[144].mxu0 }
 0xf5a   : > { %32497 = vst [vmem:[#allocation97_spill] sm:$0xff] %v30064_v8  ;;  %v30066_v7 = vpop.f32.mrb[182].mxu1  ;;  %v25172_v26 = vpop.f32.mrb[145].mxu0 }
 0xf5b   : > { %32498 = vst [vmem:[#allocation98_spill] sm:$0xff] %v30066_v7  ;;  %v25177_v30 = vpop.f32.mrb[183].mxu1 }
 0xf5e   : > { %v30068_v46 = vpop.f32.mrb[146].mxu0 }
 0xf5f   : > { %32499 = vst [vmem:[#allocation99_spill] sm:$0xff] %v30068_v46  ;;  %v30070_v23 = vpop.f32.mrb[184].mxu1  ;;  %v25182_v0 = vpop.f32.mrb[147].mxu0 }
 0xf60   : > { %32500 = vst [vmem:[#allocation100_spill] sm:$0xff] %v30070_v23  ;;  %v25187_v19 = vpop.f32.mrb[185].mxu1 }
 0xf63   : > { %v30072_v5 = vpop.f32.mrb[148].mxu0 }
 0xf64   : > { %32501 = vst [vmem:[#allocation101_spill] sm:$0xff] %v30072_v5  ;;  %v30074_v51 = vpop.f32.mrb[186].mxu1  ;;  %v25192_v33 = vpop.f32.mrb[149].mxu0 }
 0xf65   : > { %32502 = vst [vmem:[#allocation102_spill] sm:$0xff] %v30074_v51  ;;  %v25197_v15 = vpop.f32.mrb[187].mxu1  ;;  %v30194_v51 = vpop.permute.xlu0 %16033 }
 0xf68   : > { %v30076_v47 = vpop.f32.mrb[150].mxu0 }
 0xf69   : > { %32503 = vst [vmem:[#allocation103_spill] sm:$0xff] %v30076_v47  ;;  %v30078_v45 = vpop.f32.mrb[188].mxu1  ;;  %v25202_v2 = vpop.f32.mrb[151].mxu0  ;;  %v32511_v47 = vld [vmem:[#allocation8_spill] sm:$0xff] }
 0xf6a   : > { %32504 = vst [vmem:[#allocation104_spill] sm:$0xff] %v30078_v45  ;;  %v25207_v58 = vpop.f32.mrb[189].mxu1  ;;  %v30198_v5 = vpop.permute.xlu0 %16185 }
 0xf6d   : > { %v30080_v6 = vpop.f32.mrb[152].mxu0 }
 0xf6e   : > { %32505 = vst [vmem:[#allocation106_spill] sm:$0xff] %v30080_v6  ;;  %v30082_v38 = vpop.f32.mrb[190].mxu1  ;;  %v25212_v60 = vpop.f32.mrb[153].mxu0 }
 0xf6f   : > { %32506 = vst [vmem:[#allocation105_spill] sm:$0xff] %v30082_v38  ;;  %v25217_v52 = vpop.f32.mrb[191].mxu1 }
 0xf71   : > { %v30084_v20 = vpop.f32.mrb[154].mxu0 }
 0xf72   : > { %32507 = vst [vmem:[#allocation108_spill] sm:$0xff] %v30084_v20  ;;  %v25222_v21 = vpop.f32.mrb[155].mxu0 }
 0xf9d   : > { %v30086_v59 = vpop.f32.mrb[192].mxu1 }
 0xf9e   : > { %32508 = vst [vmem:[#allocation107_spill] sm:$0xff] %v30086_v59  ;;  %v25227_v63 = vpop.f32.mrb[193].mxu1 }
 0xfa1   : > { %v30088_v62 = vpop.f32.mrb[156].mxu0  ;;  %v14515_v26 = vpop.f32.mrb[194].mxu1 }
 0xfa2   : > { %32509 = vst [vmem:[#allocation110_spill] sm:$0xff] %v30088_v62  ;;  %v30092_v0 = vsel %vm26902_vm1, %v14515_v26, -32767.0  ;;  %v25232_v19 = vpop.f32.mrb[157].mxu0  ;;  %v25237_v33 = vpop.f32.mrb[195].mxu1 }
 0xfa3   : > { %v15705_v15 = vsel %vm1193_vm3, %v30092_v0, -inf }
 0xfa4   : > { %15706 = vmax.xlane.f32.xlu0 %v15705_v15 }
 0xfa5   : > { %v14593_v2 = vpop.f32.mrb[158].mxu0  ;;  %v14671_v58 = vpop.f32.mrb[196].mxu1 }
 0xfa6   : > { %v30098_v60 = vsel %vm26902_vm1, %v14593_v2, -32767.0  ;;  %v30102_v52 = vsel %vm26902_vm1, %v14671_v58, -32767.0  ;;  %v25242_v21 = vpop.f32.mrb[159].mxu0  ;;  %v25247_v63 = vpop.f32.mrb[197].mxu1 }
 0xfa7   : > { %v15708_v26 = vsel %vm1193_vm3, %v30098_v60, -inf  ;;  %v15711_v19 = vsel %vm1193_vm3, %v30102_v52, -inf }
 0xfa8   : > { %15709 = vmax.xlane.f32.xlu1 %v15708_v26  ;;  %15712 = vmax.xlane.f32.xlu0 %v15711_v19 }
 0xfa9   : > { %v14749_v33 = vpop.f32.mrb[160].mxu0  ;;  %v14827_v15 = vpop.f32.mrb[198].mxu1 }
 0xfaa   : > { %v30110_v2 = vsel %vm26902_vm1, %v14749_v33, -32767.0  ;;  %v30114_v58 = vsel %vm26902_vm1, %v14827_v15, -32767.0  ;;  %v25252_v21 = vpop.f32.mrb[161].mxu0  ;;  %v25257_v63 = vpop.f32.mrb[199].mxu1 }
 0xfab   : > { %v15714_v46 = vsel %vm1193_vm3, %v30110_v2, -inf  ;;  %v15717_v7 = vsel %vm1193_vm3, %v30114_v58, -inf }
 0xfac   : > { %15715 = vmax.xlane.f32.xlu0 %v15714_v46  ;;  %15718 = vmax.xlane.f32.xlu1 %v15717_v7 }
 0xfad   : > { %v14905_v26 = vpop.f32.mrb[162].mxu0  ;;  %v14983_v19 = vpop.f32.mrb[200].mxu1 }
 0xfae   : > { %v30122_v33 = vsel %vm26902_vm1, %v14905_v26, -32767.0  ;;  %v30126_v15 = vsel %vm26902_vm1, %v14983_v19, -32767.0  ;;  %v25262_v21 = vpop.f32.mrb[163].mxu0  ;;  %v25267_v63 = vpop.f32.mrb[201].mxu1 }
 0xfaf   : > { %v15720_v62 = vsel %vm1193_vm3, %v30122_v33, -inf  ;;  %v15723_v59 = vsel %vm1193_vm3, %v30126_v15, -inf }
 0xfb0   : > { %15721 = vmax.xlane.f32.xlu0 %v15720_v62  ;;  %15724 = vmax.xlane.f32.xlu1 %v15723_v59 }
 0xfb1   : > { %v15061_v7 = vpop.f32.mrb[164].mxu0  ;;  %v15139_v46 = vpop.f32.mrb[202].mxu1 }
 0xfb2   : > { %v30134_v26 = vsel %vm26902_vm1, %v15061_v7, -32767.0  ;;  %v30138_v19 = vsel %vm26902_vm1, %v15139_v46, -32767.0  ;;  %v25272_v21 = vpop.f32.mrb[165].mxu0  ;;  %v25277_v63 = vpop.f32.mrb[203].mxu1 }
 0xfb3   : > { %v15726_v8 = vsel %vm1193_vm3, %v30134_v26, -inf  ;;  %v15729_v1 = vsel %vm1193_vm3, %v30138_v19, -inf }
 0xfb4   : > { %15727 = vmax.xlane.f32.xlu0 %v15726_v8  ;;  %15730 = vmax.xlane.f32.xlu1 %v15729_v1 }
 0xfb5   : > { %v15217_v59 = vpop.f32.mrb[166].mxu0  ;;  %v15295_v62 = vpop.f32.mrb[204].mxu1 }
 0xfb6   : > { %v30146_v7 = vsel %vm26902_vm1, %v15217_v59, -32767.0  ;;  %v30150_v46 = vsel %vm26902_vm1, %v15295_v62, -32767.0  ;;  %v25282_v21 = vpop.f32.mrb[167].mxu0  ;;  %v25287_v63 = vpop.f32.mrb[205].mxu1 }
 0xfb7   : > { %v15732_v20 = vsel %vm1193_vm3, %v30146_v7, -inf  ;;  %v15735_v38 = vsel %vm1193_vm3, %v30150_v46, -inf }
 0xfb8   : > { %15733 = vmax.xlane.f32.xlu0 %v15732_v20  ;;  %15736 = vmax.xlane.f32.xlu1 %v15735_v38 }
 0xfb9   : > { %v15373_v1 = vpop.f32.mrb[168].mxu0  ;;  %v15451_v8 = vpop.f32.mrb[206].mxu1 }
 0xfba   : > { %v30158_v59 = vsel %vm26902_vm1, %v15373_v1, -32767.0  ;;  %v30162_v62 = vsel %vm26902_vm1, %v15451_v8, -32767.0  ;;  %v25292_v21 = vpop.f32.mrb[169].mxu0  ;;  %v25297_v63 = vpop.f32.mrb[207].mxu1 }
 0xfbb   : > { %v15738_v24 = vsel %vm1193_vm3, %v30158_v59, -inf  ;;  %v15741_v45 = vsel %vm1193_vm3, %v30162_v62, -inf }
 0xfbc   : > { %15739 = vmax.xlane.f32.xlu0 %v15738_v24  ;;  %15742 = vmax.xlane.f32.xlu1 %v15741_v45  ;;  %v32512_v24 = vld [vmem:[#allocation7_spill] sm:$0xff] }
 0xfbd   : > { %v15529_v38 = vpop.f32.mrb[170].mxu0  ;;  %v15607_v20 = vpop.f32.mrb[208].mxu1 }
 0xfbe   : > { %v30170_v1 = vsel %vm26902_vm1, %v15529_v38, -32767.0  ;;  %v25302_v6 = vpop.f32.mrb[171].mxu0  ;;  %v25307_v11 = vpop.f32.mrb[209].mxu1  ;;  %v30180_v45 = vsel %vm26902_vm1, %v15607_v20, -32767.0 }
 0xfbf   : > { %v15744_v8 = vsel %vm1193_vm3, %v30170_v1, -inf  ;;  %v30182_v38 = vpop.permute.xlu1 %16109  ;;  %v15747_v11 = vsel %vm1193_vm3, %v30180_v45, -inf }
 0xfc0   : > { %15745 = vmax.xlane.f32.xlu0 %v15744_v8 }
 0xfc1   : > { %v15685_v21 = vpop.f32.mrb[172].mxu0 }
 0xfc2   : > { %v25312_v63 = vpop.f32.mrb[173].mxu0  ;;  %v30188_v6 = vsel %vm26902_vm1, %v15685_v21, -32767.0  ;;  %v30204_v21 = vpop.permute.xlu0 %16489 }
 0xfc3   : > { %v15750_v8 = vsel %vm1193_vm3, %v30188_v6, -inf  ;;  %v30192_v63 = vpop.permute.xlu1 %16261  ;;  %32515 = vst [vmem:[#allocation111_spill] sm:$0xff] %v30204_v21 }
 0xfc7   : > { %v30196_v20 = vpop.permute.xlu1 %16337 }
 0xfcb   : > { %v30200_v23 = vpop.permute.xlu1 %16413 }
 0xfcc   : > { %32513 = vst [vmem:[#allocation109_spill] sm:$0xff] %v30200_v23 }
 0xfcd   : > { %17489 = vrot.lane.b32.xlu1 %v32511_v47, %s26623_s13  ;;  %v30210_v47 = vpop.permute.xlu0 %16641 }
 0xfce   : > { %32518 = vst [vmem:[#allocation113_spill] sm:$0xff] %v30210_v47 }
 0xfcf   : > { %v30208_v30 = vpop.permute.xlu1 %16565 }
 0xfd0   : > { %32517 = vst [vmem:[#allocation112_spill] sm:$0xff] %v30208_v30 }
 0xfd1   : > { %v30216_v22 = vpop.permute.xlu0 %16793 }
 0xfd2   : > { %32521 = vst [vmem:[#allocation115_spill] sm:$0xff] %v30216_v22 }
 0xfd3   : > { %v30214_v28 = vpop.permute.xlu1 %16717 }
 0xfd4   : > { %32520 = vst [vmem:[#allocation114_spill] sm:$0xff] %v30214_v28 }
 0xfd5   : > { %v30222_v39 = vpop.permute.xlu0 %16945 }
 0xfd6   : > { %17411 = vrot.lane.b32.xlu0 %v32512_v24, %s26623_s13  ;;  %v32514_v24 = vld [vmem:[#allocation25_spill] sm:$0xff]  ;;  %32524 = vst [vmem:[#allocation117_spill] sm:$0xff] %v30222_v39 }
 0xff1   : > { %15748 = vmax.xlane.f32.xlu1 %v15747_v11  ;;  %v32516_v11 = vld [vmem:[#allocation12_spill] sm:$0xff] }
 0xff5   : > { %15751 = vmax.xlane.f32.xlu0 %v15750_v8  ;;  %v32519_v8 = vld [vmem:[#allocation24_spill] sm:$0xff] }
0x1002   : > { %17487 = vrot.lane.b32.xlu1 %v32514_v24, %s26624_s14  ;;  %v30220_v24 = vpop.permute.xlu1 %16869 }
0x1003   : > { %32523 = vst [vmem:[#allocation116_spill] sm:$0xff] %v30220_v24 }
0x1006   : > { %17645 = vrot.lane.b32.xlu1 %v32516_v11, %s26623_s13  ;;  %v30224_v48 = vpop.permute.xlu1 %17021  ;;  %v30226_v11 = vpop.permute.xlu0 %17099 }
0x1007   : > { %32525 = vst [vmem:[#allocation118_spill] sm:$0xff] %v30224_v48  ;;  %32526 = vst [vmem:[#allocation119_spill] sm:$0xff] %v30226_v11 }
0x100a   : > { %v30228_v30 = vpop.permute.xlu1 %17177  ;;  %v30230_v47 = vpop.permute.xlu0 %17097 }
0x100b   : > { %17409 = vrot.lane.b32.xlu0 %v32519_v8, %s26624_s14  ;;  %32527 = vst [vmem:[#allocation120_spill] sm:$0xff] %v30228_v30  ;;  %32528 = vst [vmem:[#allocation121_spill] sm:$0xff] %v30230_v47 }
0x100e   : > { %v30232_v8 = vpop.permute.xlu1 %17175  ;;  %v30234_v28 = vpop.permute.xlu0 %17255 }
0x100f   : > { %17567 = vrot.lane.b32.xlu0 %v32522_v41, %s26623_s13  ;;  %32529 = vst [vmem:[#allocation122_spill] sm:$0xff] %v30232_v8  ;;  %32530 = vst [vmem:[#allocation123_spill] sm:$0xff] %v30234_v28 }
0x1012   : > { %v30236_v22 = vpop.permute.xlu1 %17333  ;;  %v30238_v3 = vpop.permute.xlu0 %17253 }
0x1013   : > { %32531 = vst [vmem:[#allocation124_spill] sm:$0xff] %v30236_v22  ;;  %32532 = vst [vmem:[#allocation125_spill] sm:$0xff] %v30238_v3 }
0x1016   : > { %v30240_v41 = vpop.permute.xlu1 %17331 }
0x1017   : > { %32533 = vst [vmem:[#allocation126_spill] sm:$0xff] %v30240_v41 }
0x1031   : > { %v15707_v24 = vpop.xlane.xlu0 %15706 }
0x1032   : > { %v15753_v39 = vsub.f32 %v30092_v0, %v15707_v24 }
0x1034   : > { %v15769_v48 = vmul.f32 1.442695, %v15753_v39 }
0x1035   : > { %v15710_v21 = vpop.xlane.xlu1 %15709  ;;  %v15713_v11 = vpop.xlane.xlu0 %15712 }
0x1036   : > { %26330 = vpow2.f32 %v15769_v48  ;;  %v15754_v30 = vsub.f32 %v30098_v60, %v15710_v21  ;;  %v15755_v47 = vsub.f32 %v30102_v52, %v15713_v11 }
0x1038   : > { %v15771_v8 = vmul.f32 1.442695, %v15754_v30  ;;  %v15773_v23 = vmul.f32 1.442695, %v15755_v47 }
0x1039   : > { %v15716_v28 = vpop.xlane.xlu0 %15715  ;;  %v15719_v40 = vpop.xlane.xlu1 %15718 }
0x103a   : > { %26332 = vpow2.f32 %v15771_v8  ;;  %v15756_v22 = vsub.f32 %v30110_v2, %v15716_v28  ;;  %v15757_v41 = vsub.f32 %v30114_v58, %v15719_v40 }
0x103b   : > { %26334 = vpow2.f32 %v15773_v23 }
0x103c   : > { %v15775_v3 = vmul.f32 1.442695, %v15756_v22  ;;  %v15777_v0 = vmul.f32 1.442695, %v15757_v41 }
0x103d   : > { %v15722_v39 = vpop.xlane.xlu0 %15721  ;;  %v15725_v24 = vpop.xlane.xlu1 %15724 }
0x103e   : > { %26336 = vpow2.f32 %v15775_v3  ;;  %v15758_v48 = vsub.f32 %v30122_v33, %v15722_v39  ;;  %v15759_v60 = vsub.f32 %v30126_v15, %v15725_v24 }
0x103f   : > { %26338 = vpow2.f32 %v15777_v0 }
0x1040   : > { %v30249_v30 = vpop.eup %26330  ;;  %v15779_v47 = vmul.f32 1.442695, %v15758_v48  ;;  %v15781_v52 = vmul.f32 1.442695, %v15759_v60 }
0x1041   : > { %v15728_v21 = vpop.xlane.xlu0 %15727  ;;  %v15731_v11 = vpop.xlane.xlu1 %15730  ;;  %v15801_v40 = vsel %vm1193_vm3, %v30249_v30, 0.0 }
0x1042   : > { %26340 = vpow2.f32 %v15779_v47  ;;  %v15760_v41 = vsub.f32 %v30134_v26, %v15728_v21  ;;  %v15761_v22 = vsub.f32 %v30138_v19, %v15731_v11  ;;  %15802 = vadd.xlane.f32.xlu1 %v15801_v40 }
0x1043   : > { %26342 = vpow2.f32 %v15781_v52 }
0x1044   : > { %v30255_v3 = vpop.eup %26332  ;;  %v15783_v28 = vmul.f32 1.442695, %v15760_v41  ;;  %v15785_v23 = vmul.f32 1.442695, %v15761_v22 }
0x1045   : > { %v30257_v2 = vpop.eup %26334  ;;  %v15734_v58 = vpop.xlane.xlu0 %15733  ;;  %v15804_v15 = vsel %vm1193_vm3, %v30255_v3, 0.0 }
0x1046   : > { %v15737_v33 = vpop.xlane.xlu1 %15736  ;;  %26344 = vpow2.f32 %v15783_v28  ;;  %v15762_v8 = vsub.f32 %v30146_v7, %v15734_v58  ;;  %15805 = vadd.xlane.f32.xlu0 %v15804_v15  ;;  %v15807_v19 = vsel %vm1193_vm3, %v30257_v2, 0.0 }
0x1047   : > { %v15763_v26 = vsub.f32 %v30150_v46, %v15737_v33  ;;  %26346 = vpow2.f32 %v15785_v23  ;;  %15808 = vadd.xlane.f32.xlu1 %v15807_v19 }
0x1048   : > { %v30265_v0 = vpop.eup %26336  ;;  %v15787_v39 = vmul.f32 1.442695, %v15762_v8 }
0x1049   : > { %v15789_v24 = vmul.f32 1.442695, %v15763_v26  ;;  %v30267_v48 = vpop.eup %26338  ;;  %v15740_v60 = vpop.xlane.xlu0 %15739  ;;  %v15810_v52 = vsel %vm1193_vm3, %v30265_v0, 0.0 }
0x104a   : > { %v15743_v47 = vpop.xlane.xlu1 %15742  ;;  %26348 = vpow2.f32 %v15787_v39  ;;  %v15764_v7 = vsub.f32 %v30158_v59, %v15740_v60  ;;  %15811 = vadd.xlane.f32.xlu0 %v15810_v52  ;;  %v15813_v21 = vsel %vm1193_vm3, %v30267_v48, 0.0 }
0x104b   : > { %v15765_v46 = vsub.f32 %v30162_v62, %v15743_v47  ;;  %26350 = vpow2.f32 %v15789_v24  ;;  %15814 = vadd.xlane.f32.xlu1 %v15813_v21 }
0x104c   : > { %v30275_v11 = vpop.eup %26340  ;;  %v15791_v40 = vmul.f32 1.442695, %v15764_v7 }
0x104d   : > { %v15793_v41 = vmul.f32 1.442695, %v15765_v46  ;;  %v30277_v22 = vpop.eup %26342  ;;  %v15746_v28 = vpop.xlane.xlu0 %15745  ;;  %v15816_v23 = vsel %vm1193_vm3, %v30275_v11, 0.0 }
0x104e   : > { %26352 = vpow2.f32 %v15791_v40  ;;  %v15766_v59 = vsub.f32 %v30170_v1, %v15746_v28  ;;  %15817 = vadd.xlane.f32.xlu0 %v15816_v23  ;;  %v15819_v62 = vsel %vm1193_vm3, %v30277_v22, 0.0  ;;  %v30312_v40 = vpop.permute.xlu1 %17489 }
0x104f   : > { %26354 = vpow2.f32 %v15793_v41  ;;  %15820 = vadd.xlane.f32.xlu1 %v15819_v62 }
0x1050   : > { %v30284_v58 = vpop.eup %26344  ;;  %v15795_v33 = vmul.f32 1.442695, %v15766_v59 }
0x1051   : > { %v30286_v15 = vpop.eup %26346  ;;  %v15822_v8 = vsel %vm1193_vm3, %v30284_v58, 0.0  ;;  %v30314_v41 = vpop.permute.xlu0 %17411 }
0x1052   : > { %26356 = vpow2.f32 %v15795_v33  ;;  %15823 = vadd.xlane.f32.xlu0 %v15822_v8  ;;  %v15825_v26 = vsel %vm1193_vm3, %v30286_v15, 0.0 }
0x1053   : > { %15826 = vadd.xlane.f32.xlu1 %v15825_v26 }
0x1054   : > { %v30292_v1 = vpop.eup %26348 }
0x1055   : > { %v30294_v19 = vpop.eup %26350  ;;  %v15828_v39 = vsel %vm1193_vm3, %v30292_v1, 0.0 }
0x1056   : > { %15829 = vadd.xlane.f32.xlu0 %v15828_v39  ;;  %v15831_v24 = vsel %vm1193_vm3, %v30294_v19, 0.0 }
0x1057   : > { %15832 = vadd.xlane.f32.xlu1 %v15831_v24 }
0x1058   : > { %v30300_v60 = vpop.eup %26352 }
0x1059   : > { %v30302_v47 = vpop.eup %26354  ;;  %v15834_v52 = vsel %vm1193_vm3, %v30300_v60, 0.0 }
0x105a   : > { %15835 = vadd.xlane.f32.xlu0 %v15834_v52  ;;  %v15837_v7 = vsel %vm1193_vm3, %v30302_v47, 0.0 }
0x105b   : > { %15838 = vadd.xlane.f32.xlu1 %v15837_v7  ;;  %v32535_v7 = vld [vmem:[#allocation45_spill] sm:$0xff] }
0x105c   : > { %v30308_v46 = vpop.eup %26356 }
0x105d   : > { %v15840_v21 = vsel %vm1193_vm3, %v30308_v46, 0.0 }
0x105e   : > { %15841 = vadd.xlane.f32.xlu0 %v15840_v21 }
0x107e   : > { %v15749_v28 = vpop.xlane.xlu1 %15748 }
0x107f   : > { %v15767_v23 = vsub.f32 %v30180_v45, %v15749_v28  ;;  %v32536_v28 = vld [vmem:[#allocation33_spill] sm:$0xff] }
0x1081   : > { %v15797_v59 = vmul.f32 1.442695, %v15767_v23 }
0x1082   : > { %v15752_v62 = vpop.xlane.xlu0 %15751  ;;  %v30360_v45 = vpop.permute.xlu1 %17487 }
0x1083   : > { %26358 = vpow2.f32 %v15797_v59  ;;  %v15768_v33 = vsub.f32 %v30188_v6, %v15752_v62  ;;  %v32534_v6 = vld [vmem:[#allocation18_spill] sm:$0xff]  ;;  %v32537_v59 = vld [vmem:[#allocation9_spill] sm:$0xff]  ;;  %v32538_v62 = vld [vmem:[#allocation43_spill] sm:$0xff] }
0x1085   : > { %v15799_v8 = vmul.f32 1.442695, %v15768_v33 }
0x1086   : > { %v30366_v21 = vpop.permute.xlu0 %17409  ;;  %v30370_v23 = vpop.permute.xlu1 %17645 }
0x1087   : > { %26360 = vpow2.f32 %v15799_v8 }
0x108a   : > { %v30376_v33 = vpop.permute.xlu0 %17567 }
0x108d   : > { %v30318_v26 = vpop.eup %26358 }
0x108e   : > { %v15843_v39 = vsel %vm1193_vm3, %v30318_v26, 0.0 }
0x108f   : > { %15844 = vadd.xlane.f32.xlu1 %v15843_v39  ;;  %v32539_v39 = vld [vmem:[#allocation44_spill] sm:$0xff] }
0x1091   : > { %v30322_v24 = vpop.eup %26360 }
0x1092   : > { %v15846_v52 = vsel %vm1193_vm3, %v30322_v24, 0.0 }
0x1093   : > { %15847 = vadd.xlane.f32.xlu0 %v15846_v52 }
0x10a0   : > { %17643 = vrot.lane.b32.xlu1 %v32322_v17, %s26624_s14 }
0x10a4   : > { %17801 = vrot.lane.b32.xlu1 %v32277_v13, %s26623_s13 }
0x10a8   : > { %17799 = vrot.lane.b32.xlu1 %v32278_v12, %s26624_s14 }
0x10a9   : > { %17565 = vrot.lane.b32.xlu0 %v32323_v50, %s26624_s14 }
0x10ac   : > { %17957 = vrot.lane.b32.xlu1 %v32279_v16, %s26623_s13 }
0x10ad   : > { %17723 = vrot.lane.b32.xlu0 %v32324_v61, %s26623_s13 }
0x10b0   : > { %17955 = vrot.lane.b32.xlu1 %v32280_v53, %s26624_s14 }
0x10b1   : > { %17721 = vrot.lane.b32.xlu0 %v32325_v54, %s26624_s14 }
0x10b4   : > { %18113 = vrot.lane.b32.xlu1 %v27074_v37, %s26623_s13 }
0x10b5   : > { %17879 = vrot.lane.b32.xlu0 %v32326_v18, %s26623_s13 }
0x10b8   : > { %18111 = vrot.lane.b32.xlu1 %v27228_v4, %s26624_s14 }
0x10b9   : > { %17877 = vrot.lane.b32.xlu0 %v32392_v9, %s26624_s14 }
0x10bc   : > { %18269 = vrot.lane.b32.xlu1 %v32393_v44, %s26623_s13 }
0x10bd   : > { %18035 = vrot.lane.b32.xlu0 %v32394_v10, %s26623_s13 }
0x10c0   : > { %18267 = vrot.lane.b32.xlu1 %v32281_v32, %s26624_s14 }
0x10c1   : > { %18033 = vrot.lane.b32.xlu0 %v32329_v43, %s26624_s14 }
0x10c4   : > { %18537 = vrot.lane.b32.xlu1 %v32463_v55, %s26624_s14 }
0x10c5   : > { %18191 = vrot.lane.b32.xlu0 %v32534_v6, %s26623_s13 }
0x10c8   : > { %18765 = vrot.lane.b32.xlu1 %v32535_v7, %s26624_s14 }
0x10c9   : > { %18189 = vrot.lane.b32.xlu0 %v32536_v28, %s26624_s14  ;;  %v32540_v28 = vld [vmem:[#allocation48_spill] sm:$0xff] }
0x10cc   : > { %18917 = vrot.lane.b32.xlu1 %v32537_v59, %s26624_s14 }
0x10cd   : > { %18613 = vrot.lane.b32.xlu0 %v32538_v62, %s26624_s14 }
0x10cf   : > { %v15803_v8 = vpop.xlane.xlu1 %15802 }
0x10d0   : > { %26362 = vrcp.f32 %v15803_v8  ;;  %18993 = vrot.lane.b32.xlu1 %v32399_v29, %s26624_s14 }
0x10d1   : > { %18689 = vrot.lane.b32.xlu0 %v32539_v39, %s26624_s14 }
0x10d3   : > { %v15806_v52 = vpop.xlane.xlu0 %15805 }
0x10d4   : > { %26364 = vrcp.f32 %v15806_v52  ;;  %v15809_v7 = vpop.xlane.xlu1 %15808  ;;  %19069 = vrot.lane.b32.xlu1 %v32540_v28, %s26624_s14 }
0x10d5   : > { %26366 = vrcp.f32 %v15809_v7  ;;  %18841 = vrot.lane.b32.xlu0 %v32334_v35, %s26624_s14 }
0x10d7   : > { %v15812_v59 = vpop.xlane.xlu0 %15811 }
0x10d8   : > { %26368 = vrcp.f32 %v15812_v59  ;;  %v15815_v62 = vpop.xlane.xlu1 %15814  ;;  %19221 = vrot.lane.b32.xlu1 %v27651_v34, %s26624_s14 }
0x10d9   : > { %26370 = vrcp.f32 %v15815_v62  ;;  %19145 = vrot.lane.b32.xlu0 %v27642_v56, %s26624_s14 }
0x10da   : > { %v26363_v8 = vpop.eup %26362 }
0x10db   : > { %v15818_v52 = vpop.xlane.xlu0 %15817  ;;  %v15850_v29 = vmul.f32 %v26363_v8, %v30249_v30 }
0x10dc   : > { %26372 = vrcp.f32 %v15818_v52  ;;  %v15821_v28 = vpop.xlane.xlu1 %15820  ;;  %19373 = vrot.lane.b32.xlu1 %v27674_v42, %s26624_s14 }
0x10dd   : > { %26374 = vrcp.f32 %v15821_v28  ;;  %19297 = vrot.lane.b32.xlu0 %v27660_v57, %s26624_s14  ;;  %25316 = vmatmul.mubr.msk.f32.vlgmr.msra.gmra.mrb[210].mxu1 %vm1193_vm3, %v15850_v29 }
0x10de   : > { %v26365_v7 = vpop.eup %26364  ;;  %25324 = vmatpush3.msra.mxu1 %v30194_v51  ;;  %25325 = vmatprep.mubr.msk.f32.mxu1 %vm26611_vm2, %v32223_v27 }
0x10df   : > { %v26367_v59 = vpop.eup %26366  ;;  %v15824_v62 = vpop.xlane.xlu0 %15823  ;;  %25333 = vmatprep.subr.mxu1 %v32223_v27  ;;  %v15852_v30 = vmul.f32 %v26365_v7, %v30255_v3 }
0x10e0   : > { %26376 = vrcp.f32 %v15824_v62  ;;  %v15827_v8 = vpop.xlane.xlu1 %15826  ;;  %19525 = vrot.lane.b32.xlu1 %v27697_v14, %s26624_s14  ;;  %v15854_v28 = vmul.f32 %v26367_v59, %v30257_v2 }
0x10e1   : > { %26378 = vrcp.f32 %v15827_v8  ;;  %19449 = vrot.lane.b32.xlu0 %v27688_v25, %s26624_s14  ;;  %25321 = vmatmul.mubr.msk.f32.vlgmr.msra.gmra.mrb[174].mxu0 %vm1193_vm3, %v15852_v30  ;;  %v32543_v8 = vld [vmem:[#allocation111_spill] sm:$0xff] }
0x10e2   : > { %v26369_v29 = vpop.eup %26368  ;;  %25326 = vmatmul.mubr.msk.f32.vlgmr.msra.gmra.mrb[212].mxu1 %vm1193_vm3, %v15854_v28  ;;  %25329 = vmatpush3.msra.mxu0 %v30182_v38 }
0x10e3   : > { %v26371_v51 = vpop.eup %26370  ;;  %25334 = vmatpush3.msra.mxu1 %v30198_v5  ;;  %v15830_v3 = vpop.xlane.xlu0 %15829  ;;  %25330 = vmatprep.mubr.msk.f32.mxu0 %vm26611_vm2, %v32223_v27  ;;  %v15856_v2 = vmul.f32 %v26369_v29, %v30265_v0 }
0x10e4   : > { %26380 = vrcp.f32 %v15830_v3  ;;  %v15833_v52 = vpop.xlane.xlu1 %15832  ;;  %25338 = vmatprep.subr.mxu0 %v32223_v27  ;;  %19677 = vrot.lane.b32.xlu1 %v32283_v31, %s26624_s14  ;;  %v15858_v7 = vmul.f32 %v26371_v51, %v30267_v48  ;;  %v32544_v51 = vld [vmem:[#allocation22_spill] sm:$0xff] }
0x10e5   : > { %26382 = vrcp.f32 %v15833_v52  ;;  %25335 = vmatprep.mubr.msk.f32.mxu1 %vm26611_vm2, %v32223_v27  ;;  %25343 = vmatprep.subr.mxu1 %v32223_v27  ;;  %v32547_v52 = vld [vmem:[#allocation113_spill] sm:$0xff] }
0x10e6   : > { %v26373_v5 = vpop.eup %26372  ;;  %19601 = vrot.lane.b32.xlu0 %v27708_v36, %s26624_s14  ;;  %25331 = vmatmul.mubr.msk.f32.vlgmr.msra.gmra.mrb[176].mxu0 %vm1193_vm3, %v15856_v2 }
0x10e7   : > { %v26375_v38 = vpop.eup %26374  ;;  %25336 = vmatmul.mubr.msk.f32.vlgmr.msra.gmra.mrb[214].mxu1 %vm1193_vm3, %v15858_v7  ;;  %25339 = vmatpush3.msra.mxu0 %v30192_v63  ;;  %v15836_v0 = vpop.xlane.xlu0 %15835  ;;  %v15860_v48 = vmul.f32 %v26373_v5, %v30275_v11 }
0x10e8   : > { %25344 = vmatpush3.msra.mxu1 %v30196_v20  ;;  %v15839_v59 = vpop.xlane.xlu1 %15838  ;;  %25340 = vmatprep.mubr.msk.f32.mxu0 %vm26611_vm2, %v32223_v27  ;;  %v15862_v62 = vmul.f32 %v26375_v38, %v30277_v22  ;;  %26384 = vrcp.f32 %v15836_v0  ;;  %v32541_v20 = vld [vmem:[#allocation3_spill] sm:$0xff]  ;;  %v32542_v22 = vld [vmem:[#allocation109_spill] sm:$0xff]  ;;  %v32548_v38 = vld [vmem:[#allocation6_spill] sm:$0xff] }
0x10e9   : > { %25348 = vmatprep.subr.mxu0 %v32223_v27  ;;  %19833 = vrot.lane.b32.xlu1 %v32272_v49, %s26625_s15  ;;  %26386 = vrcp.f32 %v15839_v59 }
0x10ea   : > { %v26377_v30 = vpop.eup %26376  ;;  %25345 = vmatprep.mubr.msk.f32.mxu1 %vm26611_vm2, %v32223_v27  ;;  %25353 = vmatprep.subr.mxu1 %v32223_v27 }
0x10eb   : > { %v26379_v63 = vpop.eup %26378  ;;  %19755 = vrot.lane.b32.xlu0 %v32541_v20, %s26625_s15  ;;  %25341 = vmatmul.mubr.msk.f32.vlgmr.msra.gmra.mrb[178].mxu0 %vm1193_vm3, %v15860_v48  ;;  %v15842_v11 = vpop.xlane.xlu0 %15841  ;;  %v15864_v49 = vmul.f32 %v26377_v30, %v30284_v58  ;;  %v32545_v58 = vld [vmem:[#allocation19_spill] sm:$0xff] }
0x10ec   : > { %25346 = vmatmul.mubr.msk.f32.vlgmr.msra.gmra.mrb[216].mxu1 %vm1193_vm3, %v15862_v62  ;;  %25349 = vmatpush3.msra.mxu0 %v32542_v22  ;;  %26388 = vrcp.f32 %v15842_v11  ;;  %v15866_v28 = vmul.f32 %v26379_v63, %v30286_v15  ;;  %v32546_v15 = vld [vmem:[#allocation112_spill] sm:$0xff]  ;;  %v32551_v62 = vld [vmem:[#allocation115_spill] sm:$0xff]  ;;  %v32555_v11 = vld [vmem:[#allocation117_spill] sm:$0xff] }
0x10ed   : > { %25354 = vmatpush3.msra.mxu1 %v32543_v8  ;;  %25350 = vmatprep.mubr.msk.f32.mxu0 %vm26611_vm2, %v32223_v27  ;;  %v32552_v63 = vld [vmem:[#allocation23_spill] sm:$0xff]  ;;  %v32556_v22 = vld [vmem:[#allocation8_spill] sm:$0xff]  ;;  %v32559_v8 = vld [vmem:[#allocation25_spill] sm:$0xff] }
0x10ee   : > { %v26381_v29 = vpop.eup %26380  ;;  %25358 = vmatprep.subr.mxu0 %v32223_v27  ;;  %19831 = vrot.lane.b32.xlu1 %v32544_v51, %s26626_s16 }
0x10ef   : > { %v26383_v3 = vpop.eup %26382  ;;  %25355 = vmatprep.mubr.msk.f32.mxu1 %vm26611_vm2, %v32223_v27  ;;  %25363 = vmatprep.subr.mxu1 %v32223_v27  ;;  %v15868_v2 = vmul.f32 %v26381_v29, %v30292_v1  ;;  %v32549_v1 = vld [vmem:[#allocation5_spill] sm:$0xff] }
0x10f0   : > { %19753 = vrot.lane.b32.xlu0 %v32545_v58, %s26626_s16  ;;  %25351 = vmatmul.mubr.msk.f32.vlgmr.msra.gmra.mrb[180].mxu0 %vm1193_vm3, %v15864_v49  ;;  %v15870_v7 = vmul.f32 %v26383_v3, %v30294_v19  ;;  %v32550_v19 = vld [vmem:[#allocation114_spill] sm:$0xff]  ;;  %v32557_v49 = vld [vmem:[#allocation7_spill] sm:$0xff] }
0x10f1   : > { %25356 = vmatmul.mubr.msk.f32.vlgmr.msra.gmra.mrb[218].mxu1 %vm1193_vm3, %v15866_v28  ;;  %25359 = vmatpush3.msra.mxu0 %v32546_v15  ;;  %v32560_v28 = vld [vmem:[#allocation24_spill] sm:$0xff] }
0x10f2   : > { %25364 = vmatpush3.msra.mxu1 %v32547_v52  ;;  %25360 = vmatprep.mubr.msk.f32.mxu0 %vm26611_vm2, %v32223_v27  ;;  %v26385_v5 = vpop.eup %26384 }
0x10f3   : > { %25368 = vmatprep.subr.mxu0 %v32223_v27  ;;  %19989 = vrot.lane.b32.xlu1 %v32548_v38, %s26625_s15  ;;  %v26387_v0 = vpop.eup %26386  ;;  %v15872_v48 = vmul.f32 %v26385_v5, %v30300_v60  ;;  %v32553_v60 = vld [vmem:[#allocation21_spill] sm:$0xff] }
0x10f4   : > { %25365 = vmatprep.mubr.msk.f32.mxu1 %vm26611_vm2, %v32223_v27  ;;  %25373 = vmatprep.subr.mxu1 %v32223_v27  ;;  %v15874_v30 = vmul.f32 %v26387_v0, %v30302_v47  ;;  %v32554_v47 = vld [vmem:[#allocation116_spill] sm:$0xff]  ;;  %v32561_v0 = vld [vmem:[#allocation119_spill] sm:$0xff] }
0x10f5   : > { %19911 = vrot.lane.b32.xlu0 %v32549_v1, %s26625_s15  ;;  %25361 = vmatmul.mubr.msk.f32.vlgmr.msra.gmra.mrb[182].mxu0 %vm1193_vm3, %v15868_v2 }
0x10f6   : > { %25366 = vmatmul.mubr.msk.f32.vlgmr.msra.gmra.mrb[220].mxu1 %vm1193_vm3, %v15870_v7  ;;  %25369 = vmatpush3.msra.mxu0 %v32550_v19  ;;  %v26389_v59 = vpop.eup %26388 }
0x10f7   : > { %25374 = vmatpush3.msra.mxu1 %v32551_v62  ;;  %25370 = vmatprep.mubr.msk.f32.mxu0 %vm26611_vm2, %v32223_v27  ;;  %v15876_v20 = vmul.f32 %v26389_v59, %v30308_v46  ;;  %v32558_v46 = vld [vmem:[#allocation118_spill] sm:$0xff]  ;;  %v32562_v59 = vld [vmem:[#allocation121_spill] sm:$0xff]  ;;  %v32564_v62 = vld [vmem:[#allocation123_spill] sm:$0xff] }
0x10f8   : > { %25378 = vmatprep.subr.mxu0 %v32223_v27  ;;  %19987 = vrot.lane.b32.xlu1 %v32552_v63, %s26626_s16 }
0x10f9   : > { %25375 = vmatprep.mubr.msk.f32.mxu1 %vm26611_vm2, %v32223_v27  ;;  %25383 = vmatprep.subr.mxu1 %v32223_v27 }
0x10fa   : > { %19909 = vrot.lane.b32.xlu0 %v32553_v60, %s26626_s16  ;;  %25371 = vmatmul.mubr.msk.f32.vlgmr.msra.gmra.mrb[184].mxu0 %vm1193_vm3, %v15872_v48  ;;  %v32566_v60 = vld [vmem:[#allocation125_spill] sm:$0xff] }
0x10fb   : > { %25376 = vmatmul.mubr.msk.f32.vlgmr.msra.gmra.mrb[222].mxu1 %vm1193_vm3, %v15874_v30  ;;  %25379 = vmatpush3.msra.mxu0 %v32554_v47 }
0x10fc   : > { %25384 = vmatpush3.msra.mxu1 %v32555_v11  ;;  %25380 = vmatprep.mubr.msk.f32.mxu0 %vm26611_vm2, %v32223_v27 }
0x10fd   : > { %25388 = vmatprep.subr.mxu0 %v32223_v27  ;;  %20145 = vrot.lane.b32.xlu1 %v32556_v22, %s26625_s15  ;;  %v32568_v22 = vld [vmem:[#allocation126_spill] sm:$0xff] }
0x10fe   : > { %20067 = vrot.lane.b32.xlu0 %v32557_v49, %s26625_s15  ;;  %25381 = vmatmul.mubr.msk.f32.vlgmr.msra.gmra.mrb[186].mxu0 %vm1193_vm3, %v15876_v20  ;;  %v32567_v20 = vld [vmem:[#allocation124_spill] sm:$0xff] }
0x10ff   : > { %25389 = vmatpush3.msra.mxu0 %v32558_v46  ;;  %25385 = vmatprep.mubr.msk.f32.mxu1 %vm26611_vm2, %v32223_v27 }
0x1100   : > { %25393 = vmatprep.subr.mxu1 %v32223_v27  ;;  %25390 = vmatprep.mubr.msk.f32.mxu0 %vm26611_vm2, %v32223_v27 }
0x1101   : > { %20143 = vrot.lane.b32.xlu1 %v32559_v8, %s26626_s16  ;;  %25398 = vmatprep.subr.mxu0 %v32223_v27 }
0x1102   : > { %20065 = vrot.lane.b32.xlu0 %v32560_v28, %s26626_s16 }
0x111c   : > { %v15845_v29 = vpop.xlane.xlu1 %15844 }
0x111d   : > { %26390 = vrcp.f32 %v15845_v29 }
0x1120   : > { %v15848_v51 = vpop.xlane.xlu0 %15847  ;;  %v17644_v3 = vpop.permute.xlu1 %17643 }
0x1121   : > { %26392 = vrcp.f32 %v15848_v51 }
0x1124   : > { %v17566_v58 = vpop.permute.xlu0 %17565  ;;  %v17802_v15 = vpop.permute.xlu1 %17801 }
0x1127   : > { %v26391_v2 = vpop.eup %26390 }
0x1128   : > { %v17724_v52 = vpop.permute.xlu0 %17723  ;;  %v17800_v7 = vpop.permute.xlu1 %17799  ;;  %v15878_v5 = vmul.f32 %v26391_v2, %v30318_v26  ;;  %v32563_v26 = vld [vmem:[#allocation120_spill] sm:$0xff] }
0x112a   : > { %25386 = vmatmul.mubr.msk.f32.vlgmr.msra.gmra.mrb[224].mxu1 %vm1193_vm3, %v15878_v5 }
0x112b   : > { %v26393_v38 = vpop.eup %26392  ;;  %25394 = vmatpush3.xpose.msk.msra.mxu1 %vm1193_vm3, %v32561_v0  ;;  %25395 = vmatprep.mubr.msk.f32.mxu1 %vm26611_vm2, %v32223_v27 }
0x112c   : > { %v17722_v1 = vpop.permute.xlu0 %17721  ;;  %v17958_v19 = vpop.permute.xlu1 %17957  ;;  %25403 = vmatprep.subr.mxu1 %v32223_v27  ;;  %v15880_v48 = vmul.f32 %v26393_v38, %v30322_v24  ;;  %v32565_v24 = vld [vmem:[#allocation122_spill] sm:$0xff] }
0x112e   : > { %25391 = vmatmul.mubr.msk.f32.vlgmr.msra.gmra.mrb[188].mxu0 %vm1193_vm3, %v15880_v48  ;;  %25396 = vmatmul.mubr.msk.f32.vlgmr.msra.gmra.mrb[226].mxu1 %vm1193_vm3, %v32562_v59 }
0x112f   : > { %25399 = vmatpush3.xpose.msk.msra.mxu0 %vm1193_vm3, %v32563_v26  ;;  %25404 = vmatpush3.xpose.msk.msra.mxu1 %vm1193_vm3, %v32564_v62 }
0x1130   : > { %v17880_v30 = vpop.permute.xlu0 %17879  ;;  %v17956_v63 = vpop.permute.xlu1 %17955  ;;  %25400 = vmatprep.mubr.msk.f32.mxu0 %vm26611_vm2, %v32223_v27  ;;  %25405 = vmatprep.mubr.msk.f32.mxu1 %vm26611_vm2, %v32223_v27 }
0x1131   : > { %25408 = vmatprep.subr.mxu0 %v32223_v27  ;;  %25413 = vmatprep.subr.mxu1 %v32223_v27 }
0x1132   : > { %25401 = vmatmul.mubr.msk.f32.vlgmr.msra.gmra.mrb[190].mxu0 %vm1193_vm3, %v32565_v24  ;;  %25406 = vmatmul.mubr.msk.f32.vlgmr.msra.gmra.mrb[228].mxu1 %vm1193_vm3, %v32566_v60 }
0x1133   : > { %25409 = vmatpush3.xpose.msk.msra.mxu0 %vm1193_vm3, %v32567_v20  ;;  %25414 = vmatpush3.xpose.msk.msra.mxu1 %vm1193_vm3, %v30314_v41 }
0x1134   : > { %v17878_v47 = vpop.permute.xlu0 %17877  ;;  %v18114_v11 = vpop.permute.xlu1 %18113  ;;  %25410 = vmatprep.mubr.msk.f32.mxu0 %vm26611_vm2, %v32223_v27  ;;  %25415 = vmatprep.mubr.msk.f32.mxu1 %vm26611_vm2, %v32223_v27 }
0x1135   : > { %25418 = vmatprep.subr.mxu0 %v32223_v27  ;;  %25423 = vmatprep.subr.mxu1 %v32223_v27 }
0x1136   : > { %25411 = vmatmul.mubr.msk.f32.vlgmr.msra.gmra.mrb[192].mxu0 %vm1193_vm3, %v32568_v22  ;;  %25416 = vmatmul.mubr.msk.f32.vlgmr.msra.gmra.mrb[230].mxu1 %vm1193_vm3, %v30366_v21 }
0x1137   : > { %25419 = vmatpush3.xpose.msk.msra.mxu0 %vm1193_vm3, %v30312_v40  ;;  %25424 = vmatpush3.xpose.msk.msra.mxu1 %vm1193_vm3, %v30376_v33 }
0x1138   : > { %v18036_v41 = vpop.permute.xlu0 %18035  ;;  %v18112_v49 = vpop.permute.xlu1 %18111  ;;  %25420 = vmatprep.mubr.msk.f32.mxu0 %vm26611_vm2, %v32223_v27  ;;  %25425 = vmatprep.mubr.msk.f32.mxu1 %vm26611_vm2, %v32223_v27 }
0x1139   : > { %25428 = vmatprep.subr.mxu0 %v32223_v27  ;;  %25433 = vmatprep.subr.mxu1 %v32223_v27 }
0x113a   : > { %25421 = vmatmul.mubr.msk.f32.vlgmr.msra.gmra.mrb[194].mxu0 %vm1193_vm3, %v30360_v45  ;;  %25426 = vmatmul.mubr.msk.f32.vlgmr.msra.gmra.mrb[232].mxu1 %vm1193_vm3, %v17566_v58 }
0x113b   : > { %25429 = vmatpush3.xpose.msk.msra.mxu0 %vm1193_vm3, %v30370_v23  ;;  %25434 = vmatpush3.xpose.msk.msra.mxu1 %vm1193_vm3, %v17724_v52 }
0x113c   : > { %v18034_v40 = vpop.permute.xlu0 %18033  ;;  %25430 = vmatprep.mubr.msk.f32.mxu0 %vm26611_vm2, %v32223_v27  ;;  %25435 = vmatprep.mubr.msk.f32.mxu1 %vm26611_vm2, %v32223_v27  ;;  %v18270_v21 = vpop.permute.xlu1 %18269 }
0x113d   : > { %25438 = vmatprep.subr.mxu0 %v32223_v27  ;;  %25443 = vmatprep.subr.mxu1 %v32223_v27 }
0x113e   : > { %25431 = vmatmul.mubr.msk.f32.vlgmr.msra.gmra.mrb[196].mxu0 %vm1193_vm3, %v17644_v3  ;;  %25436 = vmatmul.mubr.msk.f32.vlgmr.msra.gmra.mrb[234].mxu1 %vm1193_vm3, %v17722_v1 }
0x113f   : > { %25439 = vmatpush3.xpose.msk.msra.mxu0 %vm1193_vm3, %v17802_v15  ;;  %25444 = vmatpush3.xpose.msk.msra.mxu1 %vm1193_vm3, %v17880_v30 }
0x1140   : > { %25440 = vmatprep.mubr.msk.f32.mxu0 %vm26611_vm2, %v32223_v27  ;;  %25445 = vmatprep.mubr.msk.f32.mxu1 %vm26611_vm2, %v32223_v27  ;;  %v18192_v45 = vpop.permute.xlu0 %18191  ;;  %v18268_v23 = vpop.permute.xlu1 %18267 }
0x1141   : > { %25448 = vmatprep.subr.mxu0 %v32223_v27  ;;  %25453 = vmatprep.subr.mxu1 %v32223_v27 }
0x1142   : > { %25441 = vmatmul.mubr.msk.f32.vlgmr.msra.gmra.mrb[198].mxu0 %vm1193_vm3, %v17800_v7  ;;  %25446 = vmatmul.mubr.msk.f32.vlgmr.msra.gmra.mrb[236].mxu1 %vm1193_vm3, %v17878_v47 }
0x1143   : > { %25449 = vmatpush3.xpose.msk.msra.mxu0 %vm1193_vm3, %v17958_v19  ;;  %25454 = vmatpush3.xpose.msk.msra.mxu1 %vm1193_vm3, %v18036_v41 }
0x1144   : > { %25450 = vmatprep.mubr.msk.f32.mxu0 %vm26611_vm2, %v32223_v27  ;;  %25455 = vmatprep.mubr.msk.f32.mxu1 %vm26611_vm2, %v32223_v27  ;;  %v18190_v33 = vpop.permute.xlu0 %18189  ;;  %v18538_v46 = vpop.permute.xlu1 %18537 }
0x1145   : > { %25458 = vmatprep.subr.mxu0 %v32223_v27  ;;  %25463 = vmatprep.subr.mxu1 %v32223_v27 }
0x1146   : > { %25451 = vmatmul.mubr.msk.f32.vlgmr.msra.gmra.mrb[200].mxu0 %vm1193_vm3, %v17956_v63  ;;  %25456 = vmatmul.mubr.msk.f32.vlgmr.msra.gmra.mrb[238].mxu1 %vm1193_vm3, %v18034_v40 }
0x1147   : > { %25459 = vmatpush3.xpose.msk.msra.mxu0 %vm1193_vm3, %v18114_v11  ;;  %25464 = vmatpush3.xpose.msk.msra.mxu1 %vm1193_vm3, %v18192_v45 }
0x1148   : > { %25460 = vmatprep.mubr.msk.f32.mxu0 %vm26611_vm2, %v32223_v27  ;;  %25465 = vmatprep.mubr.msk.f32.mxu1 %vm26611_vm2, %v32223_v27  ;;  %v18614_v8 = vpop.permute.xlu0 %18613 }
0x1149   : > { %25468 = vmatprep.subr.mxu0 %v32223_v27  ;;  %25473 = vmatprep.subr.mxu1 %v32223_v27 }
0x114a   : > { %25461 = vmatmul.mubr.msk.f32.vlgmr.msra.gmra.mrb[202].mxu0 %vm1193_vm3, %v18112_v49  ;;  %25466 = vmatmul.mubr.msk.f32.vlgmr.msra.gmra.mrb[240].mxu1 %vm1193_vm3, %v18190_v33 }
0x114b   : > { %25469 = vmatpush3.xpose.msk.msra.mxu0 %vm1193_vm3, %v18270_v21  ;;  %25474 = vmatpush3.msra.mxu1 %v18538_v46 }
0x114c   : > { %25470 = vmatprep.mubr.msk.f32.mxu0 %vm26611_vm2, %v32223_v27  ;;  %25478 = vmatprep.subr.mxu0 %v32223_v27 }
0x114d   : > { %25475 = vmatprep.mubr.msk.f32.mxu1 %vm26611_vm2, %v32223_v27  ;;  %25483 = vmatprep.subr.mxu1 %v32223_v27 }
0x114e   : > { %25471 = vmatmul.mubr.msk.f32.vlgmr.msra.gmra.mrb[204].mxu0 %vm1193_vm3, %v18268_v23 }
0x114f   : > { %25479 = vmatpush3.msra.mxu0 %v18614_v8  ;;  %25480 = vmatprep.mubr.msk.f32.mxu0 %vm26611_vm2, %v32223_v27 }
0x1150   : > { %25488 = vmatprep.subr.mxu0 %v32223_v27 }
0x11b0   : > { %v30614_v28 = vpop.f32.mrb[210].mxu1 }
0x11b1   : > { %32569 = vst [vmem:[#allocation18_spill] sm:$0xff] %v30614_v28  ;;  %v25317_v29 = vpop.f32.mrb[211].mxu1 }
0x11b4   : > { %v30616_v51 = vpop.f32.mrb[174].mxu0 }
0x11b5   : > { %32570 = vst [vmem:[#allocation44_spill] sm:$0xff] %v30616_v51  ;;  %v30618_v3 = vpop.f32.mrb[212].mxu1  ;;  %v25322_v58 = vpop.f32.mrb[175].mxu0 }
0x11b6   : > { %32571 = vst [vmem:[#allocation3_spill] sm:$0xff] %v30618_v3  ;;  %v25327_v15 = vpop.f32.mrb[213].mxu1 }
0x11b9   : > { %v30620_v2 = vpop.f32.mrb[176].mxu0 }
0x11ba   : > { %32572 = vst [vmem:[#allocation109_spill] sm:$0xff] %v30620_v2  ;;  %v30622_v52 = vpop.f32.mrb[214].mxu1  ;;  %v25332_v7 = vpop.f32.mrb[177].mxu0 }
0x11bb   : > { %32573 = vst [vmem:[#allocation111_spill] sm:$0xff] %v30622_v52  ;;  %v25337_v5 = vpop.f32.mrb[215].mxu1 }
0x11be   : > { %v30624_v38 = vpop.f32.mrb[178].mxu0 }
0x11bf   : > { %32574 = vst [vmem:[#allocation22_spill] sm:$0xff] %v30624_v38  ;;  %v30626_v0 = vpop.f32.mrb[216].mxu1  ;;  %v25342_v1 = vpop.f32.mrb[179].mxu0 }
0x11c0   : > { %32575 = vst [vmem:[#allocation19_spill] sm:$0xff] %v30626_v0  ;;  %v25347_v19 = vpop.f32.mrb[217].mxu1 }
0x11c3   : > { %v30628_v48 = vpop.f32.mrb[180].mxu0 }
0x11c4   : > { %32576 = vst [vmem:[#allocation112_spill] sm:$0xff] %v30628_v48  ;;  %v30630_v59 = vpop.f32.mrb[218].mxu1  ;;  %v25352_v26 = vpop.f32.mrb[181].mxu0 }
0x11c5   : > { %32577 = vst [vmem:[#allocation113_spill] sm:$0xff] %v30630_v59  ;;  %v25357_v62 = vpop.f32.mrb[219].mxu1 }
0x11c8   : > { %v30632_v30 = vpop.f32.mrb[182].mxu0 }
0x11c9   : > { %32578 = vst [vmem:[#allocation6_spill] sm:$0xff] %v30632_v30  ;;  %v30634_v63 = vpop.f32.mrb[220].mxu1  ;;  %v25362_v24 = vpop.f32.mrb[183].mxu0 }
0x11ca   : > { %32579 = vst [vmem:[#allocation5_spill] sm:$0xff] %v30634_v63  ;;  %v25367_v60 = vpop.f32.mrb[221].mxu1 }
0x11cd   : > { %v30636_v20 = vpop.f32.mrb[184].mxu0 }
0x11ce   : > { %32580 = vst [vmem:[#allocation114_spill] sm:$0xff] %v30636_v20  ;;  %v30638_v47 = vpop.f32.mrb[222].mxu1  ;;  %v25372_v11 = vpop.f32.mrb[185].mxu0 }
0x11cf   : > { %32581 = vst [vmem:[#allocation115_spill] sm:$0xff] %v30638_v47  ;;  %v25377_v22 = vpop.f32.mrb[223].mxu1 }
0x11d1   : > { %v30640_v41 = vpop.f32.mrb[186].mxu0 }
0x11d2   : > { %32582 = vst [vmem:[#allocation23_spill] sm:$0xff] %v30640_v41  ;;  %v25382_v49 = vpop.f32.mrb[187].mxu0  ;;  %v30746_v41 = vpop.permute.xlu1 %18765 }
0x11fd   : > { %v30642_v40 = vpop.f32.mrb[224].mxu1 }
0x11fe   : > { %32583 = vst [vmem:[#allocation21_spill] sm:$0xff] %v30642_v40  ;;  %v25387_v21 = vpop.f32.mrb[225].mxu1 }
0x1201   : > { %v30644_v45 = vpop.f32.mrb[188].mxu0  ;;  %v17171_v23 = vpop.f32.mrb[226].mxu1 }
0x1202   : > { %32584 = vst [vmem:[#allocation116_spill] sm:$0xff] %v30644_v45  ;;  %v30648_v46 = vsel %vm26902_vm1, %v17171_v23, -32767.0  ;;  %v25392_v8 = vpop.f32.mrb[189].mxu0  ;;  %v25397_v29 = vpop.f32.mrb[227].mxu1 }
0x1203   : > { %v18361_v58 = vsel %vm1193_vm3, %v30648_v46, -inf }
0x1204   : > { %18362 = vmax.xlane.f32.xlu0 %v18361_v58 }
0x1205   : > { %v17249_v15 = vpop.f32.mrb[190].mxu0  ;;  %v17327_v7 = vpop.f32.mrb[228].mxu1 }
0x1206   : > { %v30654_v5 = vsel %vm26902_vm1, %v17249_v15, -32767.0  ;;  %v30658_v1 = vsel %vm26902_vm1, %v17327_v7, -32767.0  ;;  %v25402_v19 = vpop.f32.mrb[191].mxu0  ;;  %v25407_v26 = vpop.f32.mrb[229].mxu1 }
0x1207   : > { %v18364_v62 = vsel %vm1193_vm3, %v30654_v5, -inf  ;;  %v18367_v24 = vsel %vm1193_vm3, %v30658_v1, -inf }
0x1208   : > { %18365 = vmax.xlane.f32.xlu1 %v18364_v62  ;;  %18368 = vmax.xlane.f32.xlu0 %v18367_v24 }
0x1209   : > { %v17405_v60 = vpop.f32.mrb[192].mxu0  ;;  %v17483_v11 = vpop.f32.mrb[230].mxu1 }
0x120a   : > { %v30666_v22 = vsel %vm26902_vm1, %v17405_v60, -32767.0  ;;  %v30670_v49 = vsel %vm26902_vm1, %v17483_v11, -32767.0  ;;  %v25412_v21 = vpop.f32.mrb[193].mxu0  ;;  %v25417_v23 = vpop.f32.mrb[231].mxu1 }
0x120b   : > { %v18370_v8 = vsel %vm1193_vm3, %v30666_v22, -inf  ;;  %v18373_v29 = vsel %vm1193_vm3, %v30670_v49, -inf }
0x120c   : > { %18371 = vmax.xlane.f32.xlu0 %v18370_v8  ;;  %18374 = vmax.xlane.f32.xlu1 %v18373_v29 }
0x120d   : > { %v17561_v58 = vpop.f32.mrb[194].mxu0  ;;  %v17639_v15 = vpop.f32.mrb[232].mxu1 }
0x120e   : > { %v30678_v7 = vsel %vm26902_vm1, %v17561_v58, -32767.0  ;;  %v30682_v19 = vsel %vm26902_vm1, %v17639_v15, -32767.0  ;;  %v25422_v26 = vpop.f32.mrb[195].mxu0  ;;  %v25427_v62 = vpop.f32.mrb[233].mxu1 }
0x120f   : > { %v18376_v24 = vsel %vm1193_vm3, %v30678_v7, -inf  ;;  %v18379_v60 = vsel %vm1193_vm3, %v30682_v19, -inf }
0x1210   : > { %18377 = vmax.xlane.f32.xlu0 %v18376_v24  ;;  %18380 = vmax.xlane.f32.xlu1 %v18379_v60 }
0x1211   : > { %v17717_v11 = vpop.f32.mrb[196].mxu0  ;;  %v17795_v21 = vpop.f32.mrb[234].mxu1 }
0x1212   : > { %v30690_v23 = vsel %vm26902_vm1, %v17717_v11, -32767.0  ;;  %v30694_v8 = vsel %vm26902_vm1, %v17795_v21, -32767.0  ;;  %v25432_v29 = vpop.f32.mrb[197].mxu0  ;;  %v25437_v58 = vpop.f32.mrb[235].mxu1 }
0x1213   : > { %v18382_v15 = vsel %vm1193_vm3, %v30690_v23, -inf  ;;  %v18385_v26 = vsel %vm1193_vm3, %v30694_v8, -inf }
0x1214   : > { %18383 = vmax.xlane.f32.xlu0 %v18382_v15  ;;  %18386 = vmax.xlane.f32.xlu1 %v18385_v26 }
0x1215   : > { %v17873_v62 = vpop.f32.mrb[198].mxu0  ;;  %v17951_v24 = vpop.f32.mrb[236].mxu1 }
0x1216   : > { %v30702_v60 = vsel %vm26902_vm1, %v17873_v62, -32767.0  ;;  %v30706_v11 = vsel %vm26902_vm1, %v17951_v24, -32767.0  ;;  %v25442_v21 = vpop.f32.mrb[199].mxu0  ;;  %v25447_v29 = vpop.f32.mrb[237].mxu1 }
0x1217   : > { %v18388_v58 = vsel %vm1193_vm3, %v30702_v60, -inf  ;;  %v18391_v38 = vsel %vm1193_vm3, %v30706_v11, -inf }
0x1218   : > { %18389 = vmax.xlane.f32.xlu0 %v18388_v58  ;;  %18392 = vmax.xlane.f32.xlu1 %v18391_v38 }
0x1219   : > { %v18029_v15 = vpop.f32.mrb[200].mxu0  ;;  %v18107_v26 = vpop.f32.mrb[238].mxu1 }
0x121a   : > { %v30714_v62 = vsel %vm26902_vm1, %v18029_v15, -32767.0  ;;  %v30718_v24 = vsel %vm26902_vm1, %v18107_v26, -32767.0  ;;  %v25452_v21 = vpop.f32.mrb[201].mxu0  ;;  %v25457_v29 = vpop.f32.mrb[239].mxu1 }
0x121b   : > { %v18394_v52 = vsel %vm1193_vm3, %v30714_v62, -inf  ;;  %v18397_v45 = vsel %vm1193_vm3, %v30718_v24, -inf }
0x121c   : > { %18395 = vmax.xlane.f32.xlu0 %v18394_v52  ;;  %18398 = vmax.xlane.f32.xlu1 %v18397_v45 }
0x121d   : > { %v18185_v38 = vpop.f32.mrb[202].mxu0  ;;  %v18263_v58 = vpop.f32.mrb[240].mxu1 }
0x121e   : > { %v30726_v15 = vsel %vm26902_vm1, %v18185_v38, -32767.0  ;;  %v30730_v26 = vsel %vm26902_vm1, %v18263_v58, -32767.0  ;;  %v25462_v21 = vpop.f32.mrb[203].mxu0  ;;  %v25467_v29 = vpop.f32.mrb[241].mxu1 }
0x121f   : > { %v18400_v40 = vsel %vm1193_vm3, %v30726_v15, -inf  ;;  %v18403_v2 = vsel %vm1193_vm3, %v30730_v26, -inf  ;;  %v32586_v21 = vld [vmem:[#allocation12_spill] sm:$0xff]  ;;  %v32587_v29 = vld [vmem:[#allocation10_spill] sm:$0xff] }
0x1220   : > { %18401 = vmax.xlane.f32.xlu0 %v18400_v40  ;;  %18404 = vmax.xlane.f32.xlu1 %v18403_v2  ;;  %v30748_v40 = vpop.permute.xlu1 %18917  ;;  %v30750_v2 = vpop.permute.xlu0 %18689 }
0x1221   : > { %v18341_v52 = vpop.f32.mrb[204].mxu0 }
0x1222   : > { %v30738_v45 = vsel %vm26902_vm1, %v18341_v52, -32767.0  ;;  %v25472_v38 = vpop.f32.mrb[205].mxu0 }
0x1223   : > { %v18406_v58 = vsel %vm1193_vm3, %v30738_v45, -inf }
0x1224   : > { %18407 = vmax.xlane.f32.xlu0 %v18406_v58  ;;  %v30752_v3 = vpop.permute.xlu1 %18993  ;;  %v30754_v52 = vpop.permute.xlu0 %18841 }
0x1228   : > { %v30756_v38 = vpop.permute.xlu1 %19069  ;;  %v30758_v47 = vpop.permute.xlu0 %19145 }
0x122c   : > { %v30760_v58 = vpop.permute.xlu1 %19221 }
0x1230   : > { %v30764_v51 = vpop.permute.xlu1 %19373 }
0x1231   : > { %20301 = vrot.lane.b32.xlu1 %v32586_v21, %s26625_s15  ;;  %v30762_v21 = vpop.permute.xlu0 %19297 }
0x1234   : > { %v30768_v20 = vpop.permute.xlu1 %19525 }
0x1235   : > { %32588 = vst [vmem:[#allocation117_spill] sm:$0xff] %v30768_v20 }
0x1238   : > { %v30772_v63 = vpop.permute.xlu1 %19677 }
0x1239   : > { %32590 = vst [vmem:[#allocation7_spill] sm:$0xff] %v30772_v63 }
0x123a   : > { %20223 = vrot.lane.b32.xlu0 %v32587_v29, %s26625_s15  ;;  %v30766_v29 = vpop.permute.xlu0 %19449 }
0x123c   : > { %v30776_v30 = vpop.permute.xlu1 %19833 }
0x123d   : > { %32592 = vst [vmem:[#allocation25_spill] sm:$0xff] %v30776_v30 }
0x123e   : > { %v30770_v28 = vpop.permute.xlu0 %19601 }
0x123f   : > { %32589 = vst [vmem:[#allocation8_spill] sm:$0xff] %v30770_v28 }
0x1240   : > { %v30780_v0 = vpop.permute.xlu1 %19831 }
0x1241   : > { %32594 = vst [vmem:[#allocation119_spill] sm:$0xff] %v30780_v0 }
0x1242   : > { %v30774_v59 = vpop.permute.xlu0 %19755 }
0x1243   : > { %32591 = vst [vmem:[#allocation118_spill] sm:$0xff] %v30774_v59 }
0x1244   : > { %v30784_v31 = vpop.permute.xlu1 %19989 }
0x1245   : > { %32596 = vst [vmem:[#allocation120_spill] sm:$0xff] %v30784_v31 }
0x1246   : > { %v30778_v48 = vpop.permute.xlu0 %19753 }
0x1247   : > { %32593 = vst [vmem:[#allocation24_spill] sm:$0xff] %v30778_v48 }
0x1248   : > { %v30788_v57 = vpop.permute.xlu1 %19987 }
0x1249   : > { %32598 = vst [vmem:[#allocation122_spill] sm:$0xff] %v30788_v57 }
0x124a   : > { %v30782_v36 = vpop.permute.xlu0 %19911 }
0x124b   : > { %32595 = vst [vmem:[#allocation121_spill] sm:$0xff] %v30782_v36 }
0x124c   : > { %v30792_v42 = vpop.permute.xlu1 %20145 }
0x124d   : > { %32600 = vst [vmem:[#allocation124_spill] sm:$0xff] %v30792_v42 }
0x124e   : > { %v30786_v25 = vpop.permute.xlu0 %19909 }
0x124f   : > { %32597 = vst [vmem:[#allocation123_spill] sm:$0xff] %v30786_v25 }
0x1250   : > { %v30796_v59 = vpop.permute.xlu1 %20143 }
0x1251   : > { %32602 = vst [vmem:[#allocation12_spill] sm:$0xff] %v30796_v59 }
0x1252   : > { %v30790_v14 = vpop.permute.xlu0 %20067 }
0x1253   : > { %32599 = vst [vmem:[#allocation125_spill] sm:$0xff] %v30790_v14 }
0x1256   : > { %v30794_v33 = vpop.permute.xlu0 %20065 }
0x1257   : > { %32601 = vst [vmem:[#allocation126_spill] sm:$0xff] %v30794_v33 }
0x1291   : > { %v18363_v30 = vpop.xlane.xlu0 %18362 }
0x1292   : > { %v18409_v48 = vsub.f32 %v30648_v46, %v18363_v30 }
0x1294   : > { %v18425_v0 = vmul.f32 1.442695, %v18409_v48 }
0x1295   : > { %v18366_v63 = vpop.xlane.xlu1 %18365  ;;  %v18369_v36 = vpop.xlane.xlu0 %18368 }
0x1296   : > { %26394 = vpow2.f32 %v18425_v0  ;;  %v18410_v31 = vsub.f32 %v30654_v5, %v18366_v63  ;;  %v18411_v25 = vsub.f32 %v30658_v1, %v18369_v36 }
0x1298   : > { %v18427_v57 = vmul.f32 1.442695, %v18410_v31  ;;  %v18429_v28 = vmul.f32 1.442695, %v18411_v25 }
0x1299   : > { %v18372_v14 = vpop.xlane.xlu0 %18371  ;;  %v18375_v20 = vpop.xlane.xlu1 %18374 }
0x129a   : > { %26396 = vpow2.f32 %v18427_v57  ;;  %v18412_v42 = vsub.f32 %v30666_v22, %v18372_v14  ;;  %v18413_v59 = vsub.f32 %v30670_v49, %v18375_v20 }
0x129b   : > { %26398 = vpow2.f32 %v18429_v28 }
0x129c   : > { %v18431_v33 = vmul.f32 1.442695, %v18412_v42  ;;  %v18433_v30 = vmul.f32 1.442695, %v18413_v59 }
0x129d   : > { %v18378_v48 = vpop.xlane.xlu0 %18377  ;;  %v18381_v46 = vpop.xlane.xlu1 %18380 }
0x129e   : > { %26400 = vpow2.f32 %v18431_v33  ;;  %v18414_v0 = vsub.f32 %v30678_v7, %v18378_v48  ;;  %v18415_v63 = vsub.f32 %v30682_v19, %v18381_v46 }
0x129f   : > { %26402 = vpow2.f32 %v18433_v30 }
0x12a0   : > { %v30805_v36 = vpop.eup %26394  ;;  %v18435_v25 = vmul.f32 1.442695, %v18414_v0  ;;  %v18437_v31 = vmul.f32 1.442695, %v18415_v63 }
0x12a1   : > { %v18384_v57 = vpop.xlane.xlu0 %18383  ;;  %v18387_v5 = vpop.xlane.xlu1 %18386  ;;  %v18457_v14 = vsel %vm1193_vm3, %v30805_v36, 0.0 }
0x12a2   : > { %26404 = vpow2.f32 %v18435_v25  ;;  %v18416_v42 = vsub.f32 %v30690_v23, %v18384_v57  ;;  %v18417_v28 = vsub.f32 %v30694_v8, %v18387_v5  ;;  %18458 = vadd.xlane.f32.xlu1 %v18457_v14 }
0x12a3   : > { %26406 = vpow2.f32 %v18437_v31 }
0x12a4   : > { %v30811_v59 = vpop.eup %26396  ;;  %v18439_v20 = vmul.f32 1.442695, %v18416_v42  ;;  %v18441_v33 = vmul.f32 1.442695, %v18417_v28 }
0x12a5   : > { %v30813_v1 = vpop.eup %26398  ;;  %v18390_v22 = vpop.xlane.xlu0 %18389  ;;  %v18460_v7 = vsel %vm1193_vm3, %v30811_v59, 0.0 }
0x12a6   : > { %v18393_v49 = vpop.xlane.xlu1 %18392  ;;  %26408 = vpow2.f32 %v18439_v20  ;;  %v18418_v19 = vsub.f32 %v30702_v60, %v18390_v22  ;;  %18461 = vadd.xlane.f32.xlu0 %v18460_v7  ;;  %v18463_v8 = vsel %vm1193_vm3, %v30813_v1, 0.0 }
0x12a7   : > { %v18419_v23 = vsub.f32 %v30706_v11, %v18393_v49  ;;  %26410 = vpow2.f32 %v18441_v33  ;;  %18464 = vadd.xlane.f32.xlu1 %v18463_v8 }
0x12a8   : > { %v30821_v30 = vpop.eup %26400  ;;  %v18443_v48 = vmul.f32 1.442695, %v18418_v19 }
0x12a9   : > { %v18445_v46 = vmul.f32 1.442695, %v18419_v23  ;;  %v30823_v0 = vpop.eup %26402  ;;  %v18396_v63 = vpop.xlane.xlu0 %18395  ;;  %v18466_v31 = vsel %vm1193_vm3, %v30821_v30, 0.0 }
0x12aa   : > { %v18399_v25 = vpop.xlane.xlu1 %18398  ;;  %26412 = vpow2.f32 %v18443_v48  ;;  %v18420_v60 = vsub.f32 %v30714_v62, %v18396_v63  ;;  %18467 = vadd.xlane.f32.xlu0 %v18466_v31  ;;  %v18469_v57 = vsel %vm1193_vm3, %v30823_v0, 0.0 }
0x12ab   : > { %v18421_v11 = vsub.f32 %v30718_v24, %v18399_v25  ;;  %26414 = vpow2.f32 %v18445_v46  ;;  %18470 = vadd.xlane.f32.xlu1 %v18469_v57 }
0x12ac   : > { %v30831_v5 = vpop.eup %26404  ;;  %v18447_v14 = vmul.f32 1.442695, %v18420_v60 }
0x12ad   : > { %v18449_v42 = vmul.f32 1.442695, %v18421_v11  ;;  %v30833_v28 = vpop.eup %26406  ;;  %v18402_v20 = vpop.xlane.xlu0 %18401  ;;  %v18472_v33 = vsel %vm1193_vm3, %v30831_v5, 0.0 }
0x12ae   : > { %26416 = vpow2.f32 %v18447_v14  ;;  %v18422_v62 = vsub.f32 %v30726_v15, %v18402_v20  ;;  %18473 = vadd.xlane.f32.xlu0 %v18472_v33  ;;  %v18475_v24 = vsel %vm1193_vm3, %v30833_v28, 0.0  ;;  %v18405_v14 = vpop.xlane.xlu1 %18404 }
0x12af   : > { %26418 = vpow2.f32 %v18449_v42  ;;  %18476 = vadd.xlane.f32.xlu1 %v18475_v24  ;;  %v18423_v42 = vsub.f32 %v30730_v26, %v18405_v14  ;;  %v32610_v14 = vld [vmem:[#allocation8_spill] sm:$0xff] }
0x12b0   : > { %v30840_v22 = vpop.eup %26408  ;;  %v18451_v49 = vmul.f32 1.442695, %v18422_v62 }
0x12b1   : > { %v30842_v7 = vpop.eup %26410  ;;  %v18478_v19 = vsel %vm1193_vm3, %v30840_v22, 0.0  ;;  %v18408_v20 = vpop.xlane.xlu0 %18407  ;;  %v18453_v62 = vmul.f32 1.442695, %v18423_v42 }
0x12b2   : > { %26420 = vpow2.f32 %v18451_v49  ;;  %18479 = vadd.xlane.f32.xlu0 %v18478_v19  ;;  %v18481_v23 = vsel %vm1193_vm3, %v30842_v7, 0.0  ;;  %v18424_v33 = vsub.f32 %v30738_v45, %v18408_v20 }
0x12b3   : > { %18482 = vadd.xlane.f32.xlu1 %v18481_v23  ;;  %26422 = vpow2.f32 %v18453_v62 }
0x12b4   : > { %v30848_v15 = vpop.eup %26412  ;;  %v18455_v24 = vmul.f32 1.442695, %v18424_v33 }
0x12b5   : > { %v30850_v8 = vpop.eup %26414  ;;  %v18484_v48 = vsel %vm1193_vm3, %v30848_v15, 0.0 }
0x12b6   : > { %18485 = vadd.xlane.f32.xlu0 %v18484_v48  ;;  %v18487_v46 = vsel %vm1193_vm3, %v30850_v8, 0.0  ;;  %26424 = vpow2.f32 %v18455_v24 }
0x12b7   : > { %18488 = vadd.xlane.f32.xlu1 %v18487_v46 }
0x12b8   : > { %v30856_v63 = vpop.eup %26416 }
0x12b9   : > { %v30858_v25 = vpop.eup %26418  ;;  %v18490_v31 = vsel %vm1193_vm3, %v30856_v63, 0.0 }
0x12ba   : > { %18491 = vadd.xlane.f32.xlu0 %v18490_v31  ;;  %v18493_v60 = vsel %vm1193_vm3, %v30858_v25, 0.0 }
0x12bb   : > { %18494 = vadd.xlane.f32.xlu1 %v18493_v60 }
0x12bc   : > { %v30864_v11 = vpop.eup %26420 }
0x12bd   : > { %v18496_v57 = vsel %vm1193_vm3, %v30864_v11, 0.0  ;;  %v30874_v49 = vpop.eup %26422 }
0x12be   : > { %18497 = vadd.xlane.f32.xlu0 %v18496_v57 }
0x12c0   : > { %v30876_v19 = vpop.eup %26424 }
0x12cc   : > { %20299 = vrot.lane.b32.xlu1 %v32322_v17, %s26626_s16  ;;  %v18499_v17 = vsel %vm1193_vm3, %v30874_v49, 0.0 }
0x12d4   : > { %20221 = vrot.lane.b32.xlu0 %v32323_v50, %s26626_s16  ;;  %v18502_v50 = vsel %vm1193_vm3, %v30876_v19, 0.0 }
0x12f0   : > { %18500 = vadd.xlane.f32.xlu1 %v18499_v17 }
0x12f3   : > { %18503 = vadd.xlane.f32.xlu0 %v18502_v50 }
0x1301   : > { %20457 = vrot.lane.b32.xlu1 %v32277_v13, %s26625_s15  ;;  %v30922_v13 = vpop.permute.xlu1 %20301 }
0x1305   : > { %20455 = vrot.lane.b32.xlu1 %v32278_v12, %s26626_s16  ;;  %v32605_v12 = vld [vmem:[#allocation9_spill] sm:$0xff] }
0x1309   : > { %20613 = vrot.lane.b32.xlu1 %v32279_v16, %s26625_s15  ;;  %20379 = vrot.lane.b32.xlu0 %v32324_v61, %s26625_s15  ;;  %v32606_v16 = vld [vmem:[#allocation45_spill] sm:$0xff]  ;;  %v32607_v61 = vld [vmem:[#allocation48_spill] sm:$0xff] }
0x130d   : > { %20611 = vrot.lane.b32.xlu1 %v32280_v53, %s26626_s16  ;;  %20377 = vrot.lane.b32.xlu0 %v32325_v54, %s26626_s16  ;;  %v30928_v53 = vpop.permute.xlu0 %20223  ;;  %v32608_v54 = vld [vmem:[#allocation47_spill] sm:$0xff] }
0x1311   : > { %20769 = vrot.lane.b32.xlu1 %v27074_v37, %s26625_s15  ;;  %20535 = vrot.lane.b32.xlu0 %v32326_v18, %s26625_s15  ;;  %v32603_v37 = vld [vmem:[#allocation33_spill] sm:$0xff] }
0x1315   : > { %20767 = vrot.lane.b32.xlu1 %v27228_v4, %s26626_s16  ;;  %20533 = vrot.lane.b32.xlu0 %v32392_v9, %s26626_s16  ;;  %v32604_v4 = vld [vmem:[#allocation43_spill] sm:$0xff] }
0x1319   : > { %20925 = vrot.lane.b32.xlu1 %v32393_v44, %s26625_s15  ;;  %20691 = vrot.lane.b32.xlu0 %v32394_v10, %s26625_s15 }
0x131d   : > { %20923 = vrot.lane.b32.xlu1 %v32281_v32, %s26626_s16  ;;  %20689 = vrot.lane.b32.xlu0 %v32329_v43, %s26626_s16 }
0x1321   : > { %21193 = vrot.lane.b32.xlu1 %v32463_v55, %s26626_s16  ;;  %20847 = vrot.lane.b32.xlu0 %v32534_v6, %s26625_s15 }
0x1325   : > { %21345 = vrot.lane.b32.xlu1 %v32539_v39, %s26626_s16  ;;  %20845 = vrot.lane.b32.xlu0 %v32603_v37, %s26626_s16 }
0x1329   : > { %21497 = vrot.lane.b32.xlu1 %v32334_v35, %s26626_s16  ;;  %21269 = vrot.lane.b32.xlu0 %v32604_v4, %s26626_s16 }
0x132d   : > { %21573 = vrot.lane.b32.xlu1 %v32605_v12, %s26626_s16  ;;  %21421 = vrot.lane.b32.xlu0 %v32606_v16, %s26626_s16 }
0x132f   : > { %v18459_v32 = vpop.xlane.xlu1 %18458 }
0x1330   : > { %26426 = vrcp.f32 %v18459_v32  ;;  %v32612_v32 = vld [vmem:[#allocation118_spill] sm:$0xff] }
0x1331   : > { %21725 = vrot.lane.b32.xlu1 %v32607_v61, %s26626_s16  ;;  %21649 = vrot.lane.b32.xlu0 %v32608_v54, %s26626_s16 }
0x1333   : > { %v18462_v18 = vpop.xlane.xlu0 %18461 }
0x1334   : > { %26428 = vrcp.f32 %v18462_v18  ;;  %v18465_v35 = vpop.xlane.xlu1 %18464 }
0x1335   : > { %26430 = vrcp.f32 %v18465_v35  ;;  %21877 = vrot.lane.b32.xlu1 %v27651_v34, %s26626_s16  ;;  %21801 = vrot.lane.b32.xlu0 %v27642_v56, %s26626_s16  ;;  %v32613_v35 = vld [vmem:[#allocation24_spill] sm:$0xff] }
0x1337   : > { %v18468_v43 = vpop.xlane.xlu0 %18467 }
0x1338   : > { %26432 = vrcp.f32 %v18468_v43  ;;  %v18471_v9 = vpop.xlane.xlu1 %18470  ;;  %v32615_v43 = vld [vmem:[#allocation121_spill] sm:$0xff] }
0x1339   : > { %26434 = vrcp.f32 %v18471_v9 }
0x133a   : > { %v26427_v44 = vpop.eup %26426 }
0x133b   : > { %v18474_v10 = vpop.xlane.xlu0 %18473  ;;  %v18506_v55 = vmul.f32 %v26427_v44, %v30805_v36 }
0x133c   : > { %26436 = vrcp.f32 %v18474_v10  ;;  %v18477_v6 = vpop.xlane.xlu1 %18476  ;;  %v32617_v10 = vld [vmem:[#allocation123_spill] sm:$0xff] }
0x133d   : > { %26438 = vrcp.f32 %v18477_v6  ;;  %25476 = vmatmul.mubr.msk.f32.vlgmr.msra.gmra.mrb[242].mxu1 %vm1193_vm3, %v18506_v55  ;;  %v32618_v55 = vld [vmem:[#allocation120_spill] sm:$0xff]  ;;  %v32619_v6 = vld [vmem:[#allocation125_spill] sm:$0xff] }
0x133e   : > { %v26429_v39 = vpop.eup %26428  ;;  %25484 = vmatpush3.msra.mxu1 %v30750_v2  ;;  %25485 = vmatprep.mubr.msk.f32.mxu1 %vm26611_vm2, %v32223_v27 }
0x133f   : > { %v26431_v56 = vpop.eup %26430  ;;  %v18480_v34 = vpop.xlane.xlu0 %18479  ;;  %25493 = vmatprep.subr.mxu1 %v32223_v27  ;;  %v18508_v26 = vmul.f32 %v26429_v39, %v30811_v59 }
0x1340   : > { %26440 = vrcp.f32 %v18480_v34  ;;  %v18483_v45 = vpop.xlane.xlu1 %18482  ;;  %v18510_v36 = vmul.f32 %v26431_v56, %v30813_v1  ;;  %v32620_v56 = vld [vmem:[#allocation122_spill] sm:$0xff] }
0x1341   : > { %26442 = vrcp.f32 %v18483_v45  ;;  %25481 = vmatmul.mubr.msk.f32.vlgmr.msra.gmra.mrb[206].mxu0 %vm1193_vm3, %v18508_v26  ;;  %v32621_v34 = vld [vmem:[#allocation126_spill] sm:$0xff]  ;;  %v32622_v26 = vld [vmem:[#allocation124_spill] sm:$0xff] }
0x1342   : > { %v26433_v23 = vpop.eup %26432  ;;  %25486 = vmatmul.mubr.msk.f32.vlgmr.msra.gmra.mrb[244].mxu1 %vm1193_vm3, %v18510_v36  ;;  %25489 = vmatpush3.msra.mxu0 %v30746_v41  ;;  %v32623_v36 = vld [vmem:[#allocation12_spill] sm:$0xff] }
0x1343   : > { %v26435_v2 = vpop.eup %26434  ;;  %25494 = vmatpush3.msra.mxu1 %v30754_v52  ;;  %v18486_v48 = vpop.xlane.xlu0 %18485  ;;  %25490 = vmatprep.mubr.msk.f32.mxu0 %vm26611_vm2, %v32223_v27  ;;  %v18512_v59 = vmul.f32 %v26433_v23, %v30821_v30 }
0x1344   : > { %26444 = vrcp.f32 %v18486_v48  ;;  %v18489_v46 = vpop.xlane.xlu1 %18488  ;;  %25495 = vmatprep.mubr.msk.f32.mxu1 %vm26611_vm2, %v32223_v27  ;;  %25498 = vmatprep.subr.mxu0 %v32223_v27  ;;  %v18514_v1 = vmul.f32 %v26435_v2, %v30823_v0 }
0x1345   : > { %26446 = vrcp.f32 %v18489_v46  ;;  %25503 = vmatprep.subr.mxu1 %v32223_v27  ;;  %25491 = vmatmul.mubr.msk.f32.vlgmr.msra.gmra.mrb[208].mxu0 %vm1193_vm3, %v18512_v59 }
0x1346   : > { %v26437_v41 = vpop.eup %26436  ;;  %25496 = vmatmul.mubr.msk.f32.vlgmr.msra.gmra.mrb[246].mxu1 %vm1193_vm3, %v18514_v1  ;;  %25499 = vmatpush3.msra.mxu0 %v30748_v40 }
0x1347   : > { %v26439_v52 = vpop.eup %26438  ;;  %25504 = vmatpush3.msra.mxu1 %v30752_v3  ;;  %v18492_v30 = vpop.xlane.xlu0 %18491  ;;  %25500 = vmatprep.mubr.msk.f32.mxu0 %vm26611_vm2, %v32223_v27  ;;  %v18516_v31 = vmul.f32 %v26437_v41, %v30831_v5 }
0x1348   : > { %26448 = vrcp.f32 %v18492_v30  ;;  %v18495_v0 = vpop.xlane.xlu1 %18494  ;;  %25505 = vmatprep.mubr.msk.f32.mxu1 %vm26611_vm2, %v32223_v27  ;;  %25508 = vmatprep.subr.mxu0 %v32223_v27  ;;  %v18518_v60 = vmul.f32 %v26439_v52, %v30833_v28 }
0x1349   : > { %26450 = vrcp.f32 %v18495_v0  ;;  %25513 = vmatprep.subr.mxu1 %v32223_v27  ;;  %25501 = vmatmul.mubr.msk.f32.vlgmr.msra.gmra.mrb[210].mxu0 %vm1193_vm3, %v18516_v31 }
0x134a   : > { %v26441_v3 = vpop.eup %26440  ;;  %25506 = vmatmul.mubr.msk.f32.vlgmr.msra.gmra.mrb[248].mxu1 %vm1193_vm3, %v18518_v60  ;;  %25509 = vmatpush3.msra.mxu0 %v30756_v38 }
0x134b   : > { %v26443_v40 = vpop.eup %26442  ;;  %25514 = vmatpush3.msra.mxu1 %v30758_v47  ;;  %v18498_v5 = vpop.xlane.xlu0 %18497  ;;  %25510 = vmatprep.mubr.msk.f32.mxu0 %vm26611_vm2, %v32223_v27  ;;  %v18520_v57 = vmul.f32 %v26441_v3, %v30840_v22 }
0x134c   : > { %26452 = vrcp.f32 %v18498_v5  ;;  %25515 = vmatprep.mubr.msk.f32.mxu1 %vm26611_vm2, %v32223_v27  ;;  %25518 = vmatprep.subr.mxu0 %v32223_v27  ;;  %v18522_v28 = vmul.f32 %v26443_v40, %v30842_v7  ;;  %v20300_v42 = vpop.permute.xlu1 %20299 }
0x134d   : > { %25523 = vmatprep.subr.mxu1 %v32223_v27  ;;  %25511 = vmatmul.mubr.msk.f32.vlgmr.msra.gmra.mrb[212].mxu0 %vm1193_vm3, %v18520_v57 }
0x134e   : > { %v26445_v38 = vpop.eup %26444  ;;  %25516 = vmatmul.mubr.msk.f32.vlgmr.msra.gmra.mrb[250].mxu1 %vm1193_vm3, %v18522_v28  ;;  %25519 = vmatpush3.msra.mxu0 %v30760_v58 }
0x134f   : > { %v26447_v47 = vpop.eup %26446  ;;  %25524 = vmatpush3.msra.mxu1 %v30762_v21  ;;  %25520 = vmatprep.mubr.msk.f32.mxu0 %vm26611_vm2, %v32223_v27  ;;  %v18524_v22 = vmul.f32 %v26445_v38, %v30848_v15  ;;  %v20222_v20 = vpop.permute.xlu0 %20221 }
0x1350   : > { %25525 = vmatprep.mubr.msk.f32.mxu1 %vm26611_vm2, %v32223_v27  ;;  %25528 = vmatprep.subr.mxu0 %v32223_v27  ;;  %v18526_v7 = vmul.f32 %v26447_v47, %v30850_v8 }
0x1351   : > { %25533 = vmatprep.subr.mxu1 %v32223_v27  ;;  %25521 = vmatmul.mubr.msk.f32.vlgmr.msra.gmra.mrb[214].mxu0 %vm1193_vm3, %v18524_v22 }
0x1352   : > { %v26449_v58 = vpop.eup %26448  ;;  %25526 = vmatmul.mubr.msk.f32.vlgmr.msra.gmra.mrb[252].mxu1 %vm1193_vm3, %v18526_v7  ;;  %25529 = vmatpush3.msra.mxu0 %v30764_v51 }
0x1353   : > { %v26451_v21 = vpop.eup %26450  ;;  %25534 = vmatpush3.msra.mxu1 %v30766_v29  ;;  %25530 = vmatprep.mubr.msk.f32.mxu0 %vm26611_vm2, %v32223_v27  ;;  %v18528_v15 = vmul.f32 %v26449_v58, %v30856_v63  ;;  %v32609_v29 = vld [vmem:[#allocation117_spill] sm:$0xff] }
0x1354   : > { %25535 = vmatprep.mubr.msk.f32.mxu1 %vm26611_vm2, %v32223_v27  ;;  %25538 = vmatprep.subr.mxu0 %v32223_v27  ;;  %v18530_v8 = vmul.f32 %v26451_v21, %v30858_v25  ;;  %v32611_v25 = vld [vmem:[#allocation7_spill] sm:$0xff] }
0x1355   : > { %25543 = vmatprep.subr.mxu1 %v32223_v27  ;;  %25531 = vmatmul.mubr.msk.f32.vlgmr.msra.gmra.mrb[216].mxu0 %vm1193_vm3, %v18528_v15 }
0x1356   : > { %v26453_v51 = vpop.eup %26452  ;;  %25536 = vmatmul.mubr.msk.f32.vlgmr.msra.gmra.mrb[254].mxu1 %vm1193_vm3, %v18530_v8  ;;  %25539 = vmatpush3.msra.mxu0 %v32609_v29 }
0x1357   : > { %25544 = vmatpush3.msra.mxu1 %v32610_v14  ;;  %25540 = vmatprep.mubr.msk.f32.mxu0 %vm26611_vm2, %v32223_v27  ;;  %v18532_v63 = vmul.f32 %v26453_v51, %v30864_v11 }
0x1358   : > { %25548 = vmatprep.subr.mxu0 %v32223_v27  ;;  %25545 = vmatprep.mubr.msk.f32.mxu1 %vm26611_vm2, %v32223_v27 }
0x1359   : > { %25541 = vmatmul.mubr.msk.f32.vlgmr.msra.gmra.mrb[218].mxu0 %vm1193_vm3, %v18532_v63  ;;  %25553 = vmatprep.subr.mxu1 %v32223_v27 }
0x135a   : > { %25549 = vmatpush3.msra.mxu0 %v32611_v25  ;;  %25550 = vmatprep.mubr.msk.f32.mxu0 %vm26611_vm2, %v32223_v27 }
0x135b   : > { %25558 = vmatprep.subr.mxu0 %v32223_v27 }
0x137d   : > { %v18501_v33 = vpop.xlane.xlu1 %18500 }
0x137e   : > { %26454 = vrcp.f32 %v18501_v33 }
0x1380   : > { %v18504_v11 = vpop.xlane.xlu0 %18503 }
0x1381   : > { %26456 = vrcp.f32 %v18504_v11  ;;  %v20458_v62 = vpop.permute.xlu1 %20457 }
0x1384   : > { %v20380_v24 = vpop.permute.xlu0 %20379 }
0x1385   : > { %v20456_v17 = vpop.permute.xlu1 %20455 }
0x1388   : > { %v26455_v50 = vpop.eup %26454  ;;  %v20378_v37 = vpop.permute.xlu0 %20377 }
0x1389   : > { %v18534_v4 = vmul.f32 %v26455_v50, %v30874_v49  ;;  %v20614_v12 = vpop.permute.xlu1 %20613  ;;  %v32614_v49 = vld [vmem:[#allocation25_spill] sm:$0xff] }
0x138b   : > { %v26457_v16 = vpop.eup %26456  ;;  %25546 = vmatmul.mubr.msk.f32.vlgmr.msra.gmra.mrb[0].mxu1 %vm1193_vm3, %v18534_v4 }
0x138c   : > { %25554 = vmatpush3.xpose.msk.msra.mxu1 %vm1193_vm3, %v32612_v32  ;;  %v20536_v61 = vpop.permute.xlu0 %20535  ;;  %25555 = vmatprep.mubr.msk.f32.mxu1 %vm26611_vm2, %v32223_v27  ;;  %v18536_v54 = vmul.f32 %v26457_v16, %v30876_v19  ;;  %v32616_v19 = vld [vmem:[#allocation119_spill] sm:$0xff] }
0x138d   : > { %v20612_v18 = vpop.permute.xlu1 %20611  ;;  %25563 = vmatprep.subr.mxu1 %v32223_v27 }
0x138e   : > { %25551 = vmatmul.mubr.msk.f32.vlgmr.msra.gmra.mrb[220].mxu0 %vm1193_vm3, %v18536_v54 }
0x138f   : > { %25556 = vmatmul.mubr.msk.f32.vlgmr.msra.gmra.mrb[2].mxu1 %vm1193_vm3, %v32613_v35  ;;  %25559 = vmatpush3.xpose.msk.msra.mxu0 %vm1193_vm3, %v32614_v49 }
0x1390   : > { %25564 = vmatpush3.xpose.msk.msra.mxu1 %vm1193_vm3, %v32615_v43  ;;  %v20534_v9 = vpop.permute.xlu0 %20533  ;;  %25560 = vmatprep.mubr.msk.f32.mxu0 %vm26611_vm2, %v32223_v27 }
0x1391   : > { %25565 = vmatprep.mubr.msk.f32.mxu1 %vm26611_vm2, %v32223_v27  ;;  %25568 = vmatprep.subr.mxu0 %v32223_v27  ;;  %v20770_v44 = vpop.permute.xlu1 %20769 }
0x1392   : > { %25573 = vmatprep.subr.mxu1 %v32223_v27  ;;  %25561 = vmatmul.mubr.msk.f32.vlgmr.msra.gmra.mrb[222].mxu0 %vm1193_vm3, %v32616_v19 }
0x1393   : > { %25566 = vmatmul.mubr.msk.f32.vlgmr.msra.gmra.mrb[4].mxu1 %vm1193_vm3, %v32617_v10  ;;  %25569 = vmatpush3.xpose.msk.msra.mxu0 %vm1193_vm3, %v32618_v55 }
0x1394   : > { %25574 = vmatpush3.xpose.msk.msra.mxu1 %vm1193_vm3, %v32619_v6  ;;  %25570 = vmatprep.mubr.msk.f32.mxu0 %vm26611_vm2, %v32223_v27  ;;  %v20692_v39 = vpop.permute.xlu0 %20691 }
0x1395   : > { %25575 = vmatprep.mubr.msk.f32.mxu1 %vm26611_vm2, %v32223_v27  ;;  %25578 = vmatprep.subr.mxu0 %v32223_v27  ;;  %v20768_v45 = vpop.permute.xlu1 %20767 }
0x1396   : > { %25583 = vmatprep.subr.mxu1 %v32223_v27  ;;  %25571 = vmatmul.mubr.msk.f32.vlgmr.msra.gmra.mrb[224].mxu0 %vm1193_vm3, %v32620_v56 }
0x1397   : > { %25576 = vmatmul.mubr.msk.f32.vlgmr.msra.gmra.mrb[6].mxu1 %vm1193_vm3, %v32621_v34  ;;  %25579 = vmatpush3.xpose.msk.msra.mxu0 %vm1193_vm3, %v32622_v26 }
0x1398   : > { %25584 = vmatpush3.xpose.msk.msra.mxu1 %vm1193_vm3, %v30928_v53  ;;  %25580 = vmatprep.mubr.msk.f32.mxu0 %vm26611_vm2, %v32223_v27  ;;  %v20690_v53 = vpop.permute.xlu0 %20689 }
0x1399   : > { %25585 = vmatprep.mubr.msk.f32.mxu1 %vm26611_vm2, %v32223_v27  ;;  %25588 = vmatprep.subr.mxu0 %v32223_v27  ;;  %v20926_v23 = vpop.permute.xlu1 %20925 }
0x139a   : > { %25593 = vmatprep.subr.mxu1 %v32223_v27  ;;  %25581 = vmatmul.mubr.msk.f32.vlgmr.msra.gmra.mrb[226].mxu0 %vm1193_vm3, %v32623_v36 }
0x139b   : > { %25586 = vmatmul.mubr.msk.f32.vlgmr.msra.gmra.mrb[8].mxu1 %vm1193_vm3, %v20222_v20  ;;  %25589 = vmatpush3.xpose.msk.msra.mxu0 %vm1193_vm3, %v30922_v13 }
0x139c   : > { %25594 = vmatpush3.xpose.msk.msra.mxu1 %vm1193_vm3, %v20380_v24  ;;  %25590 = vmatprep.mubr.msk.f32.mxu0 %vm26611_vm2, %v32223_v27  ;;  %v20848_v13 = vpop.permute.xlu0 %20847 }
0x139d   : > { %25595 = vmatprep.mubr.msk.f32.mxu1 %vm26611_vm2, %v32223_v27  ;;  %25598 = vmatprep.subr.mxu0 %v32223_v27  ;;  %v20924_v2 = vpop.permute.xlu1 %20923 }
0x139e   : > { %25603 = vmatprep.subr.mxu1 %v32223_v27  ;;  %25591 = vmatmul.mubr.msk.f32.vlgmr.msra.gmra.mrb[228].mxu0 %vm1193_vm3, %v20300_v42 }
0x139f   : > { %25596 = vmatmul.mubr.msk.f32.vlgmr.msra.gmra.mrb[10].mxu1 %vm1193_vm3, %v20378_v37  ;;  %25599 = vmatpush3.xpose.msk.msra.mxu0 %vm1193_vm3, %v20458_v62 }
0x13a0   : > { %25604 = vmatpush3.xpose.msk.msra.mxu1 %vm1193_vm3, %v20536_v61  ;;  %25600 = vmatprep.mubr.msk.f32.mxu0 %vm26611_vm2, %v32223_v27  ;;  %v20846_v48 = vpop.permute.xlu0 %20845 }
0x13a1   : > { %25605 = vmatprep.mubr.msk.f32.mxu1 %vm26611_vm2, %v32223_v27  ;;  %25608 = vmatprep.subr.mxu0 %v32223_v27  ;;  %v21194_v59 = vpop.permute.xlu1 %21193 }
0x13a2   : > { %25613 = vmatprep.subr.mxu1 %v32223_v27  ;;  %25601 = vmatmul.mubr.msk.f32.vlgmr.msra.gmra.mrb[230].mxu0 %vm1193_vm3, %v20456_v17 }
0x13a3   : > { %25606 = vmatmul.mubr.msk.f32.vlgmr.msra.gmra.mrb[12].mxu1 %vm1193_vm3, %v20534_v9  ;;  %25609 = vmatpush3.xpose.msk.msra.mxu0 %vm1193_vm3, %v20614_v12 }
0x13a4   : > { %25614 = vmatpush3.xpose.msk.msra.mxu1 %vm1193_vm3, %v20692_v39  ;;  %25610 = vmatprep.mubr.msk.f32.mxu0 %vm26611_vm2, %v32223_v27  ;;  %v21270_v46 = vpop.permute.xlu0 %21269 }
0x13a5   : > { %25615 = vmatprep.mubr.msk.f32.mxu1 %vm26611_vm2, %v32223_v27  ;;  %25618 = vmatprep.subr.mxu0 %v32223_v27  ;;  %v31262_v37 = vpop.permute.xlu1 %21345 }
0x13a6   : > { %25623 = vmatprep.subr.mxu1 %v32223_v27  ;;  %25611 = vmatmul.mubr.msk.f32.vlgmr.msra.gmra.mrb[232].mxu0 %vm1193_vm3, %v20612_v18 }
0x13a7   : > { %25616 = vmatmul.mubr.msk.f32.vlgmr.msra.gmra.mrb[14].mxu1 %vm1193_vm3, %v20690_v53  ;;  %25619 = vmatpush3.xpose.msk.msra.mxu0 %vm1193_vm3, %v20770_v44 }
0x13a8   : > { %25624 = vmatpush3.xpose.msk.msra.mxu1 %vm1193_vm3, %v20848_v13  ;;  %25620 = vmatprep.mubr.msk.f32.mxu0 %vm26611_vm2, %v32223_v27 }
0x13a9   : > { %25625 = vmatprep.mubr.msk.f32.mxu1 %vm26611_vm2, %v32223_v27  ;;  %25628 = vmatprep.subr.mxu0 %v32223_v27 }
0x13aa   : > { %25633 = vmatprep.subr.mxu1 %v32223_v27  ;;  %25621 = vmatmul.mubr.msk.f32.vlgmr.msra.gmra.mrb[234].mxu0 %vm1193_vm3, %v20768_v45 }
0x13ab   : > { %25626 = vmatmul.mubr.msk.f32.vlgmr.msra.gmra.mrb[16].mxu1 %vm1193_vm3, %v20846_v48  ;;  %25629 = vmatpush3.xpose.msk.msra.mxu0 %vm1193_vm3, %v20926_v23 }
0x13ac   : > { %25634 = vmatpush3.msra.mxu1 %v21194_v59  ;;  %25630 = vmatprep.mubr.msk.f32.mxu0 %vm26611_vm2, %v32223_v27 }
0x13ad   : > { %25638 = vmatprep.subr.mxu0 %v32223_v27  ;;  %25635 = vmatprep.mubr.msk.f32.mxu1 %vm26611_vm2, %v32223_v27 }
0x13ae   : > { %25631 = vmatmul.mubr.msk.f32.vlgmr.msra.gmra.mrb[236].mxu0 %vm1193_vm3, %v20924_v2  ;;  %25643 = vmatprep.subr.mxu1 %v32223_v27 }
0x13af   : > { %25639 = vmatpush3.msra.mxu0 %v21270_v46  ;;  %25640 = vmatprep.mubr.msk.f32.mxu0 %vm26611_vm2, %v32223_v27 }
0x13b0   : > { %25648 = vmatprep.subr.mxu0 %v32223_v27 }
0x1410   : > { %v31126_v1 = vpop.f32.mrb[242].mxu1 }
0x1411   : > { %v25477_v41 = vpop.f32.mrb[243].mxu1 }
0x1414   : > { %v31128_v52 = vpop.f32.mrb[206].mxu0 }
0x1415   : > { %v31130_v30 = vpop.f32.mrb[244].mxu1  ;;  %v25482_v31 = vpop.f32.mrb[207].mxu0 }
0x1416   : > { %v25487_v0 = vpop.f32.mrb[245].mxu1 }
0x1418   : > { %v31132_v60 = vpop.f32.mrb[208].mxu0 }
0x1419   : > { %v31134_v3 = vpop.f32.mrb[246].mxu1  ;;  %v25492_v40 = vpop.f32.mrb[209].mxu0 }
0x141a   : > { %v25497_v5 = vpop.f32.mrb[247].mxu1 }
0x141c   : > { %v31136_v57 = vpop.f32.mrb[210].mxu0 }
0x141d   : > { %v31138_v28 = vpop.f32.mrb[248].mxu1  ;;  %v25502_v38 = vpop.f32.mrb[211].mxu0 }
0x141e   : > { %v25507_v47 = vpop.f32.mrb[249].mxu1 }
0x1420   : > { %v31140_v22 = vpop.f32.mrb[212].mxu0 }
0x1421   : > { %v31142_v7 = vpop.f32.mrb[250].mxu1  ;;  %v25512_v58 = vpop.f32.mrb[213].mxu0 }
0x1422   : > { %v25517_v21 = vpop.f32.mrb[251].mxu1 }
0x1424   : > { %v31144_v15 = vpop.f32.mrb[214].mxu0 }
0x1425   : > { %v31146_v8 = vpop.f32.mrb[252].mxu1  ;;  %v25522_v51 = vpop.f32.mrb[215].mxu0 }
0x1426   : > { %v25527_v29 = vpop.f32.mrb[253].mxu1 }
0x1428   : > { %v31148_v14 = vpop.f32.mrb[216].mxu0 }
0x1429   : > { %v31150_v63 = vpop.f32.mrb[254].mxu1  ;;  %v25532_v25 = vpop.f32.mrb[217].mxu0 }
0x142a   : > { %v25537_v42 = vpop.f32.mrb[255].mxu1 }
0x142c   : > { %v31152_v20 = vpop.f32.mrb[218].mxu0 }
0x142d   : > { %v25542_v33 = vpop.f32.mrb[219].mxu0 }
0x145e   : > { %v31154_v11 = vpop.f32.mrb[0].mxu1 }
0x145f   : > { %v25547_v62 = vpop.f32.mrb[1].mxu1 }
0x1461   : > { %v31156_v24 = vpop.f32.mrb[220].mxu0 }
0x1462   : > { %v19827_v17 = vpop.f32.mrb[2].mxu1  ;;  %v25552_v50 = vpop.f32.mrb[221].mxu0 }
0x1463   : > { %v31160_v4 = vsel %vm26902_vm1, %v19827_v17, -32767.0  ;;  %v25557_v12 = vpop.f32.mrb[3].mxu1 }
0x1464   : > { %v21017_v16 = vsel %vm1193_vm3, %v31160_v4, -inf }
0x1465   : > { %21018 = vmax.xlane.f32.xlu0 %v21017_v16  ;;  %v19905_v32 = vpop.f32.mrb[222].mxu0 }
0x1466   : > { %v31166_v61 = vsel %vm26902_vm1, %v19905_v32, -32767.0  ;;  %v19983_v54 = vpop.f32.mrb[4].mxu1  ;;  %v25562_v18 = vpop.f32.mrb[223].mxu0 }
0x1467   : > { %v21020_v35 = vsel %vm1193_vm3, %v31166_v61, -inf  ;;  %v31172_v49 = vsel %vm26902_vm1, %v19983_v54, -32767.0  ;;  %v25567_v43 = vpop.f32.mrb[5].mxu1 }
0x1468   : > { %v21023_v9 = vsel %vm1193_vm3, %v31172_v49, -inf  ;;  %21021 = vmax.xlane.f32.xlu1 %v21020_v35 }
0x1469   : > { %21024 = vmax.xlane.f32.xlu0 %v21023_v9  ;;  %v20061_v19 = vpop.f32.mrb[224].mxu0 }
0x146a   : > { %v31178_v44 = vsel %vm26902_vm1, %v20061_v19, -32767.0  ;;  %v20139_v10 = vpop.f32.mrb[6].mxu1  ;;  %v25572_v55 = vpop.f32.mrb[225].mxu0 }
0x146b   : > { %v21026_v6 = vsel %vm1193_vm3, %v31178_v44, -inf  ;;  %v31184_v39 = vsel %vm26902_vm1, %v20139_v10, -32767.0  ;;  %v25577_v56 = vpop.f32.mrb[7].mxu1 }
0x146c   : > { %v21029_v34 = vsel %vm1193_vm3, %v31184_v39, -inf }
0x146d   : > { %21027 = vmax.xlane.f32.xlu0 %v21026_v6  ;;  %21030 = vmax.xlane.f32.xlu1 %v21029_v34  ;;  %v20217_v26 = vpop.f32.mrb[226].mxu0 }
0x146e   : > { %v31190_v45 = vsel %vm26902_vm1, %v20217_v26, -32767.0  ;;  %v20295_v36 = vpop.f32.mrb[8].mxu1  ;;  %v25582_v53 = vpop.f32.mrb[227].mxu0 }
0x146f   : > { %v21032_v23 = vsel %vm1193_vm3, %v31190_v45, -inf  ;;  %v31196_v13 = vsel %vm26902_vm1, %v20295_v36, -32767.0  ;;  %v25587_v2 = vpop.f32.mrb[9].mxu1 }
0x1470   : > { %v21035_v48 = vsel %vm1193_vm3, %v31196_v13, -inf  ;;  %v32626_v2 = vld [vmem:[#allocation51_spill] sm:$0xff] }
0x1471   : > { %21033 = vmax.xlane.f32.xlu0 %v21032_v23  ;;  %21036 = vmax.xlane.f32.xlu1 %v21035_v48  ;;  %v20373_v59 = vpop.f32.mrb[228].mxu0  ;;  %v32625_v23 = vld [vmem:[#allocation39_spill] sm:$0xff]  ;;  %v32627_v48 = vld [vmem:[#allocation49_spill] sm:$0xff] }
0x1472   : > { %v31202_v46 = vsel %vm26902_vm1, %v20373_v59, -32767.0  ;;  %v20451_v41 = vpop.f32.mrb[10].mxu1  ;;  %v25592_v31 = vpop.f32.mrb[229].mxu0  ;;  %v32628_v59 = vld [vmem:[#allocation50_spill] sm:$0xff] }
0x1473   : > { %v21038_v0 = vsel %vm1193_vm3, %v31202_v46, -inf  ;;  %v31208_v40 = vsel %vm26902_vm1, %v20451_v41, -32767.0  ;;  %v25597_v5 = vpop.f32.mrb[11].mxu1  ;;  %v31264_v41 = vpop.permute.xlu1 %21497 }
0x1474   : > { %v21041_v38 = vsel %vm1193_vm3, %v31208_v40, -inf  ;;  %v31266_v31 = vpop.permute.xlu0 %21421 }
0x1475   : > { %21039 = vmax.xlane.f32.xlu0 %v21038_v0  ;;  %21042 = vmax.xlane.f32.xlu1 %v21041_v38  ;;  %v20529_v47 = vpop.f32.mrb[230].mxu0 }
0x1476   : > { %v31214_v58 = vsel %vm26902_vm1, %v20529_v47, -32767.0  ;;  %v20607_v21 = vpop.f32.mrb[12].mxu1  ;;  %v25602_v51 = vpop.f32.mrb[231].mxu0 }
0x1477   : > { %v21044_v29 = vsel %vm1193_vm3, %v31214_v58, -inf  ;;  %v31220_v25 = vsel %vm26902_vm1, %v20607_v21, -32767.0  ;;  %v25607_v42 = vpop.f32.mrb[13].mxu1  ;;  %v31268_v0 = vpop.permute.xlu1 %21573 }
0x1478   : > { %v21047_v33 = vsel %vm1193_vm3, %v31220_v25, -inf  ;;  %v31270_v5 = vpop.permute.xlu0 %21649 }
0x1479   : > { %21045 = vmax.xlane.f32.xlu0 %v21044_v29  ;;  %21048 = vmax.xlane.f32.xlu1 %v21047_v33  ;;  %v20685_v62 = vpop.f32.mrb[232].mxu0 }
0x147a   : > { %v31226_v17 = vsel %vm26902_vm1, %v20685_v62, -32767.0  ;;  %v20763_v50 = vpop.f32.mrb[14].mxu1  ;;  %v25612_v12 = vpop.f32.mrb[233].mxu0 }
0x147b   : > { %v21050_v16 = vsel %vm1193_vm3, %v31226_v17, -inf  ;;  %v31232_v32 = vsel %vm26902_vm1, %v20763_v50, -32767.0  ;;  %v25617_v54 = vpop.f32.mrb[15].mxu1  ;;  %v31272_v38 = vpop.permute.xlu1 %21725 }
0x147c   : > { %v21053_v18 = vsel %vm1193_vm3, %v31232_v32, -inf  ;;  %v31274_v47 = vpop.permute.xlu0 %21801 }
0x147d   : > { %21051 = vmax.xlane.f32.xlu0 %v21050_v16  ;;  %21054 = vmax.xlane.f32.xlu1 %v21053_v18  ;;  %v20841_v35 = vpop.f32.mrb[234].mxu0 }
0x147e   : > { %v31238_v43 = vsel %vm26902_vm1, %v20841_v35, -32767.0  ;;  %v20919_v9 = vpop.f32.mrb[16].mxu1  ;;  %v25622_v19 = vpop.f32.mrb[235].mxu0 }
0x147f   : > { %v21056_v10 = vsel %vm1193_vm3, %v31238_v43, -inf  ;;  %v31244_v55 = vsel %vm26902_vm1, %v20919_v9, -32767.0  ;;  %v25627_v6 = vpop.f32.mrb[17].mxu1  ;;  %v31276_v21 = vpop.permute.xlu1 %21877 }
0x1480   : > { %v21059_v56 = vsel %vm1193_vm3, %v31244_v55, -inf }
0x1481   : > { %21057 = vmax.xlane.f32.xlu0 %v21056_v10  ;;  %21060 = vmax.xlane.f32.xlu1 %v21059_v56  ;;  %v20997_v34 = vpop.f32.mrb[236].mxu0 }
0x1482   : > { %v31250_v26 = vsel %vm26902_vm1, %v20997_v34, -32767.0  ;;  %v25632_v36 = vpop.f32.mrb[237].mxu0 }
0x1483   : > { %v21062_v53 = vsel %vm1193_vm3, %v31250_v26, -inf }
0x1485   : > { %21063 = vmax.xlane.f32.xlu0 %v21062_v53 }
0x1492   : > { %22029 = vrot.lane.b32.xlu1 %v32625_v23, %s26626_s16 }
0x1496   : > { %22181 = vrot.lane.b32.xlu1 %v32626_v2, %s26626_s16 }
0x149b   : > { %21953 = vrot.lane.b32.xlu0 %v32627_v48, %s26626_s16 }
0x149f   : > { %22105 = vrot.lane.b32.xlu0 %v32628_v59, %s26626_s16 }
0x14f2   : > { %v21019_v51 = vpop.xlane.xlu0 %21018 }
0x14f3   : > { %v21065_v29 = vsub.f32 %v31160_v4, %v21019_v51 }
0x14f5   : > { %v21081_v42 = vmul.f32 1.442695, %v21065_v29  ;;  %v21022_v33 = vpop.xlane.xlu1 %21021 }
0x14f6   : > { %v21066_v62 = vsub.f32 %v31166_v61, %v21022_v33  ;;  %v21025_v50 = vpop.xlane.xlu0 %21024 }
0x14f7   : > { %26458 = vpow2.f32 %v21081_v42  ;;  %v21067_v12 = vsub.f32 %v31172_v49, %v21025_v50 }
0x14f8   : > { %v21083_v16 = vmul.f32 1.442695, %v21066_v62 }
0x14f9   : > { %v21085_v54 = vmul.f32 1.442695, %v21067_v12 }
0x14fa   : > { %26460 = vpow2.f32 %v21083_v16  ;;  %v21028_v18 = vpop.xlane.xlu0 %21027  ;;  %v21031_v35 = vpop.xlane.xlu1 %21030 }
0x14fb   : > { %26462 = vpow2.f32 %v21085_v54  ;;  %v21068_v9 = vsub.f32 %v31178_v44, %v21028_v18  ;;  %v21069_v19 = vsub.f32 %v31184_v39, %v21031_v35 }
0x14fd   : > { %v21087_v10 = vmul.f32 1.442695, %v21068_v9  ;;  %v21089_v4 = vmul.f32 1.442695, %v21069_v19 }
0x14fe   : > { %v21034_v6 = vpop.xlane.xlu0 %21033  ;;  %v21037_v56 = vpop.xlane.xlu1 %21036 }
0x14ff   : > { %26464 = vpow2.f32 %v21087_v10  ;;  %v21070_v61 = vsub.f32 %v31190_v45, %v21034_v6  ;;  %v21071_v34 = vsub.f32 %v31196_v13, %v21037_v56 }
0x1500   : > { %26466 = vpow2.f32 %v21089_v4 }
0x1501   : > { %v31285_v49 = vpop.eup %26458  ;;  %v21091_v36 = vmul.f32 1.442695, %v21070_v61  ;;  %v21093_v53 = vmul.f32 1.442695, %v21071_v34 }
0x1502   : > { %v21040_v23 = vpop.xlane.xlu0 %21039  ;;  %v21043_v2 = vpop.xlane.xlu1 %21042  ;;  %v21113_v44 = vsel %vm1193_vm3, %v31285_v49, 0.0 }
0x1503   : > { %26468 = vpow2.f32 %v21091_v36  ;;  %v21072_v39 = vsub.f32 %v31202_v46, %v21040_v23  ;;  %v21073_v48 = vsub.f32 %v31208_v40, %v21043_v2  ;;  %21114 = vadd.xlane.f32.xlu1 %v21113_v44 }
0x1504   : > { %v31291_v59 = vpop.eup %26460  ;;  %26470 = vpow2.f32 %v21093_v53 }
0x1505   : > { %v31293_v45 = vpop.eup %26462  ;;  %v21095_v13 = vmul.f32 1.442695, %v21072_v39  ;;  %v21097_v51 = vmul.f32 1.442695, %v21073_v48  ;;  %v21116_v29 = vsel %vm1193_vm3, %v31291_v59, 0.0 }
0x1506   : > { %v21046_v42 = vpop.xlane.xlu0 %21045  ;;  %v21049_v33 = vpop.xlane.xlu1 %21048  ;;  %21117 = vadd.xlane.f32.xlu0 %v21116_v29  ;;  %v21119_v62 = vsel %vm1193_vm3, %v31293_v45, 0.0 }
0x1507   : > { %26472 = vpow2.f32 %v21095_v13  ;;  %v21074_v46 = vsub.f32 %v31214_v58, %v21046_v42  ;;  %v21075_v40 = vsub.f32 %v31220_v25, %v21049_v33  ;;  %21120 = vadd.xlane.f32.xlu1 %v21119_v62 }
0x1508   : > { %26474 = vpow2.f32 %v21097_v51 }
0x1509   : > { %v31301_v50 = vpop.eup %26464  ;;  %v21099_v12 = vmul.f32 1.442695, %v21074_v46  ;;  %v21101_v16 = vmul.f32 1.442695, %v21075_v40 }
0x150a   : > { %v31303_v54 = vpop.eup %26466  ;;  %v21052_v18 = vpop.xlane.xlu0 %21051  ;;  %v21122_v9 = vsel %vm1193_vm3, %v31301_v50, 0.0 }
0x150b   : > { %v21055_v35 = vpop.xlane.xlu1 %21054  ;;  %26476 = vpow2.f32 %v21099_v12  ;;  %v21076_v19 = vsub.f32 %v31226_v17, %v21052_v18  ;;  %21123 = vadd.xlane.f32.xlu0 %v21122_v9  ;;  %v21125_v25 = vsel %vm1193_vm3, %v31303_v54, 0.0 }
0x150c   : > { %v21077_v58 = vsub.f32 %v31232_v32, %v21055_v35  ;;  %26478 = vpow2.f32 %v21101_v16  ;;  %21126 = vadd.xlane.f32.xlu1 %v21125_v25  ;;  %v32629_v25 = vld [vmem:[#allocation52_spill] sm:$0xff] }
0x150d   : > { %v31311_v10 = vpop.eup %26468  ;;  %v21103_v4 = vmul.f32 1.442695, %v21076_v19 }
0x150e   : > { %v21105_v6 = vmul.f32 1.442695, %v21077_v58  ;;  %v31313_v56 = vpop.eup %26470  ;;  %v21058_v61 = vpop.xlane.xlu0 %21057  ;;  %v21128_v36 = vsel %vm1193_vm3, %v31311_v10, 0.0 }
0x150f   : > { %v21061_v34 = vpop.xlane.xlu1 %21060  ;;  %26480 = vpow2.f32 %v21103_v4  ;;  %v21078_v17 = vsub.f32 %v31238_v43, %v21058_v61  ;;  %21129 = vadd.xlane.f32.xlu0 %v21128_v36  ;;  %v21131_v53 = vsel %vm1193_vm3, %v31313_v56, 0.0  ;;  %v32630_v4 = vld [vmem:[#allocation16_spill] sm:$0xff]  ;;  %v32632_v61 = vld [vmem:[#allocation11_spill] sm:$0xff] }
0x1510   : > { %v21079_v32 = vsub.f32 %v31244_v55, %v21061_v34  ;;  %26482 = vpow2.f32 %v21105_v6  ;;  %21132 = vadd.xlane.f32.xlu1 %v21131_v53  ;;  %v32631_v6 = vld [vmem:[#allocation78_spill] sm:$0xff]  ;;  %v32633_v34 = vld [vmem:[#allocation81_spill] sm:$0xff]  ;;  %v32634_v36 = vld [vmem:[#allocation68_spill] sm:$0xff] }
0x1511   : > { %v31321_v23 = vpop.eup %26472  ;;  %v21107_v2 = vmul.f32 1.442695, %v21078_v17  ;;  %v32635_v17 = vld [vmem:[#allocation69_spill] sm:$0xff]  ;;  %v32637_v53 = vld [vmem:[#allocation19_spill] sm:$0xff] }
0x1512   : > { %v21109_v44 = vmul.f32 1.442695, %v21079_v32  ;;  %v31323_v39 = vpop.eup %26474  ;;  %v21064_v48 = vpop.xlane.xlu0 %21063  ;;  %v21134_v13 = vsel %vm1193_vm3, %v31321_v23, 0.0  ;;  %v32636_v32 = vld [vmem:[#allocation46_spill] sm:$0xff] }
0x1513   : > { %26484 = vpow2.f32 %v21107_v2  ;;  %v21080_v43 = vsub.f32 %v31250_v26, %v21064_v48  ;;  %21135 = vadd.xlane.f32.xlu0 %v21134_v13  ;;  %v21137_v55 = vsel %vm1193_vm3, %v31323_v39, 0.0  ;;  %v32638_v2 = vld [vmem:[#allocation79_spill] sm:$0xff]  ;;  %v32640_v48 = vld [vmem:[#allocation100_spill] sm:$0xff]  ;;  %v32641_v13 = vld [vmem:[#allocation101_spill] sm:$0xff] }
0x1514   : > { %26486 = vpow2.f32 %v21109_v44  ;;  %21138 = vadd.xlane.f32.xlu1 %v21137_v55  ;;  %v32639_v44 = vld [vmem:[#allocation73_spill] sm:$0xff]  ;;  %v32643_v55 = vld [vmem:[#allocation31_spill] sm:$0xff] }
0x1515   : > { %v31330_v51 = vpop.eup %26476  ;;  %v21111_v29 = vmul.f32 1.442695, %v21080_v43  ;;  %v32642_v43 = vld [vmem:[#allocation87_spill] sm:$0xff] }
0x1516   : > { %v31332_v42 = vpop.eup %26478  ;;  %v21140_v33 = vsel %vm1193_vm3, %v31330_v51, 0.0 }
0x1517   : > { %26488 = vpow2.f32 %v21111_v29  ;;  %21141 = vadd.xlane.f32.xlu0 %v21140_v33  ;;  %v21143_v62 = vsel %vm1193_vm3, %v31332_v42, 0.0  ;;  %v32644_v29 = vld [vmem:[#allocation102_spill] sm:$0xff]  ;;  %v32645_v33 = vld [vmem:[#allocation112_spill] sm:$0xff] }
0x1518   : > { %21144 = vadd.xlane.f32.xlu1 %v21143_v62  ;;  %v32646_v62 = vld [vmem:[#allocation65_spill] sm:$0xff] }
0x1519   : > { %v31338_v26 = vpop.eup %26480 }
0x151a   : > { %v31340_v46 = vpop.eup %26482  ;;  %v21146_v40 = vsel %vm1193_vm3, %v31338_v26, 0.0 }
0x151b   : > { %21147 = vadd.xlane.f32.xlu0 %v21146_v40  ;;  %v21149_v12 = vsel %vm1193_vm3, %v31340_v46, 0.0  ;;  %v32648_v40 = vld [vmem:[#allocation103_spill] sm:$0xff] }
0x151c   : > { %21150 = vadd.xlane.f32.xlu1 %v21149_v12  ;;  %v32649_v12 = vld [vmem:[#allocation4_spill] sm:$0xff] }
0x151d   : > { %v31346_v16 = vpop.eup %26484 }
0x151e   : > { %v31348_v18 = vpop.eup %26486  ;;  %v21152_v35 = vsel %vm1193_vm3, %v31346_v16, 0.0 }
0x151f   : > { %21153 = vadd.xlane.f32.xlu0 %v21152_v35  ;;  %v21155_v9 = vsel %vm1193_vm3, %v31348_v18, 0.0  ;;  %v32650_v35 = vld [vmem:[#allocation88_spill] sm:$0xff] }
0x1520   : > { %21156 = vadd.xlane.f32.xlu1 %v21155_v9  ;;  %v32651_v9 = vld [vmem:[#allocation26_spill] sm:$0xff] }
0x1521   : > { %v31354_v19 = vpop.eup %26488 }
0x1522   : > { %v21158_v58 = vsel %vm1193_vm3, %v31354_v19, 0.0 }
0x1523   : > { %21159 = vadd.xlane.f32.xlu0 %v21158_v58  ;;  %v32652_v58 = vld [vmem:[#allocation70_spill] sm:$0xff] }
0x1531   : > { %22333 = vrot.lane.b32.xlu1 %v32629_v25, %s26626_s16  ;;  %v32653_v25 = vld [vmem:[#allocation6_spill] sm:$0xff] }
0x1535   : > { %22439 = vrot.lane.b32.xlu1 %v32630_v4, %s26625_s15  ;;  %v32654_v4 = vld [vmem:[#allocation113_spill] sm:$0xff] }
0x1539   : > { %22503 = vrot.lane.b32.xlu1 %v32631_v6, %s26623_s13  ;;  %22257 = vrot.lane.b32.xlu0 %v32632_v61, %s26626_s16  ;;  %v32656_v6 = vld [vmem:[#allocation34_spill] sm:$0xff] }
0x153a   : > { %v32657_v61 = vld [vmem:[#allocation30_spill] sm:$0xff] }
0x153d   : > { %22567 = vrot.lane.b32.xlu1 %v32633_v34, %s26621_s11  ;;  %22437 = vrot.lane.b32.xlu0 %v32634_v36, %s26625_s15  ;;  %v32658_v34 = vld [vmem:[#allocation74_spill] sm:$0xff]  ;;  %v32659_v36 = vld [vmem:[#allocation20_spill] sm:$0xff] }
0x1541   : > { %22441 = vrot.lane.b32.xlu1 %v32635_v17, %s26625_s15  ;;  %22501 = vrot.lane.b32.xlu0 %v32636_v32, %s26623_s13  ;;  %v32660_v17 = vld [vmem:[#allocation82_spill] sm:$0xff]  ;;  %v32661_v32 = vld [vmem:[#allocation35_spill] sm:$0xff] }
0x1545   : > { %22693 = vrot.lane.b32.xlu1 %v32637_v53, %s26617_s30  ;;  %22565 = vrot.lane.b32.xlu0 %v32638_v2, %s26621_s11  ;;  %v32662_v53 = vld [vmem:[#allocation89_spill] sm:$0xff]  ;;  %v32663_v2 = vld [vmem:[#allocation71_spill] sm:$0xff] }
0x1549   : > { %22505 = vrot.lane.b32.xlu1 %v32639_v44, %s26623_s13  ;;  %22629 = vrot.lane.b32.xlu0 %v32640_v48, %s26619_s9  ;;  %v32666_v44 = vld [vmem:[#allocation104_spill] sm:$0xff]  ;;  %v31442_v48 = vpop.permute.xlu1 %22029 }
0x154d   : > { %22757 = vrot.lane.b32.xlu1 %v31138_v28, %s26615_s28  ;;  %22631 = vrot.lane.b32.xlu0 %v32641_v13, %s26619_s9  ;;  %v32647_v28 = vld [vmem:[#allocation80_spill] sm:$0xff]  ;;  %v31444_v13 = vpop.permute.xlu0 %21953 }
0x1551   : > { %22569 = vrot.lane.b32.xlu1 %v32642_v43, %s26621_s11  ;;  %22443 = vrot.lane.b32.xlu0 %v32643_v55, %s26625_s15  ;;  %v32667_v43 = vld [vmem:[#allocation5_spill] sm:$0xff]  ;;  %v32668_v55 = vld [vmem:[#allocation66_spill] sm:$0xff] }
0x1555   : > { %22633 = vrot.lane.b32.xlu1 %v32644_v29, %s26619_s9  ;;  %22695 = vrot.lane.b32.xlu0 %v32645_v33, %s26617_s30  ;;  %v31450_v29 = vpop.permute.xlu1 %22181  ;;  %v32669_v33 = vld [vmem:[#allocation63_spill] sm:$0xff] }
0x1559   : > { %22425 = vrot.lane.b32.xlu1 %v32646_v62, %s26625_s15  ;;  %22507 = vrot.lane.b32.xlu0 %v32647_v28, %s26623_s13  ;;  %v32670_v62 = vld [vmem:[#allocation96_spill] sm:$0xff]  ;;  %v31456_v28 = vpop.permute.xlu0 %22105 }
0x155d   : > { %22635 = vrot.lane.b32.xlu1 %v32648_v40, %s26619_s9  ;;  %22759 = vrot.lane.b32.xlu0 %v31140_v22, %s26615_s28  ;;  %v32655_v22 = vld [vmem:[#allocation27_spill] sm:$0xff] }
0x1561   : > { %22427 = vrot.lane.b32.xlu1 %v32649_v12, %s26625_s15  ;;  %22571 = vrot.lane.b32.xlu0 %v32650_v35, %s26621_s11  ;;  %v32671_v12 = vld [vmem:[#allocation75_spill] sm:$0xff]  ;;  %v32672_v35 = vld [vmem:[#allocation18_spill] sm:$0xff] }
0x1565   : > { %22489 = vrot.lane.b32.xlu1 %v32651_v9, %s26623_s13  ;;  %22445 = vrot.lane.b32.xlu0 %v32652_v58, %s26625_s15 }
0x1569   : > { %22699 = vrot.lane.b32.xlu1 %v32653_v25, %s26617_s30  ;;  %22697 = vrot.lane.b32.xlu0 %v32654_v4, %s26617_s30  ;;  %v32673_v25 = vld [vmem:[#allocation114_spill] sm:$0xff] }
0x156a   : > { %v32674_v4 = vld [vmem:[#allocation14_spill] sm:$0xff] }
0x156d   : > { %22491 = vrot.lane.b32.xlu1 %v32655_v22, %s26623_s13  ;;  %22447 = vrot.lane.b32.xlu0 %v32656_v6, %s26625_s15 }
0x1571   : > { %22553 = vrot.lane.b32.xlu1 %v32657_v61, %s26621_s11  ;;  %22509 = vrot.lane.b32.xlu0 %v32658_v34, %s26623_s13  ;;  %v32675_v61 = vld [vmem:[#allocation13_spill] sm:$0xff] }
0x1575   : > { %22763 = vrot.lane.b32.xlu1 %v31144_v15, %s26615_s28  ;;  %22761 = vrot.lane.b32.xlu0 %v31142_v7, %s26615_s28  ;;  %v32664_v15 = vld [vmem:[#allocation90_spill] sm:$0xff] }
0x1576   : > { %v32665_v7 = vld [vmem:[#allocation106_spill] sm:$0xff] }
0x1579   : > { %22555 = vrot.lane.b32.xlu1 %v32659_v36, %s26621_s11  ;;  %22511 = vrot.lane.b32.xlu0 %v32660_v17, %s26623_s13 }
0x157d   : > { %22617 = vrot.lane.b32.xlu1 %v32661_v32, %s26619_s9  ;;  %22573 = vrot.lane.b32.xlu0 %v32662_v53, %s26621_s11  ;;  %v32676_v32 = vld [vmem:[#allocation83_spill] sm:$0xff] }
0x1581   : > { %22449 = vrot.lane.b32.xlu1 %v32663_v2, %s26625_s15  ;;  %22575 = vrot.lane.b32.xlu0 %v32664_v15, %s26621_s11  ;;  %v32677_v2 = vld [vmem:[#allocation44_spill] sm:$0xff] }
0x1585   : > { %22639 = vrot.lane.b32.xlu1 %v32665_v7, %s26619_s9  ;;  %22637 = vrot.lane.b32.xlu0 %v32666_v44, %s26619_s9 }
0x1589   : > { %22701 = vrot.lane.b32.xlu1 %v32667_v43, %s26617_s30  ;;  %22429 = vrot.lane.b32.xlu0 %v32668_v55, %s26625_s15  ;;  %v32678_v43 = vld [vmem:[#allocation92_spill] sm:$0xff] }
0x158d   : > { %22451 = vrot.lane.b32.xlu1 %v32669_v33, %s26625_s15  ;;  %22619 = vrot.lane.b32.xlu0 %v32670_v62, %s26619_s9 }
0x1590   : > { %v21115_v40 = vpop.xlane.xlu1 %21114 }
0x1591   : > { %22513 = vrot.lane.b32.xlu1 %v32671_v12, %s26623_s13  ;;  %26490 = vrcp.f32 %v21115_v40  ;;  %22681 = vrot.lane.b32.xlu0 %v32672_v35, %s26617_s30  ;;  %v32680_v12 = vld [vmem:[#allocation91_spill] sm:$0xff] }
0x1593   : > { %v21118_v9 = vpop.xlane.xlu0 %21117 }
0x1594   : > { %26492 = vrcp.f32 %v21118_v9  ;;  %v21121_v58 = vpop.xlane.xlu1 %21120  ;;  %v32681_v9 = vld [vmem:[#allocation17_spill] sm:$0xff] }
0x1595   : > { %22703 = vrot.lane.b32.xlu1 %v32673_v25, %s26617_s30  ;;  %26494 = vrcp.f32 %v21121_v58  ;;  %22431 = vrot.lane.b32.xlu0 %v32674_v4, %s26625_s15  ;;  %v32682_v4 = vld [vmem:[#allocation105_spill] sm:$0xff] }
0x1598   : > { %v21124_v22 = vpop.xlane.xlu0 %21123 }
0x1599   : > { %26496 = vrcp.f32 %v21124_v22  ;;  %22765 = vrot.lane.b32.xlu1 %v31146_v8, %s26615_s28  ;;  %v21127_v6 = vpop.xlane.xlu1 %21126  ;;  %22493 = vrot.lane.b32.xlu0 %v32675_v61, %s26623_s13  ;;  %v32683_v61 = vld [vmem:[#allocation72_spill] sm:$0xff] }
0x159a   : > { %26498 = vrcp.f32 %v21127_v6 }
0x159b   : > { %v26491_v34 = vpop.eup %26490 }
0x159c   : > { %v21162_v36 = vmul.f32 %v26491_v34, %v31285_v49  ;;  %v21130_v17 = vpop.xlane.xlu0 %21129  ;;  %v32684_v34 = vld [vmem:[#allocation85_spill] sm:$0xff] }
0x159d   : > { %26500 = vrcp.f32 %v21130_v17  ;;  %22515 = vrot.lane.b32.xlu1 %v32676_v32, %s26623_s13  ;;  %v21133_v53 = vpop.xlane.xlu1 %21132  ;;  %22683 = vrot.lane.b32.xlu0 %v32677_v2, %s26617_s30  ;;  %v32685_v32 = vld [vmem:[#allocation108_spill] sm:$0xff] }
0x159e   : > { %v26493_v15 = vpop.eup %26492  ;;  %26502 = vrcp.f32 %v21133_v53  ;;  %25636 = vmatmul.mubr.msk.f32.vlgmr.msra.gmra.mrb[18].mxu1 %vm1193_vm3, %v21162_v36  ;;  %v32686_v53 = vld [vmem:[#allocation95_spill] sm:$0xff] }
0x159f   : > { %v26495_v8 = vpop.eup %26494  ;;  %25644 = vmatpush3.msra.mxu1 %v31262_v37  ;;  %25645 = vmatprep.mubr.msk.f32.mxu1 %vm26611_vm2, %v32223_v27  ;;  %v21164_v49 = vmul.f32 %v26493_v15, %v31291_v59 }
0x15a0   : > { %v21166_v7 = vmul.f32 %v26495_v8, %v31293_v45  ;;  %v21136_v44 = vpop.xlane.xlu0 %21135  ;;  %25653 = vmatprep.subr.mxu1 %v32223_v27 }
0x15a1   : > { %26504 = vrcp.f32 %v21136_v44  ;;  %22577 = vrot.lane.b32.xlu1 %v32678_v43, %s26621_s11  ;;  %v21139_v55 = vpop.xlane.xlu1 %21138  ;;  %22745 = vrot.lane.b32.xlu0 %v31126_v1, %s26615_s28  ;;  %v32690_v43 = vld [vmem:[#allocation97_spill] sm:$0xff] }
0x15a2   : > { %26506 = vrcp.f32 %v21139_v55  ;;  %25641 = vmatmul.mubr.msk.f32.vlgmr.msra.gmra.mrb[238].mxu0 %vm1193_vm3, %v21164_v49  ;;  %25646 = vmatmul.mubr.msk.f32.vlgmr.msra.gmra.mrb[20].mxu1 %vm1193_vm3, %v21166_v7  ;;  %v32687_v49 = vld [vmem:[#allocation115_spill] sm:$0xff] }
0x15a3   : > { %v26497_v37 = vpop.eup %26496  ;;  %25649 = vmatpush3.msra.mxu0 %v31266_v31  ;;  %25654 = vmatpush3.msra.mxu1 %v31264_v41  ;;  %v32679_v31 = vld [vmem:[#allocation28_spill] sm:$0xff]  ;;  %v32688_v7 = vld [vmem:[#allocation67_spill] sm:$0xff] }
0x15a4   : > { %v26499_v59 = vpop.eup %26498  ;;  %v21142_v45 = vpop.xlane.xlu0 %21141  ;;  %25650 = vmatprep.mubr.msk.f32.mxu0 %vm26611_vm2, %v32223_v27  ;;  %25655 = vmatprep.mubr.msk.f32.mxu1 %vm26611_vm2, %v32223_v27  ;;  %v21168_v1 = vmul.f32 %v26497_v37, %v31301_v50 }
0x15a5   : > { %v21170_v33 = vmul.f32 %v26499_v59, %v31303_v54  ;;  %26508 = vrcp.f32 %v21142_v45  ;;  %22767 = vrot.lane.b32.xlu1 %v31148_v14, %s26615_s28  ;;  %v21145_v62 = vpop.xlane.xlu1 %21144  ;;  %22495 = vrot.lane.b32.xlu0 %v32679_v31, %s26623_s13  ;;  %v32692_v59 = vld [vmem:[#allocation3_spill] sm:$0xff] }
0x15a6   : > { %26510 = vrcp.f32 %v21145_v62  ;;  %25658 = vmatprep.subr.mxu0 %v32223_v27  ;;  %25663 = vmatprep.subr.mxu1 %v32223_v27  ;;  %v32694_v62 = vld [vmem:[#allocation29_spill] sm:$0xff] }
0x15a7   : > { %v26501_v41 = vpop.eup %26500  ;;  %25651 = vmatmul.mubr.msk.f32.vlgmr.msra.gmra.mrb[240].mxu0 %vm1193_vm3, %v21168_v1  ;;  %25656 = vmatmul.mubr.msk.f32.vlgmr.msra.gmra.mrb[22].mxu1 %vm1193_vm3, %v21170_v33  ;;  %v32693_v33 = vld [vmem:[#allocation23_spill] sm:$0xff] }
0x15a8   : > { %v26503_v50 = vpop.eup %26502  ;;  %25659 = vmatpush3.msra.mxu0 %v31268_v0  ;;  %25664 = vmatpush3.msra.mxu1 %v31270_v5  ;;  %v21148_v14 = vpop.xlane.xlu0 %21147  ;;  %v21172_v54 = vmul.f32 %v26501_v41, %v31311_v10  ;;  %v32695_v41 = vld [vmem:[#allocation15_spill] sm:$0xff] }
0x15a9   : > { %v21174_v40 = vmul.f32 %v26503_v50, %v31313_v56  ;;  %26512 = vrcp.f32 %v21148_v14  ;;  %22579 = vrot.lane.b32.xlu1 %v32680_v12, %s26621_s11  ;;  %v21151_v35 = vpop.xlane.xlu1 %21150  ;;  %22557 = vrot.lane.b32.xlu0 %v32681_v9, %s26621_s11  ;;  %v32696_v14 = vld [vmem:[#allocation55_spill] sm:$0xff]  ;;  %v32698_v9 = vld [vmem:[#allocation109_spill] sm:$0xff] }
0x15aa   : > { %26514 = vrcp.f32 %v21151_v35  ;;  %25660 = vmatprep.mubr.msk.f32.mxu0 %vm26611_vm2, %v32223_v27  ;;  %25665 = vmatprep.mubr.msk.f32.mxu1 %vm26611_vm2, %v32223_v27  ;;  %v32697_v35 = vld [vmem:[#allocation76_spill] sm:$0xff] }
0x15ab   : > { %v26505_v0 = vpop.eup %26504  ;;  %25668 = vmatprep.subr.mxu0 %v32223_v27  ;;  %25673 = vmatprep.subr.mxu1 %v32223_v27 }
0x15ac   : > { %v26507_v5 = vpop.eup %26506  ;;  %25661 = vmatmul.mubr.msk.f32.vlgmr.msra.gmra.mrb[242].mxu0 %vm1193_vm3, %v21172_v54  ;;  %25666 = vmatmul.mubr.msk.f32.vlgmr.msra.gmra.mrb[24].mxu1 %vm1193_vm3, %v21174_v40  ;;  %v21154_v10 = vpop.xlane.xlu0 %21153  ;;  %v21176_v25 = vmul.f32 %v26505_v0, %v31321_v23 }
0x15ad   : > { %v21178_v56 = vmul.f32 %v26507_v5, %v31323_v39  ;;  %25669 = vmatpush3.msra.mxu0 %v31272_v38  ;;  %25674 = vmatpush3.msra.mxu1 %v31274_v47  ;;  %v21157_v58 = vpop.xlane.xlu1 %21156  ;;  %26516 = vrcp.f32 %v21154_v10  ;;  %v32699_v5 = vld [vmem:[#allocation54_spill] sm:$0xff] }
0x15ae   : > { %22641 = vrot.lane.b32.xlu1 %v32682_v4, %s26619_s9  ;;  %22747 = vrot.lane.b32.xlu0 %v31128_v52, %s26615_s28  ;;  %26518 = vrcp.f32 %v21157_v58 }
0x15af   : > { %v26509_v22 = vpop.eup %26508  ;;  %25670 = vmatprep.mubr.msk.f32.mxu0 %vm26611_vm2, %v32223_v27  ;;  %25675 = vmatprep.mubr.msk.f32.mxu1 %vm26611_vm2, %v32223_v27 }
0x15b0   : > { %v26511_v38 = vpop.eup %26510  ;;  %25678 = vmatprep.subr.mxu0 %v32223_v27  ;;  %25683 = vmatprep.subr.mxu1 %v32223_v27  ;;  %v21160_v47 = vpop.xlane.xlu0 %21159  ;;  %v21180_v39 = vmul.f32 %v26509_v22, %v31330_v51  ;;  %v32701_v22 = vld [vmem:[#allocation94_spill] sm:$0xff] }
0x15b1   : > { %25671 = vmatmul.mubr.msk.f32.vlgmr.msra.gmra.mrb[244].mxu0 %vm1193_vm3, %v21176_v25  ;;  %25676 = vmatmul.mubr.msk.f32.vlgmr.msra.gmra.mrb[26].mxu1 %vm1193_vm3, %v21178_v56  ;;  %v22334_v23 = vpop.permute.xlu1 %22333  ;;  %v21182_v52 = vmul.f32 %v26511_v38, %v31332_v42  ;;  %26520 = vrcp.f32 %v21160_v47  ;;  %v32700_v56 = vld [vmem:[#allocation56_spill] sm:$0xff] }
0x15b2   : > { %25679 = vmatpush3.msra.mxu0 %v31276_v21  ;;  %25684 = vmatpush3.msra.mxu1 %v31444_v13 }
0x15b3   : > { %v26513_v6 = vpop.eup %26512  ;;  %22453 = vrot.lane.b32.xlu1 %v32683_v61, %s26625_s15  ;;  %22559 = vrot.lane.b32.xlu0 %v32684_v34, %s26621_s11  ;;  %v32702_v34 = vld [vmem:[#allocation32_spill] sm:$0xff] }
0x15b4   : > { %v26515_v36 = vpop.eup %26514  ;;  %25680 = vmatprep.mubr.msk.f32.mxu0 %vm26611_vm2, %v32223_v27  ;;  %25685 = vmatprep.mubr.msk.f32.mxu1 %vm26611_vm2, %v32223_v27  ;;  %v22258_v21 = vpop.permute.xlu0 %22257  ;;  %v21184_v13 = vmul.f32 %v26513_v6, %v31338_v26 }
0x15b5   : > { %25688 = vmatprep.subr.mxu0 %v32223_v27  ;;  %25693 = vmatprep.subr.mxu1 %v32223_v27  ;;  %v31550_v51 = vpop.permute.xlu1 %22439  ;;  %v21186_v42 = vmul.f32 %v26515_v36, %v31340_v46 }
0x15b6   : > { %25681 = vmatmul.mubr.msk.f32.vlgmr.msra.gmra.mrb[246].mxu0 %vm1193_vm3, %v21180_v39  ;;  %25686 = vmatmul.mubr.msk.f32.vlgmr.msra.gmra.mrb[28].mxu1 %vm1193_vm3, %v21182_v52  ;;  %v22864_v10 = vsel %vm1193_vm3, %v32699_v5, %v31550_v51 }
0x15b7   : > { %25689 = vmatpush3.msra.mxu0 %v31442_v48  ;;  %25694 = vmatpush3.msra.mxu1 %v31456_v28  ;;  %v26517_v17 = vpop.eup %26516 }
0x15b8   : > { %22643 = vrot.lane.b32.xlu1 %v32685_v32, %s26619_s9  ;;  %22621 = vrot.lane.b32.xlu0 %v32686_v53, %s26619_s9  ;;  %v31562_v2 = vpop.permute.xlu0 %22437  ;;  %v26519_v15 = vpop.eup %26518  ;;  %v21188_v26 = vmul.f32 %v26517_v17, %v31346_v16  ;;  %v32705_v17 = vld [vmem:[#allocation77_spill] sm:$0xff] }
0x15b9   : > { %25690 = vmatprep.mubr.msk.f32.mxu0 %vm26611_vm2, %v32223_v27  ;;  %25695 = vmatprep.mubr.msk.f32.mxu1 %vm26611_vm2, %v32223_v27  ;;  %v22504_v46 = vpop.permute.xlu1 %22503  ;;  %v21190_v28 = vmul.f32 %v26519_v15, %v31348_v18 }
0x15ba   : > { %25698 = vmatprep.subr.mxu0 %v32223_v27  ;;  %25703 = vmatprep.subr.mxu1 %v32223_v27  ;;  %v22881_v4 = vsel %vm22873_vm4, %v22864_v10, %v22504_v46  ;;  %v32706_v46 = vld [vmem:[#allocation107_spill] sm:$0xff] }
0x15bb   : > { %25691 = vmatmul.mubr.msk.f32.vlgmr.msra.gmra.mrb[248].mxu0 %vm1193_vm3, %v21184_v13  ;;  %25696 = vmatmul.mubr.msk.f32.vlgmr.msra.gmra.mrb[30].mxu1 %vm1193_vm3, %v21186_v42  ;;  %v26521_v48 = vpop.eup %26520  ;;  %v32704_v13 = vld [vmem:[#allocation93_spill] sm:$0xff] }
0x15bc   : > { %25699 = vmatpush3.msra.mxu0 %v31450_v29  ;;  %25704 = vmatpush3.msra.mxu1 %v22258_v21  ;;  %v31575_v8 = vpop.permute.xlu0 %22501  ;;  %v21192_v16 = vmul.f32 %v26521_v48, %v31354_v19  ;;  %v32689_v29 = vld [vmem:[#allocation64_spill] sm:$0xff] }
0x15bd   : > { %22705 = vrot.lane.b32.xlu1 %v32687_v49, %s26617_s30  ;;  %22433 = vrot.lane.b32.xlu0 %v32688_v7, %s26625_s15  ;;  %v22568_v44 = vpop.permute.xlu1 %22567  ;;  %v32691_v19 = vld [vmem:[#allocation84_spill] sm:$0xff] }
0x15be   : > { %25700 = vmatprep.mubr.msk.f32.mxu0 %vm26611_vm2, %v32223_v27  ;;  %25705 = vmatprep.mubr.msk.f32.mxu1 %vm26611_vm2, %v32223_v27  ;;  %v32703_v21 = vld [vmem:[#allocation36_spill] sm:$0xff] }
0x15bf   : > { %25708 = vmatprep.subr.mxu0 %v32223_v27  ;;  %25701 = vmatmul.mubr.msk.f32.vlgmr.msra.gmra.mrb[250].mxu0 %vm1193_vm3, %v21188_v26  ;;  %v32707_v26 = vld [vmem:[#allocation57_spill] sm:$0xff]  ;;  %v32708_v49 = vld [vmem:[#allocation40_spill] sm:$0xff] }
0x15c0   : > { %25706 = vmatmul.mubr.msk.f32.vlgmr.msra.gmra.mrb[32].mxu1 %vm1193_vm3, %v21190_v28  ;;  %25709 = vmatpush3.msra.mxu0 %v22334_v23  ;;  %v31589_v18 = vpop.permute.xlu0 %22565  ;;  %v22898_v23 = vsel %vm22890_vm5, %v22881_v4, %v22568_v44 }
0x15c1   : > { %22455 = vrot.lane.b32.xlu1 %v32689_v29, %s26625_s15  ;;  %22623 = vrot.lane.b32.xlu0 %v32690_v43, %s26619_s9  ;;  %v22442_v55 = vpop.permute.xlu1 %22441  ;;  %v32710_v29 = vld [vmem:[#allocation86_spill] sm:$0xff] }
0x15c2   : > { %25710 = vmatprep.mubr.msk.f32.mxu0 %vm26611_vm2, %v32223_v27  ;;  %v22865_v54 = vsel %vm1193_vm3, %v32696_v14, %v22442_v55  ;;  %v32714_v14 = vld [vmem:[#allocation116_spill] sm:$0xff] }
0x15c3   : > { %25711 = vmatmul.mubr.msk.f32.vlgmr.msra.gmra.mrb[252].mxu0 %vm1193_vm3, %v21192_v16  ;;  %v32709_v16 = vld [vmem:[#allocation110_spill] sm:$0xff] }
0x15c4   : > { %v31598_v37 = vpop.permute.xlu0 %22629 }
0x15c5   : > { %22517 = vrot.lane.b32.xlu1 %v32691_v19, %s26623_s13  ;;  %22685 = vrot.lane.b32.xlu0 %v32692_v59, %s26617_s30  ;;  %v31604_v45 = vpop.permute.xlu1 %22693  ;;  %v32711_v59 = vld [vmem:[#allocation21_spill] sm:$0xff] }
0x15c8   : > { %v22632_v1 = vpop.permute.xlu0 %22631 }
0x15c9   : > { %22707 = vrot.lane.b32.xlu1 %v32693_v33, %s26617_s30  ;;  %22435 = vrot.lane.b32.xlu0 %v32694_v62, %s26625_s15  ;;  %v22506_v27 = vpop.permute.xlu1 %22505  ;;  %v22915_v39 = vsel %vm22907_vm6, %v22898_v23, %v22632_v1  ;;  %v32712_v1 = vld [vmem:[#allocation98_spill] sm:$0xff] }
0x15ca   : > { %v22882_v12 = vsel %vm22873_vm4, %v22865_v54, %v22506_v27  ;;  %v32713_v33 = vld [vmem:[#allocation58_spill] sm:$0xff]  ;;  %v32715_v54 = vld [vmem:[#allocation99_spill] sm:$0xff] }
0x15cc   : > { %v22444_v31 = vpop.permute.xlu0 %22443 }
0x15cd   : > { %22769 = vrot.lane.b32.xlu1 %v31150_v63, %s26615_s28  ;;  %22497 = vrot.lane.b32.xlu0 %v32695_v41, %s26623_s13  ;;  %v31614_v50 = vpop.permute.xlu1 %22757  ;;  %v22866_v58 = vsel %vm1193_vm3, %v32700_v56, %v22444_v31 }
0x15d0   : > { %v22696_v40 = vpop.permute.xlu0 %22695 }
0x15d1   : > { %22519 = vrot.lane.b32.xlu1 %v32697_v35, %s26623_s13  ;;  %22687 = vrot.lane.b32.xlu0 %v32698_v9, %s26617_s30  ;;  %v22570_v63 = vpop.permute.xlu1 %22569  ;;  %v22932_v6 = vsel %vm22924_vm7, %v22915_v39, %v22696_v40 }
0x15d2   : > { %v22899_v0 = vsel %vm22890_vm5, %v22882_v12, %v22570_v63  ;;  %v32716_v63 = vld [vmem:[#allocation111_spill] sm:$0xff] }
0x15d4   : > { %v22508_v25 = vpop.permute.xlu0 %22507 }
0x15d5   : > { %22581 = vrot.lane.b32.xlu1 %v32701_v22, %s26621_s11  ;;  %22749 = vrot.lane.b32.xlu0 %v31130_v30, %s26615_s28  ;;  %v22883_v38 = vsel %vm22873_vm4, %v22866_v58, %v22508_v25  ;;  %v22634_v47 = vpop.permute.xlu1 %22633  ;;  %v32717_v58 = vld [vmem:[#allocation22_spill] sm:$0xff] }
0x15d6   : > { %v22916_v52 = vsel %vm22907_vm6, %v22899_v0, %v22634_v47 }
0x15d8   : > { %v22760_v61 = vpop.permute.xlu0 %22759 }
0x15d9   : > { %22771 = vrot.lane.b32.xlu1 %v31152_v20, %s26615_s28  ;;  %22499 = vrot.lane.b32.xlu0 %v32702_v34, %s26623_s13  ;;  %v31644_v30 = vsel %vm22941_vm8, %v22932_v6, %v22760_v61  ;;  %v22426_v36 = vpop.permute.xlu1 %22425 }
0x15da   : > { %v22857_v51 = vsel %vm1193_vm3, %v32703_v21, %v22426_v36 }
0x15dc   : > { %v22572_v42 = vpop.permute.xlu0 %22571 }
0x15dd   : > { %22583 = vrot.lane.b32.xlu1 %v32704_v13, %s26621_s11  ;;  %22561 = vrot.lane.b32.xlu0 %v32705_v17, %s26621_s11  ;;  %v22900_v32 = vsel %vm22890_vm5, %v22883_v38, %v22572_v42  ;;  %v22636_v20 = vpop.permute.xlu1 %22635  ;;  %v32718_v42 = vld [vmem:[#allocation59_spill] sm:$0xff] }
0x15de   : > { %v22917_v53 = vsel %vm22907_vm6, %v22900_v32, %v22636_v20  ;;  %v32719_v32 = vld [vmem:[#allocation37_spill] sm:$0xff] }
0x15e0   : > { %v22446_v15 = vpop.permute.xlu0 %22445 }
0x15e1   : > { %22645 = vrot.lane.b32.xlu1 %v32706_v46, %s26619_s9  ;;  %22751 = vrot.lane.b32.xlu0 %v31132_v60, %s26615_s28  ;;  %v22867_v48 = vsel %vm1193_vm3, %v32707_v26, %v22446_v15  ;;  %v22428_v28 = vpop.permute.xlu1 %22427 }
0x15e2   : > { %v22858_v7 = vsel %vm1193_vm3, %v32708_v49, %v22428_v28 }
0x15e4   : > { %v22698_v44 = vpop.permute.xlu0 %22697 }
0x15e5   : > { %22647 = vrot.lane.b32.xlu1 %v32709_v16, %s26619_s9  ;;  %22563 = vrot.lane.b32.xlu0 %v32710_v29, %s26621_s11  ;;  %v22933_v43 = vsel %vm22924_vm7, %v22916_v52, %v22698_v44  ;;  %v22490_v55 = vpop.permute.xlu1 %22489  ;;  %v32720_v16 = vld [vmem:[#allocation60_spill] sm:$0xff] }
0x15e6   : > { %v22874_v19 = vsel %vm22873_vm4, %v22857_v51, %v22490_v55  ;;  %v32721_v55 = vld [vmem:[#allocation38_spill] sm:$0xff] }
0x15e8   : > { %v22448_v60 = vpop.permute.xlu0 %22447 }
0x15e9   : > { %22709 = vrot.lane.b32.xlu1 %v32711_v59, %s26617_s30  ;;  %22625 = vrot.lane.b32.xlu0 %v32712_v1, %s26619_s9  ;;  %v22868_v62 = vsel %vm1193_vm3, %v32713_v33, %v22448_v60  ;;  %v22700_v27 = vpop.permute.xlu1 %22699 }
0x15ea   : > { %v22934_v31 = vsel %vm22924_vm7, %v22917_v53, %v22700_v27 }
0x15ec   : > { %v22510_v41 = vpop.permute.xlu0 %22509 }
0x15ed   : > { %22711 = vrot.lane.b32.xlu1 %v32714_v14, %s26617_s30  ;;  %22627 = vrot.lane.b32.xlu0 %v32715_v54, %s26619_s9  ;;  %v22884_v40 = vsel %vm22873_vm4, %v22867_v48, %v22510_v41  ;;  %v22492_v12 = vpop.permute.xlu1 %22491 }
0x15ee   : > { %v22875_v35 = vsel %vm22873_vm4, %v22858_v7, %v22492_v12 }
0x15f0   : > { %v22762_v9 = vpop.permute.xlu0 %22761 }
0x15f1   : > { %22689 = vrot.lane.b32.xlu0 %v32716_v63, %s26617_s30  ;;  %v31684_v0 = vsel %vm22941_vm8, %v22933_v43, %v22762_v9  ;;  %v22554_v5 = vpop.permute.xlu1 %22553 }
0x15f2   : > { %v22891_v10 = vsel %vm22890_vm5, %v22874_v19, %v22554_v5 }
0x15f4   : > { %v22512_v56 = vpop.permute.xlu0 %22511 }
0x15f5   : > { %22691 = vrot.lane.b32.xlu0 %v32717_v58, %s26617_s30  ;;  %v22885_v25 = vsel %vm22873_vm4, %v22868_v62, %v22512_v56  ;;  %v22764_v4 = vpop.permute.xlu1 %22763 }
0x15f6   : > { %v31691_v22 = vsel %vm22941_vm8, %v22934_v31, %v22764_v4  ;;  %v22976_v4 = vld [vmem:[%s32069_s5 + $0x8] sm:$0xff] }
0x15f8   : > { %v22574_v38 = vpop.permute.xlu0 %22573 }
0x15f9   : > { %v22901_v47 = vsel %vm22890_vm5, %v22884_v40, %v22574_v38  ;;  %v22556_v23 = vpop.permute.xlu1 %22555  ;;  %v22977_v38 = vld [vmem:[%s32069_s5 + $0x10] sm:$0xff] }
0x15fa   : > { %v22892_v52 = vsel %vm22890_vm5, %v22875_v35, %v22556_v23 }
0x15fc   : > { %v22576_v39 = vpop.permute.xlu0 %22575 }
0x15fd   : > { %v22902_v6 = vsel %vm22890_vm5, %v22885_v25, %v22576_v39  ;;  %v22618_v61 = vpop.permute.xlu1 %22617  ;;  %v22975_v25 = vld [vmem:[%s32069_s5] sm:$0xff]  ;;  %v22978_v39 = vld [vmem:[%s32069_s5 + $0x18] sm:$0xff] }
0x15fe   : > { %v22908_v34 = vsel %vm22907_vm6, %v22891_v10, %v22618_v61  ;;  %v25789_v61 = vpack.c.bf16 %v22978_v39, %v22977_v38  ;;  %v22981_v38 = vld [vmem:[%s32069_s5 + $0x30] sm:$0xff] }
0x1600   : > { %v22638_v36 = vpop.permute.xlu0 %22637 }
0x1601   : > { %v22918_v21 = vsel %vm22907_vm6, %v22901_v47, %v22638_v36  ;;  %v22450_v51 = vpop.permute.xlu1 %22449  ;;  %v22980_v36 = vld [vmem:[%s32069_s5 + $0x28] sm:$0xff] }
0x1602   : > { %v22869_v13 = vsel %vm1193_vm3, %v32718_v42, %v22450_v51 }
0x1604   : > { %v22430_v17 = vpop.permute.xlu0 %22429 }
0x1605   : > { %v22859_v20 = vsel %vm1193_vm3, %v32719_v32, %v22430_v17  ;;  %v22640_v53 = vpop.permute.xlu1 %22639 }
0x1606   : > { %v22919_v15 = vsel %vm22907_vm6, %v22902_v6, %v22640_v53 }
0x1608   : > { %v22620_v46 = vpop.permute.xlu0 %22619 }
0x1609   : > { %v22909_v26 = vsel %vm22907_vm6, %v22892_v52, %v22620_v46  ;;  %v22702_v48 = vpop.permute.xlu1 %22701  ;;  %v25785_v52 = vpack.c.bf16 %v22976_v4, %v22975_v25 }
0x160a   : > { %v22935_v28 = vsel %vm22924_vm7, %v22918_v21, %v22702_v48 }
0x160b   : > { %25786 = vmatprep.subr.bf16.mxu0 %v25785_v52  ;;  %25801 = vmatprep.subr.bf16.mxu1 %v25785_v52 }
0x160c   : > { %v22682_v49 = vpop.permute.xlu0 %22681  ;;  %25788 = vmatpush3.bf16.msra.mxu0 %v25785_v52  ;;  %25805 = vmatpush3.bf16.msra.mxu1 %v25785_v52 }
0x160d   : > { %v22925_v7 = vsel %vm22924_vm7, %v22908_v34, %v22682_v49  ;;  %v22452_v44 = vpop.permute.xlu1 %22451  ;;  %v22979_v34 = vld [vmem:[%s32069_s5 + $0x20] sm:$0xff]  ;;  %25790 = vmatprep.subr.bf16.mxu0 %v25789_v61  ;;  %25802 = vmatprep.subr.bf16.mxu1 %v25789_v61 }
0x160e   : > { %v22870_v29 = vsel %vm1193_vm3, %v32720_v16, %v22452_v44  ;;  %v32723_v44 = vld [vmem:[#allocation41_spill] sm:$0xff] }
0x1610   : > { %v22432_v43 = vpop.permute.xlu0 %22431  ;;  %25792 = vmatpush3.bf16.msra.mxu0 %v25789_v61  ;;  %25806 = vmatpush3.bf16.msra.mxu1 %v25789_v61 }
0x1611   : > { %v22860_v19 = vsel %vm1193_vm3, %v32721_v55, %v22432_v43  ;;  %v22514_v60 = vpop.permute.xlu1 %22513 }
0x1612   : > { %v22886_v59 = vsel %vm22873_vm4, %v22869_v13, %v22514_v60  ;;  %v25793_v13 = vpack.c.bf16 %v22980_v36, %v22979_v34 }
0x1614   : > { %v22494_v1 = vpop.permute.xlu0 %22493  ;;  %25794 = vmatprep.subr.bf16.mxu0 %v25793_v13  ;;  %25803 = vmatprep.subr.bf16.mxu1 %v25793_v13 }
0x1615   : > { %v22876_v33 = vsel %vm22873_vm4, %v22859_v20, %v22494_v1  ;;  %v22704_v62 = vpop.permute.xlu1 %22703  ;;  %25796 = vmatpush3.bf16.msra.mxu0 %v25793_v13  ;;  %25807 = vmatpush3.bf16.msra.mxu1 %v25793_v13 }
0x1616   : > { %v22936_v27 = vsel %vm22924_vm7, %v22919_v15, %v22704_v62  ;;  %v32724_v62 = vld [vmem:[#allocation62_spill] sm:$0xff] }
0x1618   : > { %v22684_v31 = vpop.permute.xlu0 %22683 }
0x1619   : > { %v22926_v41 = vsel %vm22924_vm7, %v22909_v26, %v22684_v31  ;;  %v22766_v14 = vpop.permute.xlu1 %22765 }
0x161a   : > { %v31715_v54 = vsel %vm22941_vm8, %v22935_v28, %v22766_v14  ;;  %v32722_v28 = vld [vmem:[#allocation61_spill] sm:$0xff] }
0x161c   : > { %v22746_v40 = vpop.permute.xlu0 %22745 }
0x161d   : > { %v31718_v12 = vsel %vm22941_vm8, %v22925_v7, %v22746_v40  ;;  %v22516_v35 = vpop.permute.xlu1 %22515 }
0x161e   : > { %v22887_v9 = vsel %vm22873_vm4, %v22870_v29, %v22516_v35 }
0x1620   : > { %v22496_v63 = vpop.permute.xlu0 %22495 }
0x1621   : > { %v22877_v5 = vsel %vm22873_vm4, %v22860_v19, %v22496_v63  ;;  %v22578_v10 = vpop.permute.xlu1 %22577 }
0x1622   : > { %v22903_v56 = vsel %vm22890_vm5, %v22886_v59, %v22578_v10 }
0x1624   : > { %v22558_v58 = vpop.permute.xlu0 %22557 }
0x1625   : > { %v22893_v47 = vsel %vm22890_vm5, %v22876_v33, %v22558_v58  ;;  %v22768_v23 = vpop.permute.xlu1 %22767 }
0x1626   : > { %v31737_v6 = vsel %vm22941_vm8, %v22936_v27, %v22768_v23 }
0x1628   : > { %v22748_v21 = vpop.permute.xlu0 %22747 }
0x1629   : > { %v31746_v51 = vsel %vm22941_vm8, %v22926_v41, %v22748_v21  ;;  %v22580_v42 = vpop.permute.xlu1 %22579  ;;  %v32725_v41 = vld [vmem:[#allocation42_spill] sm:$0xff] }
0x162a   : > { %v22904_v17 = vsel %vm22890_vm5, %v22887_v9, %v22580_v42 }
0x162c   : > { %v22560_v32 = vpop.permute.xlu0 %22559 }
0x162d   : > { %v22894_v20 = vsel %vm22890_vm5, %v22877_v5, %v22560_v32  ;;  %v22642_v53 = vpop.permute.xlu1 %22641 }
0x162e   : > { %v22920_v15 = vsel %vm22907_vm6, %v22903_v56, %v22642_v53 }
0x1630   : > { %v22622_v46 = vpop.permute.xlu0 %22621 }
0x1631   : > { %v31752_v26 = vsel %vm22907_vm6, %v22893_v47, %v22622_v46  ;;  %v22454_v48 = vpop.permute.xlu1 %22453  ;;  %v22982_v47 = vld [vmem:[%s32069_s5 + $0x38] sm:$0xff] }
0x1632   : > { %v22871_v49 = vsel %vm1193_vm3, %v32722_v28, %v22454_v48  ;;  %v25797_v23 = vpack.c.bf16 %v22982_v47, %v22981_v38 }
0x1634   : > { %v22434_v7 = vpop.permute.xlu0 %22433  ;;  %25798 = vmatprep.subr.bf16.mxu0 %v25797_v23  ;;  %25804 = vmatprep.subr.bf16.mxu1 %v25797_v23 }
0x1635   : > { %v22861_v16 = vsel %vm1193_vm3, %v32723_v44, %v22434_v7  ;;  %v22644_v29 = vpop.permute.xlu1 %22643  ;;  %25800 = vmatpush3.bf16.msra.mxu0 %v25797_v23  ;;  %25808 = vmatpush3.bf16.msra.mxu1 %v25797_v23 }
0x1636   : > { %v22921_v43 = vsel %vm22907_vm6, %v22904_v17, %v22644_v29 }
0x1638   : > { %v22624_v55 = vpop.permute.xlu0 %22623 }
0x1639   : > { %v31760_v19 = vsel %vm22907_vm6, %v22894_v20, %v22624_v55  ;;  %v22706_v60 = vpop.permute.xlu1 %22705 }
0x163a   : > { %v31763_v59 = vsel %vm22924_vm7, %v22920_v15, %v22706_v60 }
0x163c   : > { %v31765_v1 = vpop.permute.xlu0 %22685 }
0x163d   : > { %v22456_v33 = vpop.permute.xlu1 %22455 }
0x163e   : > { %v31769_v27 = vsel %vm1193_vm3, %v32724_v62, %v22456_v33 }
0x1640   : > { %v22436_v31 = vpop.permute.xlu0 %22435 }
0x1641   : > { %v22862_v14 = vsel %vm1193_vm3, %v32725_v41, %v22436_v31  ;;  %v22518_v40 = vpop.permute.xlu1 %22517 }
0x1642   : > { %v31774_v35 = vsel %vm22873_vm4, %v22871_v49, %v22518_v40 }
0x1644   : > { %v22498_v9 = vpop.permute.xlu0 %22497 }
0x1645   : > { %v31777_v63 = vsel %vm22873_vm4, %v22861_v16, %v22498_v9  ;;  %v22708_v5 = vpop.permute.xlu1 %22707 }
0x1646   : > { %v31780_v10 = vsel %vm22924_vm7, %v22921_v43, %v22708_v5 }
0x1648   : > { %v31782_v56 = vpop.permute.xlu0 %22687 }
0x164c   : > { %v31784_v58 = vpop.permute.xlu0 %22749 }
0x1650   : > { %v22500_v25 = vpop.permute.xlu0 %22499 }
0x1651   : > { %v31787_v4 = vsel %vm22873_vm4, %v22862_v14, %v22500_v25 }
0x1671   : > { %v21265_v52 = vpop.f32.mrb[18].mxu1 }
0x1672   : > { %22809 = vrot.lane.b32.xlu0 %v21265_v52, %s26614_s23  ;;  %v25637_v39 = vpop.f32.mrb[19].mxu1 }
0x1675   : > { %v21341_v61 = vpop.f32.mrb[238].mxu0  ;;  %v21417_v34 = vpop.f32.mrb[20].mxu1 }
0x1676   : > { %v25642_v36 = vpop.f32.mrb[239].mxu0  ;;  %22811 = vrot.lane.b32.xlu0 %v21341_v61, %s26614_s23  ;;  %v25647_v21 = vpop.f32.mrb[21].mxu1 }
0x167a   : > { %v21493_v42 = vpop.f32.mrb[240].mxu0  ;;  %v21569_v13 = vpop.f32.mrb[22].mxu1  ;;  %22813 = vrot.lane.b32.xlu0 %v21417_v34, %s26614_s23 }
0x167b   : > { %v25652_v17 = vpop.f32.mrb[241].mxu0  ;;  %v25657_v32 = vpop.f32.mrb[23].mxu1 }
0x167e   : > { %22815 = vrot.lane.b32.xlu0 %v21493_v42, %s26614_s23 }
0x167f   : > { %v21645_v20 = vpop.f32.mrb[242].mxu0  ;;  %v21721_v53 = vpop.f32.mrb[24].mxu1 }
0x1680   : > { %v25662_v15 = vpop.f32.mrb[243].mxu0  ;;  %22821 = vrot.lane.b32.xlu1 %v21721_v53, %s26614_s23  ;;  %v25667_v46 = vpop.f32.mrb[25].mxu1  ;;  %v32726_v53 = vld [vmem:[#allocation53_spill] sm:$0xff] }
0x1681   : > { %v22863_v15 = vsel %vm1193_vm3, %v32726_v53, %v31562_v2  ;;  %v22927_v46 = vsel %vm22924_vm7, %v31752_v26, %v31765_v1 }
0x1684   : > { %v21797_v48 = vpop.f32.mrb[244].mxu0  ;;  %v21873_v28 = vpop.f32.mrb[26].mxu1  ;;  %22773 = vrot.lane.b32.xlu1 %v31154_v11, %s26615_s28 }
0x1685   : > { %v25672_v49 = vpop.f32.mrb[245].mxu0  ;;  %22823 = vrot.lane.b32.xlu0 %v21797_v48, %s26614_s23  ;;  %v25677_v7 = vpop.f32.mrb[27].mxu1  ;;  %v22944_v48 = vsel %vm22941_vm8, %v22927_v46, %v31784_v58 }
0x1688   : > { %22775 = vrot.lane.b32.xlu1 %v31156_v24, %s26615_s28 }
0x1689   : > { %v21949_v44 = vpop.f32.mrb[246].mxu0  ;;  %v22025_v16 = vpop.f32.mrb[28].mxu1  ;;  %22825 = vrot.lane.b32.xlu0 %v21873_v28, %s26614_s23 }
0x168a   : > { %v25682_v29 = vpop.f32.mrb[247].mxu0  ;;  %v25687_v43 = vpop.f32.mrb[29].mxu1 }
0x168c   : > { %22827 = vrot.lane.b32.xlu1 %v21949_v44, %s26614_s23 }
0x168d   : > { %22753 = vrot.lane.b32.xlu0 %v31134_v3, %s26615_s28  ;;  %v22562_v3 = vpop.permute.xlu0 %22561 }
0x168e   : > { %v22101_v55 = vpop.f32.mrb[248].mxu0  ;;  %v22177_v11 = vpop.f32.mrb[30].mxu1 }
0x168f   : > { %v25692_v60 = vpop.f32.mrb[249].mxu0  ;;  %v25697_v33 = vpop.f32.mrb[31].mxu1 }
0x1690   : > { %22829 = vrot.lane.b32.xlu1 %v22025_v16, %s26614_s23 }
0x1691   : > { %22755 = vrot.lane.b32.xlu0 %v31136_v57, %s26615_s28  ;;  %v31819_v57 = vpop.permute.xlu1 %22769  ;;  %v22752_v9 = vpop.permute.xlu0 %22751 }
0x1692   : > { %v22253_v24 = vpop.f32.mrb[250].mxu0 }
0x1693   : > { %v22329_v62 = vpop.f32.mrb[32].mxu1  ;;  %v25702_v31 = vpop.f32.mrb[251].mxu0 }
0x1694   : > { %v25707_v41 = vpop.f32.mrb[33].mxu1  ;;  %22831 = vrot.lane.b32.xlu1 %v22101_v55, %s26614_s23 }
0x1695   : > { %22817 = vrot.lane.b32.xlu0 %v21569_v13, %s26614_s23  ;;  %v31821_v5 = vpop.permute.xlu1 %22519  ;;  %v22564_v25 = vpop.permute.xlu0 %22563 }
0x1696   : > { %v22405_v14 = vpop.f32.mrb[252].mxu0 }
0x1697   : > { %v25712_v40 = vpop.f32.mrb[253].mxu0 }
0x1698   : > { %22833 = vrot.lane.b32.xlu1 %v22177_v11, %s26614_s23 }
0x1699   : > { %22819 = vrot.lane.b32.xlu0 %v21645_v20, %s26614_s23  ;;  %v31823_v38 = vpop.permute.xlu1 %22581  ;;  %v22626_v47 = vpop.permute.xlu0 %22625 }
0x169c   : > { %22835 = vrot.lane.b32.xlu1 %v22253_v24, %s26614_s23 }
0x169d   : > { %v31825_v23 = vpop.permute.xlu1 %22771  ;;  %v22628_v52 = vpop.permute.xlu0 %22627 }
0x16a0   : > { %22837 = vrot.lane.b32.xlu1 %v22329_v62, %s26614_s23  ;;  %v22895_v62 = vsel %vm22890_vm5, %v31777_v63, %v22562_v3  ;;  %v22954_v3 = vsel %vm22941_vm8, %v31763_v59, %v31819_v57  ;;  %v22905_v59 = vsel %vm22890_vm5, %v31774_v35, %v31823_v38 }
0x16a1   : > { %v31827_v39 = vpop.permute.xlu1 %22583  ;;  %v22690_v61 = vpop.permute.xlu0 %22689 }
0x16a4   : > { %22839 = vrot.lane.b32.xlu1 %v22405_v14, %s26614_s23 }
0x16a5   : > { %v31829_v34 = vpop.permute.xlu1 %22645  ;;  %v22692_v36 = vpop.permute.xlu0 %22691 }
0x16a9   : > { %v31831_v21 = vpop.permute.xlu1 %22647 }
0x16ad   : > { %v31836_v17 = vpop.permute.xlu1 %22709 }
0x16b1   : > { %v31856_v2 = vpop.permute.xlu1 %22711 }
0x16e4   : > { %v22810_v42 = vpop.permute.xlu0 %22809 }
0x16e5   : > { %v22959_v13 = vsel %vm22958_vm9, %v31718_v12, %v22810_v42  ;;  %v22880_v12 = vsel %vm22873_vm4, %v22863_v15, %v31575_v8  ;;  %v22928_v8 = vsel %vm22924_vm7, %v31760_v19, %v31782_v56 }
0x16e6   : > { %25729 = vmatprep.mubr.msk.f32.mxu0 %vm418_vm0, %v22959_v13  ;;  %v22945_v26 = vsel %vm22941_vm8, %v22928_v8, %v22752_v9  ;;  %v22896_v9 = vsel %vm22890_vm5, %v31787_v4, %v22564_v25 }
0x16e7   : > { %v22913_v63 = vsel %vm22907_vm6, %v22896_v9, %v22628_v52  ;;  %v22955_v52 = vsel %vm22941_vm8, %v31780_v10, %v31825_v23 }
0x16e8   : > { %v22812_v32 = vpop.permute.xlu0 %22811 }
0x16e9   : > { %v22960_v20 = vsel %vm22958_vm9, %v31746_v51, %v22812_v32  ;;  %v22897_v51 = vsel %vm22890_vm5, %v22880_v12, %v31589_v18 }
0x16ea   : > { %25730 = vmatmul.mubr.msk.f32.vlgmr.msra.gmra.mrb[254].mxu0 %vm418_vm0, %v22960_v20  ;;  %v22914_v7 = vsel %vm22907_vm6, %v22897_v51, %v31598_v37  ;;  %v22889_v20 = vsel %vm22873_vm4, %v31769_v27, %v31821_v5  ;;  %v31935_v5 = vld [vmem:[%s32070_s6] ss:$0 sm:$0xff] }
0x16eb   : > { %v22931_v58 = vsel %vm22924_vm7, %v22914_v7, %v31604_v45  ;;  %v22906_v35 = vsel %vm22890_vm5, %v22889_v20, %v31827_v39 }
0x16ec   : > { %v22814_v28 = vpop.permute.xlu0 %22813  ;;  %v22948_v44 = vsel %vm22941_vm8, %v22931_v58, %v31614_v50 }
0x16ed   : > { %v22961_v49 = vsel %vm22958_vm9, %v22944_v48, %v22814_v28 }
0x16ee   : > { %25732 = vmatprep.mubr.msk.f32.mxu0 %vm418_vm0, %v22961_v49 }
0x16f0   : > { %v22816_v1 = vpop.permute.xlu0 %22815 }
0x16f1   : > { %v22962_v18 = vsel %vm22958_vm9, %v22945_v26, %v22816_v1 }
0x16f2   : > { %v22822_v37 = vpop.permute.xlu1 %22821  ;;  %25733 = vmatmul.mubr.msk.f32.gmra.mrb[0].mxu0 %vm418_vm0, %v22962_v18 }
0x16f3   : > { %v22965_v16 = vsel %vm22958_vm9, %v22948_v44, %v22822_v37 }
0x16f4   : > { %25738 = vmatprep.mubr.msk.f32.mxu1 %vm418_vm0, %v22965_v16 }
0x16f6   : > { %v22774_v29 = vpop.permute.xlu1 %22773 }
0x16f7   : > { %v22824_v19 = vpop.permute.xlu0 %22823 }
0x16f8   : > { %v22966_v56 = vsel %vm22958_vm9, %v31644_v30, %v22824_v19 }
0x16f9   : > { %25739 = vmatmul.mubr.msk.f32.vlgmr.msra.gmra.mrb[34].mxu1 %vm418_vm0, %v22966_v56 }
0x16fa   : > { %v22776_v45 = vpop.permute.xlu1 %22775 }
0x16fb   : > { %v22826_v43 = vpop.permute.xlu0 %22825 }
0x16fc   : > { %v22967_v55 = vsel %vm22958_vm9, %v31684_v0, %v22826_v43  ;;  %v22912_v0 = vsel %vm22907_vm6, %v22895_v62, %v22626_v47  ;;  %v22930_v47 = vsel %vm22924_vm7, %v22913_v63, %v22692_v36  ;;  %v22922_v36 = vsel %vm22907_vm6, %v22905_v59, %v31829_v34 }
0x16fd   : > { %25741 = vmatprep.mubr.msk.f32.mxu1 %vm418_vm0, %v22967_v55  ;;  %v22929_v31 = vsel %vm22924_vm7, %v22912_v0, %v22690_v61  ;;  %v22939_v32 = vsel %vm22924_vm7, %v22922_v36, %v31836_v17  ;;  %v22923_v34 = vsel %vm22907_vm6, %v22906_v35, %v31831_v21 }
0x16fe   : > { %v22828_v50 = vpop.permute.xlu1 %22827  ;;  %v22956_v10 = vsel %vm22941_vm8, %v22939_v32, %v22774_v29  ;;  %v22940_v17 = vsel %vm22924_vm7, %v22923_v34, %v31856_v2 }
0x16ff   : > { %v22968_v11 = vsel %vm22958_vm9, %v31691_v22, %v22828_v50  ;;  %v22754_v60 = vpop.permute.xlu0 %22753  ;;  %v22957_v53 = vsel %vm22941_vm8, %v22940_v17, %v22776_v45 }
0x1700   : > { %25742 = vmatmul.mubr.msk.f32.gmra.mrb[36].mxu1 %vm418_vm0, %v22968_v11  ;;  %v22946_v22 = vsel %vm22941_vm8, %v22929_v31, %v22754_v60 }
0x1702   : > { %v22830_v33 = vpop.permute.xlu1 %22829 }
0x1703   : > { %v22756_v24 = vpop.permute.xlu0 %22755  ;;  %v22969_v30 = vsel %vm22958_vm9, %v31715_v54, %v22830_v33 }
0x1704   : > { %25744 = vmatprep.mubr.msk.f32.mxu1 %vm418_vm0, %v22969_v30 }
0x1706   : > { %v22832_v41 = vpop.permute.xlu1 %22831 }
0x1707   : > { %v22818_v14 = vpop.permute.xlu0 %22817  ;;  %v22970_v40 = vsel %vm22958_vm9, %v31737_v6, %v22832_v41  ;;  %v22947_v6 = vsel %vm22941_vm8, %v22930_v47, %v22756_v24 }
0x1708   : > { %v22963_v54 = vsel %vm22958_vm9, %v22946_v22, %v22818_v14  ;;  %25745 = vmatmul.mubr.msk.f32.gmra.mrb[38].mxu1 %vm418_vm0, %v22970_v40 }
0x1709   : > { %25735 = vmatprep.mubr.msk.f32.mxu0 %vm418_vm0, %v22963_v54 }
0x170a   : > { %v22834_v61 = vpop.permute.xlu1 %22833 }
0x170b   : > { %v22820_v42 = vpop.permute.xlu0 %22819  ;;  %v22971_v4 = vsel %vm22958_vm9, %v22954_v3, %v22834_v61 }
0x170c   : > { %v22964_v25 = vsel %vm22958_vm9, %v22947_v6, %v22820_v42  ;;  %25747 = vmatprep.mubr.msk.f32.mxu1 %vm418_vm0, %v22971_v4 }
0x170d   : > { %25736 = vmatmul.mubr.msk.f32.gmra.mrb[2].mxu0 %vm418_vm0, %v22964_v25 }
0x170e   : > { %v22836_v13 = vpop.permute.xlu1 %22835 }
0x170f   : > { %v22972_v57 = vsel %vm22958_vm9, %v22955_v52, %v22836_v13 }
0x1710   : > { %25748 = vmatmul.mubr.msk.f32.gmra.mrb[40].mxu1 %vm418_vm0, %v22972_v57 }
0x1712   : > { %v22838_v23 = vpop.permute.xlu1 %22837 }
0x1713   : > { %v22973_v38 = vsel %vm22958_vm9, %v22956_v10, %v22838_v23 }
0x1714   : > { %25750 = vmatprep.mubr.msk.f32.mxu1 %vm418_vm0, %v22973_v38 }
0x1716   : > { %v22840_v15 = vpop.permute.xlu1 %22839 }
0x1717   : > { %v22974_v27 = vsel %vm22958_vm9, %v22957_v53, %v22840_v15 }
0x1718   : > { %25751 = vmatmul.mubr.msk.f32.gmra.mrb[42].mxu1 %vm418_vm0, %v22974_v27 }
0x17bd   : > { %v25731_v39 = vpop.f32.mrb[254].mxu0 }
0x17be   : > { %v31938_v21 = vadd.f32 %v25731_v39, %v31935_v5  ;;  %v23104_v46 = vpop.f32.mrb[255].mxu0 }
0x17bf   : > { %v31941_v12 = vadd.f32 %v31935_v5, %v23104_v46 }
0x17c0   : > { %v23200_v48 = vand.u32 2147483647, %v31938_v21  ;;  %v23184_v10 = vmax.f32 %v31938_v21, 0.0 }
0x17c1   : > { %v23199_v28 = vand.u32 2147483647, %v31941_v12  ;;  %v23183_v34 = vmax.f32 %v31941_v12, 0.0 }
0x17c2   : > { %v23216_v51 = vsub.f32 0.0, %v23200_v48 }
0x17c3   : > { %v23215_v49 = vsub.f32 0.0, %v23199_v28 }
0x17c4   : > { %v23233_v7 = vmul.f32 1.442695, %v23216_v51 }
0x17c5   : > { %v23231_v2 = vmul.f32 1.442695, %v23215_v49  ;;  %v25734_v8 = vpop.f32.mrb[0].mxu0 }
0x17c6   : > { %26522 = vpow2.f32 %v23233_v7  ;;  %v31946_v26 = vadd.f32 %v25734_v8, %v31935_v5  ;;  %v23114_v1 = vpop.f32.mrb[1].mxu0 }
0x17c7   : > { %26524 = vpow2.f32 %v23231_v2  ;;  %v31949_v58 = vadd.f32 %v31935_v5, %v23114_v1 }
0x17c8   : > { %v23202_v18 = vand.u32 2147483647, %v31946_v26 }
0x17c9   : > { %v23201_v44 = vand.u32 2147483647, %v31949_v58 }
0x17ca   : > { %v23218_v37 = vsub.f32 0.0, %v23202_v18 }
0x17cb   : > { %v23217_v16 = vsub.f32 0.0, %v23201_v44 }
0x17cc   : > { %v23237_v29 = vmul.f32 1.442695, %v23218_v37  ;;  %v25740_v19 = vpop.f32.mrb[34].mxu1 }
0x17cd   : > { %v23235_v56 = vmul.f32 1.442695, %v23217_v16  ;;  %v31954_v45 = vadd.f32 %v25740_v19, %v31935_v5  ;;  %v23134_v43 = vpop.f32.mrb[35].mxu1 }
0x17ce   : > { %26526 = vpow2.f32 %v23237_v29  ;;  %v31957_v55 = vadd.f32 %v31935_v5, %v23134_v43 }
0x17cf   : > { %26528 = vpow2.f32 %v23235_v56  ;;  %v23206_v50 = vand.u32 2147483647, %v31954_v45 }
0x17d0   : > { %v26523_v11 = vpop.eup %26522  ;;  %v23205_v60 = vand.u32 2147483647, %v31957_v55 }
0x17d1   : > { %v26525_v33 = vpop.eup %26524  ;;  %v23264_v24 = vadd.f32 1.0, %v26523_v11  ;;  %v23222_v30 = vsub.f32 0.0, %v23206_v50  ;;  %v23186_v50 = vmax.f32 %v31946_v26, 0.0 }
0x17d2   : > { %v23263_v62 = vadd.f32 1.0, %v26525_v33  ;;  %v23221_v0 = vsub.f32 0.0, %v23205_v60 }
0x17d3   : > { %26530 = vlog2.f32 %v23264_v24  ;;  %v23245_v31 = vmul.f32 1.442695, %v23222_v30  ;;  %v25743_v41 = vpop.f32.mrb[36].mxu1  ;;  %v23185_v30 = vmax.f32 %v31949_v58, 0.0 }
0x17d4   : > { %26532 = vlog2.f32 %v23263_v62  ;;  %v23243_v22 = vmul.f32 1.442695, %v23221_v0  ;;  %v31962_v14 = vadd.f32 %v25743_v41, %v31935_v5  ;;  %v23144_v40 = vpop.f32.mrb[37].mxu1 }
0x17d5   : > { %26534 = vpow2.f32 %v23245_v31  ;;  %v31965_v9 = vadd.f32 %v31935_v5, %v23144_v40 }
0x17d6   : > { %26536 = vpow2.f32 %v23243_v22  ;;  %v23208_v54 = vand.u32 2147483647, %v31962_v14 }
0x17d7   : > { %v23207_v63 = vand.u32 2147483647, %v31965_v9 }
0x17d8   : > { %v26527_v3 = vpop.eup %26526  ;;  %v23224_v47 = vsub.f32 0.0, %v23208_v54 }
0x17d9   : > { %v26529_v61 = vpop.eup %26528  ;;  %v23266_v6 = vadd.f32 1.0, %v26527_v3  ;;  %v23223_v42 = vsub.f32 0.0, %v23207_v63 }
0x17da   : > { %v23265_v4 = vadd.f32 1.0, %v26529_v61  ;;  %v23249_v25 = vmul.f32 1.442695, %v23224_v47 }
0x17db   : > { %26538 = vlog2.f32 %v23266_v6  ;;  %v23247_v52 = vmul.f32 1.442695, %v23223_v42  ;;  %v25746_v13 = vpop.f32.mrb[38].mxu1  ;;  %v23190_v42 = vmax.f32 %v31954_v45, 0.0 }
0x17dc   : > { %26540 = vlog2.f32 %v23265_v4  ;;  %v31970_v59 = vadd.f32 %v25746_v13, %v31935_v5  ;;  %v23154_v57 = vpop.f32.mrb[39].mxu1 }
0x17dd   : > { %v26531_v36 = vpop.eup %26530  ;;  %26542 = vpow2.f32 %v23249_v25  ;;  %v31973_v32 = vadd.f32 %v31935_v5, %v23154_v57 }
0x17de   : > { %v26533_v20 = vpop.eup %26532  ;;  %v23282_v23 = vmul.f32 0.6931472, %v26531_v36  ;;  %26544 = vpow2.f32 %v23247_v52  ;;  %v23210_v35 = vand.u32 2147483647, %v31970_v59 }
0x17df   : > { %v26535_v38 = vpop.eup %26534  ;;  %v23280_v17 = vmul.f32 0.6931472, %v26533_v20  ;;  %v23209_v53 = vand.u32 2147483647, %v31973_v32 }
0x17e0   : > { %v26537_v15 = vpop.eup %26536  ;;  %v23312_v27 = vadd.f32 %v23282_v23, %v23184_v10  ;;  %v23270_v39 = vadd.f32 1.0, %v26535_v38  ;;  %v23226_v21 = vsub.f32 0.0, %v23210_v35  ;;  %v25737_v46 = vpop.f32.mrb[2].mxu0  ;;  %v23189_v10 = vmax.f32 %v31957_v55, 0.0 }
0x17e1   : > { %v23311_v48 = vadd.f32 %v23280_v17, %v23183_v34  ;;  %v23269_v28 = vadd.f32 1.0, %v26537_v15  ;;  %v23225_v51 = vsub.f32 0.0, %v23209_v53  ;;  %v31986_v49 = vadd.f32 %v25737_v46, %v31935_v5  ;;  %v23124_v7 = vpop.f32.mrb[3].mxu0 }
0x17e2   : > { %23328 = vst.msk [vmem:[%s31981_s19 + $0x8] sm:$0xff] %vm418_vm0, %v23312_v27  ;;  %26546 = vlog2.f32 %v23270_v39  ;;  %v23253_v12 = vmul.f32 1.442695, %v23226_v21  ;;  %v31991_v2 = vadd.f32 %v31935_v5, %v23124_v7 }
0x17e3   : > { %23327 = vst.msk [vmem:[%s31981_s19] sm:$0xff] %vm418_vm0, %v23311_v48  ;;  %26548 = vlog2.f32 %v23269_v28  ;;  %v23251_v8 = vmul.f32 1.442695, %v23225_v51  ;;  %v23204_v1 = vand.u32 2147483647, %v31986_v49  ;;  %v25749_v18 = vpop.f32.mrb[40].mxu1 }
0x17e4   : > { %26550 = vpow2.f32 %v23253_v12  ;;  %v23203_v44 = vand.u32 2147483647, %v31991_v2  ;;  %v31998_v37 = vadd.f32 %v25749_v18, %v31935_v5  ;;  %v23164_v16 = vpop.f32.mrb[41].mxu1  ;;  %v23192_v51 = vmax.f32 %v31962_v14, 0.0 }
0x17e5   : > { %v26539_v29 = vpop.eup %26538  ;;  %26552 = vpow2.f32 %v23251_v8  ;;  %v23220_v19 = vsub.f32 0.0, %v23204_v1  ;;  %v32001_v56 = vadd.f32 %v31935_v5, %v23164_v16  ;;  %v23191_v8 = vmax.f32 %v31965_v9, 0.0 }
0x17e6   : > { %v26541_v43 = vpop.eup %26540  ;;  %v23286_v11 = vmul.f32 0.6931472, %v26539_v29  ;;  %v23219_v60 = vsub.f32 0.0, %v23203_v44  ;;  %v23212_v33 = vand.u32 2147483647, %v31998_v37 }
0x17e7   : > { %v26543_v24 = vpop.eup %26542  ;;  %v23284_v62 = vmul.f32 0.6931472, %v26541_v43  ;;  %v23241_v0 = vmul.f32 1.442695, %v23220_v19  ;;  %v23211_v26 = vand.u32 2147483647, %v32001_v56 }
0x17e8   : > { %v26545_v31 = vpop.eup %26544  ;;  %v23314_v41 = vadd.f32 %v23286_v11, %v23186_v50  ;;  %v23272_v22 = vadd.f32 1.0, %v26543_v24  ;;  %v23239_v40 = vmul.f32 1.442695, %v23219_v60  ;;  %v23228_v54 = vsub.f32 0.0, %v23212_v33 }
0x17e9   : > { %v23313_v63 = vadd.f32 %v23284_v62, %v23185_v30  ;;  %v23271_v3 = vadd.f32 1.0, %v26545_v31  ;;  %26554 = vpow2.f32 %v23241_v0  ;;  %v23227_v58 = vsub.f32 0.0, %v23211_v26 }
0x17ea   : > { %23330 = vst.msk [vmem:[%s31981_s19 + $0x18] sm:$0xff] %vm418_vm0, %v23314_v41  ;;  %26556 = vlog2.f32 %v23272_v22  ;;  %v23257_v47 = vmul.f32 1.442695, %v23228_v54  ;;  %v23194_v11 = vmax.f32 %v31970_v59, 0.0  ;;  %v23193_v33 = vmax.f32 %v31973_v32, 0.0 }
0x17eb   : > { %23329 = vst.msk [vmem:[%s31981_s19 + $0x10] sm:$0xff] %vm418_vm0, %v23313_v63  ;;  %26558 = vlog2.f32 %v23271_v3  ;;  %v25752_v61 = vpop.f32.mrb[42].mxu1  ;;  %v23255_v57 = vmul.f32 1.442695, %v23227_v58  ;;  %v23187_v26 = vmax.f32 %v31991_v2, 0.0  ;;  %v23196_v58 = vmax.f32 %v31998_v37, 0.0 }
0x17ec   : > { %v26547_v6 = vpop.eup %26546  ;;  %26560 = vpow2.f32 %v23239_v40  ;;  %v32013_v4 = vadd.f32 %v25752_v61, %v31935_v5  ;;  %v23174_v25 = vpop.f32.mrb[43].mxu1  ;;  %v23188_v40 = vmax.f32 %v31986_v49, 0.0 }
0x17ed   : > { %v26549_v52 = vpop.eup %26548  ;;  %v23294_v13 = vmul.f32 0.6931472, %v26547_v6  ;;  %26562 = vpow2.f32 %v23257_v47  ;;  %v32016_v36 = vadd.f32 %v31935_v5, %v23174_v25  ;;  %v23195_v25 = vmax.f32 %v32001_v56, 0.0 }
0x17ee   : > { %v26551_v20 = vpop.eup %26550  ;;  %v23292_v23 = vmul.f32 0.6931472, %v26549_v52  ;;  %v23214_v45 = vand.u32 2147483647, %v32013_v4  ;;  %26564 = vpow2.f32 %v23255_v57  ;;  %v23198_v57 = vmax.f32 %v32013_v4, 0.0 }
0x17ef   : > { %v26553_v35 = vpop.eup %26552  ;;  %v23318_v38 = vadd.f32 %v23294_v13, %v23190_v42  ;;  %v23274_v34 = vadd.f32 1.0, %v26551_v20  ;;  %v23213_v27 = vand.u32 2147483647, %v32016_v36 }
0x17f0   : > { %v23317_v17 = vadd.f32 %v23292_v23, %v23189_v10  ;;  %v23273_v53 = vadd.f32 1.0, %v26553_v35  ;;  %v23230_v15 = vsub.f32 0.0, %v23214_v45  ;;  %v23197_v23 = vmax.f32 %v32016_v36, 0.0 }
0x17f1   : > { %23334 = vst.msk [vmem:[%s31981_s19 + $0x38] sm:$0xff] %vm418_vm0, %v23318_v38  ;;  %26566 = vlog2.f32 %v23274_v34  ;;  %v23229_v55 = vsub.f32 0.0, %v23213_v27 }
0x17f2   : > { %23333 = vst.msk [vmem:[%s31981_s19 + $0x30] sm:$0xff] %vm418_vm0, %v23317_v17  ;;  %26568 = vlog2.f32 %v23273_v53  ;;  %v23261_v5 = vmul.f32 1.442695, %v23230_v15 }
0x17f3   : > { %v26555_v39 = vpop.eup %26554  ;;  %v23259_v48 = vmul.f32 1.442695, %v23229_v55 }
0x17f4   : > { %v26557_v21 = vpop.eup %26556  ;;  %v23268_v46 = vadd.f32 1.0, %v26555_v39  ;;  %26570 = vpow2.f32 %v23261_v5 }
0x17f5   : > { %v26559_v28 = vpop.eup %26558  ;;  %v23298_v7 = vmul.f32 0.6931472, %v26557_v21 }
0x17f6   : > { %v26561_v12 = vpop.eup %26560  ;;  %v23296_v1 = vmul.f32 0.6931472, %v26559_v28  ;;  %26572 = vlog2.f32 %v23268_v46 }
0x17f7   : > { %v26563_v18 = vpop.eup %26562  ;;  %v23320_v44 = vadd.f32 %v23298_v7, %v23192_v51  ;;  %v23267_v16 = vadd.f32 1.0, %v26561_v12  ;;  %26574 = vpow2.f32 %v23259_v48 }
0x17f8   : > { %v23319_v29 = vadd.f32 %v23296_v1, %v23191_v8  ;;  %v23276_v19 = vadd.f32 1.0, %v26563_v18  ;;  %v26565_v43 = vpop.eup %26564 }
0x17f9   : > { %23336 = vst.msk [vmem:[%s31981_s19 + $0x48] sm:$0xff] %vm418_vm0, %v23320_v44  ;;  %26576 = vlog2.f32 %v23267_v16  ;;  %v23275_v14 = vadd.f32 1.0, %v26565_v43 }
0x17fa   : > { %23335 = vst.msk [vmem:[%s31981_s19 + $0x40] sm:$0xff] %vm418_vm0, %v23319_v29  ;;  %26578 = vlog2.f32 %v23276_v19 }
0x17fb   : > { %v26567_v50 = vpop.eup %26566  ;;  %26580 = vlog2.f32 %v23275_v14 }
0x17fc   : > { %v26569_v9 = vpop.eup %26568  ;;  %v23302_v60 = vmul.f32 0.6931472, %v26567_v50 }
0x17fd   : > { %v23300_v24 = vmul.f32 0.6931472, %v26569_v9 }
0x17fe   : > { %v26571_v30 = vpop.eup %26570  ;;  %v23322_v62 = vadd.f32 %v23302_v60, %v23194_v11 }
0x17ff   : > { %v23321_v0 = vadd.f32 %v23300_v24, %v23193_v33  ;;  %v23278_v31 = vadd.f32 1.0, %v26571_v30 }
0x1800   : > { %v26573_v41 = vpop.eup %26572  ;;  %23338 = vst.msk [vmem:[%s31981_s19 + $0x58] sm:$0xff] %vm418_vm0, %v23322_v62 }
0x1801   : > { %v26575_v22 = vpop.eup %26574  ;;  %23337 = vst.msk [vmem:[%s31981_s19 + $0x50] sm:$0xff] %vm418_vm0, %v23321_v0  ;;  %v23290_v54 = vmul.f32 0.6931472, %v26573_v41  ;;  %26582 = vlog2.f32 %v23278_v31 }
0x1802   : > { %v23277_v59 = vadd.f32 1.0, %v26575_v22 }
0x1803   : > { %v26577_v32 = vpop.eup %26576  ;;  %v23316_v63 = vadd.f32 %v23290_v54, %v23188_v40 }
0x1804   : > { %v26579_v3 = vpop.eup %26578  ;;  %v23288_v47 = vmul.f32 0.6931472, %v26577_v32  ;;  %26584 = vlog2.f32 %v23277_v59 }
0x1805   : > { %23332 = vst.msk [vmem:[%s31981_s19 + $0x28] sm:$0xff] %vm418_vm0, %v23316_v63  ;;  %v23306_v61 = vmul.f32 0.6931472, %v26579_v3  ;;  %v26581_v6 = vpop.eup %26580 }
0x1806   : > { %v23315_v49 = vadd.f32 %v23288_v47, %v23187_v26  ;;  %v23304_v52 = vmul.f32 0.6931472, %v26581_v6 }
0x1807   : > { %v23324_v42 = vadd.f32 %v23306_v61, %v23196_v58 }
0x1808   : > { %23331 = vst.msk [vmem:[%s31981_s19 + $0x20] sm:$0xff] %vm418_vm0, %v23315_v49  ;;  %v23323_v2 = vadd.f32 %v23304_v52, %v23195_v25 }
0x1809   : > { %23340 = vst.msk [vmem:[%s31981_s19 + $0x68] sm:$0xff] %vm418_vm0, %v23324_v42 }
0x180a   : > { %23339 = vst.msk [vmem:[%s31981_s19 + $0x60] sm:$0xff] %vm418_vm0, %v23323_v2 }
0x180b   : > { %v26583_v13 = vpop.eup %26582 }
0x180c   : > { %v23310_v37 = vmul.f32 0.6931472, %v26583_v13 }
0x180e   : > { %v26585_v20 = vpop.eup %26584  ;;  %v23326_v10 = vadd.f32 %v23310_v37, %v23198_v57 }
0x180f   : > { %v23308_v45 = vmul.f32 0.6931472, %v26585_v20 }
0x1810   : > { %23342 = vst.msk [vmem:[%s31981_s19 + $0x78] sm:$0xff] %vm418_vm0, %v23326_v10 }
0x1811   : > { %v23325_v56 = vadd.f32 %v23308_v45, %v23197_v23 }
0x1813   : > { %23341 = vst.msk [vmem:[%s31981_s19 + $0x70] sm:$0xff] %vm418_vm0, %v23325_v56 }
0x1814 PF: > { %s17_s26 = sadd.s32 1, %s26608_s26   ;;  %s32727_s24 = smov %s26604_s25 }
0x1815   : > { %p14_p5 = scmp.ge.s32.totalorder %s17_s26, 4   ;;  %s32728_s25 = smov %s32730_s27 }
0x1817   :  { %16 = sbr.rel (!%p14_p5) target bundleno = 2 (0x2), region = 81 }

</bundles_post_ra>
